<compile_context>
chip_gen: v7x
topology: tpu7x:2x2x1
jax: 0.10.0
libtpu: 0.0.40
codegen_flags: <defaults>
</compile_context>

<pallas_src>
import functools
import math

import jax
import jax.numpy as jnp
from jax.experimental import pallas as pl
from jax.experimental.pallas import tpu as pltpu


# ----------------------------------------------------------------------------
# small helpers (glue)
# ----------------------------------------------------------------------------
def _ru(x, m):
    return ((x + m - 1) // m) * m


def _pad2d(x, rp, cp, value=0.0):
    r, c = x.shape
    if r == rp and c == cp:
        return x
    return jnp.pad(x, ((0, rp - r), (0, cp - c)), constant_values=value)


def _pick_tile(extent, unit, cap):
    """Tile (multiple of `unit`) for an axis of length `extent`.
    Full rounded extent if it fits under `cap` (single tile, no k/j axis),
    else the largest divisor of the rounded extent <= cap (no pad copy)."""
    full = _ru(extent, unit)
    if full <= cap:
        return full
    for d in range(cap - cap % unit, 0, -unit):
        if full % d == 0:
            return d
    return unit


# ----------------------------------------------------------------------------
# Pallas kernel 1: tiled matmul + bias (+ optional ReLU epilogue), bf16 -> f32
# ----------------------------------------------------------------------------
def _matmul_kernel(a_ref, b_ref, bias_ref, o_ref, acc_ref, *, activation):
    @pl.when(pl.program_id(2) == 0)
    def _():
        acc_ref[...] = jnp.zeros_like(acc_ref)

    acc_ref[...] += jnp.dot(a_ref[...], b_ref[...],
                            preferred_element_type=jnp.float32)

    @pl.when(pl.program_id(2) == pl.num_programs(2) - 1)
    def _():
        out = acc_ref[...] + bias_ref[...]
        if activation == "relu":
            out = jnp.maximum(out, 0.0)
        o_ref[...] = out.astype(o_ref.dtype)


def matmul_bias(a, b_bf16, bias, activation=None):
    """(M,K) @ (K,N) + bias[N], optional ReLU.  A cast to bf16, B already bf16,
    f32 accumulation.  Tiles sized to minimize grid steps / pad copies."""
    M, K = a.shape
    K2, N = b_bf16.shape
    assert K == K2
    tm = min(_ru(M, 16), 256)            # 16 = bf16 sublane-pack minimum
    tn = _pick_tile(N, 128, 1024)
    tk = _pick_tile(K, 128, 2048)
    Mp, Kp, Np = _ru(M, tm), _ru(K, tk), _ru(N, tn)

    a_p = _pad2d(a.astype(jnp.bfloat16), Mp, Kp)
    b_p = _pad2d(b_bf16, Kp, Np)
    bias_p = _pad2d(bias.reshape(1, N).astype(jnp.float32), 1, Np)

    out = pl.pallas_call(
        functools.partial(_matmul_kernel, activation=activation),
        out_shape=jax.ShapeDtypeStruct((Mp, Np), jnp.float32),
        grid_spec=pltpu.PrefetchScalarGridSpec(
            num_scalar_prefetch=0,
            grid=(Mp // tm, Np // tn, Kp // tk),
            in_specs=[
                pl.BlockSpec((tm, tk), lambda i, j, k: (i, k)),
                pl.BlockSpec((tk, tn), lambda i, j, k: (k, j)),
                pl.BlockSpec((1, tn), lambda i, j, k: (0, j)),
            ],
            out_specs=pl.BlockSpec((tm, tn), lambda i, j, k: (i, j)),
            scratch_shapes=[pltpu.VMEM((tm, tn), jnp.float32)],
        ),
        compiler_params=pltpu.CompilerParams(
            dimension_semantics=("parallel", "parallel", "arbitrary")),
    )(a_p, b_p, bias_p)
    return out[:M, :N]


# ----------------------------------------------------------------------------
# Pallas kernel 2: per-column sum / sum-of-squares (BatchNorm batch stats)
# ----------------------------------------------------------------------------
def _colstats_kernel(x_ref, sum_ref, ssq_ref):
    @pl.when(pl.program_id(0) == 0)
    def _():
        sum_ref[...] = jnp.zeros_like(sum_ref)
        ssq_ref[...] = jnp.zeros_like(ssq_ref)

    x = x_ref[...]
    sum_ref[...] += jnp.sum(x, axis=0, keepdims=True)
    ssq_ref[...] += jnp.sum(x * x, axis=0, keepdims=True)


def pallas_col_mean_var(x):
    R, C = x.shape
    tr = min(_ru(R, 8), 1024)
    Rp, Cp = _ru(R, tr), _ru(C, 128)
    xp = _pad2d(x, Rp, Cp)                       # zero rows contribute 0 to sums
    s, ss = pl.pallas_call(
        _colstats_kernel,
        out_shape=(jax.ShapeDtypeStruct((1, Cp), jnp.float32),
                   jax.ShapeDtypeStruct((1, Cp), jnp.float32)),
        grid=(Rp // tr,),
        in_specs=[pl.BlockSpec((tr, Cp), lambda i: (i, 0))],
        out_specs=(pl.BlockSpec((1, Cp), lambda i: (0, 0)),
                   pl.BlockSpec((1, Cp), lambda i: (0, 0))),
        compiler_params=pltpu.CompilerParams(dimension_semantics=("arbitrary",)),
    )(xp)
    mean = s[0, :C] / R
    var = jnp.maximum(ss[0, :C] / R - mean * mean, 0.0)   # biased (BN training)
    return mean, var


# ----------------------------------------------------------------------------
# Pallas kernel 3: fused per-channel scale/shift + ReLU  (BatchNorm + ReLU)
# ----------------------------------------------------------------------------
def _scale_shift_relu_kernel(x_ref, s_ref, t_ref, o_ref):
    o_ref[...] = jnp.maximum(x_ref[...] * s_ref[...] + t_ref[...], 0.0)


def scale_shift_relu(x, s, t):
    R, C = x.shape
    tr = min(_ru(R, 8), 1024)
    Rp, Cp = _ru(R, tr), _ru(C, 128)
    xp = _pad2d(x, Rp, Cp)
    sp = _pad2d(s.reshape(1, C), 1, Cp)
    tp = _pad2d(t.reshape(1, C), 1, Cp)
    out = pl.pallas_call(
        _scale_shift_relu_kernel,
        out_shape=jax.ShapeDtypeStruct((Rp, Cp), jnp.float32),
        grid=(Rp // tr,),
        in_specs=[
            pl.BlockSpec((tr, Cp), lambda i: (i, 0)),
            pl.BlockSpec((1, Cp), lambda i: (0, 0)),
            pl.BlockSpec((1, Cp), lambda i: (0, 0)),
        ],
        out_specs=pl.BlockSpec((tr, Cp), lambda i: (i, 0)),
        compiler_params=pltpu.CompilerParams(dimension_semantics=("parallel",)),
    )(xp, sp, tp)
    return out[:R, :C]


# ----------------------------------------------------------------------------
# Pallas kernel 4: max over 3 stacked pooling taps
# ----------------------------------------------------------------------------
def _max_taps_kernel(x_ref, o_ref):
    o_ref[...] = jnp.max(x_ref[...], axis=0)


def pallas_max_over_taps(x):
    T, R, C = x.shape
    tr = min(_ru(R, 8), 1024)
    Rp, Cp = _ru(R, tr), _ru(C, 128)
    xp = x if (R == Rp and C == Cp) else jnp.pad(
        x, ((0, 0), (0, Rp - R), (0, Cp - C)))
    out = pl.pallas_call(
        _max_taps_kernel,
        out_shape=jax.ShapeDtypeStruct((Rp, Cp), jnp.float32),
        grid=(Rp // tr,),
        in_specs=[pl.BlockSpec((T, tr, Cp), lambda i: (0, i, 0))],
        out_specs=pl.BlockSpec((tr, Cp), lambda i: (i, 0)),
        compiler_params=pltpu.CompilerParams(dimension_semantics=("parallel",)),
    )(xp)
    return out[:R, :C]


# ----------------------------------------------------------------------------
# Pallas kernel 5: row softmax (dim=-1)
# ----------------------------------------------------------------------------
def _softmax_kernel(x_ref, o_ref):
    x = x_ref[...]
    m = jnp.max(x, axis=-1, keepdims=True)
    e = jnp.exp(x - m)
    o_ref[...] = e / jnp.sum(e, axis=-1, keepdims=True)


def pallas_softmax(x):
    M, N = x.shape
    Mp, Np = _ru(M, 8), _ru(N, 128)
    xp = _pad2d(x, Mp, Np, value=-1e30)          # padded logits -> exp ~ 0
    out = pl.pallas_call(
        _softmax_kernel,
        out_shape=jax.ShapeDtypeStruct((Mp, Np), jnp.float32),
        grid=(1,),
        in_specs=[pl.BlockSpec((Mp, Np), lambda i: (0, 0))],
        out_specs=pl.BlockSpec((Mp, Np), lambda i: (0, 0)),
    )(xp)
    return out[:M, :N]


# ----------------------------------------------------------------------------
# layer builders (JAX glue around the Pallas kernels)
# ----------------------------------------------------------------------------
def _im2col(x_nhwc, kh, kw, stride, pad):
    x = jnp.pad(x_nhwc, ((0, 0), (pad, pad), (pad, pad), (0, 0)))
    N, H, W, C = x.shape
    OH = (H - kh) // stride + 1
    OW = (W - kw) // stride + 1
    taps = []
    for i in range(kh):
        for j in range(kw):
            taps.append(x[:, i:i + stride * (OH - 1) + 1:stride,
                          j:j + stride * (OW - 1) + 1:stride, :])
    patches = jnp.stack(taps, axis=3)              # (N, OH, OW, kh*kw, C)
    return patches.reshape(N * OH * OW, kh * kw * C), (N, OH, OW)


def conv_bn_relu(x_nhwc, p, ksize, stride, pad, eps=1e-5):
    patches, (N, OH, OW) = _im2col(x_nhwc, ksize, ksize, stride, pad)
    OC = p["w_mat"].shape[1]
    y = matmul_bias(patches, p["w_mat"], p["b"])   # Pallas MXU matmul (hot path)
    mean, var = pallas_col_mean_var(y)             # Pallas reduction (BN stats)
    s = p["gamma"] * jax.lax.rsqrt(var + eps)
    t = p["beta"] - mean * s
    y = scale_shift_relu(y, s, t)                  # Pallas BN-normalize + ReLU
    return y.reshape(N, OH, OW, OC)


def maxpool3x3s2(x_nhwc):
    N, H, W, C = x_nhwc.shape
    OH = (H - 3) // 2 + 1
    OW = (W - 3) // 2 + 1
    # separable pooling: 3-tap H max (XLA-fused elementwise), then 3-tap W max
    # as a Pallas reduction.
    r = jnp.maximum(jnp.maximum(x_nhwc[:, 0:2 * OH - 1:2],
                                x_nhwc[:, 1:2 * OH:2]),
                    x_nhwc[:, 2:2 * OH + 1:2])               # (N, OH, W, C)
    taps = jnp.stack([r[:, :, 0:2 * OW - 1:2],
                      r[:, :, 1:2 * OW:2],
                      r[:, :, 2:2 * OW + 1:2]], axis=0)      # (3, N, OH, OW, C)
    out = pallas_max_over_taps(taps.reshape(3, N * OH * OW, C))
    return out.reshape(N, OH, OW, C)


def linear(x, p, activation=None):
    # PyTorch Linear: y = x @ W.T + b   (W.T pre-folded to bf16 at init)
    return matmul_bias(x, p["w_t"], p["b"], activation=activation)


# ----------------------------------------------------------------------------
# parameters (deterministic synthetic init, PyTorch semantics)
# ----------------------------------------------------------------------------
def init_params(key, in_ch, out_classes, feat_dim, hidden):
    keys = iter(jax.random.split(key, 16))

    def conv(ic, oc, k):
        fan_in = ic * k * k
        w = jax.random.normal(next(keys), (oc, ic, k, k), jnp.float32) / math.sqrt(fan_in)
        # fold PyTorch (OC,IC,KH,KW) weight into matmul layout once, as bf16.
        w_mat = jnp.transpose(w, (2, 3, 1, 0)).reshape(k * k * ic, oc).astype(jnp.bfloat16)
        return {
            "w_mat": w_mat,
            "b": 0.01 * jax.random.normal(next(keys), (oc,), jnp.float32),
            "gamma": jnp.ones((oc,), jnp.float32),
            "beta": jnp.zeros((oc,), jnp.float32),
        }

    def lin(i, o):
        w = jax.random.normal(next(keys), (o, i), jnp.float32) / math.sqrt(i)
        return {"w_t": w.T.astype(jnp.bfloat16),   # (in, out), bf16 once
                "b": 0.01 * jax.random.normal(next(keys), (o,), jnp.float32)}

    return {
        "c1": conv(in_ch, 48, 11),
        "c2": conv(48, 128, 5),
        "c3": conv(128, 192, 3),
        "c4": conv(192, 192, 3),
        "c5": conv(192, 128, 3),
        "f1": lin(feat_dim, hidden),
        "f2": lin(hidden, hidden),
        "f3": lin(hidden, out_classes),
    }


def _feature_hw(h, w):
    """Spatial size after the AlexNet feature extractor."""
    def conv(n, k, s, p):
        return (n + 2 * p - k) // s + 1

    def pool(n):
        return (n - 3) // 2 + 1

    for (k, s, p, do_pool) in [(11, 4, 2, True), (5, 1, 2, True),
                               (3, 1, 1, False), (3, 1, 1, False), (3, 1, 1, False)]:
        h, w = conv(h, k, s, p), conv(w, k, s, p)
        if do_pool:
            h, w = pool(h), pool(w)
    return h, w


# ----------------------------------------------------------------------------
# full forward pass
# ----------------------------------------------------------------------------
def alexnet_forward(x_nchw, params):
    x = jnp.transpose(x_nchw, (0, 2, 3, 1))              # NCHW -> NHWC internal

    x = conv_bn_relu(x, params["c1"], 11, 4, 2)          # Conv(11,s4,p2)+BN+ReLU
    x = maxpool3x3s2(x)                                  # MaxPool(3,s2)
    x = conv_bn_relu(x, params["c2"], 5, 1, 2)           # Conv(5,p2)+BN+ReLU
    x = maxpool3x3s2(x)                                  # MaxPool(3,s2)
    x = conv_bn_relu(x, params["c3"], 3, 1, 1)           # Conv(3,p1)+BN+ReLU
    x = conv_bn_relu(x, params["c4"], 3, 1, 1)           # Conv(3,p1)+BN+ReLU
    x = conv_bn_relu(x, params["c5"], 3, 1, 1)           # Conv(3,p1)+BN+ReLU

    # flatten in NCHW order, exactly like features.view(N, -1) in PyTorch
    feats = jnp.transpose(x, (0, 3, 1, 2)).reshape(x.shape[0], -1)
    assert feats.shape[1] == params["f1"]["w_t"].shape[0]

    # Dropout(p=0) is the identity in both train and eval -> omitted.
    h = linear(feats, params["f1"], activation="relu")
    h = linear(h, params["f2"], activation="relu")
    logits = linear(h, params["f3"], activation=None)
    return pallas_softmax(logits)                        # Softmax(dim=-1)


# ----------------------------------------------------------------------------
if __name__ == "__main__":
    key = jax.random.PRNGKey(0)
    k_x, k_p = jax.random.split(key)

    # Small configuration so the script also finishes quickly under the Pallas
    # interpreter.  Full-size AlexNet would be in_size=(3,224,224), hidden=4096
    # (feat_dim = 128*13*13 = 21632); all kernels above are size-generic.
    batch = 2
    in_size = (3, 64, 64)
    out_classes = 10
    hidden = 256

    fh, fw = _feature_hw(in_size[1], in_size[2])
    feat_dim = 128 * fh * fw

    params = init_params(k_p, in_size[0], out_classes, feat_dim, hidden)
    x = jax.random.normal(k_x, (batch,) + in_size, dtype=jnp.float32)

    fwd = jax.jit(alexnet_forward)
    out = jax.block_until_ready(fwd(x, params))

    assert out.shape == (batch, out_classes)
    assert bool(jnp.all(jnp.isfinite(out)))
    assert bool(jnp.all(jnp.abs(jnp.sum(out, axis=-1) - 1.0) < 1e-3))
    print("KERNEL_OK")
</pallas_src>

<mosaic_0001>
module attributes {stable_mosaic.version = 11 : i64} {
  func.func @_matmul_kernel(%arg0: i32, %arg1: i32, %arg2: i32, %arg3: memref<256x384xbf16, #tpu.memory_space<vmem>>, %arg4: memref<384x128xbf16, #tpu.memory_space<vmem>>, %arg5: memref<1x128xf32, #tpu.memory_space<vmem>>, %arg6: memref<256x128xf32, #tpu.memory_space<vmem>>, %arg7: memref<256x128xf32, #tpu.memory_space<vmem>>) attributes {dimension_semantics = [#tpu.dimension_semantics<parallel>, #tpu.dimension_semantics<parallel>, #tpu.dimension_semantics<arbitrary>], iteration_bounds = array<i64: 2, 1, 1>, scalar_prefetch = 0 : i64, scratch_operands = 1 : i64, tpu.core_type = #tpu.core_type<tc>, window_params = [{transform_indices = @transform_0, window_bounds = array<i64: 256, 384>}, {transform_indices = @transform_1, window_bounds = array<i64: 384, 128>}, {transform_indices = @transform_2, window_bounds = array<i64: 1, 128>}, {transform_indices = @transform_3, window_bounds = array<i64: 256, 128>}]} {
    %c0_i32 = arith.constant 0 : i32
    %0 = arith.cmpi eq, %arg2, %c0_i32 : i32
    %1 = arith.extui %0 : i1 to i32
    %c0_i32_0 = arith.constant 0 : i32
    %2 = arith.cmpi ne, %1, %c0_i32_0 : i32
    scf.if %2 {
      %cst_10 = arith.constant 0.000000e+00 : f32
      %12 = vector.broadcast %cst_10 : f32 to vector<256x128xf32>
      %c0_11 = arith.constant 0 : index
      %c0_12 = arith.constant 0 : index
      %13 = vector.load %arg7[%c0_11, %c0_12] : memref<256x128xf32, #tpu.memory_space<vmem>>, vector<256x128xf32>
      tpu.vector_store %arg7[%c0_11, %c0_12], %12 {strides = array<i32>} : memref<256x128xf32, #tpu.memory_space<vmem>>, vector<256x128xf32>,
    } else {
    }
    %c0 = arith.constant 0 : index
    %c0_1 = arith.constant 0 : index
    %3 = vector.load %arg7[%c0, %c0_1] : memref<256x128xf32, #tpu.memory_space<vmem>>, vector<256x128xf32>
    %c0_2 = arith.constant 0 : index
    %c0_3 = arith.constant 0 : index
    %4 = vector.load %arg3[%c0_2, %c0_3] : memref<256x384xbf16, #tpu.memory_space<vmem>>, vector<256x384xbf16>
    %c0_4 = arith.constant 0 : index
    %c0_5 = arith.constant 0 : index
    %5 = vector.load %arg4[%c0_4, %c0_5] : memref<384x128xbf16, #tpu.memory_space<vmem>>, vector<384x128xbf16>
    %cst = arith.constant dense<0.000000e+00> : vector<256x128xf32>
    %6 = tpu.matmul %4, %5, %cst {dimension_numbers = #tpu.dot_dimension_numbers<[1], [0], [0], [1], [0, 0, 1, 1], [], []>} : vector<256x384xbf16>, vector<384x128xbf16>, vector<256x128xf32> -> vector<256x128xf32>
    %7 = arith.addf %3, %6 : vector<256x128xf32>
    %c0_6 = arith.constant 0 : index
    %c0_7 = arith.constant 0 : index
    %8 = vector.load %arg7[%c0_6, %c0_7] : memref<256x128xf32, #tpu.memory_space<vmem>>, vector<256x128xf32>
    tpu.vector_store %arg7[%c0_6, %c0_7], %7 {strides = array<i32>} : memref<256x128xf32, #tpu.memory_space<vmem>>, vector<256x128xf32>,
    %c0_i32_8 = arith.constant 0 : i32
    %9 = arith.cmpi eq, %arg2, %c0_i32_8 : i32
    %10 = arith.extui %9 : i1 to i32
    %c0_i32_9 = arith.constant 0 : i32
    %11 = arith.cmpi ne, %10, %c0_i32_9 : i32
    scf.if %11 {
      %c0_10 = arith.constant 0 : index
      %c0_11 = arith.constant 0 : index
      %12 = vector.load %arg7[%c0_10, %c0_11] : memref<256x128xf32, #tpu.memory_space<vmem>>, vector<256x128xf32>
      %c0_12 = arith.constant 0 : index
      %c0_13 = arith.constant 0 : index
      %13 = vector.load %arg5[%c0_12, %c0_13] : memref<1x128xf32, #tpu.memory_space<vmem>>, vector<1x128xf32>
      %14 = vector.broadcast %13 : vector<1x128xf32> to vector<256x128xf32>
      %15 = arith.addf %12, %14 : vector<256x128xf32>
      %c0_14 = arith.constant 0 : index
      %c0_15 = arith.constant 0 : index
      %16 = vector.load %arg6[%c0_14, %c0_15] : memref<256x128xf32, #tpu.memory_space<vmem>>, vector<256x128xf32>
      tpu.vector_store %arg6[%c0_14, %c0_15], %15 {strides = array<i32>} : memref<256x128xf32, #tpu.memory_space<vmem>>, vector<256x128xf32>,
    } else {
    }
    return
  }
  func.func @transform_0(%arg0: i32, %arg1: i32, %arg2: i32) -> (i32, i32) {
    %c0_i32 = arith.constant 0 : i32
    return %arg0, %arg2 : i32, i32
  }
  func.func @transform_1(%arg0: i32, %arg1: i32, %arg2: i32) -> (i32, i32) {
    %c0_i32 = arith.constant 0 : i32
    return %arg2, %arg1 : i32, i32
  }
  func.func @transform_2(%arg0: i32, %arg1: i32, %arg2: i32) -> (i32, i32) {
    %c0_i32 = arith.constant 0 : i32
    %c0_i32_0 = arith.constant 0 : i32
    return %c0_i32, %arg1 : i32, i32
  }
  func.func @transform_3(%arg0: i32, %arg1: i32, %arg2: i32) -> (i32, i32) {
    %c0_i32 = arith.constant 0 : i32
    return %arg0, %arg1 : i32, i32
  }
}

module attributes {stable_mosaic.version = 11 : i64} {
  func.func @_colstats_kernel(%arg0: i32, %arg1: memref<456x128xf32, #tpu.memory_space<vmem>>, %arg2: memref<1x128xf32, #tpu.memory_space<vmem>>, %arg3: memref<1x128xf32, #tpu.memory_space<vmem>>) attributes {dimension_semantics = [#tpu.dimension_semantics<arbitrary>], iteration_bounds = array<i64: 1>, scalar_prefetch = 0 : i64, scratch_operands = 0 : i64, tpu.core_type = #tpu.core_type<tc>, window_params = [{transform_indices = @transform_0, window_bounds = array<i64: 456, 128>}, {pipeline_mode = #tpu.pipeline_mode<synchronous>, transform_indices = @transform_1, window_bounds = array<i64: 1, 128>}, {pipeline_mode = #tpu.pipeline_mode<synchronous>, transform_indices = @transform_2, window_bounds = array<i64: 1, 128>}]} {
    %c0_i32 = arith.constant 0 : i32
    %0 = arith.cmpi eq, %arg0, %c0_i32 : i32
    %1 = arith.extui %0 : i1 to i32
    %c0_i32_0 = arith.constant 0 : i32
    %2 = arith.cmpi ne, %1, %c0_i32_0 : i32
    scf.if %2 {
      %cst_11 = arith.constant 0.000000e+00 : f32
      %15 = vector.broadcast %cst_11 : f32 to vector<1x128xf32>
      %c0_12 = arith.constant 0 : index
      %c0_13 = arith.constant 0 : index
      %16 = vector.load %arg2[%c0_12, %c0_13] : memref<1x128xf32, #tpu.memory_space<vmem>>, vector<1x128xf32>
      tpu.vector_store %arg2[%c0_12, %c0_13], %15 {strides = array<i32>} : memref<1x128xf32, #tpu.memory_space<vmem>>, vector<1x128xf32>,
      %cst_14 = arith.constant 0.000000e+00 : f32
      %17 = vector.broadcast %cst_14 : f32 to vector<1x128xf32>
      %c0_15 = arith.constant 0 : index
      %c0_16 = arith.constant 0 : index
      %18 = vector.load %arg3[%c0_15, %c0_16] : memref<1x128xf32, #tpu.memory_space<vmem>>, vector<1x128xf32>
      tpu.vector_store %arg3[%c0_15, %c0_16], %17 {strides = array<i32>} : memref<1x128xf32, #tpu.memory_space<vmem>>, vector<1x128xf32>,
    } else {
    }
    %c0 = arith.constant 0 : index
    %c0_1 = arith.constant 0 : index
    %3 = vector.load %arg1[%c0, %c0_1] : memref<456x128xf32, #tpu.memory_space<vmem>>, vector<456x128xf32>
    %c0_2 = arith.constant 0 : index
    %c0_3 = arith.constant 0 : index
    %4 = vector.load %arg2[%c0_2, %c0_3] : memref<1x128xf32, #tpu.memory_space<vmem>>, vector<1x128xf32>
    %cst = arith.constant dense<0.000000e+00> : vector<128xf32>
    %5 = vector.multi_reduction <add>, %3, %cst [0] : vector<456x128xf32> to vector<128xf32>
    %6 = vector.shape_cast %5 : vector<128xf32> to vector<1x128xf32>
    %7 = arith.addf %4, %6 : vector<1x128xf32>
    %c0_4 = arith.constant 0 : index
    %c0_5 = arith.constant 0 : index
    %8 = vector.load %arg2[%c0_4, %c0_5] : memref<1x128xf32, #tpu.memory_space<vmem>>, vector<1x128xf32>
    tpu.vector_store %arg2[%c0_4, %c0_5], %7 {strides = array<i32>} : memref<1x128xf32, #tpu.memory_space<vmem>>, vector<1x128xf32>,
    %c0_6 = arith.constant 0 : index
    %c0_7 = arith.constant 0 : index
    %9 = vector.load %arg3[%c0_6, %c0_7] : memref<1x128xf32, #tpu.memory_space<vmem>>, vector<1x128xf32>
    %10 = arith.mulf %3, %3 : vector<456x128xf32>
    %cst_8 = arith.constant dense<0.000000e+00> : vector<128xf32>
    %11 = vector.multi_reduction <add>, %10, %cst_8 [0] : vector<456x128xf32> to vector<128xf32>
    %12 = vector.shape_cast %11 : vector<128xf32> to vector<1x128xf32>
    %13 = arith.addf %9, %12 : vector<1x128xf32>
    %c0_9 = arith.constant 0 : index
    %c0_10 = arith.constant 0 : index
    %14 = vector.load %arg3[%c0_9, %c0_10] : memref<1x128xf32, #tpu.memory_space<vmem>>, vector<1x128xf32>
    tpu.vector_store %arg3[%c0_9, %c0_10], %13 {strides = array<i32>} : memref<1x128xf32, #tpu.memory_space<vmem>>, vector<1x128xf32>,
    return
  }
  func.func @transform_0(%arg0: i32) -> (i32, i32) {
    %c0_i32 = arith.constant 0 : i32
    %c0_i32_0 = arith.constant 0 : i32
    return %arg0, %c0_i32 : i32, i32
  }
  func.func @transform_1(%arg0: i32) -> (i32, i32) {
    %c0_i32 = arith.constant 0 : i32
    %c0_i32_0 = arith.constant 0 : i32
    %c0_i32_1 = arith.constant 0 : i32
    return %c0_i32, %c0_i32_0 : i32, i32
  }
  func.func @transform_2(%arg0: i32) -> (i32, i32) {
    %c0_i32 = arith.constant 0 : i32
    %c0_i32_0 = arith.constant 0 : i32
    %c0_i32_1 = arith.constant 0 : i32
    return %c0_i32, %c0_i32_0 : i32, i32
  }
}

module attributes {stable_mosaic.version = 11 : i64} {
  func.func @_scale_shift_relu_kernel(%arg0: i32, %arg1: memref<456x128xf32, #tpu.memory_space<vmem>>, %arg2: memref<1x128xf32, #tpu.memory_space<vmem>>, %arg3: memref<1x128xf32, #tpu.memory_space<vmem>>, %arg4: memref<456x128xf32, #tpu.memory_space<vmem>>) attributes {dimension_semantics = [#tpu.dimension_semantics<parallel>], iteration_bounds = array<i64: 1>, scalar_prefetch = 0 : i64, scratch_operands = 0 : i64, tpu.core_type = #tpu.core_type<tc>, window_params = [{transform_indices = @transform_0, window_bounds = array<i64: 456, 128>}, {pipeline_mode = #tpu.pipeline_mode<synchronous>, transform_indices = @transform_1, window_bounds = array<i64: 1, 128>}, {pipeline_mode = #tpu.pipeline_mode<synchronous>, transform_indices = @transform_2, window_bounds = array<i64: 1, 128>}, {transform_indices = @transform_3, window_bounds = array<i64: 456, 128>}]} {
    %c0 = arith.constant 0 : index
    %c0_0 = arith.constant 0 : index
    %0 = vector.load %arg1[%c0, %c0_0] : memref<456x128xf32, #tpu.memory_space<vmem>>, vector<456x128xf32>
    %c0_1 = arith.constant 0 : index
    %c0_2 = arith.constant 0 : index
    %1 = vector.load %arg2[%c0_1, %c0_2] : memref<1x128xf32, #tpu.memory_space<vmem>>, vector<1x128xf32>
    %2 = vector.broadcast %1 : vector<1x128xf32> to vector<456x128xf32>
    %3 = arith.mulf %0, %2 : vector<456x128xf32>
    %c0_3 = arith.constant 0 : index
    %c0_4 = arith.constant 0 : index
    %4 = vector.load %arg3[%c0_3, %c0_4] : memref<1x128xf32, #tpu.memory_space<vmem>>, vector<1x128xf32>
    %5 = vector.broadcast %4 : vector<1x128xf32> to vector<456x128xf32>
    %6 = arith.addf %3, %5 : vector<456x128xf32>
    %cst = arith.constant 0.000000e+00 : f32
    %7 = vector.broadcast %cst : f32 to vector<456x128xf32>
    %8 = arith.maximumf %6, %7 : vector<456x128xf32>
    %c0_5 = arith.constant 0 : index
    %c0_6 = arith.constant 0 : index
    %9 = vector.load %arg4[%c0_5, %c0_6] : memref<456x128xf32, #tpu.memory_space<vmem>>, vector<456x128xf32>
    tpu.vector_store %arg4[%c0_5, %c0_6], %8 {strides = array<i32>} : memref<456x128xf32, #tpu.memory_space<vmem>>, vector<456x128xf32>,
    return
  }
  func.func @transform_0(%arg0: i32) -> (i32, i32) {
    %c0_i32 = arith.constant 0 : i32
    %c0_i32_0 = arith.constant 0 : i32
    return %arg0, %c0_i32 : i32, i32
  }
  func.func @transform_1(%arg0: i32) -> (i32, i32) {
    %c0_i32 = arith.constant 0 : i32
    %c0_i32_0 = arith.constant 0 : i32
    %c0_i32_1 = arith.constant 0 : i32
    return %c0_i32, %c0_i32_0 : i32, i32
  }
  func.func @transform_2(%arg0: i32) -> (i32, i32) {
    %c0_i32 = arith.constant 0 : i32
    %c0_i32_0 = arith.constant 0 : i32
    %c0_i32_1 = arith.constant 0 : i32
    return %c0_i32, %c0_i32_0 : i32, i32
  }
  func.func @transform_3(%arg0: i32) -> (i32, i32) {
    %c0_i32 = arith.constant 0 : i32
    %c0_i32_0 = arith.constant 0 : i32
    return %arg0, %c0_i32 : i32, i32
  }
}

module attributes {stable_mosaic.version = 11 : i64} {
  func.func @_max_taps_kernel(%arg0: i32, %arg1: memref<3x104x128xf32, #tpu.memory_space<vmem>>, %arg2: memref<104x128xf32, #tpu.memory_space<vmem>>) attributes {dimension_semantics = [#tpu.dimension_semantics<parallel>], iteration_bounds = array<i64: 1>, scalar_prefetch = 0 : i64, scratch_operands = 0 : i64, tpu.core_type = #tpu.core_type<tc>, window_params = [{transform_indices = @transform_0, window_bounds = array<i64: 3, 104, 128>}, {transform_indices = @transform_1, window_bounds = array<i64: 104, 128>}]} {
    %c0 = arith.constant 0 : index
    %c0_0 = arith.constant 0 : index
    %c0_1 = arith.constant 0 : index
    %0 = vector.load %arg1[%c0, %c0_0, %c0_1] : memref<3x104x128xf32, #tpu.memory_space<vmem>>, vector<3x104x128xf32>
    %cst = arith.constant dense<0xFF800000> : vector<104x128xf32>
    %1 = vector.multi_reduction <maximumf>, %0, %cst [0] : vector<3x104x128xf32> to vector<104x128xf32>
    %c0_2 = arith.constant 0 : index
    %c0_3 = arith.constant 0 : index
    %2 = vector.load %arg2[%c0_2, %c0_3] : memref<104x128xf32, #tpu.memory_space<vmem>>, vector<104x128xf32>
    tpu.vector_store %arg2[%c0_2, %c0_3], %1 {strides = array<i32>} : memref<104x128xf32, #tpu.memory_space<vmem>>, vector<104x128xf32>,
    return
  }
  func.func @transform_0(%arg0: i32) -> (i32, i32, i32) {
    %c0_i32 = arith.constant 0 : i32
    %c0_i32_0 = arith.constant 0 : i32
    %c0_i32_1 = arith.constant 0 : i32
    return %c0_i32, %arg0, %c0_i32_0 : i32, i32, i32
  }
  func.func @transform_1(%arg0: i32) -> (i32, i32) {
    %c0_i32 = arith.constant 0 : i32
    %c0_i32_0 = arith.constant 0 : i32
    return %arg0, %c0_i32 : i32, i32
  }
}

module attributes {stable_mosaic.version = 11 : i64} {
  func.func @_matmul_kernel(%arg0: i32, %arg1: i32, %arg2: i32, %arg3: memref<112x1280xbf16, #tpu.memory_space<vmem>>, %arg4: memref<1280x128xbf16, #tpu.memory_space<vmem>>, %arg5: memref<1x128xf32, #tpu.memory_space<vmem>>, %arg6: memref<112x128xf32, #tpu.memory_space<vmem>>, %arg7: memref<112x128xf32, #tpu.memory_space<vmem>>) attributes {dimension_semantics = [#tpu.dimension_semantics<parallel>, #tpu.dimension_semantics<parallel>, #tpu.dimension_semantics<arbitrary>], iteration_bounds = array<i64: 1, 1, 1>, scalar_prefetch = 0 : i64, scratch_operands = 1 : i64, tpu.core_type = #tpu.core_type<tc>, window_params = [{transform_indices = @transform_0, window_bounds = array<i64: 112, 1280>}, {transform_indices = @transform_1, window_bounds = array<i64: 1280, 128>}, {transform_indices = @transform_2, window_bounds = array<i64: 1, 128>}, {transform_indices = @transform_3, window_bounds = array<i64: 112, 128>}]} {
    %c0_i32 = arith.constant 0 : i32
    %0 = arith.cmpi eq, %arg2, %c0_i32 : i32
    %1 = arith.extui %0 : i1 to i32
    %c0_i32_0 = arith.constant 0 : i32
    %2 = arith.cmpi ne, %1, %c0_i32_0 : i32
    scf.if %2 {
      %cst_10 = arith.constant 0.000000e+00 : f32
      %12 = vector.broadcast %cst_10 : f32 to vector<112x128xf32>
      %c0_11 = arith.constant 0 : index
      %c0_12 = arith.constant 0 : index
      %13 = vector.load %arg7[%c0_11, %c0_12] : memref<112x128xf32, #tpu.memory_space<vmem>>, vector<112x128xf32>
      tpu.vector_store %arg7[%c0_11, %c0_12], %12 {strides = array<i32>} : memref<112x128xf32, #tpu.memory_space<vmem>>, vector<112x128xf32>,
    } else {
    }
    %c0 = arith.constant 0 : index
    %c0_1 = arith.constant 0 : index
    %3 = vector.load %arg7[%c0, %c0_1] : memref<112x128xf32, #tpu.memory_space<vmem>>, vector<112x128xf32>
    %c0_2 = arith.constant 0 : index
    %c0_3 = arith.constant 0 : index
    %4 = vector.load %arg3[%c0_2, %c0_3] : memref<112x1280xbf16, #tpu.memory_space<vmem>>, vector<112x1280xbf16>
    %c0_4 = arith.constant 0 : index
    %c0_5 = arith.constant 0 : index
    %5 = vector.load %arg4[%c0_4, %c0_5] : memref<1280x128xbf16, #tpu.memory_space<vmem>>, vector<1280x128xbf16>
    %cst = arith.constant dense<0.000000e+00> : vector<112x128xf32>
    %6 = tpu.matmul %4, %5, %cst {dimension_numbers = #tpu.dot_dimension_numbers<[1], [0], [0], [1], [0, 0, 1, 1], [], []>} : vector<112x1280xbf16>, vector<1280x128xbf16>, vector<112x128xf32> -> vector<112x128xf32>
    %7 = arith.addf %3, %6 : vector<112x128xf32>
    %c0_6 = arith.constant 0 : index
    %c0_7 = arith.constant 0 : index
    %8 = vector.load %arg7[%c0_6, %c0_7] : memref<112x128xf32, #tpu.memory_space<vmem>>, vector<112x128xf32>
    tpu.vector_store %arg7[%c0_6, %c0_7], %7 {strides = array<i32>} : memref<112x128xf32, #tpu.memory_space<vmem>>, vector<112x128xf32>,
    %c0_i32_8 = arith.constant 0 : i32
    %9 = arith.cmpi eq, %arg2, %c0_i32_8 : i32
    %10 = arith.extui %9 : i1 to i32
    %c0_i32_9 = arith.constant 0 : i32
    %11 = arith.cmpi ne, %10, %c0_i32_9 : i32
    scf.if %11 {
      %c0_10 = arith.constant 0 : index
      %c0_11 = arith.constant 0 : index
      %12 = vector.load %arg7[%c0_10, %c0_11] : memref<112x128xf32, #tpu.memory_space<vmem>>, vector<112x128xf32>
      %c0_12 = arith.constant 0 : index
      %c0_13 = arith.constant 0 : index
      %13 = vector.load %arg5[%c0_12, %c0_13] : memref<1x128xf32, #tpu.memory_space<vmem>>, vector<1x128xf32>
      %14 = vector.broadcast %13 : vector<1x128xf32> to vector<112x128xf32>
      %15 = arith.addf %12, %14 : vector<112x128xf32>
      %c0_14 = arith.constant 0 : index
      %c0_15 = arith.constant 0 : index
      %16 = vector.load %arg6[%c0_14, %c0_15] : memref<112x128xf32, #tpu.memory_space<vmem>>, vector<112x128xf32>
      tpu.vector_store %arg6[%c0_14, %c0_15], %15 {strides = array<i32>} : memref<112x128xf32, #tpu.memory_space<vmem>>, vector<112x128xf32>,
    } else {
    }
    return
  }
  func.func @transform_0(%arg0: i32, %arg1: i32, %arg2: i32) -> (i32, i32) {
    %c0_i32 = arith.constant 0 : i32
    return %arg0, %arg2 : i32, i32
  }
  func.func @transform_1(%arg0: i32, %arg1: i32, %arg2: i32) -> (i32, i32) {
    %c0_i32 = arith.constant 0 : i32
    return %arg2, %arg1 : i32, i32
  }
  func.func @transform_2(%arg0: i32, %arg1: i32, %arg2: i32) -> (i32, i32) {
    %c0_i32 = arith.constant 0 : i32
    %c0_i32_0 = arith.constant 0 : i32
    return %c0_i32, %arg1 : i32, i32
  }
  func.func @transform_3(%arg0: i32, %arg1: i32, %arg2: i32) -> (i32, i32) {
    %c0_i32 = arith.constant 0 : i32
    return %arg0, %arg1 : i32, i32
  }
}

module attributes {stable_mosaic.version = 11 : i64} {
  func.func @_colstats_kernel(%arg0: i32, %arg1: memref<104x128xf32, #tpu.memory_space<vmem>>, %arg2: memref<1x128xf32, #tpu.memory_space<vmem>>, %arg3: memref<1x128xf32, #tpu.memory_space<vmem>>) attributes {dimension_semantics = [#tpu.dimension_semantics<arbitrary>], iteration_bounds = array<i64: 1>, scalar_prefetch = 0 : i64, scratch_operands = 0 : i64, tpu.core_type = #tpu.core_type<tc>, window_params = [{transform_indices = @transform_0, window_bounds = array<i64: 104, 128>}, {pipeline_mode = #tpu.pipeline_mode<synchronous>, transform_indices = @transform_1, window_bounds = array<i64: 1, 128>}, {pipeline_mode = #tpu.pipeline_mode<synchronous>, transform_indices = @transform_2, window_bounds = array<i64: 1, 128>}]} {
    %c0_i32 = arith.constant 0 : i32
    %0 = arith.cmpi eq, %arg0, %c0_i32 : i32
    %1 = arith.extui %0 : i1 to i32
    %c0_i32_0 = arith.constant 0 : i32
    %2 = arith.cmpi ne, %1, %c0_i32_0 : i32
    scf.if %2 {
      %cst_11 = arith.constant 0.000000e+00 : f32
      %15 = vector.broadcast %cst_11 : f32 to vector<1x128xf32>
      %c0_12 = arith.constant 0 : index
      %c0_13 = arith.constant 0 : index
      %16 = vector.load %arg2[%c0_12, %c0_13] : memref<1x128xf32, #tpu.memory_space<vmem>>, vector<1x128xf32>
      tpu.vector_store %arg2[%c0_12, %c0_13], %15 {strides = array<i32>} : memref<1x128xf32, #tpu.memory_space<vmem>>, vector<1x128xf32>,
      %cst_14 = arith.constant 0.000000e+00 : f32
      %17 = vector.broadcast %cst_14 : f32 to vector<1x128xf32>
      %c0_15 = arith.constant 0 : index
      %c0_16 = arith.constant 0 : index
      %18 = vector.load %arg3[%c0_15, %c0_16] : memref<1x128xf32, #tpu.memory_space<vmem>>, vector<1x128xf32>
      tpu.vector_store %arg3[%c0_15, %c0_16], %17 {strides = array<i32>} : memref<1x128xf32, #tpu.memory_space<vmem>>, vector<1x128xf32>,
    } else {
    }
    %c0 = arith.constant 0 : index
    %c0_1 = arith.constant 0 : index
    %3 = vector.load %arg1[%c0, %c0_1] : memref<104x128xf32, #tpu.memory_space<vmem>>, vector<104x128xf32>
    %c0_2 = arith.constant 0 : index
    %c0_3 = arith.constant 0 : index
    %4 = vector.load %arg2[%c0_2, %c0_3] : memref<1x128xf32, #tpu.memory_space<vmem>>, vector<1x128xf32>
    %cst = arith.constant dense<0.000000e+00> : vector<128xf32>
    %5 = vector.multi_reduction <add>, %3, %cst [0] : vector<104x128xf32> to vector<128xf32>
    %6 = vector.shape_cast %5 : vector<128xf32> to vector<1x128xf32>
    %7 = arith.addf %4, %6 : vector<1x128xf32>
    %c0_4 = arith.constant 0 : index
    %c0_5 = arith.constant 0 : index
    %8 = vector.load %arg2[%c0_4, %c0_5] : memref<1x128xf32, #tpu.memory_space<vmem>>, vector<1x128xf32>
    tpu.vector_store %arg2[%c0_4, %c0_5], %7 {strides = array<i32>} : memref<1x128xf32, #tpu.memory_space<vmem>>, vector<1x128xf32>,
    %c0_6 = arith.constant 0 : index
    %c0_7 = arith.constant 0 : index
    %9 = vector.load %arg3[%c0_6, %c0_7] : memref<1x128xf32, #tpu.memory_space<vmem>>, vector<1x128xf32>
    %10 = arith.mulf %3, %3 : vector<104x128xf32>
    %cst_8 = arith.constant dense<0.000000e+00> : vector<128xf32>
    %11 = vector.multi_reduction <add>, %10, %cst_8 [0] : vector<104x128xf32> to vector<128xf32>
    %12 = vector.shape_cast %11 : vector<128xf32> to vector<1x128xf32>
    %13 = arith.addf %9, %12 : vector<1x128xf32>
    %c0_9 = arith.constant 0 : index
    %c0_10 = arith.constant 0 : index
    %14 = vector.load %arg3[%c0_9, %c0_10] : memref<1x128xf32, #tpu.memory_space<vmem>>, vector<1x128xf32>
    tpu.vector_store %arg3[%c0_9, %c0_10], %13 {strides = array<i32>} : memref<1x128xf32, #tpu.memory_space<vmem>>, vector<1x128xf32>,
    return
  }
  func.func @transform_0(%arg0: i32) -> (i32, i32) {
    %c0_i32 = arith.constant 0 : i32
    %c0_i32_0 = arith.constant 0 : i32
    return %arg0, %c0_i32 : i32, i32
  }
  func.func @transform_1(%arg0: i32) -> (i32, i32) {
    %c0_i32 = arith.constant 0 : i32
    %c0_i32_0 = arith.constant 0 : i32
    %c0_i32_1 = arith.constant 0 : i32
    return %c0_i32, %c0_i32_0 : i32, i32
  }
  func.func @transform_2(%arg0: i32) -> (i32, i32) {
    %c0_i32 = arith.constant 0 : i32
    %c0_i32_0 = arith.constant 0 : i32
    %c0_i32_1 = arith.constant 0 : i32
    return %c0_i32, %c0_i32_0 : i32, i32
  }
}

module attributes {stable_mosaic.version = 11 : i64} {
  func.func @_scale_shift_relu_kernel(%arg0: i32, %arg1: memref<104x128xf32, #tpu.memory_space<vmem>>, %arg2: memref<1x128xf32, #tpu.memory_space<vmem>>, %arg3: memref<1x128xf32, #tpu.memory_space<vmem>>, %arg4: memref<104x128xf32, #tpu.memory_space<vmem>>) attributes {dimension_semantics = [#tpu.dimension_semantics<parallel>], iteration_bounds = array<i64: 1>, scalar_prefetch = 0 : i64, scratch_operands = 0 : i64, tpu.core_type = #tpu.core_type<tc>, window_params = [{transform_indices = @transform_0, window_bounds = array<i64: 104, 128>}, {pipeline_mode = #tpu.pipeline_mode<synchronous>, transform_indices = @transform_1, window_bounds = array<i64: 1, 128>}, {pipeline_mode = #tpu.pipeline_mode<synchronous>, transform_indices = @transform_2, window_bounds = array<i64: 1, 128>}, {transform_indices = @transform_3, window_bounds = array<i64: 104, 128>}]} {
    %c0 = arith.constant 0 : index
    %c0_0 = arith.constant 0 : index
    %0 = vector.load %arg1[%c0, %c0_0] : memref<104x128xf32, #tpu.memory_space<vmem>>, vector<104x128xf32>
    %c0_1 = arith.constant 0 : index
    %c0_2 = arith.constant 0 : index
    %1 = vector.load %arg2[%c0_1, %c0_2] : memref<1x128xf32, #tpu.memory_space<vmem>>, vector<1x128xf32>
    %2 = vector.broadcast %1 : vector<1x128xf32> to vector<104x128xf32>
    %3 = arith.mulf %0, %2 : vector<104x128xf32>
    %c0_3 = arith.constant 0 : index
    %c0_4 = arith.constant 0 : index
    %4 = vector.load %arg3[%c0_3, %c0_4] : memref<1x128xf32, #tpu.memory_space<vmem>>, vector<1x128xf32>
    %5 = vector.broadcast %4 : vector<1x128xf32> to vector<104x128xf32>
    %6 = arith.addf %3, %5 : vector<104x128xf32>
    %cst = arith.constant 0.000000e+00 : f32
    %7 = vector.broadcast %cst : f32 to vector<104x128xf32>
    %8 = arith.maximumf %6, %7 : vector<104x128xf32>
    %c0_5 = arith.constant 0 : index
    %c0_6 = arith.constant 0 : index
    %9 = vector.load %arg4[%c0_5, %c0_6] : memref<104x128xf32, #tpu.memory_space<vmem>>, vector<104x128xf32>
    tpu.vector_store %arg4[%c0_5, %c0_6], %8 {strides = array<i32>} : memref<104x128xf32, #tpu.memory_space<vmem>>, vector<104x128xf32>,
    return
  }
  func.func @transform_0(%arg0: i32) -> (i32, i32) {
    %c0_i32 = arith.constant 0 : i32
    %c0_i32_0 = arith.constant 0 : i32
    return %arg0, %c0_i32 : i32, i32
  }
  func.func @transform_1(%arg0: i32) -> (i32, i32) {
    %c0_i32 = arith.constant 0 : i32
    %c0_i32_0 = arith.constant 0 : i32
    %c0_i32_1 = arith.constant 0 : i32
    return %c0_i32, %c0_i32_0 : i32, i32
  }
  func.func @transform_2(%arg0: i32) -> (i32, i32) {
    %c0_i32 = arith.constant 0 : i32
    %c0_i32_0 = arith.constant 0 : i32
    %c0_i32_1 = arith.constant 0 : i32
    return %c0_i32, %c0_i32_0 : i32, i32
  }
  func.func @transform_3(%arg0: i32) -> (i32, i32) {
    %c0_i32 = arith.constant 0 : i32
    %c0_i32_0 = arith.constant 0 : i32
    return %arg0, %c0_i32 : i32, i32
  }
}

module attributes {stable_mosaic.version = 11 : i64} {
  func.func @_max_taps_kernel(%arg0: i32, %arg1: memref<3x24x128xf32, #tpu.memory_space<vmem>>, %arg2: memref<24x128xf32, #tpu.memory_space<vmem>>) attributes {dimension_semantics = [#tpu.dimension_semantics<parallel>], iteration_bounds = array<i64: 1>, scalar_prefetch = 0 : i64, scratch_operands = 0 : i64, tpu.core_type = #tpu.core_type<tc>, window_params = [{transform_indices = @transform_0, window_bounds = array<i64: 3, 24, 128>}, {transform_indices = @transform_1, window_bounds = array<i64: 24, 128>}]} {
    %c0 = arith.constant 0 : index
    %c0_0 = arith.constant 0 : index
    %c0_1 = arith.constant 0 : index
    %0 = vector.load %arg1[%c0, %c0_0, %c0_1] : memref<3x24x128xf32, #tpu.memory_space<vmem>>, vector<3x24x128xf32>
    %cst = arith.constant dense<0xFF800000> : vector<24x128xf32>
    %1 = vector.multi_reduction <maximumf>, %0, %cst [0] : vector<3x24x128xf32> to vector<24x128xf32>
    %c0_2 = arith.constant 0 : index
    %c0_3 = arith.constant 0 : index
    %2 = vector.load %arg2[%c0_2, %c0_3] : memref<24x128xf32, #tpu.memory_space<vmem>>, vector<24x128xf32>
    tpu.vector_store %arg2[%c0_2, %c0_3], %1 {strides = array<i32>} : memref<24x128xf32, #tpu.memory_space<vmem>>, vector<24x128xf32>,
    return
  }
  func.func @transform_0(%arg0: i32) -> (i32, i32, i32) {
    %c0_i32 = arith.constant 0 : i32
    %c0_i32_0 = arith.constant 0 : i32
    %c0_i32_1 = arith.constant 0 : i32
    return %c0_i32, %arg0, %c0_i32_0 : i32, i32, i32
  }
  func.func @transform_1(%arg0: i32) -> (i32, i32) {
    %c0_i32 = arith.constant 0 : i32
    %c0_i32_0 = arith.constant 0 : i32
    return %arg0, %c0_i32 : i32, i32
  }
}

module attributes {stable_mosaic.version = 11 : i64} {
  func.func @_matmul_kernel(%arg0: i32, %arg1: i32, %arg2: i32, %arg3: memref<32x1152xbf16, #tpu.memory_space<vmem>>, %arg4: memref<1152x256xbf16, #tpu.memory_space<vmem>>, %arg5: memref<1x256xf32, #tpu.memory_space<vmem>>, %arg6: memref<32x256xf32, #tpu.memory_space<vmem>>, %arg7: memref<32x256xf32, #tpu.memory_space<vmem>>) attributes {dimension_semantics = [#tpu.dimension_semantics<parallel>, #tpu.dimension_semantics<parallel>, #tpu.dimension_semantics<arbitrary>], iteration_bounds = array<i64: 1, 1, 1>, scalar_prefetch = 0 : i64, scratch_operands = 1 : i64, tpu.core_type = #tpu.core_type<tc>, window_params = [{transform_indices = @transform_0, window_bounds = array<i64: 32, 1152>}, {transform_indices = @transform_1, window_bounds = array<i64: 1152, 256>}, {transform_indices = @transform_2, window_bounds = array<i64: 1, 256>}, {transform_indices = @transform_3, window_bounds = array<i64: 32, 256>}]} {
    %c0_i32 = arith.constant 0 : i32
    %0 = arith.cmpi eq, %arg2, %c0_i32 : i32
    %1 = arith.extui %0 : i1 to i32
    %c0_i32_0 = arith.constant 0 : i32
    %2 = arith.cmpi ne, %1, %c0_i32_0 : i32
    scf.if %2 {
      %cst_10 = arith.constant 0.000000e+00 : f32
      %12 = vector.broadcast %cst_10 : f32 to vector<32x256xf32>
      %c0_11 = arith.constant 0 : index
      %c0_12 = arith.constant 0 : index
      %13 = vector.load %arg7[%c0_11, %c0_12] : memref<32x256xf32, #tpu.memory_space<vmem>>, vector<32x256xf32>
      tpu.vector_store %arg7[%c0_11, %c0_12], %12 {strides = array<i32>} : memref<32x256xf32, #tpu.memory_space<vmem>>, vector<32x256xf32>,
    } else {
    }
    %c0 = arith.constant 0 : index
    %c0_1 = arith.constant 0 : index
    %3 = vector.load %arg7[%c0, %c0_1] : memref<32x256xf32, #tpu.memory_space<vmem>>, vector<32x256xf32>
    %c0_2 = arith.constant 0 : index
    %c0_3 = arith.constant 0 : index
    %4 = vector.load %arg3[%c0_2, %c0_3] : memref<32x1152xbf16, #tpu.memory_space<vmem>>, vector<32x1152xbf16>
    %c0_4 = arith.constant 0 : index
    %c0_5 = arith.constant 0 : index
    %5 = vector.load %arg4[%c0_4, %c0_5] : memref<1152x256xbf16, #tpu.memory_space<vmem>>, vector<1152x256xbf16>
    %cst = arith.constant dense<0.000000e+00> : vector<32x256xf32>
    %6 = tpu.matmul %4, %5, %cst {dimension_numbers = #tpu.dot_dimension_numbers<[1], [0], [0], [1], [0, 0, 1, 1], [], []>} : vector<32x1152xbf16>, vector<1152x256xbf16>, vector<32x256xf32> -> vector<32x256xf32>
    %7 = arith.addf %3, %6 : vector<32x256xf32>
    %c0_6 = arith.constant 0 : index
    %c0_7 = arith.constant 0 : index
    %8 = vector.load %arg7[%c0_6, %c0_7] : memref<32x256xf32, #tpu.memory_space<vmem>>, vector<32x256xf32>
    tpu.vector_store %arg7[%c0_6, %c0_7], %7 {strides = array<i32>} : memref<32x256xf32, #tpu.memory_space<vmem>>, vector<32x256xf32>,
    %c0_i32_8 = arith.constant 0 : i32
    %9 = arith.cmpi eq, %arg2, %c0_i32_8 : i32
    %10 = arith.extui %9 : i1 to i32
    %c0_i32_9 = arith.constant 0 : i32
    %11 = arith.cmpi ne, %10, %c0_i32_9 : i32
    scf.if %11 {
      %c0_10 = arith.constant 0 : index
      %c0_11 = arith.constant 0 : index
      %12 = vector.load %arg7[%c0_10, %c0_11] : memref<32x256xf32, #tpu.memory_space<vmem>>, vector<32x256xf32>
      %c0_12 = arith.constant 0 : index
      %c0_13 = arith.constant 0 : index
      %13 = vector.load %arg5[%c0_12, %c0_13] : memref<1x256xf32, #tpu.memory_space<vmem>>, vector<1x256xf32>
      %14 = vector.broadcast %13 : vector<1x256xf32> to vector<32x256xf32>
      %15 = arith.addf %12, %14 : vector<32x256xf32>
      %c0_14 = arith.constant 0 : index
      %c0_15 = arith.constant 0 : index
      %16 = vector.load %arg6[%c0_14, %c0_15] : memref<32x256xf32, #tpu.memory_space<vmem>>, vector<32x256xf32>
      tpu.vector_store %arg6[%c0_14, %c0_15], %15 {strides = array<i32>} : memref<32x256xf32, #tpu.memory_space<vmem>>, vector<32x256xf32>,
    } else {
    }
    return
  }
  func.func @transform_0(%arg0: i32, %arg1: i32, %arg2: i32) -> (i32, i32) {
    %c0_i32 = arith.constant 0 : i32
    return %arg0, %arg2 : i32, i32
  }
  func.func @transform_1(%arg0: i32, %arg1: i32, %arg2: i32) -> (i32, i32) {
    %c0_i32 = arith.constant 0 : i32
    return %arg2, %arg1 : i32, i32
  }
  func.func @transform_2(%arg0: i32, %arg1: i32, %arg2: i32) -> (i32, i32) {
    %c0_i32 = arith.constant 0 : i32
    %c0_i32_0 = arith.constant 0 : i32
    return %c0_i32, %arg1 : i32, i32
  }
  func.func @transform_3(%arg0: i32, %arg1: i32, %arg2: i32) -> (i32, i32) {
    %c0_i32 = arith.constant 0 : i32
    return %arg0, %arg1 : i32, i32
  }
}

module attributes {stable_mosaic.version = 11 : i64} {
  func.func @_colstats_kernel(%arg0: i32, %arg1: memref<24x256xf32, #tpu.memory_space<vmem>>, %arg2: memref<1x256xf32, #tpu.memory_space<vmem>>, %arg3: memref<1x256xf32, #tpu.memory_space<vmem>>) attributes {dimension_semantics = [#tpu.dimension_semantics<arbitrary>], iteration_bounds = array<i64: 1>, scalar_prefetch = 0 : i64, scratch_operands = 0 : i64, tpu.core_type = #tpu.core_type<tc>, window_params = [{transform_indices = @transform_0, window_bounds = array<i64: 24, 256>}, {pipeline_mode = #tpu.pipeline_mode<synchronous>, transform_indices = @transform_1, window_bounds = array<i64: 1, 256>}, {pipeline_mode = #tpu.pipeline_mode<synchronous>, transform_indices = @transform_2, window_bounds = array<i64: 1, 256>}]} {
    %c0_i32 = arith.constant 0 : i32
    %0 = arith.cmpi eq, %arg0, %c0_i32 : i32
    %1 = arith.extui %0 : i1 to i32
    %c0_i32_0 = arith.constant 0 : i32
    %2 = arith.cmpi ne, %1, %c0_i32_0 : i32
    scf.if %2 {
      %cst_11 = arith.constant 0.000000e+00 : f32
      %15 = vector.broadcast %cst_11 : f32 to vector<1x256xf32>
      %c0_12 = arith.constant 0 : index
      %c0_13 = arith.constant 0 : index
      %16 = vector.load %arg2[%c0_12, %c0_13] : memref<1x256xf32, #tpu.memory_space<vmem>>, vector<1x256xf32>
      tpu.vector_store %arg2[%c0_12, %c0_13], %15 {strides = array<i32>} : memref<1x256xf32, #tpu.memory_space<vmem>>, vector<1x256xf32>,
      %cst_14 = arith.constant 0.000000e+00 : f32
      %17 = vector.broadcast %cst_14 : f32 to vector<1x256xf32>
      %c0_15 = arith.constant 0 : index
      %c0_16 = arith.constant 0 : index
      %18 = vector.load %arg3[%c0_15, %c0_16] : memref<1x256xf32, #tpu.memory_space<vmem>>, vector<1x256xf32>
      tpu.vector_store %arg3[%c0_15, %c0_16], %17 {strides = array<i32>} : memref<1x256xf32, #tpu.memory_space<vmem>>, vector<1x256xf32>,
    } else {
    }
    %c0 = arith.constant 0 : index
    %c0_1 = arith.constant 0 : index
    %3 = vector.load %arg1[%c0, %c0_1] : memref<24x256xf32, #tpu.memory_space<vmem>>, vector<24x256xf32>
    %c0_2 = arith.constant 0 : index
    %c0_3 = arith.constant 0 : index
    %4 = vector.load %arg2[%c0_2, %c0_3] : memref<1x256xf32, #tpu.memory_space<vmem>>, vector<1x256xf32>
    %cst = arith.constant dense<0.000000e+00> : vector<256xf32>
    %5 = vector.multi_reduction <add>, %3, %cst [0] : vector<24x256xf32> to vector<256xf32>
    %6 = vector.shape_cast %5 : vector<256xf32> to vector<1x256xf32>
    %7 = arith.addf %4, %6 : vector<1x256xf32>
    %c0_4 = arith.constant 0 : index
    %c0_5 = arith.constant 0 : index
    %8 = vector.load %arg2[%c0_4, %c0_5] : memref<1x256xf32, #tpu.memory_space<vmem>>, vector<1x256xf32>
    tpu.vector_store %arg2[%c0_4, %c0_5], %7 {strides = array<i32>} : memref<1x256xf32, #tpu.memory_space<vmem>>, vector<1x256xf32>,
    %c0_6 = arith.constant 0 : index
    %c0_7 = arith.constant 0 : index
    %9 = vector.load %arg3[%c0_6, %c0_7] : memref<1x256xf32, #tpu.memory_space<vmem>>, vector<1x256xf32>
    %10 = arith.mulf %3, %3 : vector<24x256xf32>
    %cst_8 = arith.constant dense<0.000000e+00> : vector<256xf32>
    %11 = vector.multi_reduction <add>, %10, %cst_8 [0] : vector<24x256xf32> to vector<256xf32>
    %12 = vector.shape_cast %11 : vector<256xf32> to vector<1x256xf32>
    %13 = arith.addf %9, %12 : vector<1x256xf32>
    %c0_9 = arith.constant 0 : index
    %c0_10 = arith.constant 0 : index
    %14 = vector.load %arg3[%c0_9, %c0_10] : memref<1x256xf32, #tpu.memory_space<vmem>>, vector<1x256xf32>
    tpu.vector_store %arg3[%c0_9, %c0_10], %13 {strides = array<i32>} : memref<1x256xf32, #tpu.memory_space<vmem>>, vector<1x256xf32>,
    return
  }
  func.func @transform_0(%arg0: i32) -> (i32, i32) {
    %c0_i32 = arith.constant 0 : i32
    %c0_i32_0 = arith.constant 0 : i32
    return %arg0, %c0_i32 : i32, i32
  }
  func.func @transform_1(%arg0: i32) -> (i32, i32) {
    %c0_i32 = arith.constant 0 : i32
    %c0_i32_0 = arith.constant 0 : i32
    %c0_i32_1 = arith.constant 0 : i32
    return %c0_i32, %c0_i32_0 : i32, i32
  }
  func.func @transform_2(%arg0: i32) -> (i32, i32) {
    %c0_i32 = arith.constant 0 : i32
    %c0_i32_0 = arith.constant 0 : i32
    %c0_i32_1 = arith.constant 0 : i32
    return %c0_i32, %c0_i32_0 : i32, i32
  }
}

module attributes {stable_mosaic.version = 11 : i64} {
  func.func @_scale_shift_relu_kernel(%arg0: i32, %arg1: memref<24x256xf32, #tpu.memory_space<vmem>>, %arg2: memref<1x256xf32, #tpu.memory_space<vmem>>, %arg3: memref<1x256xf32, #tpu.memory_space<vmem>>, %arg4: memref<24x256xf32, #tpu.memory_space<vmem>>) attributes {dimension_semantics = [#tpu.dimension_semantics<parallel>], iteration_bounds = array<i64: 1>, scalar_prefetch = 0 : i64, scratch_operands = 0 : i64, tpu.core_type = #tpu.core_type<tc>, window_params = [{transform_indices = @transform_0, window_bounds = array<i64: 24, 256>}, {pipeline_mode = #tpu.pipeline_mode<synchronous>, transform_indices = @transform_1, window_bounds = array<i64: 1, 256>}, {pipeline_mode = #tpu.pipeline_mode<synchronous>, transform_indices = @transform_2, window_bounds = array<i64: 1, 256>}, {transform_indices = @transform_3, window_bounds = array<i64: 24, 256>}]} {
    %c0 = arith.constant 0 : index
    %c0_0 = arith.constant 0 : index
    %0 = vector.load %arg1[%c0, %c0_0] : memref<24x256xf32, #tpu.memory_space<vmem>>, vector<24x256xf32>
    %c0_1 = arith.constant 0 : index
    %c0_2 = arith.constant 0 : index
    %1 = vector.load %arg2[%c0_1, %c0_2] : memref<1x256xf32, #tpu.memory_space<vmem>>, vector<1x256xf32>
    %2 = vector.broadcast %1 : vector<1x256xf32> to vector<24x256xf32>
    %3 = arith.mulf %0, %2 : vector<24x256xf32>
    %c0_3 = arith.constant 0 : index
    %c0_4 = arith.constant 0 : index
    %4 = vector.load %arg3[%c0_3, %c0_4] : memref<1x256xf32, #tpu.memory_space<vmem>>, vector<1x256xf32>
    %5 = vector.broadcast %4 : vector<1x256xf32> to vector<24x256xf32>
    %6 = arith.addf %3, %5 : vector<24x256xf32>
    %cst = arith.constant 0.000000e+00 : f32
    %7 = vector.broadcast %cst : f32 to vector<24x256xf32>
    %8 = arith.maximumf %6, %7 : vector<24x256xf32>
    %c0_5 = arith.constant 0 : index
    %c0_6 = arith.constant 0 : index
    %9 = vector.load %arg4[%c0_5, %c0_6] : memref<24x256xf32, #tpu.memory_space<vmem>>, vector<24x256xf32>
    tpu.vector_store %arg4[%c0_5, %c0_6], %8 {strides = array<i32>} : memref<24x256xf32, #tpu.memory_space<vmem>>, vector<24x256xf32>,
    return
  }
  func.func @transform_0(%arg0: i32) -> (i32, i32) {
    %c0_i32 = arith.constant 0 : i32
    %c0_i32_0 = arith.constant 0 : i32
    return %arg0, %c0_i32 : i32, i32
  }
  func.func @transform_1(%arg0: i32) -> (i32, i32) {
    %c0_i32 = arith.constant 0 : i32
    %c0_i32_0 = arith.constant 0 : i32
    %c0_i32_1 = arith.constant 0 : i32
    return %c0_i32, %c0_i32_0 : i32, i32
  }
  func.func @transform_2(%arg0: i32) -> (i32, i32) {
    %c0_i32 = arith.constant 0 : i32
    %c0_i32_0 = arith.constant 0 : i32
    %c0_i32_1 = arith.constant 0 : i32
    return %c0_i32, %c0_i32_0 : i32, i32
  }
  func.func @transform_3(%arg0: i32) -> (i32, i32) {
    %c0_i32 = arith.constant 0 : i32
    %c0_i32_0 = arith.constant 0 : i32
    return %arg0, %c0_i32 : i32, i32
  }
}

module attributes {stable_mosaic.version = 11 : i64} {
  func.func @_matmul_kernel(%arg0: i32, %arg1: i32, %arg2: i32, %arg3: memref<32x1792xbf16, #tpu.memory_space<vmem>>, %arg4: memref<1792x256xbf16, #tpu.memory_space<vmem>>, %arg5: memref<1x256xf32, #tpu.memory_space<vmem>>, %arg6: memref<32x256xf32, #tpu.memory_space<vmem>>, %arg7: memref<32x256xf32, #tpu.memory_space<vmem>>) attributes {dimension_semantics = [#tpu.dimension_semantics<parallel>, #tpu.dimension_semantics<parallel>, #tpu.dimension_semantics<arbitrary>], iteration_bounds = array<i64: 1, 1, 1>, scalar_prefetch = 0 : i64, scratch_operands = 1 : i64, tpu.core_type = #tpu.core_type<tc>, window_params = [{transform_indices = @transform_0, window_bounds = array<i64: 32, 1792>}, {transform_indices = @transform_1, window_bounds = array<i64: 1792, 256>}, {transform_indices = @transform_2, window_bounds = array<i64: 1, 256>}, {transform_indices = @transform_3, window_bounds = array<i64: 32, 256>}]} {
    %c0_i32 = arith.constant 0 : i32
    %0 = arith.cmpi eq, %arg2, %c0_i32 : i32
    %1 = arith.extui %0 : i1 to i32
    %c0_i32_0 = arith.constant 0 : i32
    %2 = arith.cmpi ne, %1, %c0_i32_0 : i32
    scf.if %2 {
      %cst_10 = arith.constant 0.000000e+00 : f32
      %12 = vector.broadcast %cst_10 : f32 to vector<32x256xf32>
      %c0_11 = arith.constant 0 : index
      %c0_12 = arith.constant 0 : index
      %13 = vector.load %arg7[%c0_11, %c0_12] : memref<32x256xf32, #tpu.memory_space<vmem>>, vector<32x256xf32>
      tpu.vector_store %arg7[%c0_11, %c0_12], %12 {strides = array<i32>} : memref<32x256xf32, #tpu.memory_space<vmem>>, vector<32x256xf32>,
    } else {
    }
    %c0 = arith.constant 0 : index
    %c0_1 = arith.constant 0 : index
    %3 = vector.load %arg7[%c0, %c0_1] : memref<32x256xf32, #tpu.memory_space<vmem>>, vector<32x256xf32>
    %c0_2 = arith.constant 0 : index
    %c0_3 = arith.constant 0 : index
    %4 = vector.load %arg3[%c0_2, %c0_3] : memref<32x1792xbf16, #tpu.memory_space<vmem>>, vector<32x1792xbf16>
    %c0_4 = arith.constant 0 : index
    %c0_5 = arith.constant 0 : index
    %5 = vector.load %arg4[%c0_4, %c0_5] : memref<1792x256xbf16, #tpu.memory_space<vmem>>, vector<1792x256xbf16>
    %cst = arith.constant dense<0.000000e+00> : vector<32x256xf32>
    %6 = tpu.matmul %4, %5, %cst {dimension_numbers = #tpu.dot_dimension_numbers<[1], [0], [0], [1], [0, 0, 1, 1], [], []>} : vector<32x1792xbf16>, vector<1792x256xbf16>, vector<32x256xf32> -> vector<32x256xf32>
    %7 = arith.addf %3, %6 : vector<32x256xf32>
    %c0_6 = arith.constant 0 : index
    %c0_7 = arith.constant 0 : index
    %8 = vector.load %arg7[%c0_6, %c0_7] : memref<32x256xf32, #tpu.memory_space<vmem>>, vector<32x256xf32>
    tpu.vector_store %arg7[%c0_6, %c0_7], %7 {strides = array<i32>} : memref<32x256xf32, #tpu.memory_space<vmem>>, vector<32x256xf32>,
    %c0_i32_8 = arith.constant 0 : i32
    %9 = arith.cmpi eq, %arg2, %c0_i32_8 : i32
    %10 = arith.extui %9 : i1 to i32
    %c0_i32_9 = arith.constant 0 : i32
    %11 = arith.cmpi ne, %10, %c0_i32_9 : i32
    scf.if %11 {
      %c0_10 = arith.constant 0 : index
      %c0_11 = arith.constant 0 : index
      %12 = vector.load %arg7[%c0_10, %c0_11] : memref<32x256xf32, #tpu.memory_space<vmem>>, vector<32x256xf32>
      %c0_12 = arith.constant 0 : index
      %c0_13 = arith.constant 0 : index
      %13 = vector.load %arg5[%c0_12, %c0_13] : memref<1x256xf32, #tpu.memory_space<vmem>>, vector<1x256xf32>
      %14 = vector.broadcast %13 : vector<1x256xf32> to vector<32x256xf32>
      %15 = arith.addf %12, %14 : vector<32x256xf32>
      %c0_14 = arith.constant 0 : index
      %c0_15 = arith.constant 0 : index
      %16 = vector.load %arg6[%c0_14, %c0_15] : memref<32x256xf32, #tpu.memory_space<vmem>>, vector<32x256xf32>
      tpu.vector_store %arg6[%c0_14, %c0_15], %15 {strides = array<i32>} : memref<32x256xf32, #tpu.memory_space<vmem>>, vector<32x256xf32>,
    } else {
    }
    return
  }
  func.func @transform_0(%arg0: i32, %arg1: i32, %arg2: i32) -> (i32, i32) {
    %c0_i32 = arith.constant 0 : i32
    return %arg0, %arg2 : i32, i32
  }
  func.func @transform_1(%arg0: i32, %arg1: i32, %arg2: i32) -> (i32, i32) {
    %c0_i32 = arith.constant 0 : i32
    return %arg2, %arg1 : i32, i32
  }
  func.func @transform_2(%arg0: i32, %arg1: i32, %arg2: i32) -> (i32, i32) {
    %c0_i32 = arith.constant 0 : i32
    %c0_i32_0 = arith.constant 0 : i32
    return %c0_i32, %arg1 : i32, i32
  }
  func.func @transform_3(%arg0: i32, %arg1: i32, %arg2: i32) -> (i32, i32) {
    %c0_i32 = arith.constant 0 : i32
    return %arg0, %arg1 : i32, i32
  }
}

module attributes {stable_mosaic.version = 11 : i64} {
  func.func @_matmul_kernel(%arg0: i32, %arg1: i32, %arg2: i32, %arg3: memref<32x1792xbf16, #tpu.memory_space<vmem>>, %arg4: memref<1792x128xbf16, #tpu.memory_space<vmem>>, %arg5: memref<1x128xf32, #tpu.memory_space<vmem>>, %arg6: memref<32x128xf32, #tpu.memory_space<vmem>>, %arg7: memref<32x128xf32, #tpu.memory_space<vmem>>) attributes {dimension_semantics = [#tpu.dimension_semantics<parallel>, #tpu.dimension_semantics<parallel>, #tpu.dimension_semantics<arbitrary>], iteration_bounds = array<i64: 1, 1, 1>, scalar_prefetch = 0 : i64, scratch_operands = 1 : i64, tpu.core_type = #tpu.core_type<tc>, window_params = [{transform_indices = @transform_0, window_bounds = array<i64: 32, 1792>}, {transform_indices = @transform_1, window_bounds = array<i64: 1792, 128>}, {transform_indices = @transform_2, window_bounds = array<i64: 1, 128>}, {transform_indices = @transform_3, window_bounds = array<i64: 32, 128>}]} {
    %c0_i32 = arith.constant 0 : i32
    %0 = arith.cmpi eq, %arg2, %c0_i32 : i32
    %1 = arith.extui %0 : i1 to i32
    %c0_i32_0 = arith.constant 0 : i32
    %2 = arith.cmpi ne, %1, %c0_i32_0 : i32
    scf.if %2 {
      %cst_10 = arith.constant 0.000000e+00 : f32
      %12 = vector.broadcast %cst_10 : f32 to vector<32x128xf32>
      %c0_11 = arith.constant 0 : index
      %c0_12 = arith.constant 0 : index
      %13 = vector.load %arg7[%c0_11, %c0_12] : memref<32x128xf32, #tpu.memory_space<vmem>>, vector<32x128xf32>
      tpu.vector_store %arg7[%c0_11, %c0_12], %12 {strides = array<i32>} : memref<32x128xf32, #tpu.memory_space<vmem>>, vector<32x128xf32>,
    } else {
    }
    %c0 = arith.constant 0 : index
    %c0_1 = arith.constant 0 : index
    %3 = vector.load %arg7[%c0, %c0_1] : memref<32x128xf32, #tpu.memory_space<vmem>>, vector<32x128xf32>
    %c0_2 = arith.constant 0 : index
    %c0_3 = arith.constant 0 : index
    %4 = vector.load %arg3[%c0_2, %c0_3] : memref<32x1792xbf16, #tpu.memory_space<vmem>>, vector<32x1792xbf16>
    %c0_4 = arith.constant 0 : index
    %c0_5 = arith.constant 0 : index
    %5 = vector.load %arg4[%c0_4, %c0_5] : memref<1792x128xbf16, #tpu.memory_space<vmem>>, vector<1792x128xbf16>
    %cst = arith.constant dense<0.000000e+00> : vector<32x128xf32>
    %6 = tpu.matmul %4, %5, %cst {dimension_numbers = #tpu.dot_dimension_numbers<[1], [0], [0], [1], [0, 0, 1, 1], [], []>} : vector<32x1792xbf16>, vector<1792x128xbf16>, vector<32x128xf32> -> vector<32x128xf32>
    %7 = arith.addf %3, %6 : vector<32x128xf32>
    %c0_6 = arith.constant 0 : index
    %c0_7 = arith.constant 0 : index
    %8 = vector.load %arg7[%c0_6, %c0_7] : memref<32x128xf32, #tpu.memory_space<vmem>>, vector<32x128xf32>
    tpu.vector_store %arg7[%c0_6, %c0_7], %7 {strides = array<i32>} : memref<32x128xf32, #tpu.memory_space<vmem>>, vector<32x128xf32>,
    %c0_i32_8 = arith.constant 0 : i32
    %9 = arith.cmpi eq, %arg2, %c0_i32_8 : i32
    %10 = arith.extui %9 : i1 to i32
    %c0_i32_9 = arith.constant 0 : i32
    %11 = arith.cmpi ne, %10, %c0_i32_9 : i32
    scf.if %11 {
      %c0_10 = arith.constant 0 : index
      %c0_11 = arith.constant 0 : index
      %12 = vector.load %arg7[%c0_10, %c0_11] : memref<32x128xf32, #tpu.memory_space<vmem>>, vector<32x128xf32>
      %c0_12 = arith.constant 0 : index
      %c0_13 = arith.constant 0 : index
      %13 = vector.load %arg5[%c0_12, %c0_13] : memref<1x128xf32, #tpu.memory_space<vmem>>, vector<1x128xf32>
      %14 = vector.broadcast %13 : vector<1x128xf32> to vector<32x128xf32>
      %15 = arith.addf %12, %14 : vector<32x128xf32>
      %c0_14 = arith.constant 0 : index
      %c0_15 = arith.constant 0 : index
      %16 = vector.load %arg6[%c0_14, %c0_15] : memref<32x128xf32, #tpu.memory_space<vmem>>, vector<32x128xf32>
      tpu.vector_store %arg6[%c0_14, %c0_15], %15 {strides = array<i32>} : memref<32x128xf32, #tpu.memory_space<vmem>>, vector<32x128xf32>,
    } else {
    }
    return
  }
  func.func @transform_0(%arg0: i32, %arg1: i32, %arg2: i32) -> (i32, i32) {
    %c0_i32 = arith.constant 0 : i32
    return %arg0, %arg2 : i32, i32
  }
  func.func @transform_1(%arg0: i32, %arg1: i32, %arg2: i32) -> (i32, i32) {
    %c0_i32 = arith.constant 0 : i32
    return %arg2, %arg1 : i32, i32
  }
  func.func @transform_2(%arg0: i32, %arg1: i32, %arg2: i32) -> (i32, i32) {
    %c0_i32 = arith.constant 0 : i32
    %c0_i32_0 = arith.constant 0 : i32
    return %c0_i32, %arg1 : i32, i32
  }
  func.func @transform_3(%arg0: i32, %arg1: i32, %arg2: i32) -> (i32, i32) {
    %c0_i32 = arith.constant 0 : i32
    return %arg0, %arg1 : i32, i32
  }
}

module attributes {stable_mosaic.version = 11 : i64} {
  func.func @_colstats_kernel(%arg0: i32, %arg1: memref<24x128xf32, #tpu.memory_space<vmem>>, %arg2: memref<1x128xf32, #tpu.memory_space<vmem>>, %arg3: memref<1x128xf32, #tpu.memory_space<vmem>>) attributes {dimension_semantics = [#tpu.dimension_semantics<arbitrary>], iteration_bounds = array<i64: 1>, scalar_prefetch = 0 : i64, scratch_operands = 0 : i64, tpu.core_type = #tpu.core_type<tc>, window_params = [{transform_indices = @transform_0, window_bounds = array<i64: 24, 128>}, {pipeline_mode = #tpu.pipeline_mode<synchronous>, transform_indices = @transform_1, window_bounds = array<i64: 1, 128>}, {pipeline_mode = #tpu.pipeline_mode<synchronous>, transform_indices = @transform_2, window_bounds = array<i64: 1, 128>}]} {
    %c0_i32 = arith.constant 0 : i32
    %0 = arith.cmpi eq, %arg0, %c0_i32 : i32
    %1 = arith.extui %0 : i1 to i32
    %c0_i32_0 = arith.constant 0 : i32
    %2 = arith.cmpi ne, %1, %c0_i32_0 : i32
    scf.if %2 {
      %cst_11 = arith.constant 0.000000e+00 : f32
      %15 = vector.broadcast %cst_11 : f32 to vector<1x128xf32>
      %c0_12 = arith.constant 0 : index
      %c0_13 = arith.constant 0 : index
      %16 = vector.load %arg2[%c0_12, %c0_13] : memref<1x128xf32, #tpu.memory_space<vmem>>, vector<1x128xf32>
      tpu.vector_store %arg2[%c0_12, %c0_13], %15 {strides = array<i32>} : memref<1x128xf32, #tpu.memory_space<vmem>>, vector<1x128xf32>,
      %cst_14 = arith.constant 0.000000e+00 : f32
      %17 = vector.broadcast %cst_14 : f32 to vector<1x128xf32>
      %c0_15 = arith.constant 0 : index
      %c0_16 = arith.constant 0 : index
      %18 = vector.load %arg3[%c0_15, %c0_16] : memref<1x128xf32, #tpu.memory_space<vmem>>, vector<1x128xf32>
      tpu.vector_store %arg3[%c0_15, %c0_16], %17 {strides = array<i32>} : memref<1x128xf32, #tpu.memory_space<vmem>>, vector<1x128xf32>,
    } else {
    }
    %c0 = arith.constant 0 : index
    %c0_1 = arith.constant 0 : index
    %3 = vector.load %arg1[%c0, %c0_1] : memref<24x128xf32, #tpu.memory_space<vmem>>, vector<24x128xf32>
    %c0_2 = arith.constant 0 : index
    %c0_3 = arith.constant 0 : index
    %4 = vector.load %arg2[%c0_2, %c0_3] : memref<1x128xf32, #tpu.memory_space<vmem>>, vector<1x128xf32>
    %cst = arith.constant dense<0.000000e+00> : vector<128xf32>
    %5 = vector.multi_reduction <add>, %3, %cst [0] : vector<24x128xf32> to vector<128xf32>
    %6 = vector.shape_cast %5 : vector<128xf32> to vector<1x128xf32>
    %7 = arith.addf %4, %6 : vector<1x128xf32>
    %c0_4 = arith.constant 0 : index
    %c0_5 = arith.constant 0 : index
    %8 = vector.load %arg2[%c0_4, %c0_5] : memref<1x128xf32, #tpu.memory_space<vmem>>, vector<1x128xf32>
    tpu.vector_store %arg2[%c0_4, %c0_5], %7 {strides = array<i32>} : memref<1x128xf32, #tpu.memory_space<vmem>>, vector<1x128xf32>,
    %c0_6 = arith.constant 0 : index
    %c0_7 = arith.constant 0 : index
    %9 = vector.load %arg3[%c0_6, %c0_7] : memref<1x128xf32, #tpu.memory_space<vmem>>, vector<1x128xf32>
    %10 = arith.mulf %3, %3 : vector<24x128xf32>
    %cst_8 = arith.constant dense<0.000000e+00> : vector<128xf32>
    %11 = vector.multi_reduction <add>, %10, %cst_8 [0] : vector<24x128xf32> to vector<128xf32>
    %12 = vector.shape_cast %11 : vector<128xf32> to vector<1x128xf32>
    %13 = arith.addf %9, %12 : vector<1x128xf32>
    %c0_9 = arith.constant 0 : index
    %c0_10 = arith.constant 0 : index
    %14 = vector.load %arg3[%c0_9, %c0_10] : memref<1x128xf32, #tpu.memory_space<vmem>>, vector<1x128xf32>
    tpu.vector_store %arg3[%c0_9, %c0_10], %13 {strides = array<i32>} : memref<1x128xf32, #tpu.memory_space<vmem>>, vector<1x128xf32>,
    return
  }
  func.func @transform_0(%arg0: i32) -> (i32, i32) {
    %c0_i32 = arith.constant 0 : i32
    %c0_i32_0 = arith.constant 0 : i32
    return %arg0, %c0_i32 : i32, i32
  }
  func.func @transform_1(%arg0: i32) -> (i32, i32) {
    %c0_i32 = arith.constant 0 : i32
    %c0_i32_0 = arith.constant 0 : i32
    %c0_i32_1 = arith.constant 0 : i32
    return %c0_i32, %c0_i32_0 : i32, i32
  }
  func.func @transform_2(%arg0: i32) -> (i32, i32) {
    %c0_i32 = arith.constant 0 : i32
    %c0_i32_0 = arith.constant 0 : i32
    %c0_i32_1 = arith.constant 0 : i32
    return %c0_i32, %c0_i32_0 : i32, i32
  }
}

module attributes {stable_mosaic.version = 11 : i64} {
  func.func @_scale_shift_relu_kernel(%arg0: i32, %arg1: memref<24x128xf32, #tpu.memory_space<vmem>>, %arg2: memref<1x128xf32, #tpu.memory_space<vmem>>, %arg3: memref<1x128xf32, #tpu.memory_space<vmem>>, %arg4: memref<24x128xf32, #tpu.memory_space<vmem>>) attributes {dimension_semantics = [#tpu.dimension_semantics<parallel>], iteration_bounds = array<i64: 1>, scalar_prefetch = 0 : i64, scratch_operands = 0 : i64, tpu.core_type = #tpu.core_type<tc>, window_params = [{transform_indices = @transform_0, window_bounds = array<i64: 24, 128>}, {pipeline_mode = #tpu.pipeline_mode<synchronous>, transform_indices = @transform_1, window_bounds = array<i64: 1, 128>}, {pipeline_mode = #tpu.pipeline_mode<synchronous>, transform_indices = @transform_2, window_bounds = array<i64: 1, 128>}, {transform_indices = @transform_3, window_bounds = array<i64: 24, 128>}]} {
    %c0 = arith.constant 0 : index
    %c0_0 = arith.constant 0 : index
    %0 = vector.load %arg1[%c0, %c0_0] : memref<24x128xf32, #tpu.memory_space<vmem>>, vector<24x128xf32>
    %c0_1 = arith.constant 0 : index
    %c0_2 = arith.constant 0 : index
    %1 = vector.load %arg2[%c0_1, %c0_2] : memref<1x128xf32, #tpu.memory_space<vmem>>, vector<1x128xf32>
    %2 = vector.broadcast %1 : vector<1x128xf32> to vector<24x128xf32>
    %3 = arith.mulf %0, %2 : vector<24x128xf32>
    %c0_3 = arith.constant 0 : index
    %c0_4 = arith.constant 0 : index
    %4 = vector.load %arg3[%c0_3, %c0_4] : memref<1x128xf32, #tpu.memory_space<vmem>>, vector<1x128xf32>
    %5 = vector.broadcast %4 : vector<1x128xf32> to vector<24x128xf32>
    %6 = arith.addf %3, %5 : vector<24x128xf32>
    %cst = arith.constant 0.000000e+00 : f32
    %7 = vector.broadcast %cst : f32 to vector<24x128xf32>
    %8 = arith.maximumf %6, %7 : vector<24x128xf32>
    %c0_5 = arith.constant 0 : index
    %c0_6 = arith.constant 0 : index
    %9 = vector.load %arg4[%c0_5, %c0_6] : memref<24x128xf32, #tpu.memory_space<vmem>>, vector<24x128xf32>
    tpu.vector_store %arg4[%c0_5, %c0_6], %8 {strides = array<i32>} : memref<24x128xf32, #tpu.memory_space<vmem>>, vector<24x128xf32>,
    return
  }
  func.func @transform_0(%arg0: i32) -> (i32, i32) {
    %c0_i32 = arith.constant 0 : i32
    %c0_i32_0 = arith.constant 0 : i32
    return %arg0, %c0_i32 : i32, i32
  }
  func.func @transform_1(%arg0: i32) -> (i32, i32) {
    %c0_i32 = arith.constant 0 : i32
    %c0_i32_0 = arith.constant 0 : i32
    %c0_i32_1 = arith.constant 0 : i32
    return %c0_i32, %c0_i32_0 : i32, i32
  }
  func.func @transform_2(%arg0: i32) -> (i32, i32) {
    %c0_i32 = arith.constant 0 : i32
    %c0_i32_0 = arith.constant 0 : i32
    %c0_i32_1 = arith.constant 0 : i32
    return %c0_i32, %c0_i32_0 : i32, i32
  }
  func.func @transform_3(%arg0: i32) -> (i32, i32) {
    %c0_i32 = arith.constant 0 : i32
    %c0_i32_0 = arith.constant 0 : i32
    return %arg0, %c0_i32 : i32, i32
  }
}

module attributes {stable_mosaic.version = 11 : i64} {
  func.func @_matmul_kernel(%arg0: i32, %arg1: i32, %arg2: i32, %arg3: memref<16x1152xbf16, #tpu.memory_space<vmem>>, %arg4: memref<1152x256xbf16, #tpu.memory_space<vmem>>, %arg5: memref<1x256xf32, #tpu.memory_space<vmem>>, %arg6: memref<16x256xf32, #tpu.memory_space<vmem>>, %arg7: memref<16x256xf32, #tpu.memory_space<vmem>>) attributes {dimension_semantics = [#tpu.dimension_semantics<parallel>, #tpu.dimension_semantics<parallel>, #tpu.dimension_semantics<arbitrary>], iteration_bounds = array<i64: 1, 1, 1>, scalar_prefetch = 0 : i64, scratch_operands = 1 : i64, tpu.core_type = #tpu.core_type<tc>, window_params = [{transform_indices = @transform_0, window_bounds = array<i64: 16, 1152>}, {transform_indices = @transform_1, window_bounds = array<i64: 1152, 256>}, {transform_indices = @transform_2, window_bounds = array<i64: 1, 256>}, {transform_indices = @transform_3, window_bounds = array<i64: 16, 256>}]} {
    %c0_i32 = arith.constant 0 : i32
    %0 = arith.cmpi eq, %arg2, %c0_i32 : i32
    %1 = arith.extui %0 : i1 to i32
    %c0_i32_0 = arith.constant 0 : i32
    %2 = arith.cmpi ne, %1, %c0_i32_0 : i32
    scf.if %2 {
      %cst_10 = arith.constant 0.000000e+00 : f32
      %12 = vector.broadcast %cst_10 : f32 to vector<16x256xf32>
      %c0_11 = arith.constant 0 : index
      %c0_12 = arith.constant 0 : index
      %13 = vector.load %arg7[%c0_11, %c0_12] : memref<16x256xf32, #tpu.memory_space<vmem>>, vector<16x256xf32>
      tpu.vector_store %arg7[%c0_11, %c0_12], %12 {strides = array<i32>} : memref<16x256xf32, #tpu.memory_space<vmem>>, vector<16x256xf32>,
    } else {
    }
    %c0 = arith.constant 0 : index
    %c0_1 = arith.constant 0 : index
    %3 = vector.load %arg7[%c0, %c0_1] : memref<16x256xf32, #tpu.memory_space<vmem>>, vector<16x256xf32>
    %c0_2 = arith.constant 0 : index
    %c0_3 = arith.constant 0 : index
    %4 = vector.load %arg3[%c0_2, %c0_3] : memref<16x1152xbf16, #tpu.memory_space<vmem>>, vector<16x1152xbf16>
    %c0_4 = arith.constant 0 : index
    %c0_5 = arith.constant 0 : index
    %5 = vector.load %arg4[%c0_4, %c0_5] : memref<1152x256xbf16, #tpu.memory_space<vmem>>, vector<1152x256xbf16>
    %cst = arith.constant dense<0.000000e+00> : vector<16x256xf32>
    %6 = tpu.matmul %4, %5, %cst {dimension_numbers = #tpu.dot_dimension_numbers<[1], [0], [0], [1], [0, 0, 1, 1], [], []>} : vector<16x1152xbf16>, vector<1152x256xbf16>, vector<16x256xf32> -> vector<16x256xf32>
    %7 = arith.addf %3, %6 : vector<16x256xf32>
    %c0_6 = arith.constant 0 : index
    %c0_7 = arith.constant 0 : index
    %8 = vector.load %arg7[%c0_6, %c0_7] : memref<16x256xf32, #tpu.memory_space<vmem>>, vector<16x256xf32>
    tpu.vector_store %arg7[%c0_6, %c0_7], %7 {strides = array<i32>} : memref<16x256xf32, #tpu.memory_space<vmem>>, vector<16x256xf32>,
    %c0_i32_8 = arith.constant 0 : i32
    %9 = arith.cmpi eq, %arg2, %c0_i32_8 : i32
    %10 = arith.extui %9 : i1 to i32
    %c0_i32_9 = arith.constant 0 : i32
    %11 = arith.cmpi ne, %10, %c0_i32_9 : i32
    scf.if %11 {
      %c0_10 = arith.constant 0 : index
      %c0_11 = arith.constant 0 : index
      %12 = vector.load %arg7[%c0_10, %c0_11] : memref<16x256xf32, #tpu.memory_space<vmem>>, vector<16x256xf32>
      %c0_12 = arith.constant 0 : index
      %c0_13 = arith.constant 0 : index
      %13 = vector.load %arg5[%c0_12, %c0_13] : memref<1x256xf32, #tpu.memory_space<vmem>>, vector<1x256xf32>
      %14 = vector.broadcast %13 : vector<1x256xf32> to vector<16x256xf32>
      %15 = arith.addf %12, %14 : vector<16x256xf32>
      %cst_14 = arith.constant 0.000000e+00 : f32
      %16 = vector.broadcast %cst_14 : f32 to vector<16x256xf32>
      %17 = arith.maximumf %15, %16 : vector<16x256xf32>
      %c0_15 = arith.constant 0 : index
      %c0_16 = arith.constant 0 : index
      %18 = vector.load %arg6[%c0_15, %c0_16] : memref<16x256xf32, #tpu.memory_space<vmem>>, vector<16x256xf32>
      tpu.vector_store %arg6[%c0_15, %c0_16], %17 {strides = array<i32>} : memref<16x256xf32, #tpu.memory_space<vmem>>, vector<16x256xf32>,
    } else {
    }
    return
  }
  func.func @transform_0(%arg0: i32, %arg1: i32, %arg2: i32) -> (i32, i32) {
    %c0_i32 = arith.constant 0 : i32
    return %arg0, %arg2 : i32, i32
  }
  func.func @transform_1(%arg0: i32, %arg1: i32, %arg2: i32) -> (i32, i32) {
    %c0_i32 = arith.constant 0 : i32
    return %arg2, %arg1 : i32, i32
  }
  func.func @transform_2(%arg0: i32, %arg1: i32, %arg2: i32) -> (i32, i32) {
    %c0_i32 = arith.constant 0 : i32
    %c0_i32_0 = arith.constant 0 : i32
    return %c0_i32, %arg1 : i32, i32
  }
  func.func @transform_3(%arg0: i32, %arg1: i32, %arg2: i32) -> (i32, i32) {
    %c0_i32 = arith.constant 0 : i32
    return %arg0, %arg1 : i32, i32
  }
}

module attributes {stable_mosaic.version = 11 : i64} {
  func.func @_matmul_kernel(%arg0: i32, %arg1: i32, %arg2: i32, %arg3: memref<16x256xbf16, #tpu.memory_space<vmem>>, %arg4: memref<256x256xbf16, #tpu.memory_space<vmem>>, %arg5: memref<1x256xf32, #tpu.memory_space<vmem>>, %arg6: memref<16x256xf32, #tpu.memory_space<vmem>>, %arg7: memref<16x256xf32, #tpu.memory_space<vmem>>) attributes {dimension_semantics = [#tpu.dimension_semantics<parallel>, #tpu.dimension_semantics<parallel>, #tpu.dimension_semantics<arbitrary>], iteration_bounds = array<i64: 1, 1, 1>, scalar_prefetch = 0 : i64, scratch_operands = 1 : i64, tpu.core_type = #tpu.core_type<tc>, window_params = [{transform_indices = @transform_0, window_bounds = array<i64: 16, 256>}, {transform_indices = @transform_1, window_bounds = array<i64: 256, 256>}, {transform_indices = @transform_2, window_bounds = array<i64: 1, 256>}, {transform_indices = @transform_3, window_bounds = array<i64: 16, 256>}]} {
    %c0_i32 = arith.constant 0 : i32
    %0 = arith.cmpi eq, %arg2, %c0_i32 : i32
    %1 = arith.extui %0 : i1 to i32
    %c0_i32_0 = arith.constant 0 : i32
    %2 = arith.cmpi ne, %1, %c0_i32_0 : i32
    scf.if %2 {
      %cst_10 = arith.constant 0.000000e+00 : f32
      %12 = vector.broadcast %cst_10 : f32 to vector<16x256xf32>
      %c0_11 = arith.constant 0 : index
      %c0_12 = arith.constant 0 : index
      %13 = vector.load %arg7[%c0_11, %c0_12] : memref<16x256xf32, #tpu.memory_space<vmem>>, vector<16x256xf32>
      tpu.vector_store %arg7[%c0_11, %c0_12], %12 {strides = array<i32>} : memref<16x256xf32, #tpu.memory_space<vmem>>, vector<16x256xf32>,
    } else {
    }
    %c0 = arith.constant 0 : index
    %c0_1 = arith.constant 0 : index
    %3 = vector.load %arg7[%c0, %c0_1] : memref<16x256xf32, #tpu.memory_space<vmem>>, vector<16x256xf32>
    %c0_2 = arith.constant 0 : index
    %c0_3 = arith.constant 0 : index
    %4 = vector.load %arg3[%c0_2, %c0_3] : memref<16x256xbf16, #tpu.memory_space<vmem>>, vector<16x256xbf16>
    %c0_4 = arith.constant 0 : index
    %c0_5 = arith.constant 0 : index
    %5 = vector.load %arg4[%c0_4, %c0_5] : memref<256x256xbf16, #tpu.memory_space<vmem>>, vector<256x256xbf16>
    %cst = arith.constant dense<0.000000e+00> : vector<16x256xf32>
    %6 = tpu.matmul %4, %5, %cst {dimension_numbers = #tpu.dot_dimension_numbers<[1], [0], [0], [1], [0, 0, 1, 1], [], []>} : vector<16x256xbf16>, vector<256x256xbf16>, vector<16x256xf32> -> vector<16x256xf32>
    %7 = arith.addf %3, %6 : vector<16x256xf32>
    %c0_6 = arith.constant 0 : index
    %c0_7 = arith.constant 0 : index
    %8 = vector.load %arg7[%c0_6, %c0_7] : memref<16x256xf32, #tpu.memory_space<vmem>>, vector<16x256xf32>
    tpu.vector_store %arg7[%c0_6, %c0_7], %7 {strides = array<i32>} : memref<16x256xf32, #tpu.memory_space<vmem>>, vector<16x256xf32>,
    %c0_i32_8 = arith.constant 0 : i32
    %9 = arith.cmpi eq, %arg2, %c0_i32_8 : i32
    %10 = arith.extui %9 : i1 to i32
    %c0_i32_9 = arith.constant 0 : i32
    %11 = arith.cmpi ne, %10, %c0_i32_9 : i32
    scf.if %11 {
      %c0_10 = arith.constant 0 : index
      %c0_11 = arith.constant 0 : index
      %12 = vector.load %arg7[%c0_10, %c0_11] : memref<16x256xf32, #tpu.memory_space<vmem>>, vector<16x256xf32>
      %c0_12 = arith.constant 0 : index
      %c0_13 = arith.constant 0 : index
      %13 = vector.load %arg5[%c0_12, %c0_13] : memref<1x256xf32, #tpu.memory_space<vmem>>, vector<1x256xf32>
      %14 = vector.broadcast %13 : vector<1x256xf32> to vector<16x256xf32>
      %15 = arith.addf %12, %14 : vector<16x256xf32>
      %cst_14 = arith.constant 0.000000e+00 : f32
      %16 = vector.broadcast %cst_14 : f32 to vector<16x256xf32>
      %17 = arith.maximumf %15, %16 : vector<16x256xf32>
      %c0_15 = arith.constant 0 : index
      %c0_16 = arith.constant 0 : index
      %18 = vector.load %arg6[%c0_15, %c0_16] : memref<16x256xf32, #tpu.memory_space<vmem>>, vector<16x256xf32>
      tpu.vector_store %arg6[%c0_15, %c0_16], %17 {strides = array<i32>} : memref<16x256xf32, #tpu.memory_space<vmem>>, vector<16x256xf32>,
    } else {
    }
    return
  }
  func.func @transform_0(%arg0: i32, %arg1: i32, %arg2: i32) -> (i32, i32) {
    %c0_i32 = arith.constant 0 : i32
    return %arg0, %arg2 : i32, i32
  }
  func.func @transform_1(%arg0: i32, %arg1: i32, %arg2: i32) -> (i32, i32) {
    %c0_i32 = arith.constant 0 : i32
    return %arg2, %arg1 : i32, i32
  }
  func.func @transform_2(%arg0: i32, %arg1: i32, %arg2: i32) -> (i32, i32) {
    %c0_i32 = arith.constant 0 : i32
    %c0_i32_0 = arith.constant 0 : i32
    return %c0_i32, %arg1 : i32, i32
  }
  func.func @transform_3(%arg0: i32, %arg1: i32, %arg2: i32) -> (i32, i32) {
    %c0_i32 = arith.constant 0 : i32
    return %arg0, %arg1 : i32, i32
  }
}

module attributes {stable_mosaic.version = 11 : i64} {
  func.func @_matmul_kernel(%arg0: i32, %arg1: i32, %arg2: i32, %arg3: memref<16x256xbf16, #tpu.memory_space<vmem>>, %arg4: memref<256x128xbf16, #tpu.memory_space<vmem>>, %arg5: memref<1x128xf32, #tpu.memory_space<vmem>>, %arg6: memref<16x128xf32, #tpu.memory_space<vmem>>, %arg7: memref<16x128xf32, #tpu.memory_space<vmem>>) attributes {dimension_semantics = [#tpu.dimension_semantics<parallel>, #tpu.dimension_semantics<parallel>, #tpu.dimension_semantics<arbitrary>], iteration_bounds = array<i64: 1, 1, 1>, scalar_prefetch = 0 : i64, scratch_operands = 1 : i64, tpu.core_type = #tpu.core_type<tc>, window_params = [{transform_indices = @transform_0, window_bounds = array<i64: 16, 256>}, {transform_indices = @transform_1, window_bounds = array<i64: 256, 128>}, {transform_indices = @transform_2, window_bounds = array<i64: 1, 128>}, {transform_indices = @transform_3, window_bounds = array<i64: 16, 128>}]} {
    %c0_i32 = arith.constant 0 : i32
    %0 = arith.cmpi eq, %arg2, %c0_i32 : i32
    %1 = arith.extui %0 : i1 to i32
    %c0_i32_0 = arith.constant 0 : i32
    %2 = arith.cmpi ne, %1, %c0_i32_0 : i32
    scf.if %2 {
      %cst_10 = arith.constant 0.000000e+00 : f32
      %12 = vector.broadcast %cst_10 : f32 to vector<16x128xf32>
      %c0_11 = arith.constant 0 : index
      %c0_12 = arith.constant 0 : index
      %13 = vector.load %arg7[%c0_11, %c0_12] : memref<16x128xf32, #tpu.memory_space<vmem>>, vector<16x128xf32>
      tpu.vector_store %arg7[%c0_11, %c0_12], %12 {strides = array<i32>} : memref<16x128xf32, #tpu.memory_space<vmem>>, vector<16x128xf32>,
    } else {
    }
    %c0 = arith.constant 0 : index
    %c0_1 = arith.constant 0 : index
    %3 = vector.load %arg7[%c0, %c0_1] : memref<16x128xf32, #tpu.memory_space<vmem>>, vector<16x128xf32>
    %c0_2 = arith.constant 0 : index
    %c0_3 = arith.constant 0 : index
    %4 = vector.load %arg3[%c0_2, %c0_3] : memref<16x256xbf16, #tpu.memory_space<vmem>>, vector<16x256xbf16>
    %c0_4 = arith.constant 0 : index
    %c0_5 = arith.constant 0 : index
    %5 = vector.load %arg4[%c0_4, %c0_5] : memref<256x128xbf16, #tpu.memory_space<vmem>>, vector<256x128xbf16>
    %cst = arith.constant dense<0.000000e+00> : vector<16x128xf32>
    %6 = tpu.matmul %4, %5, %cst {dimension_numbers = #tpu.dot_dimension_numbers<[1], [0], [0], [1], [0, 0, 1, 1], [], []>} : vector<16x256xbf16>, vector<256x128xbf16>, vector<16x128xf32> -> vector<16x128xf32>
    %7 = arith.addf %3, %6 : vector<16x128xf32>
    %c0_6 = arith.constant 0 : index
    %c0_7 = arith.constant 0 : index
    %8 = vector.load %arg7[%c0_6, %c0_7] : memref<16x128xf32, #tpu.memory_space<vmem>>, vector<16x128xf32>
    tpu.vector_store %arg7[%c0_6, %c0_7], %7 {strides = array<i32>} : memref<16x128xf32, #tpu.memory_space<vmem>>, vector<16x128xf32>,
    %c0_i32_8 = arith.constant 0 : i32
    %9 = arith.cmpi eq, %arg2, %c0_i32_8 : i32
    %10 = arith.extui %9 : i1 to i32
    %c0_i32_9 = arith.constant 0 : i32
    %11 = arith.cmpi ne, %10, %c0_i32_9 : i32
    scf.if %11 {
      %c0_10 = arith.constant 0 : index
      %c0_11 = arith.constant 0 : index
      %12 = vector.load %arg7[%c0_10, %c0_11] : memref<16x128xf32, #tpu.memory_space<vmem>>, vector<16x128xf32>
      %c0_12 = arith.constant 0 : index
      %c0_13 = arith.constant 0 : index
      %13 = vector.load %arg5[%c0_12, %c0_13] : memref<1x128xf32, #tpu.memory_space<vmem>>, vector<1x128xf32>
      %14 = vector.broadcast %13 : vector<1x128xf32> to vector<16x128xf32>
      %15 = arith.addf %12, %14 : vector<16x128xf32>
      %c0_14 = arith.constant 0 : index
      %c0_15 = arith.constant 0 : index
      %16 = vector.load %arg6[%c0_14, %c0_15] : memref<16x128xf32, #tpu.memory_space<vmem>>, vector<16x128xf32>
      tpu.vector_store %arg6[%c0_14, %c0_15], %15 {strides = array<i32>} : memref<16x128xf32, #tpu.memory_space<vmem>>, vector<16x128xf32>,
    } else {
    }
    return
  }
  func.func @transform_0(%arg0: i32, %arg1: i32, %arg2: i32) -> (i32, i32) {
    %c0_i32 = arith.constant 0 : i32
    return %arg0, %arg2 : i32, i32
  }
  func.func @transform_1(%arg0: i32, %arg1: i32, %arg2: i32) -> (i32, i32) {
    %c0_i32 = arith.constant 0 : i32
    return %arg2, %arg1 : i32, i32
  }
  func.func @transform_2(%arg0: i32, %arg1: i32, %arg2: i32) -> (i32, i32) {
    %c0_i32 = arith.constant 0 : i32
    %c0_i32_0 = arith.constant 0 : i32
    return %c0_i32, %arg1 : i32, i32
  }
  func.func @transform_3(%arg0: i32, %arg1: i32, %arg2: i32) -> (i32, i32) {
    %c0_i32 = arith.constant 0 : i32
    return %arg0, %arg1 : i32, i32
  }
}

module attributes {stable_mosaic.version = 11 : i64} {
  func.func @_softmax_kernel(%arg0: i32, %arg1: memref<8x128xf32, #tpu.memory_space<vmem>>, %arg2: memref<8x128xf32, #tpu.memory_space<vmem>>) attributes {dimension_semantics = [#tpu.dimension_semantics<arbitrary>], iteration_bounds = array<i64: 1>, scalar_prefetch = 0 : i64, scratch_operands = 0 : i64, tpu.core_type = #tpu.core_type<tc>, window_params = [{pipeline_mode = #tpu.pipeline_mode<synchronous>, transform_indices = @transform_0, window_bounds = array<i64: 8, 128>}, {pipeline_mode = #tpu.pipeline_mode<synchronous>, transform_indices = @transform_1, window_bounds = array<i64: 8, 128>}]} {
    %c0 = arith.constant 0 : index
    %c0_0 = arith.constant 0 : index
    %0 = vector.load %arg1[%c0, %c0_0] : memref<8x128xf32, #tpu.memory_space<vmem>>, vector<8x128xf32>
    %cst = arith.constant dense<0xFF800000> : vector<8xf32>
    %1 = vector.multi_reduction <maximumf>, %0, %cst [1] : vector<8x128xf32> to vector<8xf32>
    %2 = vector.shape_cast %1 : vector<8xf32> to vector<8x1xf32>
    %3 = vector.broadcast %2 : vector<8x1xf32> to vector<8x128xf32>
    %4 = arith.subf %0, %3 : vector<8x128xf32>
    %5 = math.exp %4 : vector<8x128xf32>
    %cst_1 = arith.constant dense<0.000000e+00> : vector<8xf32>
    %6 = vector.multi_reduction <add>, %5, %cst_1 [1] : vector<8x128xf32> to vector<8xf32>
    %7 = vector.shape_cast %6 : vector<8xf32> to vector<8x1xf32>
    %8 = vector.broadcast %7 : vector<8x1xf32> to vector<8x128xf32>
    %9 = arith.divf %5, %8 : vector<8x128xf32>
    %c0_2 = arith.constant 0 : index
    %c0_3 = arith.constant 0 : index
    %10 = vector.load %arg2[%c0_2, %c0_3] : memref<8x128xf32, #tpu.memory_space<vmem>>, vector<8x128xf32>
    tpu.vector_store %arg2[%c0_2, %c0_3], %9 {strides = array<i32>} : memref<8x128xf32, #tpu.memory_space<vmem>>, vector<8x128xf32>,
    return
  }
  func.func @transform_0(%arg0: i32) -> (i32, i32) {
    %c0_i32 = arith.constant 0 : i32
    %c0_i32_0 = arith.constant 0 : i32
    %c0_i32_1 = arith.constant 0 : i32
    return %c0_i32, %c0_i32_0 : i32, i32
  }
  func.func @transform_1(%arg0: i32) -> (i32, i32) {
    %c0_i32 = arith.constant 0 : i32
    %c0_i32_0 = arith.constant 0 : i32
    %c0_i32_1 = arith.constant 0 : i32
    return %c0_i32, %c0_i32_0 : i32, i32
  }
}

</mosaic_0001>

<bundles_post_ra>
// kernel: alexnet_forward.22
= control target key start
LH: loop header
LB: loop body
LE: loop exit
PB: predicated region body
PF: predicated region fallthrough
CT: control target
= control target key end

     0   :  { %v269_v0 = vmov 0.0   ;;  %s474_s1 = inlined_call_operand.vmem [shape: f32[1,128], index: 1, kind: output, shape index: {0}]   ;;  %s475_s2 = inlined_call_operand.vmem [shape: f32[1,128], index: 2, kind: output, shape index: {1}]   ;;  %s476_s0 = inlined_call_operand.vmem [shape: f32[456,128], index: 0, kind: input, shape index: {}]  }
   0x1   :  { %14 = vst [vmem:[%s474_s1] sm:$0x1] %v269_v0  ;;  %15 = vst [vmem:[%s475_s2] sm:$0x1] %v269_v0  ;;  %v16_v1 = vld [vmem:[%s476_s0] sm:$0xff]  ;;  %v17_v2 = vld [vmem:[%s476_s0 + $0x8] sm:$0xff] }
   0x2   :  { %v18_v3 = vld [vmem:[%s476_s0 + $0x10] sm:$0xff]  ;;  %v19_v4 = vld [vmem:[%s476_s0 + $0x18] sm:$0xff]  ;;  %v74_v5 = vadd.f32 %v17_v2, %v16_v1  ;;  %v139_v6 = vmul.f32 %v16_v1, %v16_v1  ;;  %v140_v7 = vmul.f32 %v17_v2, %v17_v2  ;;  %v20_v9 = vld [vmem:[%s476_s0 + $0x20] sm:$0xff] }
   0x3   :  { %v141_v8 = vmul.f32 %v18_v3, %v18_v3  ;;  %v142_v11 = vmul.f32 %v19_v4, %v19_v4  ;;  %v21_v13 = vld [vmem:[%s476_s0 + $0x28] sm:$0xff]  ;;  %v143_v15 = vmul.f32 %v20_v9, %v20_v9  ;;  %v22_v17 = vld [vmem:[%s476_s0 + $0x30] sm:$0xff]  ;;  %v23_v21 = vld [vmem:[%s476_s0 + $0x38] sm:$0xff] }
   0x4   :  { %v75_v10 = vadd.f32 %v74_v5, %v18_v3  ;;  %v196_v12 = vadd.f32 %v140_v7, %v139_v6  ;;  %v144_v19 = vmul.f32 %v21_v13, %v21_v13  ;;  %v145_v23 = vmul.f32 %v22_v17, %v22_v17  ;;  %v24_v25 = vld [vmem:[%s476_s0 + $0x40] sm:$0xff]  ;;  %v25_v29 = vld [vmem:[%s476_s0 + $0x48] sm:$0xff]  ;;  %v26_v33 = vld [vmem:[%s476_s0 + $0x50] sm:$0xff] }
   0x5   :  { %v146_v27 = vmul.f32 %v23_v21, %v23_v21  ;;  %v147_v31 = vmul.f32 %v24_v25, %v24_v25  ;;  %v148_v35 = vmul.f32 %v25_v29, %v25_v29  ;;  %v27_v37 = vld [vmem:[%s476_s0 + $0x58] sm:$0xff]  ;;  %v149_v39 = vmul.f32 %v26_v33, %v26_v33  ;;  %v28_v41 = vld [vmem:[%s476_s0 + $0x60] sm:$0xff]  ;;  %v29_v45 = vld [vmem:[%s476_s0 + $0x68] sm:$0xff] }
   0x6   :  { %v76_v14 = vadd.f32 %v75_v10, %v19_v4  ;;  %v197_v16 = vadd.f32 %v196_v12, %v141_v8  ;;  %v150_v43 = vmul.f32 %v27_v37, %v27_v37  ;;  %v151_v47 = vmul.f32 %v28_v41, %v28_v41  ;;  %v30_v49 = vld [vmem:[%s476_s0 + $0x70] sm:$0xff]  ;;  %v31_v53 = vld [vmem:[%s476_s0 + $0x78] sm:$0xff]  ;;  %v32_v57 = vld [vmem:[%s476_s0 + $0x80] sm:$0xff] }
   0x7   :  { %v152_v51 = vmul.f32 %v29_v45, %v29_v45  ;;  %v153_v55 = vmul.f32 %v30_v49, %v30_v49  ;;  %v154_v59 = vmul.f32 %v31_v53, %v31_v53  ;;  %v33_v61 = vld [vmem:[%s476_s0 + $0x88] sm:$0xff]  ;;  %v155_v63 = vmul.f32 %v32_v57, %v32_v57  ;;  %v34_v1 = vld [vmem:[%s476_s0 + $0x90] sm:$0xff]  ;;  %v35_v5 = vld [vmem:[%s476_s0 + $0x98] sm:$0xff] }
   0x8   :  { %v77_v18 = vadd.f32 %v76_v14, %v20_v9  ;;  %v198_v20 = vadd.f32 %v197_v16, %v142_v11  ;;  %v156_v3 = vmul.f32 %v33_v61, %v33_v61  ;;  %v157_v7 = vmul.f32 %v34_v1, %v34_v1  ;;  %v36_v9 = vld [vmem:[%s476_s0 + $0xa0] sm:$0xff] }
   0x9   :  { %v158_v11 = vmul.f32 %v35_v5, %v35_v5 }
   0xa   :  { %v78_v22 = vadd.f32 %v77_v18, %v21_v13  ;;  %v199_v24 = vadd.f32 %v198_v20, %v143_v15  ;;  %v37_v13 = vld [vmem:[%s476_s0 + $0xa8] sm:$0xff]  ;;  %v159_v15 = vmul.f32 %v36_v9, %v36_v9 }
   0xc   :  { %v79_v26 = vadd.f32 %v78_v22, %v22_v17  ;;  %v200_v28 = vadd.f32 %v199_v24, %v144_v19  ;;  %v38_v17 = vld [vmem:[%s476_s0 + $0xb0] sm:$0xff]  ;;  %v160_v19 = vmul.f32 %v37_v13, %v37_v13 }
   0xe   :  { %v80_v30 = vadd.f32 %v79_v26, %v23_v21  ;;  %v201_v32 = vadd.f32 %v200_v28, %v145_v23  ;;  %v39_v21 = vld [vmem:[%s476_s0 + $0xb8] sm:$0xff]  ;;  %v161_v23 = vmul.f32 %v38_v17, %v38_v17 }
  0x10   :  { %v81_v34 = vadd.f32 %v80_v30, %v24_v25  ;;  %v202_v36 = vadd.f32 %v201_v32, %v146_v27  ;;  %v40_v25 = vld [vmem:[%s476_s0 + $0xc0] sm:$0xff]  ;;  %v162_v27 = vmul.f32 %v39_v21, %v39_v21 }
  0x12   :  { %v82_v38 = vadd.f32 %v81_v34, %v25_v29  ;;  %v203_v40 = vadd.f32 %v202_v36, %v147_v31  ;;  %v41_v29 = vld [vmem:[%s476_s0 + $0xc8] sm:$0xff]  ;;  %v163_v31 = vmul.f32 %v40_v25, %v40_v25 }
  0x14   :  { %v83_v42 = vadd.f32 %v82_v38, %v26_v33  ;;  %v204_v44 = vadd.f32 %v203_v40, %v148_v35  ;;  %v42_v33 = vld [vmem:[%s476_s0 + $0xd0] sm:$0xff]  ;;  %v164_v35 = vmul.f32 %v41_v29, %v41_v29 }
  0x16   :  { %v84_v46 = vadd.f32 %v83_v42, %v27_v37  ;;  %v205_v48 = vadd.f32 %v204_v44, %v149_v39  ;;  %v43_v37 = vld [vmem:[%s476_s0 + $0xd8] sm:$0xff]  ;;  %v165_v39 = vmul.f32 %v42_v33, %v42_v33 }
  0x18   :  { %v85_v50 = vadd.f32 %v84_v46, %v28_v41  ;;  %v206_v52 = vadd.f32 %v205_v48, %v150_v43  ;;  %v44_v41 = vld [vmem:[%s476_s0 + $0xe0] sm:$0xff]  ;;  %v166_v43 = vmul.f32 %v43_v37, %v43_v37 }
  0x1a   :  { %v86_v54 = vadd.f32 %v85_v50, %v29_v45  ;;  %v207_v56 = vadd.f32 %v206_v52, %v151_v47  ;;  %v45_v45 = vld [vmem:[%s476_s0 + $0xe8] sm:$0xff]  ;;  %v167_v47 = vmul.f32 %v44_v41, %v44_v41 }
  0x1c   :  { %v87_v58 = vadd.f32 %v86_v54, %v30_v49  ;;  %v208_v60 = vadd.f32 %v207_v56, %v152_v51  ;;  %v46_v49 = vld [vmem:[%s476_s0 + $0xf0] sm:$0xff]  ;;  %v168_v51 = vmul.f32 %v45_v45, %v45_v45 }
  0x1e   :  { %v88_v62 = vadd.f32 %v87_v58, %v31_v53  ;;  %v209_v0 = vadd.f32 %v208_v60, %v153_v55  ;;  %v47_v53 = vld [vmem:[%s476_s0 + $0xf8] sm:$0xff]  ;;  %v169_v55 = vmul.f32 %v46_v49, %v46_v49 }
  0x20   :  { %v89_v2 = vadd.f32 %v88_v62, %v32_v57  ;;  %v210_v4 = vadd.f32 %v209_v0, %v154_v59  ;;  %v48_v57 = vld [vmem:[%s476_s0 + $0x100] sm:$0xff]  ;;  %v170_v59 = vmul.f32 %v47_v53, %v47_v53 }
  0x22   :  { %v90_v6 = vadd.f32 %v89_v2, %v33_v61  ;;  %v211_v8 = vadd.f32 %v210_v4, %v155_v63  ;;  %v49_v61 = vld [vmem:[%s476_s0 + $0x108] sm:$0xff]  ;;  %v171_v63 = vmul.f32 %v48_v57, %v48_v57 }
  0x24   :  { %v91_v10 = vadd.f32 %v90_v6, %v34_v1  ;;  %v212_v12 = vadd.f32 %v211_v8, %v156_v3  ;;  %v50_v1 = vld [vmem:[%s476_s0 + $0x110] sm:$0xff]  ;;  %v172_v3 = vmul.f32 %v49_v61, %v49_v61 }
  0x26   :  { %v92_v14 = vadd.f32 %v91_v10, %v35_v5  ;;  %v213_v16 = vadd.f32 %v212_v12, %v157_v7  ;;  %v51_v5 = vld [vmem:[%s476_s0 + $0x118] sm:$0xff]  ;;  %v173_v7 = vmul.f32 %v50_v1, %v50_v1 }
  0x28   :  { %v93_v18 = vadd.f32 %v92_v14, %v36_v9  ;;  %v214_v20 = vadd.f32 %v213_v16, %v158_v11  ;;  %v52_v9 = vld [vmem:[%s476_s0 + $0x120] sm:$0xff]  ;;  %v174_v11 = vmul.f32 %v51_v5, %v51_v5 }
  0x2a   :  { %v94_v22 = vadd.f32 %v93_v18, %v37_v13  ;;  %v215_v24 = vadd.f32 %v214_v20, %v159_v15  ;;  %v53_v13 = vld [vmem:[%s476_s0 + $0x128] sm:$0xff]  ;;  %v175_v15 = vmul.f32 %v52_v9, %v52_v9 }
  0x2c   :  { %v95_v26 = vadd.f32 %v94_v22, %v38_v17  ;;  %v216_v28 = vadd.f32 %v215_v24, %v160_v19  ;;  %v54_v17 = vld [vmem:[%s476_s0 + $0x130] sm:$0xff]  ;;  %v176_v19 = vmul.f32 %v53_v13, %v53_v13 }
  0x2e   :  { %v96_v30 = vadd.f32 %v95_v26, %v39_v21  ;;  %v217_v32 = vadd.f32 %v216_v28, %v161_v23  ;;  %v55_v21 = vld [vmem:[%s476_s0 + $0x138] sm:$0xff]  ;;  %v177_v23 = vmul.f32 %v54_v17, %v54_v17 }
  0x30   :  { %v97_v34 = vadd.f32 %v96_v30, %v40_v25  ;;  %v218_v36 = vadd.f32 %v217_v32, %v162_v27  ;;  %v56_v25 = vld [vmem:[%s476_s0 + $0x140] sm:$0xff]  ;;  %v178_v27 = vmul.f32 %v55_v21, %v55_v21 }
  0x32   :  { %v98_v38 = vadd.f32 %v97_v34, %v41_v29  ;;  %v219_v40 = vadd.f32 %v218_v36, %v163_v31  ;;  %v57_v29 = vld [vmem:[%s476_s0 + $0x148] sm:$0xff]  ;;  %v179_v31 = vmul.f32 %v56_v25, %v56_v25 }
  0x34   :  { %v99_v42 = vadd.f32 %v98_v38, %v42_v33  ;;  %v220_v44 = vadd.f32 %v219_v40, %v164_v35  ;;  %v58_v33 = vld [vmem:[%s476_s0 + $0x150] sm:$0xff]  ;;  %v180_v35 = vmul.f32 %v57_v29, %v57_v29 }
  0x36   :  { %v100_v46 = vadd.f32 %v99_v42, %v43_v37  ;;  %v221_v48 = vadd.f32 %v220_v44, %v165_v39  ;;  %v59_v37 = vld [vmem:[%s476_s0 + $0x158] sm:$0xff]  ;;  %v181_v39 = vmul.f32 %v58_v33, %v58_v33 }
  0x38   :  { %v101_v50 = vadd.f32 %v100_v46, %v44_v41  ;;  %v222_v52 = vadd.f32 %v221_v48, %v166_v43  ;;  %v60_v41 = vld [vmem:[%s476_s0 + $0x160] sm:$0xff]  ;;  %v182_v43 = vmul.f32 %v59_v37, %v59_v37 }
  0x3a   :  { %v102_v54 = vadd.f32 %v101_v50, %v45_v45  ;;  %v223_v56 = vadd.f32 %v222_v52, %v167_v47  ;;  %v61_v45 = vld [vmem:[%s476_s0 + $0x168] sm:$0xff]  ;;  %v183_v47 = vmul.f32 %v60_v41, %v60_v41 }
  0x3c   :  { %v103_v58 = vadd.f32 %v102_v54, %v46_v49  ;;  %v224_v60 = vadd.f32 %v223_v56, %v168_v51  ;;  %v62_v49 = vld [vmem:[%s476_s0 + $0x170] sm:$0xff]  ;;  %v184_v51 = vmul.f32 %v61_v45, %v61_v45 }
  0x3e   :  { %v104_v62 = vadd.f32 %v103_v58, %v47_v53  ;;  %v225_v0 = vadd.f32 %v224_v60, %v169_v55  ;;  %v63_v53 = vld [vmem:[%s476_s0 + $0x178] sm:$0xff]  ;;  %v185_v55 = vmul.f32 %v62_v49, %v62_v49 }
  0x40   :  { %v105_v2 = vadd.f32 %v104_v62, %v48_v57  ;;  %v226_v4 = vadd.f32 %v225_v0, %v170_v59  ;;  %v64_v57 = vld [vmem:[%s476_s0 + $0x180] sm:$0xff]  ;;  %v186_v59 = vmul.f32 %v63_v53, %v63_v53 }
  0x42   :  { %v106_v6 = vadd.f32 %v105_v2, %v49_v61  ;;  %v227_v8 = vadd.f32 %v226_v4, %v171_v63  ;;  %v65_v61 = vld [vmem:[%s476_s0 + $0x188] sm:$0xff]  ;;  %v187_v63 = vmul.f32 %v64_v57, %v64_v57 }
  0x44   :  { %v107_v10 = vadd.f32 %v106_v6, %v50_v1  ;;  %v228_v12 = vadd.f32 %v227_v8, %v172_v3  ;;  %v66_v1 = vld [vmem:[%s476_s0 + $0x190] sm:$0xff]  ;;  %v188_v3 = vmul.f32 %v65_v61, %v65_v61 }
  0x46   :  { %v108_v14 = vadd.f32 %v107_v10, %v51_v5  ;;  %v229_v16 = vadd.f32 %v228_v12, %v173_v7  ;;  %v67_v5 = vld [vmem:[%s476_s0 + $0x198] sm:$0xff]  ;;  %v189_v7 = vmul.f32 %v66_v1, %v66_v1 }
  0x48   :  { %v109_v18 = vadd.f32 %v108_v14, %v52_v9  ;;  %v230_v20 = vadd.f32 %v229_v16, %v174_v11  ;;  %v68_v9 = vld [vmem:[%s476_s0 + $0x1a0] sm:$0xff]  ;;  %v190_v11 = vmul.f32 %v67_v5, %v67_v5 }
  0x4a   :  { %v110_v22 = vadd.f32 %v109_v18, %v53_v13  ;;  %v231_v24 = vadd.f32 %v230_v20, %v175_v15  ;;  %v69_v13 = vld [vmem:[%s476_s0 + $0x1a8] sm:$0xff]  ;;  %v191_v15 = vmul.f32 %v68_v9, %v68_v9 }
  0x4c   :  { %v111_v26 = vadd.f32 %v110_v22, %v54_v17  ;;  %v232_v28 = vadd.f32 %v231_v24, %v176_v19  ;;  %v70_v17 = vld [vmem:[%s476_s0 + $0x1b0] sm:$0xff]  ;;  %v192_v19 = vmul.f32 %v69_v13, %v69_v13 }
  0x4e   :  { %v112_v30 = vadd.f32 %v111_v26, %v55_v21  ;;  %v233_v32 = vadd.f32 %v232_v28, %v177_v23  ;;  %v71_v21 = vld [vmem:[%s476_s0 + $0x1b8] sm:$0xff]  ;;  %v193_v23 = vmul.f32 %v70_v17, %v70_v17 }
  0x50   :  { %v113_v34 = vadd.f32 %v112_v30, %v56_v25  ;;  %v234_v36 = vadd.f32 %v233_v32, %v178_v27  ;;  %v72_v25 = vld [vmem:[%s476_s0 + $0x1c0] sm:$0xff]  ;;  %v194_v27 = vmul.f32 %v71_v21, %v71_v21 }
  0x51   :  { %v195_v30 = vmul.f32 %v72_v25, %v72_v25 }
  0x52   :  { %v114_v38 = vadd.f32 %v113_v34, %v57_v29  ;;  %v235_v40 = vadd.f32 %v234_v36, %v179_v31 }
  0x54   :  { %v115_v42 = vadd.f32 %v114_v38, %v58_v33  ;;  %v236_v44 = vadd.f32 %v235_v40, %v180_v35 }
  0x56   :  { %v116_v46 = vadd.f32 %v115_v42, %v59_v37  ;;  %v237_v48 = vadd.f32 %v236_v44, %v181_v39 }
  0x58   :  { %v117_v50 = vadd.f32 %v116_v46, %v60_v41  ;;  %v238_v52 = vadd.f32 %v237_v48, %v182_v43  ;;  %v73_v43 = vld [vmem:[%s474_s1] sm:$0x1] }
  0x59   :  { %v138_v48 = vld [vmem:[%s475_s2] sm:$0x1] }
  0x5a   :  { %v118_v54 = vadd.f32 %v117_v50, %v61_v45  ;;  %v239_v56 = vadd.f32 %v238_v52, %v183_v47 }
  0x5c   :  { %v119_v58 = vadd.f32 %v118_v54, %v62_v49  ;;  %v240_v60 = vadd.f32 %v239_v56, %v184_v51 }
  0x5e   :  { %v120_v62 = vadd.f32 %v119_v58, %v63_v53  ;;  %v241_v0 = vadd.f32 %v240_v60, %v185_v55 }
  0x60   :  { %v121_v2 = vadd.f32 %v120_v62, %v64_v57  ;;  %v242_v4 = vadd.f32 %v241_v0, %v186_v59 }
  0x62   :  { %v122_v6 = vadd.f32 %v121_v2, %v65_v61  ;;  %v243_v8 = vadd.f32 %v242_v4, %v187_v63 }
  0x64   :  { %v123_v10 = vadd.f32 %v122_v6, %v66_v1  ;;  %v244_v12 = vadd.f32 %v243_v8, %v188_v3 }
  0x66   :  { %v124_v14 = vadd.f32 %v123_v10, %v67_v5  ;;  %v245_v16 = vadd.f32 %v244_v12, %v189_v7 }
  0x68   :  { %v125_v18 = vadd.f32 %v124_v14, %v68_v9  ;;  %v246_v20 = vadd.f32 %v245_v16, %v190_v11 }
  0x6a   :  { %v126_v22 = vadd.f32 %v125_v18, %v69_v13  ;;  %v247_v24 = vadd.f32 %v246_v20, %v191_v15 }
  0x6c   :  { %v127_v26 = vadd.f32 %v126_v22, %v70_v17  ;;  %v248_v28 = vadd.f32 %v247_v24, %v192_v19 }
  0x6e   :  { %v128_v29 = vadd.f32 %v127_v26, %v71_v21  ;;  %v249_v31 = vadd.f32 %v248_v28, %v193_v23 }
  0x70   :  { %v129_v32 = vadd.f32 %v128_v29, %v72_v25  ;;  %v250_v33 = vadd.f32 %v249_v31, %v194_v27 }
  0x72   :  { %v130_v34 = vrot.slane %v129_v32, 4  ;;  %v251_v35 = vadd.f32 %v250_v33, %v195_v30 }
  0x74   :  { %v131_v36 = vadd.f32 %v130_v34, %v129_v32  ;;  %v252_v37 = vrot.slane %v251_v35, 4 }
  0x76   :  { %v132_v38 = vrot.slane %v131_v36, 2  ;;  %v253_v39 = vadd.f32 %v252_v37, %v251_v35 }
  0x78   :  { %v133_v40 = vadd.f32 %v132_v38, %v131_v36  ;;  %v254_v41 = vrot.slane %v253_v39, 2 }
  0x7a   :  { %v134_v42 = vrot.slane %v133_v40, 1  ;;  %v255_v44 = vadd.f32 %v254_v41, %v253_v39 }
  0x7c   :  { %v135_v45 = vadd.f32 %v134_v42, %v133_v40  ;;  %v256_v46 = vrot.slane %v255_v44, 1 }
  0x7e   :  { %v136_v47 = vadd.f32 %v135_v45, %v73_v43  ;;  %v257_v49 = vadd.f32 %v256_v46, %v255_v44 }
  0x80   :  { %137 = vst [vmem:[%s474_s1] sm:$0x1] %v136_v47  ;;  %v258_v50 = vadd.f32 %v257_v49, %v138_v48 }
  0x82   :  { %259 = vst [vmem:[%s475_s2] sm:$0x1] %v258_v50 }

// kernel: alexnet_forward.21
= control target key start
LH: loop header
LB: loop body
LE: loop exit
PB: predicated region body
PF: predicated region fallthrough
CT: control target
= control target key end

     0   :  { %s1897_s12 = smov 0   ;;  %s1899_s13 = smov 0   ;;  %s2151_s0 = inlined_call_operand.vmem [shape: bf16[512,384], index: 0, kind: input, shape index: {}]   ;;  %s2152_s1 = inlined_call_operand.vmem [shape: bf16[384,128], index: 1, kind: input, shape index: {}]   ;;  %s2153_s2 = inlined_call_operand.vmem [shape: f32[1,128], index: 2, kind: input, shape index: {}]   ;;  %s2154_s3 = inlined_call_operand.vmem [shape: f32[512,128], index: 3, kind: output, shape index: {}]  }
   0x1   :  { %s1901_s14 = smov 0  }
   0x2 LB: > { %s32_s15 = sadd.s32 1, %s1871_s13  ;;  %p1460_p0 = scmp.ge.s32.totalorder %s1875_s14, 1  ;;  %s1875_s14 = sphi %s1901_s14, %s13_s14   ;;  %s1871_s13 = sphi %s1899_s13, %s2156_s13   ;;  %s1867_s12 = sphi %s1897_s12, %s2155_s12  }
   0x3   : > { %p34_p1 = scmp.ge.s32.totalorder %s32_s15, 2  ;;  %p191_p2 = scmp.lt.s32.totalorder %s1875_s14, 3 }
   0x5   : > { %s2158_s15 = smov (%p34_p1, %s32_s15), 0  ;;  %p192_p3 = pnand %p1460_p0, %p191_p2 }
   0x6   : > { %v1765_v0 = vld [vmem:[%s2152_s1 + $0x40] sm:$0xff] (!%p192_p3)   ;;  %s1461_s18 = sshll.u32 (!%p192_p3), %s1867_s12, 5  ;;  %v1767_v2 = vld [vmem:[%s2152_s1 + $0x48] sm:$0xff] (!%p192_p3)   ;;  %v1769_v4 = vld [vmem:[%s2152_s1 + $0x50] sm:$0xff] (!%p192_p3)  }
   0x7   : > { %195 = sbr.rel (%p192_p3) target bundleno = 349 (0x15d), region = 32  ;;  %v1766_v1 = vld [vmem:[%s2152_s1] sm:$0xff] (!%p192_p3)   ;;  %1540 = vmatprep.subr.bf16.mxu0 (!%p192_p3), %v1765_v0  ;;  %1724 = vmatprep.subr.bf16.mxu1 (!%p192_p3), %v1765_v0  ;;  %p236_p4 = scmp.lt.s32.totalorder (!%p192_p3), %s1461_s18, 63  ;;  %v1768_v3 = vld [vmem:[%s2152_s1 + $0x8] sm:$0xff] (!%p192_p3)   ;;  %v1770_v5 = vld [vmem:[%s2152_s1 + $0x10] sm:$0xff] (!%p192_p3)  }
   0x8   : > { %1541 = vmatpush3.bf16.msra.mxu0 (!%p192_p3), %v1766_v1  ;;  %1732 = vmatpush3.bf16.msra.mxu1 (!%p192_p3), %v1766_v1  ;;  %v1771_v6 = vld [vmem:[%s2152_s1 + $0x58] sm:$0xff] (!%p192_p3)   ;;  %v1773_v8 = vld [vmem:[%s2152_s1 + $0x60] sm:$0xff] (!%p192_p3)   ;;  %v1775_v10 = vld [vmem:[%s2152_s1 + $0x68] sm:$0xff] (!%p192_p3)  }
   0x9   : > { %1542 = vmatprep.subr.bf16.mxu0 (!%p192_p3), %v1767_v2  ;;  %1725 = vmatprep.subr.bf16.mxu1 (!%p192_p3), %v1767_v2  ;;  %v1772_v7 = vld [vmem:[%s2152_s1 + $0x18] sm:$0xff] (!%p192_p3)   ;;  %v1774_v9 = vld [vmem:[%s2152_s1 + $0x20] sm:$0xff] (!%p192_p3)   ;;  %v1776_v13 = vld [vmem:[%s2152_s1 + $0x28] sm:$0xff] (!%p192_p3)  }
   0xa   : > { %v1777_v14 = vld [vmem:[%s2152_s1 + $0x70] sm:$0xff] (!%p192_p3)   ;;  %v1779_v16 = vld [vmem:[%s2152_s1 + $0x78] sm:$0xff] (!%p192_p3)   ;;  %v1787_v18 = vld [vmem:[%s2152_s1 + $0x80] sm:$0xff] (!%p192_p3)  }
   0xb   : > { %v1778_v15 = vld [vmem:[%s2152_s1 + $0x30] sm:$0xff] (!%p192_p3)   ;;  %v1780_v17 = vld [vmem:[%s2152_s1 + $0x38] sm:$0xff] (!%p192_p3)   ;;  %v1788_v22 = vld [vmem:[%s2152_s1 + $0x88] sm:$0xff] (!%p192_p3)  }
   0xc   : > { %1543 = vmatpush3.bf16.msra.mxu0 (!%p192_p3), %v1768_v3  ;;  %1733 = vmatpush3.bf16.msra.mxu1 (!%p192_p3), %v1768_v3  ;;  %v1795_v25 = vld [vmem:[%s2152_s1 + $0x90] sm:$0xff] (!%p192_p3)   ;;  %v1796_v27 = vld [vmem:[%s2152_s1 + $0x98] sm:$0xff] (!%p192_p3)   ;;  %v1803_v30 = vld [vmem:[%s2152_s1 + $0xa0] sm:$0xff] (!%p192_p3)  }
   0xd   : > { %1544 = vmatprep.subr.bf16.mxu0 (!%p192_p3), %v1769_v4  ;;  %1726 = vmatprep.subr.bf16.mxu1 (!%p192_p3), %v1769_v4  ;;  %v1804_v33 = vld [vmem:[%s2152_s1 + $0xa8] sm:$0xff] (!%p192_p3)   ;;  %v1811_v36 = vld [vmem:[%s2152_s1 + $0xb0] sm:$0xff] (!%p192_p3)   ;;  %v1812_v40 = vld [vmem:[%s2152_s1 + $0xb8] sm:$0xff] (!%p192_p3)  }
   0xe   : > { %s2160_s18 = smov (!%p236_p4, %s1461_s18), 63 }
   0xf   : > { %s1740_s4 = smul.u32 12, %s2160_s18 }
  0x10   : > { %1545 = vmatpush3.bf16.msra.mxu0 %v1770_v5  ;;  %1734 = vmatpush3.bf16.msra.mxu1 %v1770_v5 }
  0x11   : > { %1546 = vmatprep.subr.bf16.mxu0 %v1771_v6  ;;  %1727 = vmatprep.subr.bf16.mxu1 %v1771_v6  ;;  %s1948_s11 = scalar_lea.vmem %s2151_s0, %s1740_s4 }
  0x12   : > { %v1783_v11 = vld [vmem:[%s1948_s11 + $0x4] ss:$12 sps:$4 sm:$0xff]   ;;  %v1781_v19 = vld [vmem:[%s1948_s11] ss:$12 sps:$4 sm:$0xff]   ;;  %v1789_v21 = vld [vmem:[%s1948_s11 + $0x1c] ss:$12 sps:$4 sm:$0xff]  }
  0x13   : > { %v1786_v12 = vld [vmem:[%s1948_s11 + $0x124] ss:$12 sps:$4 sm:$0xff]   ;;  %880 = vmatprep.mubr.bf16.mxu0 %v1783_v11  ;;  %v1784_v20 = vld [vmem:[%s1948_s11 + $0x120] ss:$12 sps:$4 sm:$0xff]   ;;  %v1791_v23 = vld [vmem:[%s1948_s11 + $0x13c] ss:$12 sps:$4 sm:$0xff]  }
  0x14   : > { %1547 = vmatpush3.bf16.msra.mxu0 %v1772_v7  ;;  %1735 = vmatpush3.bf16.msra.mxu1 %v1772_v7  ;;  %v1793_v24 = vld [vmem:[%s1948_s11 + $0x18] ss:$12 sps:$4 sm:$0xff]   ;;  %v1797_v28 = vld [vmem:[%s1948_s11 + $0x34] ss:$12 sps:$4 sm:$0xff]   ;;  %v1801_v31 = vld [vmem:[%s1948_s11 + $0x30] ss:$12 sps:$4 sm:$0xff]  }
  0x15   : > { %1548 = vmatprep.subr.bf16.mxu0 %v1773_v8  ;;  %1728 = vmatprep.subr.bf16.mxu1 %v1773_v8  ;;  %v1794_v26 = vld [vmem:[%s1948_s11 + $0x138] ss:$12 sps:$4 sm:$0xff]   ;;  %v1799_v29 = vld [vmem:[%s1948_s11 + $0x154] ss:$12 sps:$4 sm:$0xff]   ;;  %v1802_v32 = vld [vmem:[%s1948_s11 + $0x150] ss:$12 sps:$4 sm:$0xff]  }
  0x16   : > { %976 = vmatprep.mubr.bf16.mxu1 %v1786_v12  ;;  %v1805_v34 = vld [vmem:[%s1948_s11 + $0x4c] ss:$12 sps:$4 sm:$0xff]   ;;  %v1809_v37 = vld [vmem:[%s1948_s11 + $0x48] ss:$12 sps:$4 sm:$0xff]   ;;  %v1813_v39 = vld [vmem:[%s1948_s11 + $0x64] ss:$12 sps:$4 sm:$0xff]  }
  0x17   : > { %v1807_v35 = vld [vmem:[%s1948_s11 + $0x16c] ss:$12 sps:$4 sm:$0xff]   ;;  %v1810_v38 = vld [vmem:[%s1948_s11 + $0x168] ss:$12 sps:$4 sm:$0xff]   ;;  %v1822_v47 = vld [vmem:[%s1948_s11 + $0x50] ss:$12 sps:$4 sm:$0xff]  }
  0x18   : > { %1549 = vmatpush3.bf16.msra.mxu0 %v1774_v9  ;;  %1736 = vmatpush3.bf16.msra.mxu1 %v1774_v9  ;;  %v1815_v41 = vld [vmem:[%s1948_s11 + $0x8] ss:$12 sps:$4 sm:$0xff]   ;;  %v1816_v42 = vld [vmem:[%s1948_s11 + $0x60] ss:$12 sps:$4 sm:$0xff]   ;;  %v1820_v45 = vld [vmem:[%s1948_s11 + $0x38] ss:$12 sps:$4 sm:$0xff]  }
  0x19   : > { %1550 = vmatprep.subr.bf16.mxu0 %v1775_v10  ;;  %1729 = vmatprep.subr.bf16.mxu1 %v1775_v10  ;;  %v1817_v43 = vld [vmem:[%s1948_s11 + $0x20] ss:$12 sps:$4 sm:$0xff]   ;;  %v1818_v44 = vld [vmem:[%s1948_s11 + $0x7c] ss:$12 sps:$4 sm:$0xff]   ;;  %v1821_v46 = vld [vmem:[%s1948_s11 + $0x78] ss:$12 sps:$4 sm:$0xff]  }
  0x1a   : > { %v1823_v48 = vld [vmem:[%s1948_s11 + $0x94] ss:$12 sps:$4 sm:$0xff]   ;;  %v1826_v50 = vld [vmem:[%s1948_s11 + $0x90] ss:$12 sps:$4 sm:$0xff]   ;;  %v1828_v52 = vld [vmem:[%s1948_s11 + $0xac] ss:$12 sps:$4 sm:$0xff]  }
  0x1b   : > { %v1825_v49 = vld [vmem:[%s1948_s11 + $0x68] ss:$12 sps:$4 sm:$0xff]   ;;  %v1827_v51 = vld [vmem:[%s1948_s11 + $0x80] ss:$12 sps:$4 sm:$0xff]   ;;  %v1830_v53 = vld [vmem:[%s1948_s11 + $0x98] ss:$12 sps:$4 sm:$0xff]  }
  0x1c   : > { %1551 = vmatpush3.bf16.msra.mxu0 %v1776_v13  ;;  %1737 = vmatpush3.bf16.msra.mxu1 %v1776_v13  ;;  %v1831_v54 = vld [vmem:[%s1948_s11 + $0xa8] ss:$12 sps:$4 sm:$0xff]   ;;  %v1832_v55 = vld [vmem:[%s1948_s11 + $0xb0] ss:$12 sps:$4 sm:$0xff]   ;;  %v1836_v58 = vld [vmem:[%s1948_s11 + $0xc0] ss:$12 sps:$4 sm:$0xff]  }
  0x1d   : > { %1552 = vmatprep.subr.bf16.mxu0 %v1777_v14  ;;  %1730 = vmatprep.subr.bf16.mxu1 %v1777_v14  ;;  %v1833_v56 = vld [vmem:[%s1948_s11 + $0xc4] ss:$12 sps:$4 sm:$0xff]   ;;  %v1835_v57 = vld [vmem:[%s1948_s11 + $0xc8] ss:$12 sps:$4 sm:$0xff]   ;;  %v1837_v59 = vld [vmem:[%s1948_s11 + $0xe0] ss:$12 sps:$4 sm:$0xff]  }
  0x1e   : > { %v1838_v60 = vld [vmem:[%s1948_s11 + $0xdc] ss:$12 sps:$4 sm:$0xff]   ;;  %v1840_v61 = vld [vmem:[%s1948_s11 + $0xf8] ss:$12 sps:$4 sm:$0xff]   ;;  %v1843_v0 = vld [vmem:[%s1948_s11 + $0xf4] ss:$12 sps:$4 sm:$0xff]  }
  0x1f   : > { %v1841_v62 = vld [vmem:[%s1948_s11 + $0xd8] ss:$12 sps:$4 sm:$0xff]   ;;  %v1842_v63 = vld [vmem:[%s1948_s11 + $0x110] ss:$12 sps:$4 sm:$0xff]   ;;  %v1845_v1 = vld [vmem:[%s1948_s11 + $0x128] ss:$12 sps:$4 sm:$0xff]  }
  0x20   : > { %1553 = vmatpush3.bf16.msra.mxu0 %v1778_v15  ;;  %1738 = vmatpush3.bf16.msra.mxu1 %v1778_v15  ;;  %v1846_v2 = vld [vmem:[%s1948_s11 + $0xf0] ss:$12 sps:$4 sm:$0xff]   ;;  %v1847_v3 = vld [vmem:[%s1948_s11 + $0x140] ss:$12 sps:$4 sm:$0xff]   ;;  %v1850_v5 = vld [vmem:[%s1948_s11 + $0x158] ss:$12 sps:$4 sm:$0xff]  }
  0x21   : > { %1554 = vmatprep.subr.bf16.mxu0 %v1779_v16  ;;  %1731 = vmatprep.subr.bf16.mxu1 %v1779_v16  ;;  %v1848_v4 = vld [vmem:[%s1948_s11 + $0x10c] ss:$12 sps:$4 sm:$0xff]   ;;  %v1851_v6 = vld [vmem:[%s1948_s11 + $0x108] ss:$12 sps:$4 sm:$0xff]   ;;  %v1852_v7 = vld [vmem:[%s1948_s11 + $0x170] ss:$12 sps:$4 sm:$0xff]  }
  0x22   : > { %s1464_s11 = sshll.u32 %s2160_s18, 3 }
  0x23   : > { %s2068_s28 = scalar_lea.vmem %s2154_s3, %s1464_s11 }
  0x24   : > { %1555 = vmatpush3.bf16.msra.mxu0 %v1780_v17  ;;  %1739 = vmatpush3.bf16.msra.mxu1 %v1780_v17 }
  0x25   : > { %1676 = vmatprep.subr.bf16.mxu1 %v1787_v18 }
  0x27   : > { %881 = vmatmul.mubr.bf16.vlgmr.msra.gmra.mrb[0].mxu0 %v1781_v19  ;;  %977 = vmatmul.mubr.bf16.vlgmr.msra.gmra.mrb[0].mxu1 %v1784_v20 }
  0x28   : > { %1677 = vmatpush3.bf16.msra.mxu1 %v1787_v18  ;;  %888 = vmatprep.mubr.bf16.mxu0 %v1789_v21 }
  0x29   : > { %1678 = vmatprep.subr.bf16.mxu1 %v1788_v22  ;;  %984 = vmatprep.mubr.bf16.mxu1 %v1791_v23 }
  0x2c   : > { %1679 = vmatpush3.bf16.msra.mxu1 %v1788_v22 }
  0x2d   : > { %1680 = vmatprep.subr.bf16.mxu1 %v1795_v25 }
  0x2f   : > { %889 = vmatmul.mubr.bf16.gmra.mrb[4].mxu0 %v1793_v24  ;;  %985 = vmatmul.mubr.bf16.gmra.mrb[4].mxu1 %v1794_v26 }
  0x30   : > { %1681 = vmatpush3.bf16.msra.mxu1 %v1795_v25  ;;  %896 = vmatprep.mubr.bf16.mxu0 %v1797_v28 }
  0x31   : > { %1682 = vmatprep.subr.bf16.mxu1 %v1796_v27  ;;  %992 = vmatprep.mubr.bf16.mxu1 %v1799_v29 }
  0x34   : > { %1683 = vmatpush3.bf16.msra.mxu1 %v1796_v27 }
  0x35   : > { %1684 = vmatprep.subr.bf16.mxu1 %v1803_v30 }
  0x37   : > { %897 = vmatmul.mubr.bf16.gmra.mrb[8].mxu0 %v1801_v31  ;;  %993 = vmatmul.mubr.bf16.gmra.mrb[8].mxu1 %v1802_v32 }
  0x38   : > { %1685 = vmatpush3.bf16.msra.mxu1 %v1803_v30  ;;  %904 = vmatprep.mubr.bf16.mxu0 %v1805_v34 }
  0x39   : > { %1686 = vmatprep.subr.bf16.mxu1 %v1804_v33  ;;  %1000 = vmatprep.mubr.bf16.mxu1 %v1807_v35 }
  0x3c   : > { %1687 = vmatpush3.bf16.msra.mxu1 %v1804_v33 }
  0x3d   : > { %1688 = vmatprep.subr.bf16.mxu1 %v1811_v36 }
  0x3f   : > { %905 = vmatmul.mubr.bf16.gmra.mrb[12].mxu0 %v1809_v37  ;;  %1001 = vmatmul.mubr.bf16.gmra.mrb[12].mxu1 %v1810_v38 }
  0x40   : > { %1689 = vmatpush3.bf16.msra.mxu1 %v1811_v36  ;;  %912 = vmatprep.mubr.bf16.mxu0 %v1813_v39 }
  0x41   : > { %1690 = vmatprep.subr.bf16.mxu1 %v1812_v40  ;;  %1692 = vmatprep.mubr.bf16.mxu1 %v1815_v41 }
  0x44   : > { %1691 = vmatpush3.bf16.msra.mxu1 %v1812_v40 }
  0x47   : > { %913 = vmatmul.mubr.bf16.gmra.mrb[16].mxu0 %v1816_v42  ;;  %1693 = vmatmul.mubr.bf16.vlgmr.msra.gmra.mrb[16].mxu1 %v1817_v43 }
  0x48   : > { %920 = vmatprep.mubr.bf16.mxu0 %v1818_v44  ;;  %1696 = vmatprep.mubr.bf16.mxu1 %v1820_v45 }
  0x4f   : > { %921 = vmatmul.mubr.bf16.gmra.mrb[20].mxu0 %v1821_v46  ;;  %1697 = vmatmul.mubr.bf16.gmra.mrb[20].mxu1 %v1822_v47 }
  0x50   : > { %928 = vmatprep.mubr.bf16.mxu0 %v1823_v48  ;;  %1700 = vmatprep.mubr.bf16.mxu1 %v1825_v49 }
  0x57   : > { %929 = vmatmul.mubr.bf16.gmra.mrb[24].mxu0 %v1826_v50  ;;  %1701 = vmatmul.mubr.bf16.gmra.mrb[24].mxu1 %v1827_v51 }
  0x58   : > { %936 = vmatprep.mubr.bf16.mxu0 %v1828_v52  ;;  %1704 = vmatprep.mubr.bf16.mxu1 %v1830_v53 }
  0x5f   : > { %937 = vmatmul.mubr.bf16.gmra.mrb[28].mxu0 %v1831_v54  ;;  %1705 = vmatmul.mubr.bf16.gmra.mrb[28].mxu1 %v1832_v55 }
  0x60   : > { %944 = vmatprep.mubr.bf16.mxu0 %v1833_v56  ;;  %1708 = vmatprep.mubr.bf16.mxu1 %v1835_v57 }
  0x67   : > { %945 = vmatmul.mubr.bf16.gmra.mrb[32].mxu0 %v1836_v58  ;;  %1709 = vmatmul.mubr.bf16.gmra.mrb[32].mxu1 %v1837_v59  ;;  %v2063_v58 = vld [vmem:[%s2153_s2] ss:$0 sm:$0xff] }
  0x68   : > { %952 = vmatprep.mubr.bf16.mxu0 %v1838_v60  ;;  %1712 = vmatprep.mubr.bf16.mxu1 %v1840_v61 }
  0x6f   : > { %953 = vmatmul.mubr.bf16.gmra.mrb[36].mxu0 %v1841_v62  ;;  %1713 = vmatmul.mubr.bf16.gmra.mrb[36].mxu1 %v1842_v63 }
  0x70   : > { %960 = vmatprep.mubr.bf16.mxu0 %v1843_v0  ;;  %1716 = vmatprep.mubr.bf16.mxu1 %v1845_v1 }
  0x77   : > { %961 = vmatmul.mubr.bf16.gmra.mrb[40].mxu0 %v1846_v2  ;;  %1717 = vmatmul.mubr.bf16.gmra.mrb[40].mxu1 %v1847_v3 }
  0x78   : > { %968 = vmatprep.mubr.bf16.mxu0 %v1848_v4  ;;  %1720 = vmatprep.mubr.bf16.mxu1 %v1850_v5 }
  0x7f   : > { %969 = vmatmul.mubr.bf16.gmra.mrb[44].mxu0 %v1851_v6  ;;  %1721 = vmatmul.mubr.bf16.gmra.mrb[44].mxu1 %v1852_v7 }
  0xfa   : > { %v1556_v8 = vpop.f32.mrb[0].mxu0  ;;  %v1628_v9 = vpop.f32.mrb[0].mxu1 }
  0xfb   : > { %v1557_v10 = vpop.f32.mrb[1].mxu0  ;;  %v1629_v11 = vpop.f32.mrb[1].mxu1 }
  0xfc   : > { %v1558_v12 = vadd.f32 %v1557_v10, %v1556_v8  ;;  %v2043_v13 = vadd.f32 %v1629_v11, %v1628_v9  ;;  %v1559_v14 = vpop.f32.mrb[2].mxu0  ;;  %v1631_v15 = vpop.f32.mrb[2].mxu1 }
  0xfd   : > { %v1560_v16 = vpop.f32.mrb[3].mxu0  ;;  %v1632_v17 = vpop.f32.mrb[3].mxu1 }
  0xfe   : > { %v1561_v18 = vadd.f32 %v1560_v16, %v1559_v14  ;;  %v2045_v19 = vadd.f32 %v1632_v17, %v1631_v15 }
 0x102   : > { %v1562_v20 = vpop.f32.mrb[4].mxu0  ;;  %v1634_v21 = vpop.f32.mrb[4].mxu1 }
 0x103   : > { %v1563_v22 = vpop.f32.mrb[5].mxu0  ;;  %v1635_v23 = vpop.f32.mrb[5].mxu1 }
 0x104   : > { %v1564_v24 = vadd.f32 %v1563_v22, %v1562_v20  ;;  %v2047_v25 = vadd.f32 %v1635_v23, %v1634_v21  ;;  %v1565_v26 = vpop.f32.mrb[6].mxu0  ;;  %v1637_v27 = vpop.f32.mrb[6].mxu1 }
 0x105   : > { %v1566_v28 = vpop.f32.mrb[7].mxu0  ;;  %v1638_v29 = vpop.f32.mrb[7].mxu1 }
 0x106   : > { %v1567_v30 = vadd.f32 %v1566_v28, %v1565_v26  ;;  %v2049_v31 = vadd.f32 %v1638_v29, %v1637_v27 }
 0x10a   : > { %v1568_v32 = vpop.f32.mrb[8].mxu0  ;;  %v1640_v33 = vpop.f32.mrb[8].mxu1 }
 0x10b   : > { %v1569_v34 = vpop.f32.mrb[9].mxu0  ;;  %v1641_v35 = vpop.f32.mrb[9].mxu1 }
 0x10c   : > { %v1570_v36 = vadd.f32 %v1569_v34, %v1568_v32  ;;  %v2051_v37 = vadd.f32 %v1641_v35, %v1640_v33  ;;  %v1571_v38 = vpop.f32.mrb[10].mxu0  ;;  %v1643_v39 = vpop.f32.mrb[10].mxu1 }
 0x10d   : > { %v1572_v40 = vpop.f32.mrb[11].mxu0  ;;  %v1644_v41 = vpop.f32.mrb[11].mxu1 }
 0x10e   : > { %v1573_v42 = vadd.f32 %v1572_v40, %v1571_v38  ;;  %v2053_v43 = vadd.f32 %v1644_v41, %v1643_v39 }
 0x112   : > { %v1574_v44 = vpop.f32.mrb[12].mxu0  ;;  %v1646_v45 = vpop.f32.mrb[12].mxu1 }
 0x113   : > { %v1575_v46 = vpop.f32.mrb[13].mxu0  ;;  %v1647_v47 = vpop.f32.mrb[13].mxu1 }
 0x114   : > { %v1576_v48 = vadd.f32 %v1575_v46, %v1574_v44  ;;  %v2055_v49 = vadd.f32 %v1647_v47, %v1646_v45  ;;  %v1577_v50 = vpop.f32.mrb[14].mxu0  ;;  %v1649_v51 = vpop.f32.mrb[14].mxu1 }
 0x115   : > { %v1578_v52 = vpop.f32.mrb[15].mxu0  ;;  %v1650_v53 = vpop.f32.mrb[15].mxu1 }
 0x116   : > { %v1579_v54 = vadd.f32 %v1578_v52, %v1577_v50  ;;  %v2057_v55 = vadd.f32 %v1650_v53, %v1649_v51 }
 0x11a   : > { %v1580_v56 = vpop.f32.mrb[16].mxu0  ;;  %v1694_v57 = vpop.f32.mrb[16].mxu1 }
 0x11b   : > { %v1052_v59 = vadd.f32 %v1694_v57, %v1564_v24  ;;  %v1581_v60 = vpop.f32.mrb[17].mxu0  ;;  %v1043_v61 = vpop.f32.mrb[17].mxu1 }
 0x11c   : > { %v1582_v62 = vadd.f32 %v1581_v60, %v1580_v56  ;;  %v1044_v63 = vadd.f32 %v1558_v12, %v1043_v61  ;;  %v1583_v0 = vpop.f32.mrb[18].mxu0  ;;  %v1695_v1 = vpop.f32.mrb[18].mxu1 }
 0x11d   : > { %v1278_v2 = vadd.f32 %v2063_v58, %v1052_v59  ;;  %v1055_v3 = vadd.f32 %v1695_v1, %v1567_v30  ;;  %v1584_v4 = vpop.f32.mrb[19].mxu0  ;;  %v1046_v5 = vpop.f32.mrb[19].mxu1 }
 0x11e   : > { %v1276_v6 = vadd.f32 %v2063_v58, %v1044_v63  ;;  %v1585_v7 = vadd.f32 %v1584_v4, %v1583_v0  ;;  %v1047_v8 = vadd.f32 %v1561_v18, %v1046_v5 }
 0x11f   : > { %1310 = vst [vmem:[%s2068_s28 + $0x10] sm:$0xff] %v1278_v2  ;;  %v1279_v9 = vadd.f32 %v2063_v58, %v1055_v3 }
 0x120   : > { %1308 = vst [vmem:[%s2068_s28] sm:$0xff] %v1276_v6  ;;  %v1277_v10 = vadd.f32 %v2063_v58, %v1047_v8 }
 0x121   : > { %1311 = vst [vmem:[%s2068_s28 + $0x18] sm:$0xff] %v1279_v9 }
 0x122   : > { %1309 = vst [vmem:[%s2068_s28 + $0x8] sm:$0xff] %v1277_v10  ;;  %v1586_v11 = vpop.f32.mrb[20].mxu0  ;;  %v1698_v12 = vpop.f32.mrb[20].mxu1 }
 0x123   : > { %v1068_v14 = vadd.f32 %v1698_v12, %v1576_v48  ;;  %v1587_v15 = vpop.f32.mrb[21].mxu0  ;;  %v1059_v16 = vpop.f32.mrb[21].mxu1 }
 0x124   : > { %v1588_v17 = vadd.f32 %v1587_v15, %v1586_v11  ;;  %v1060_v20 = vadd.f32 %v1570_v36, %v1059_v16  ;;  %v1589_v18 = vpop.f32.mrb[22].mxu0  ;;  %v1699_v21 = vpop.f32.mrb[22].mxu1 }
 0x125   : > { %v1282_v22 = vadd.f32 %v2063_v58, %v1068_v14  ;;  %v1071_v23 = vadd.f32 %v1699_v21, %v1579_v54  ;;  %v1590_v24 = vpop.f32.mrb[23].mxu0  ;;  %v1062_v26 = vpop.f32.mrb[23].mxu1 }
 0x126   : > { %v1280_v27 = vadd.f32 %v2063_v58, %v1060_v20  ;;  %v1591_v28 = vadd.f32 %v1590_v24, %v1589_v18  ;;  %v1063_v29 = vadd.f32 %v1573_v42, %v1062_v26 }
 0x127   : > { %1314 = vst [vmem:[%s2068_s28 + $0x30] sm:$0xff] %v1282_v22  ;;  %v1283_v30 = vadd.f32 %v2063_v58, %v1071_v23 }
 0x128   : > { %1312 = vst [vmem:[%s2068_s28 + $0x20] sm:$0xff] %v1280_v27  ;;  %v1281_v32 = vadd.f32 %v2063_v58, %v1063_v29 }
 0x129   : > { %1315 = vst [vmem:[%s2068_s28 + $0x38] sm:$0xff] %v1283_v30 }
 0x12a   : > { %1313 = vst [vmem:[%s2068_s28 + $0x28] sm:$0xff] %v1281_v32  ;;  %v1592_v33 = vpop.f32.mrb[24].mxu0  ;;  %v1702_v34 = vpop.f32.mrb[24].mxu1 }
 0x12b   : > { %v1084_v35 = vadd.f32 %v1702_v34, %v1588_v17  ;;  %v1593_v36 = vpop.f32.mrb[25].mxu0  ;;  %v1075_v38 = vpop.f32.mrb[25].mxu1 }
 0x12c   : > { %v1594_v39 = vadd.f32 %v1593_v36, %v1592_v33  ;;  %v1076_v40 = vadd.f32 %v1582_v62, %v1075_v38  ;;  %v1595_v41 = vpop.f32.mrb[26].mxu0  ;;  %v1703_v42 = vpop.f32.mrb[26].mxu1 }
 0x12d   : > { %v1286_v44 = vadd.f32 %v2063_v58, %v1084_v35  ;;  %v1087_v45 = vadd.f32 %v1703_v42, %v1591_v28  ;;  %v1596_v46 = vpop.f32.mrb[27].mxu0  ;;  %v1078_v47 = vpop.f32.mrb[27].mxu1 }
 0x12e   : > { %v1284_v48 = vadd.f32 %v2063_v58, %v1076_v40  ;;  %v1597_v50 = vadd.f32 %v1596_v46, %v1595_v41  ;;  %v1079_v51 = vadd.f32 %v1585_v7, %v1078_v47 }
 0x12f   : > { %1318 = vst [vmem:[%s2068_s28 + $0x50] sm:$0xff] %v1286_v44  ;;  %v1287_v52 = vadd.f32 %v2063_v58, %v1087_v45 }
 0x130   : > { %1316 = vst [vmem:[%s2068_s28 + $0x40] sm:$0xff] %v1284_v48  ;;  %v1285_v53 = vadd.f32 %v2063_v58, %v1079_v51 }
 0x131   : > { %1319 = vst [vmem:[%s2068_s28 + $0x58] sm:$0xff] %v1287_v52 }
 0x132   : > { %1317 = vst [vmem:[%s2068_s28 + $0x48] sm:$0xff] %v1285_v53  ;;  %v1598_v54 = vpop.f32.mrb[28].mxu0  ;;  %v1706_v56 = vpop.f32.mrb[28].mxu1 }
 0x133   : > { %v1599_v57 = vpop.f32.mrb[29].mxu0  ;;  %v1091_v59 = vpop.f32.mrb[29].mxu1 }
 0x134   : > { %v1600_v60 = vadd.f32 %v1599_v57, %v1598_v54  ;;  %v1092_v61 = vadd.f32 %v1594_v39, %v1091_v59  ;;  %v1601_v62 = vpop.f32.mrb[30].mxu0  ;;  %v1707_v63 = vpop.f32.mrb[30].mxu1 }
 0x135   : > { %v1602_v0 = vpop.f32.mrb[31].mxu0  ;;  %v1094_v1 = vpop.f32.mrb[31].mxu1 }
 0x136   : > { %v1100_v2 = vadd.f32 %v1706_v56, %v1600_v60  ;;  %v1288_v3 = vadd.f32 %v2063_v58, %v1092_v61  ;;  %v1603_v4 = vadd.f32 %v1602_v0, %v1601_v62  ;;  %v1095_v5 = vadd.f32 %v1597_v50, %v1094_v1 }
 0x138   : > { %v1290_v6 = vadd.f32 %v2063_v58, %v1100_v2  ;;  %1320 = vst [vmem:[%s2068_s28 + $0x60] sm:$0xff] %v1288_v3  ;;  %v1103_v7 = vadd.f32 %v1707_v63, %v1603_v4  ;;  %v1289_v8 = vadd.f32 %v2063_v58, %v1095_v5 }
 0x13a   : > { %1322 = vst [vmem:[%s2068_s28 + $0x70] sm:$0xff] %v1290_v6  ;;  %v1291_v9 = vadd.f32 %v2063_v58, %v1103_v7  ;;  %1321 = vst [vmem:[%s2068_s28 + $0x68] sm:$0xff] %v1289_v8  ;;  %v1604_v10 = vpop.f32.mrb[32].mxu0  ;;  %v1710_v11 = vpop.f32.mrb[32].mxu1 }
 0x13b   : > { %v1605_v12 = vpop.f32.mrb[33].mxu0  ;;  %v1107_v14 = vpop.f32.mrb[33].mxu1 }
 0x13c   : > { %1323 = vst [vmem:[%s2068_s28 + $0x78] sm:$0xff] %v1291_v9  ;;  %v1606_v15 = vadd.f32 %v1605_v12, %v1604_v10  ;;  %v1607_v16 = vpop.f32.mrb[34].mxu0  ;;  %v1711_v17 = vpop.f32.mrb[34].mxu1 }
 0x13d   : > { %v1608_v20 = vpop.f32.mrb[35].mxu0  ;;  %v1110_v18 = vpop.f32.mrb[35].mxu1 }
 0x13e   : > { %v1108_v21 = vadd.f32 %v1606_v15, %v1107_v14  ;;  %v1609_v22 = vadd.f32 %v1608_v20, %v1607_v16 }
 0x140   : > { %v1292_v23 = vadd.f32 %v2063_v58, %v1108_v21  ;;  %v1111_v24 = vadd.f32 %v1609_v22, %v1110_v18 }
 0x142   : > { %1324 = vst [vmem:[%s2068_s28 + $0x80] sm:$0xff] %v1292_v23  ;;  %v1293_v26 = vadd.f32 %v2063_v58, %v1111_v24  ;;  %v1610_v27 = vpop.f32.mrb[36].mxu0  ;;  %v1714_v28 = vpop.f32.mrb[36].mxu1 }
 0x143   : > { %v1611_v29 = vpop.f32.mrb[37].mxu0  ;;  %v1123_v30 = vpop.f32.mrb[37].mxu1 }
 0x144   : > { %1325 = vst [vmem:[%s2068_s28 + $0x88] sm:$0xff] %v1293_v26  ;;  %v1612_v32 = vadd.f32 %v1611_v29, %v1610_v27  ;;  %v1613_v33 = vpop.f32.mrb[38].mxu0  ;;  %v1715_v34 = vpop.f32.mrb[38].mxu1 }
 0x145   : > { %v1614_v35 = vpop.f32.mrb[39].mxu0  ;;  %v1126_v36 = vpop.f32.mrb[39].mxu1 }
 0x146   : > { %v1116_v38 = vadd.f32 %v1710_v11, %v1612_v32  ;;  %v1615_v39 = vadd.f32 %v1614_v35, %v1613_v33 }
 0x148   : > { %v1294_v40 = vadd.f32 %v2063_v58, %v1116_v38  ;;  %v1119_v41 = vadd.f32 %v1711_v17, %v1615_v39 }
 0x14a   : > { %1326 = vst [vmem:[%s2068_s28 + $0x90] sm:$0xff] %v1294_v40  ;;  %v1295_v42 = vadd.f32 %v2063_v58, %v1119_v41  ;;  %v1616_v44 = vpop.f32.mrb[40].mxu0  ;;  %v1718_v45 = vpop.f32.mrb[40].mxu1 }
 0x14b   : > { %v1148_v46 = vadd.f32 %v1718_v45, %v2047_v25  ;;  %v1617_v47 = vpop.f32.mrb[41].mxu0  ;;  %v1139_v48 = vpop.f32.mrb[41].mxu1 }
 0x14c   : > { %1327 = vst [vmem:[%s2068_s28 + $0x98] sm:$0xff] %v1295_v42  ;;  %v1618_v50 = vadd.f32 %v1617_v47, %v1616_v44  ;;  %v1140_v51 = vadd.f32 %v2043_v13, %v1139_v48  ;;  %v1619_v52 = vpop.f32.mrb[42].mxu0  ;;  %v1719_v53 = vpop.f32.mrb[42].mxu1 }
 0x14d   : > { %v1302_v54 = vadd.f32 %v2063_v58, %v1148_v46  ;;  %v1151_v56 = vadd.f32 %v1719_v53, %v2049_v31  ;;  %v1620_v57 = vpop.f32.mrb[43].mxu0  ;;  %v1142_v59 = vpop.f32.mrb[43].mxu1 }
 0x14e   : > { %v1124_v25 = vadd.f32 %v1618_v50, %v1123_v30  ;;  %v1300_v60 = vadd.f32 %v2063_v58, %v1140_v51  ;;  %v1621_v61 = vadd.f32 %v1620_v57, %v1619_v52  ;;  %v1143_v62 = vadd.f32 %v2045_v19, %v1142_v59 }
 0x14f   : > { %1334 = vst [vmem:[%s2068_s28 + $0xd0] sm:$0xff] %v1302_v54  ;;  %v1303_v13 = vadd.f32 %v2063_v58, %v1151_v56 }
 0x150   : > { %v1296_v63 = vadd.f32 %v2063_v58, %v1124_v25  ;;  %1332 = vst [vmem:[%s2068_s28 + $0xc0] sm:$0xff] %v1300_v60  ;;  %v1127_v0 = vadd.f32 %v1621_v61, %v1126_v36  ;;  %v1301_v1 = vadd.f32 %v2063_v58, %v1143_v62 }
 0x151   : > { %1335 = vst [vmem:[%s2068_s28 + $0xd8] sm:$0xff] %v1303_v13 }
 0x152   : > { %1328 = vst [vmem:[%s2068_s28 + $0xa0] sm:$0xff] %v1296_v63  ;;  %v1297_v31 = vadd.f32 %v2063_v58, %v1127_v0  ;;  %1333 = vst [vmem:[%s2068_s28 + $0xc8] sm:$0xff] %v1301_v1  ;;  %v1622_v2 = vpop.f32.mrb[44].mxu0  ;;  %v1722_v3 = vpop.f32.mrb[44].mxu1 }
 0x153   : > { %v1164_v4 = vadd.f32 %v1722_v3, %v2055_v49  ;;  %v1623_v19 = vpop.f32.mrb[45].mxu0  ;;  %v1155_v5 = vpop.f32.mrb[45].mxu1 }
 0x154   : > { %1329 = vst [vmem:[%s2068_s28 + $0xa8] sm:$0xff] %v1297_v31  ;;  %v1624_v6 = vadd.f32 %v1623_v19, %v1622_v2  ;;  %v1156_v7 = vadd.f32 %v2051_v37, %v1155_v5  ;;  %v1625_v8 = vpop.f32.mrb[46].mxu0  ;;  %v1723_v9 = vpop.f32.mrb[46].mxu1 }
 0x155   : > { %v1306_v10 = vadd.f32 %v2063_v58, %v1164_v4  ;;  %v1167_v11 = vadd.f32 %v1723_v9, %v2057_v55  ;;  %v1626_v12 = vpop.f32.mrb[47].mxu0  ;;  %v1158_v49 = vpop.f32.mrb[47].mxu1 }
 0x156   : > { %v1132_v14 = vadd.f32 %v1714_v28, %v1624_v6  ;;  %v1304_v15 = vadd.f32 %v2063_v58, %v1156_v7  ;;  %v1627_v16 = vadd.f32 %v1626_v12, %v1625_v8  ;;  %v1159_v17 = vadd.f32 %v2053_v43, %v1158_v49 }
 0x157   : > { %1338 = vst [vmem:[%s2068_s28 + $0xf0] sm:$0xff] %v1306_v10  ;;  %v1307_v37 = vadd.f32 %v2063_v58, %v1167_v11 }
 0x158   : > { %v1298_v20 = vadd.f32 %v2063_v58, %v1132_v14  ;;  %1336 = vst [vmem:[%s2068_s28 + $0xe0] sm:$0xff] %v1304_v15  ;;  %v1135_v18 = vadd.f32 %v1715_v34, %v1627_v16  ;;  %v1305_v21 = vadd.f32 %v2063_v58, %v1159_v17 }
 0x159   : > { %1339 = vst [vmem:[%s2068_s28 + $0xf8] sm:$0xff] %v1307_v37 }
 0x15a   : > { %1330 = vst [vmem:[%s2068_s28 + $0xb0] sm:$0xff] %v1298_v20  ;;  %v1299_v55 = vadd.f32 %v2063_v58, %v1135_v18  ;;  %1337 = vst [vmem:[%s2068_s28 + $0xe8] sm:$0xff] %v1305_v21 }
 0x15c   : > { %1331 = vst [vmem:[%s2068_s28 + $0xb8] sm:$0xff] %v1299_v55 }
 0x15d PF: > { %s13_s14 = sadd.s32 1, %s1875_s14   ;;  %s2155_s12 = smov %s1871_s13 }
 0x15e   : > { %p10_p5 = scmp.ge.s32.totalorder %s13_s14, 4   ;;  %s2156_s13 = smov %s2158_s15 }
 0x160   :  { %12 = sbr.rel (!%p10_p5) target bundleno = 2 (0x2), region = 76 }

// kernel: alexnet_forward.23
= control target key start
LH: loop header
LB: loop body
LE: loop exit
PB: predicated region body
PF: predicated region fallthrough
CT: control target
= control target key end

     0   :  { %s805_s0 = inlined_call_operand.vmem [shape: f32[456,128], index: 0, kind: input, shape index: {}]   ;;  %s806_s1 = inlined_call_operand.vmem [shape: f32[1,128], index: 1, kind: input, shape index: {}]   ;;  %s807_s2 = inlined_call_operand.vmem [shape: f32[1,128], index: 2, kind: input, shape index: {}]   ;;  %s808_s3 = inlined_call_operand.vmem [shape: f32[456,128], index: 3, kind: output, shape index: {}]  }
   0x1   :  { %v14_v0 = vld [vmem:[%s805_s0] sm:$0xff]  ;;  %v15_v4 = vld [vmem:[%s805_s0 + $0x8] sm:$0xff]  ;;  %v16_v5 = vld [vmem:[%s805_s0 + $0x10] sm:$0xff] }
   0x2   :  { %v345_v1 = vld [vmem:[%s806_s1] ss:$0 sm:$0xff]  ;;  %v17_v6 = vld [vmem:[%s805_s0 + $0x18] sm:$0xff]  ;;  %v19_v11 = vld [vmem:[%s805_s0 + $0x28] sm:$0xff] }
   0x3   :  { %v350_v2 = vld [vmem:[%s807_s2] ss:$0 sm:$0xff]  ;;  %v78_v3 = vmul.f32 %v345_v1, %v14_v0  ;;  %v79_v7 = vmul.f32 %v345_v1, %v15_v4  ;;  %v80_v8 = vmul.f32 %v345_v1, %v16_v5  ;;  %v81_v9 = vmul.f32 %v345_v1, %v17_v6  ;;  %v20_v12 = vld [vmem:[%s805_s0 + $0x30] sm:$0xff]  ;;  %v21_v17 = vld [vmem:[%s805_s0 + $0x38] sm:$0xff] }
   0x4   :  { %v18_v10 = vld [vmem:[%s805_s0 + $0x20] sm:$0xff]  ;;  %v83_v15 = vmul.f32 %v345_v1, %v19_v11  ;;  %v84_v16 = vmul.f32 %v345_v1, %v20_v12  ;;  %v85_v21 = vmul.f32 %v345_v1, %v21_v17  ;;  %v23_v27 = vld [vmem:[%s805_s0 + $0x48] sm:$0xff]  ;;  %v24_v28 = vld [vmem:[%s805_s0 + $0x50] sm:$0xff] }
   0x5   :  { %v142_v13 = vadd.f32 %v350_v2, %v78_v3  ;;  %v82_v14 = vmul.f32 %v345_v1, %v18_v10  ;;  %v143_v18 = vadd.f32 %v350_v2, %v79_v7  ;;  %v144_v19 = vadd.f32 %v350_v2, %v80_v8  ;;  %v22_v22 = vld [vmem:[%s805_s0 + $0x40] sm:$0xff]  ;;  %v25_v29 = vld [vmem:[%s805_s0 + $0x58] sm:$0xff]  ;;  %v27_v35 = vld [vmem:[%s805_s0 + $0x68] sm:$0xff] }
   0x6   :  { %v145_v20 = vadd.f32 %v350_v2, %v81_v9  ;;  %v147_v25 = vadd.f32 %v350_v2, %v83_v15  ;;  %v148_v26 = vadd.f32 %v350_v2, %v84_v16  ;;  %v149_v33 = vadd.f32 %v350_v2, %v85_v21  ;;  %v26_v34 = vld [vmem:[%s805_s0 + $0x60] sm:$0xff]  ;;  %v28_v36 = vld [vmem:[%s805_s0 + $0x70] sm:$0xff]  ;;  %v29_v41 = vld [vmem:[%s805_s0 + $0x78] sm:$0xff] }
   0x7   :  { %v199_v23 = vmax.f32 %v142_v13, 0.0  ;;  %v146_v24 = vadd.f32 %v350_v2, %v82_v14  ;;  %v200_v30 = vmax.f32 %v143_v18, 0.0  ;;  %v201_v31 = vmax.f32 %v144_v19, 0.0  ;;  %v30_v54 = vld [vmem:[%s805_s0 + $0x80] sm:$0xff]  ;;  %v31_v59 = vld [vmem:[%s805_s0 + $0x88] sm:$0xff]  ;;  %v32_v60 = vld [vmem:[%s805_s0 + $0x90] sm:$0xff] }
   0x8   :  { %v202_v32 = vmax.f32 %v145_v20, 0.0  ;;  %v204_v38 = vmax.f32 %v147_v25, 0.0  ;;  %v205_v39 = vmax.f32 %v148_v26, 0.0  ;;  %v86_v40 = vmul.f32 %v345_v1, %v22_v22  ;;  %v33_v61 = vld [vmem:[%s805_s0 + $0x98] sm:$0xff]  ;;  %v34_v4 = vld [vmem:[%s805_s0 + $0xa0] sm:$0xff]  ;;  %v35_v5 = vld [vmem:[%s805_s0 + $0xa8] sm:$0xff] }
   0x9   :  { %256 = vst [vmem:[%s808_s3] sm:$0xff] %v199_v23  ;;  %v203_v37 = vmax.f32 %v146_v24, 0.0  ;;  %257 = vst [vmem:[%s808_s3 + $0x8] sm:$0xff] %v200_v30  ;;  %v206_v42 = vmax.f32 %v149_v33, 0.0  ;;  %v87_v43 = vmul.f32 %v345_v1, %v23_v27  ;;  %v88_v44 = vmul.f32 %v345_v1, %v24_v28  ;;  %v36_v6 = vld [vmem:[%s805_s0 + $0xb0] sm:$0xff]  ;;  %v37_v11 = vld [vmem:[%s805_s0 + $0xb8] sm:$0xff] }
   0xa   :  { %258 = vst [vmem:[%s808_s3 + $0x10] sm:$0xff] %v201_v31  ;;  %259 = vst [vmem:[%s808_s3 + $0x18] sm:$0xff] %v202_v32  ;;  %v89_v45 = vmul.f32 %v345_v1, %v25_v29  ;;  %v150_v46 = vadd.f32 %v350_v2, %v86_v40  ;;  %v90_v47 = vmul.f32 %v345_v1, %v26_v34  ;;  %v38_v24 = vld [vmem:[%s805_s0 + $0xc0] sm:$0xff]  ;;  %v39_v29 = vld [vmem:[%s805_s0 + $0xc8] sm:$0xff] }
   0xb   :  { %260 = vst [vmem:[%s808_s3 + $0x20] sm:$0xff] %v203_v37  ;;  %261 = vst [vmem:[%s808_s3 + $0x28] sm:$0xff] %v204_v38  ;;  %v91_v48 = vmul.f32 %v345_v1, %v27_v35  ;;  %v92_v49 = vmul.f32 %v345_v1, %v28_v36  ;;  %v151_v50 = vadd.f32 %v350_v2, %v87_v43  ;;  %v40_v30 = vld [vmem:[%s805_s0 + $0xd0] sm:$0xff]  ;;  %v41_v31 = vld [vmem:[%s805_s0 + $0xd8] sm:$0xff] }
   0xc   :  { %262 = vst [vmem:[%s808_s3 + $0x30] sm:$0xff] %v205_v39  ;;  %263 = vst [vmem:[%s808_s3 + $0x38] sm:$0xff] %v206_v42  ;;  %v152_v51 = vadd.f32 %v350_v2, %v88_v44  ;;  %v153_v52 = vadd.f32 %v350_v2, %v89_v45  ;;  %v93_v53 = vmul.f32 %v345_v1, %v29_v41  ;;  %v207_v55 = vmax.f32 %v150_v46, 0.0  ;;  %v42_v36 = vld [vmem:[%s805_s0 + $0xe0] sm:$0xff]  ;;  %v43_v37 = vld [vmem:[%s805_s0 + $0xe8] sm:$0xff] }
   0xd   :  { %v154_v56 = vadd.f32 %v350_v2, %v90_v47  ;;  %v155_v57 = vadd.f32 %v350_v2, %v91_v48  ;;  %v156_v58 = vadd.f32 %v350_v2, %v92_v49  ;;  %v208_v62 = vmax.f32 %v151_v50, 0.0  ;;  %v44_v38 = vld [vmem:[%s805_s0 + $0xf0] sm:$0xff]  ;;  %v45_v43 = vld [vmem:[%s805_s0 + $0xf8] sm:$0xff] }
   0xe   :  { %v209_v63 = vmax.f32 %v152_v51, 0.0  ;;  %v210_v0 = vmax.f32 %v153_v52, 0.0  ;;  %v157_v3 = vadd.f32 %v350_v2, %v93_v53  ;;  %264 = vst [vmem:[%s808_s3 + $0x40] sm:$0xff] %v207_v55  ;;  %v94_v10 = vmul.f32 %v345_v1, %v30_v54 }
   0xf   :  { %v211_v7 = vmax.f32 %v154_v56, 0.0  ;;  %v212_v8 = vmax.f32 %v155_v57, 0.0  ;;  %v213_v9 = vmax.f32 %v156_v58, 0.0  ;;  %265 = vst [vmem:[%s808_s3 + $0x48] sm:$0xff] %v208_v62  ;;  %v95_v13 = vmul.f32 %v345_v1, %v31_v59  ;;  %v46_v56 = vld [vmem:[%s805_s0 + $0x100] sm:$0xff]  ;;  %v48_v62 = vld [vmem:[%s805_s0 + $0x110] sm:$0xff] }
  0x10   :  { %266 = vst [vmem:[%s808_s3 + $0x50] sm:$0xff] %v209_v63  ;;  %267 = vst [vmem:[%s808_s3 + $0x58] sm:$0xff] %v210_v0  ;;  %v214_v12 = vmax.f32 %v157_v3, 0.0  ;;  %v96_v14 = vmul.f32 %v345_v1, %v32_v60  ;;  %v97_v15 = vmul.f32 %v345_v1, %v33_v61  ;;  %v158_v16 = vadd.f32 %v350_v2, %v94_v10  ;;  %v47_v61 = vld [vmem:[%s805_s0 + $0x108] sm:$0xff]  ;;  %v49_v63 = vld [vmem:[%s805_s0 + $0x118] sm:$0xff] }
  0x11   :  { %268 = vst [vmem:[%s808_s3 + $0x60] sm:$0xff] %v211_v7  ;;  %269 = vst [vmem:[%s808_s3 + $0x68] sm:$0xff] %v212_v8  ;;  %v98_v17 = vmul.f32 %v345_v1, %v34_v4  ;;  %v99_v18 = vmul.f32 %v345_v1, %v35_v5  ;;  %v100_v19 = vmul.f32 %v345_v1, %v36_v6  ;;  %v50_v6 = vld [vmem:[%s805_s0 + $0x120] sm:$0xff]  ;;  %v51_v7 = vld [vmem:[%s805_s0 + $0x128] sm:$0xff] }
  0x12   :  { %270 = vst [vmem:[%s808_s3 + $0x70] sm:$0xff] %v213_v9  ;;  %271 = vst [vmem:[%s808_s3 + $0x78] sm:$0xff] %v214_v12  ;;  %v159_v20 = vadd.f32 %v350_v2, %v95_v13  ;;  %v160_v21 = vadd.f32 %v350_v2, %v96_v14  ;;  %v161_v22 = vadd.f32 %v350_v2, %v97_v15  ;;  %v215_v25 = vmax.f32 %v158_v16, 0.0  ;;  %v52_v8 = vld [vmem:[%s805_s0 + $0x130] sm:$0xff]  ;;  %v53_v13 = vld [vmem:[%s805_s0 + $0x138] sm:$0xff] }
  0x13   :  { %v101_v23 = vmul.f32 %v345_v1, %v37_v11  ;;  %v162_v26 = vadd.f32 %v350_v2, %v98_v17  ;;  %v163_v27 = vadd.f32 %v350_v2, %v99_v18  ;;  %v164_v28 = vadd.f32 %v350_v2, %v100_v19 }
  0x14   :  { %v216_v32 = vmax.f32 %v159_v20, 0.0  ;;  %v217_v33 = vmax.f32 %v160_v21, 0.0  ;;  %v218_v34 = vmax.f32 %v161_v22, 0.0  ;;  %272 = vst [vmem:[%s808_s3 + $0x80] sm:$0xff] %v215_v25  ;;  %v102_v42 = vmul.f32 %v345_v1, %v38_v24 }
  0x15   :  { %v165_v35 = vadd.f32 %v350_v2, %v101_v23  ;;  %v219_v39 = vmax.f32 %v162_v26, 0.0  ;;  %v220_v40 = vmax.f32 %v163_v27, 0.0  ;;  %v221_v41 = vmax.f32 %v164_v28, 0.0  ;;  %v54_v26 = vld [vmem:[%s805_s0 + $0x140] sm:$0xff] }
  0x16   :  { %273 = vst [vmem:[%s808_s3 + $0x88] sm:$0xff] %v216_v32  ;;  %274 = vst [vmem:[%s808_s3 + $0x90] sm:$0xff] %v217_v33  ;;  %v103_v45 = vmul.f32 %v345_v1, %v39_v29  ;;  %v104_v46 = vmul.f32 %v345_v1, %v40_v30  ;;  %v105_v47 = vmul.f32 %v345_v1, %v41_v31  ;;  %v55_v31 = vld [vmem:[%s805_s0 + $0x148] sm:$0xff]  ;;  %v56_v32 = vld [vmem:[%s805_s0 + $0x150] sm:$0xff] }
  0x17   :  { %275 = vst [vmem:[%s808_s3 + $0x98] sm:$0xff] %v218_v34  ;;  %v222_v44 = vmax.f32 %v165_v35, 0.0  ;;  %276 = vst [vmem:[%s808_s3 + $0xa0] sm:$0xff] %v219_v39  ;;  %v166_v48 = vadd.f32 %v350_v2, %v102_v42  ;;  %v106_v49 = vmul.f32 %v345_v1, %v42_v36  ;;  %v107_v50 = vmul.f32 %v345_v1, %v43_v37  ;;  %v57_v33 = vld [vmem:[%s805_s0 + $0x158] sm:$0xff]  ;;  %v59_v39 = vld [vmem:[%s805_s0 + $0x168] sm:$0xff] }
  0x18   :  { %277 = vst [vmem:[%s808_s3 + $0xa8] sm:$0xff] %v220_v40  ;;  %278 = vst [vmem:[%s808_s3 + $0xb0] sm:$0xff] %v221_v41  ;;  %v108_v51 = vmul.f32 %v345_v1, %v44_v38  ;;  %v167_v52 = vadd.f32 %v350_v2, %v103_v45  ;;  %v168_v53 = vadd.f32 %v350_v2, %v104_v46  ;;  %v58_v38 = vld [vmem:[%s805_s0 + $0x160] sm:$0xff]  ;;  %v60_v40 = vld [vmem:[%s805_s0 + $0x170] sm:$0xff] }
  0x19   :  { %279 = vst [vmem:[%s808_s3 + $0xb8] sm:$0xff] %v222_v44  ;;  %v169_v54 = vadd.f32 %v350_v2, %v105_v47  ;;  %v109_v55 = vmul.f32 %v345_v1, %v45_v43  ;;  %v223_v57 = vmax.f32 %v166_v48, 0.0  ;;  %v170_v58 = vadd.f32 %v350_v2, %v106_v49  ;;  %v61_v45 = vld [vmem:[%s805_s0 + $0x178] sm:$0xff] }
  0x1a   :  { %v171_v59 = vadd.f32 %v350_v2, %v107_v50  ;;  %v172_v60 = vadd.f32 %v350_v2, %v108_v51  ;;  %v224_v0 = vmax.f32 %v167_v52, 0.0  ;;  %v225_v3 = vmax.f32 %v168_v53, 0.0 }
  0x1b   :  { %v226_v4 = vmax.f32 %v169_v54, 0.0  ;;  %v173_v5 = vadd.f32 %v350_v2, %v109_v55  ;;  %280 = vst [vmem:[%s808_s3 + $0xc0] sm:$0xff] %v223_v57  ;;  %v227_v9 = vmax.f32 %v170_v58, 0.0  ;;  %v110_v12 = vmul.f32 %v345_v1, %v46_v56  ;;  %v62_v58 = vld [vmem:[%s805_s0 + $0x180] sm:$0xff] }
  0x1c   :  { %v228_v10 = vmax.f32 %v171_v59, 0.0  ;;  %v229_v11 = vmax.f32 %v172_v60, 0.0  ;;  %281 = vst [vmem:[%s808_s3 + $0xc8] sm:$0xff] %v224_v0  ;;  %282 = vst [vmem:[%s808_s3 + $0xd0] sm:$0xff] %v225_v3  ;;  %v111_v15 = vmul.f32 %v345_v1, %v47_v61  ;;  %v112_v16 = vmul.f32 %v345_v1, %v48_v62  ;;  %v64_v0 = vld [vmem:[%s805_s0 + $0x190] sm:$0xff]  ;;  %v65_v3 = vld [vmem:[%s805_s0 + $0x198] sm:$0xff] }
  0x1d   :  { %283 = vst [vmem:[%s808_s3 + $0xd8] sm:$0xff] %v226_v4  ;;  %v230_v14 = vmax.f32 %v173_v5, 0.0  ;;  %v113_v17 = vmul.f32 %v345_v1, %v49_v63  ;;  %284 = vst [vmem:[%s808_s3 + $0xe0] sm:$0xff] %v227_v9  ;;  %v174_v18 = vadd.f32 %v350_v2, %v110_v12  ;;  %v114_v19 = vmul.f32 %v345_v1, %v50_v6  ;;  %v63_v63 = vld [vmem:[%s805_s0 + $0x188] sm:$0xff] }
  0x1e   :  { %285 = vst [vmem:[%s808_s3 + $0xe8] sm:$0xff] %v228_v10  ;;  %286 = vst [vmem:[%s808_s3 + $0xf0] sm:$0xff] %v229_v11  ;;  %v115_v20 = vmul.f32 %v345_v1, %v51_v7  ;;  %v116_v21 = vmul.f32 %v345_v1, %v52_v8  ;;  %v175_v22 = vadd.f32 %v350_v2, %v111_v15  ;;  %v66_v8 = vld [vmem:[%s805_s0 + $0x1a0] sm:$0xff]  ;;  %v67_v9 = vld [vmem:[%s805_s0 + $0x1a8] sm:$0xff] }
  0x1f   :  { %287 = vst [vmem:[%s808_s3 + $0xf8] sm:$0xff] %v230_v14  ;;  %v176_v23 = vadd.f32 %v350_v2, %v112_v16  ;;  %v177_v24 = vadd.f32 %v350_v2, %v113_v17  ;;  %v117_v25 = vmul.f32 %v345_v1, %v53_v13  ;;  %v231_v27 = vmax.f32 %v174_v18, 0.0  ;;  %v68_v10 = vld [vmem:[%s805_s0 + $0x1b0] sm:$0xff]  ;;  %v69_v15 = vld [vmem:[%s805_s0 + $0x1b8] sm:$0xff] }
  0x20   :  { %v178_v28 = vadd.f32 %v350_v2, %v114_v19  ;;  %v179_v29 = vadd.f32 %v350_v2, %v115_v20  ;;  %v180_v30 = vadd.f32 %v350_v2, %v116_v21  ;;  %v232_v34 = vmax.f32 %v175_v22, 0.0 }
  0x21   :  { %v233_v35 = vmax.f32 %v176_v23, 0.0  ;;  %v234_v36 = vmax.f32 %v177_v24, 0.0  ;;  %v181_v37 = vadd.f32 %v350_v2, %v117_v25  ;;  %288 = vst [vmem:[%s808_s3 + $0x100] sm:$0xff] %v231_v27  ;;  %v118_v44 = vmul.f32 %v345_v1, %v54_v26 }
  0x22   :  { %v235_v41 = vmax.f32 %v178_v28, 0.0  ;;  %v236_v42 = vmax.f32 %v179_v29, 0.0  ;;  %v237_v43 = vmax.f32 %v180_v30, 0.0  ;;  %289 = vst [vmem:[%s808_s3 + $0x108] sm:$0xff] %v232_v34  ;;  %v119_v47 = vmul.f32 %v345_v1, %v55_v31  ;;  %v70_v28 = vld [vmem:[%s805_s0 + $0x1c0] sm:$0xff] }
  0x23   :  { %290 = vst [vmem:[%s808_s3 + $0x110] sm:$0xff] %v233_v35  ;;  %291 = vst [vmem:[%s808_s3 + $0x118] sm:$0xff] %v234_v36  ;;  %v238_v46 = vmax.f32 %v181_v37, 0.0  ;;  %v120_v48 = vmul.f32 %v345_v1, %v56_v32  ;;  %v121_v49 = vmul.f32 %v345_v1, %v57_v33  ;;  %v182_v50 = vadd.f32 %v350_v2, %v118_v44 }
  0x24   :  { %292 = vst [vmem:[%s808_s3 + $0x120] sm:$0xff] %v235_v41  ;;  %293 = vst [vmem:[%s808_s3 + $0x128] sm:$0xff] %v236_v42  ;;  %v122_v51 = vmul.f32 %v345_v1, %v58_v38  ;;  %v123_v52 = vmul.f32 %v345_v1, %v59_v39  ;;  %v124_v53 = vmul.f32 %v345_v1, %v60_v40 }
  0x25   :  { %294 = vst [vmem:[%s808_s3 + $0x130] sm:$0xff] %v237_v43  ;;  %295 = vst [vmem:[%s808_s3 + $0x138] sm:$0xff] %v238_v46  ;;  %v183_v54 = vadd.f32 %v350_v2, %v119_v47  ;;  %v184_v55 = vadd.f32 %v350_v2, %v120_v48  ;;  %v185_v56 = vadd.f32 %v350_v2, %v121_v49  ;;  %v239_v59 = vmax.f32 %v182_v50, 0.0 }
  0x26   :  { %v125_v57 = vmul.f32 %v345_v1, %v61_v45  ;;  %v186_v60 = vadd.f32 %v350_v2, %v122_v51  ;;  %v187_v61 = vadd.f32 %v350_v2, %v123_v52  ;;  %v188_v62 = vadd.f32 %v350_v2, %v124_v53 }
  0x27   :  { %v240_v4 = vmax.f32 %v183_v54, 0.0  ;;  %v241_v5 = vmax.f32 %v184_v55, 0.0  ;;  %v242_v6 = vmax.f32 %v185_v56, 0.0  ;;  %296 = vst [vmem:[%s808_s3 + $0x140] sm:$0xff] %v239_v59  ;;  %v126_v14 = vmul.f32 %v345_v1, %v62_v58 }
  0x28   :  { %v189_v7 = vadd.f32 %v350_v2, %v125_v57  ;;  %v243_v11 = vmax.f32 %v186_v60, 0.0  ;;  %v244_v12 = vmax.f32 %v187_v61, 0.0  ;;  %v245_v13 = vmax.f32 %v188_v62, 0.0 }
  0x29   :  { %297 = vst [vmem:[%s808_s3 + $0x148] sm:$0xff] %v240_v4  ;;  %298 = vst [vmem:[%s808_s3 + $0x150] sm:$0xff] %v241_v5  ;;  %v127_v17 = vmul.f32 %v345_v1, %v63_v63  ;;  %v128_v18 = vmul.f32 %v345_v1, %v64_v0  ;;  %v129_v19 = vmul.f32 %v345_v1, %v65_v3 }
  0x2a   :  { %299 = vst [vmem:[%s808_s3 + $0x158] sm:$0xff] %v242_v6  ;;  %v246_v16 = vmax.f32 %v189_v7, 0.0  ;;  %300 = vst [vmem:[%s808_s3 + $0x160] sm:$0xff] %v243_v11  ;;  %v190_v20 = vadd.f32 %v350_v2, %v126_v14  ;;  %v130_v21 = vmul.f32 %v345_v1, %v66_v8  ;;  %v131_v22 = vmul.f32 %v345_v1, %v67_v9 }
  0x2b   :  { %301 = vst [vmem:[%s808_s3 + $0x168] sm:$0xff] %v244_v12  ;;  %302 = vst [vmem:[%s808_s3 + $0x170] sm:$0xff] %v245_v13  ;;  %v132_v23 = vmul.f32 %v345_v1, %v68_v10  ;;  %v191_v24 = vadd.f32 %v350_v2, %v127_v17  ;;  %v192_v25 = vadd.f32 %v350_v2, %v128_v18 }
  0x2c   :  { %303 = vst [vmem:[%s808_s3 + $0x178] sm:$0xff] %v246_v16  ;;  %v193_v26 = vadd.f32 %v350_v2, %v129_v19  ;;  %v133_v27 = vmul.f32 %v345_v1, %v69_v15  ;;  %v247_v29 = vmax.f32 %v190_v20, 0.0  ;;  %v194_v30 = vadd.f32 %v350_v2, %v130_v21 }
  0x2d   :  { %v195_v31 = vadd.f32 %v350_v2, %v131_v22  ;;  %v196_v32 = vadd.f32 %v350_v2, %v132_v23  ;;  %v248_v33 = vmax.f32 %v191_v24, 0.0  ;;  %v249_v34 = vmax.f32 %v192_v25, 0.0 }
  0x2e   :  { %v250_v35 = vmax.f32 %v193_v26, 0.0  ;;  %v197_v36 = vadd.f32 %v350_v2, %v133_v27  ;;  %304 = vst [vmem:[%s808_s3 + $0x180] sm:$0xff] %v247_v29  ;;  %v251_v37 = vmax.f32 %v194_v30, 0.0  ;;  %v134_v40 = vmul.f32 %v345_v1, %v70_v28 }
  0x2f   :  { %v252_v38 = vmax.f32 %v195_v31, 0.0  ;;  %v253_v39 = vmax.f32 %v196_v32, 0.0  ;;  %305 = vst [vmem:[%s808_s3 + $0x188] sm:$0xff] %v248_v33  ;;  %306 = vst [vmem:[%s808_s3 + $0x190] sm:$0xff] %v249_v34 }
  0x30   :  { %307 = vst [vmem:[%s808_s3 + $0x198] sm:$0xff] %v250_v35  ;;  %v254_v41 = vmax.f32 %v197_v36, 0.0  ;;  %308 = vst [vmem:[%s808_s3 + $0x1a0] sm:$0xff] %v251_v37  ;;  %v198_v1 = vadd.f32 %v350_v2, %v134_v40 }
  0x31   :  { %309 = vst [vmem:[%s808_s3 + $0x1a8] sm:$0xff] %v252_v38  ;;  %310 = vst [vmem:[%s808_s3 + $0x1b0] sm:$0xff] %v253_v39 }
  0x32   :  { %311 = vst [vmem:[%s808_s3 + $0x1b8] sm:$0xff] %v254_v41  ;;  %v255_v42 = vmax.f32 %v198_v1, 0.0 }
  0x34   :  { %312 = vst [vmem:[%s808_s3 + $0x1c0] sm:$0xff] %v255_v42 }

// kernel: alexnet_forward.24
= control target key start
LH: loop header
LB: loop body
LE: loop exit
PB: predicated region body
PF: predicated region fallthrough
CT: control target
= control target key end

     0   :  { %s256_s0 = inlined_call_operand.vmem [shape: f32[3,104,128], index: 0, kind: input, shape index: {}]   ;;  %s257_s1 = inlined_call_operand.vmem [shape: f32[104,128], index: 1, kind: output, shape index: {}]  }
   0x1   :  { %v8_v0 = vld [vmem:[%s256_s0] sm:$0xff]  ;;  %v21_v1 = vld [vmem:[%s256_s0 + $0x68] sm:$0xff]  ;;  %v34_v2 = vld [vmem:[%s256_s0 + $0xd0] sm:$0xff] }
   0x2   :  { %v47_v3 = vmax.f32 %v8_v0, %v21_v1  ;;  %v9_v4 = vld [vmem:[%s256_s0 + $0x8] sm:$0xff]  ;;  %v22_v5 = vld [vmem:[%s256_s0 + $0x70] sm:$0xff]  ;;  %v35_v6 = vld [vmem:[%s256_s0 + $0xd8] sm:$0xff] }
   0x3   :  { %v49_v7 = vmax.f32 %v9_v4, %v22_v5  ;;  %v10_v8 = vld [vmem:[%s256_s0 + $0x10] sm:$0xff]  ;;  %v23_v9 = vld [vmem:[%s256_s0 + $0x78] sm:$0xff]  ;;  %v36_v10 = vld [vmem:[%s256_s0 + $0xe0] sm:$0xff] }
   0x4   :  { %v48_v11 = vmax.f32 %v47_v3, %v34_v2  ;;  %v51_v12 = vmax.f32 %v10_v8, %v23_v9  ;;  %v11_v13 = vld [vmem:[%s256_s0 + $0x18] sm:$0xff]  ;;  %v24_v14 = vld [vmem:[%s256_s0 + $0x80] sm:$0xff]  ;;  %v37_v15 = vld [vmem:[%s256_s0 + $0xe8] sm:$0xff] }
   0x5   :  { %v50_v16 = vmax.f32 %v49_v7, %v35_v6  ;;  %v53_v17 = vmax.f32 %v11_v13, %v24_v14  ;;  %v12_v18 = vld [vmem:[%s256_s0 + $0x20] sm:$0xff]  ;;  %v25_v19 = vld [vmem:[%s256_s0 + $0x88] sm:$0xff]  ;;  %v38_v20 = vld [vmem:[%s256_s0 + $0xf0] sm:$0xff] }
   0x6   :  { %73 = vst [vmem:[%s257_s1] sm:$0xff] %v48_v11  ;;  %v52_v21 = vmax.f32 %v51_v12, %v36_v10  ;;  %v55_v22 = vmax.f32 %v12_v18, %v25_v19  ;;  %v13_v23 = vld [vmem:[%s256_s0 + $0x28] sm:$0xff]  ;;  %v26_v24 = vld [vmem:[%s256_s0 + $0x90] sm:$0xff]  ;;  %v39_v25 = vld [vmem:[%s256_s0 + $0xf8] sm:$0xff] }
   0x7   :  { %74 = vst [vmem:[%s257_s1 + $0x8] sm:$0xff] %v50_v16  ;;  %v54_v26 = vmax.f32 %v53_v17, %v37_v15  ;;  %v57_v27 = vmax.f32 %v13_v23, %v26_v24  ;;  %v14_v28 = vld [vmem:[%s256_s0 + $0x30] sm:$0xff]  ;;  %v27_v29 = vld [vmem:[%s256_s0 + $0x98] sm:$0xff]  ;;  %v40_v30 = vld [vmem:[%s256_s0 + $0x100] sm:$0xff] }
   0x8   :  { %75 = vst [vmem:[%s257_s1 + $0x10] sm:$0xff] %v52_v21  ;;  %v56_v31 = vmax.f32 %v55_v22, %v38_v20  ;;  %v59_v32 = vmax.f32 %v14_v28, %v27_v29  ;;  %v15_v33 = vld [vmem:[%s256_s0 + $0x38] sm:$0xff]  ;;  %v28_v34 = vld [vmem:[%s256_s0 + $0xa0] sm:$0xff]  ;;  %v41_v35 = vld [vmem:[%s256_s0 + $0x108] sm:$0xff] }
   0x9   :  { %76 = vst [vmem:[%s257_s1 + $0x18] sm:$0xff] %v54_v26  ;;  %v58_v36 = vmax.f32 %v57_v27, %v39_v25  ;;  %v61_v37 = vmax.f32 %v15_v33, %v28_v34  ;;  %v16_v38 = vld [vmem:[%s256_s0 + $0x40] sm:$0xff]  ;;  %v29_v39 = vld [vmem:[%s256_s0 + $0xa8] sm:$0xff]  ;;  %v42_v40 = vld [vmem:[%s256_s0 + $0x110] sm:$0xff] }
   0xa   :  { %77 = vst [vmem:[%s257_s1 + $0x20] sm:$0xff] %v56_v31  ;;  %v60_v41 = vmax.f32 %v59_v32, %v40_v30  ;;  %v63_v42 = vmax.f32 %v16_v38, %v29_v39  ;;  %v17_v43 = vld [vmem:[%s256_s0 + $0x48] sm:$0xff]  ;;  %v30_v44 = vld [vmem:[%s256_s0 + $0xb0] sm:$0xff]  ;;  %v43_v45 = vld [vmem:[%s256_s0 + $0x118] sm:$0xff] }
   0xb   :  { %78 = vst [vmem:[%s257_s1 + $0x28] sm:$0xff] %v58_v36  ;;  %v62_v46 = vmax.f32 %v61_v37, %v41_v35  ;;  %v65_v47 = vmax.f32 %v17_v43, %v30_v44  ;;  %v18_v48 = vld [vmem:[%s256_s0 + $0x50] sm:$0xff]  ;;  %v31_v49 = vld [vmem:[%s256_s0 + $0xb8] sm:$0xff]  ;;  %v44_v50 = vld [vmem:[%s256_s0 + $0x120] sm:$0xff] }
   0xc   :  { %79 = vst [vmem:[%s257_s1 + $0x30] sm:$0xff] %v60_v41  ;;  %v64_v51 = vmax.f32 %v63_v42, %v42_v40  ;;  %v67_v52 = vmax.f32 %v18_v48, %v31_v49  ;;  %v19_v53 = vld [vmem:[%s256_s0 + $0x58] sm:$0xff]  ;;  %v32_v54 = vld [vmem:[%s256_s0 + $0xc0] sm:$0xff]  ;;  %v45_v55 = vld [vmem:[%s256_s0 + $0x128] sm:$0xff] }
   0xd   :  { %80 = vst [vmem:[%s257_s1 + $0x38] sm:$0xff] %v62_v46  ;;  %v66_v56 = vmax.f32 %v65_v47, %v43_v45  ;;  %v69_v57 = vmax.f32 %v19_v53, %v32_v54  ;;  %v20_v58 = vld [vmem:[%s256_s0 + $0x60] sm:$0xff]  ;;  %v33_v59 = vld [vmem:[%s256_s0 + $0xc8] sm:$0xff]  ;;  %v46_v60 = vld [vmem:[%s256_s0 + $0x130] sm:$0xff] }
   0xe   :  { %81 = vst [vmem:[%s257_s1 + $0x40] sm:$0xff] %v64_v51  ;;  %v68_v61 = vmax.f32 %v67_v52, %v44_v50  ;;  %v71_v62 = vmax.f32 %v20_v58, %v33_v59 }
   0xf   :  { %82 = vst [vmem:[%s257_s1 + $0x48] sm:$0xff] %v66_v56  ;;  %v70_v63 = vmax.f32 %v69_v57, %v45_v55 }
  0x10   :  { %83 = vst [vmem:[%s257_s1 + $0x50] sm:$0xff] %v68_v61  ;;  %v72_v0 = vmax.f32 %v71_v62, %v46_v60 }
  0x11   :  { %84 = vst [vmem:[%s257_s1 + $0x58] sm:$0xff] %v70_v63 }
  0x12   :  { %85 = vst [vmem:[%s257_s1 + $0x60] sm:$0xff] %v72_v0 }

// kernel: alexnet_forward.26
= control target key start
LH: loop header
LB: loop body
LE: loop exit
PB: predicated region body
PF: predicated region fallthrough
CT: control target
= control target key end

     0   :  { %v93_v0 = vmov 0.0   ;;  %s166_s1 = inlined_call_operand.vmem [shape: f32[1,128], index: 1, kind: output, shape index: {0}]   ;;  %s167_s2 = inlined_call_operand.vmem [shape: f32[1,128], index: 2, kind: output, shape index: {1}]   ;;  %s168_s0 = inlined_call_operand.vmem [shape: f32[104,128], index: 0, kind: input, shape index: {}]  }
   0x1   :  { %14 = vst [vmem:[%s166_s1] sm:$0x1] %v93_v0  ;;  %15 = vst [vmem:[%s167_s2] sm:$0x1] %v93_v0  ;;  %v16_v1 = vld [vmem:[%s168_s0] sm:$0xff]  ;;  %v17_v2 = vld [vmem:[%s168_s0 + $0x8] sm:$0xff] }
   0x2   :  { %v18_v3 = vld [vmem:[%s168_s0 + $0x10] sm:$0xff]  ;;  %v19_v4 = vld [vmem:[%s168_s0 + $0x18] sm:$0xff]  ;;  %v30_v5 = vadd.f32 %v17_v2, %v16_v1  ;;  %v51_v6 = vmul.f32 %v16_v1, %v16_v1  ;;  %v52_v7 = vmul.f32 %v17_v2, %v17_v2  ;;  %v20_v9 = vld [vmem:[%s168_s0 + $0x20] sm:$0xff] }
   0x3   :  { %v53_v8 = vmul.f32 %v18_v3, %v18_v3  ;;  %v54_v11 = vmul.f32 %v19_v4, %v19_v4  ;;  %v21_v13 = vld [vmem:[%s168_s0 + $0x28] sm:$0xff]  ;;  %v55_v15 = vmul.f32 %v20_v9, %v20_v9  ;;  %v22_v17 = vld [vmem:[%s168_s0 + $0x30] sm:$0xff]  ;;  %v23_v21 = vld [vmem:[%s168_s0 + $0x38] sm:$0xff] }
   0x4   :  { %v31_v10 = vadd.f32 %v30_v5, %v18_v3  ;;  %v64_v12 = vadd.f32 %v52_v7, %v51_v6  ;;  %v56_v19 = vmul.f32 %v21_v13, %v21_v13  ;;  %v57_v23 = vmul.f32 %v22_v17, %v22_v17  ;;  %v24_v25 = vld [vmem:[%s168_s0 + $0x40] sm:$0xff]  ;;  %v25_v29 = vld [vmem:[%s168_s0 + $0x48] sm:$0xff]  ;;  %v26_v33 = vld [vmem:[%s168_s0 + $0x50] sm:$0xff] }
   0x5   :  { %v58_v27 = vmul.f32 %v23_v21, %v23_v21  ;;  %v59_v31 = vmul.f32 %v24_v25, %v24_v25  ;;  %v60_v35 = vmul.f32 %v25_v29, %v25_v29  ;;  %v27_v37 = vld [vmem:[%s168_s0 + $0x58] sm:$0xff]  ;;  %v61_v39 = vmul.f32 %v26_v33, %v26_v33  ;;  %v28_v41 = vld [vmem:[%s168_s0 + $0x60] sm:$0xff] }
   0x6   :  { %v32_v14 = vadd.f32 %v31_v10, %v19_v4  ;;  %v65_v16 = vadd.f32 %v64_v12, %v53_v8  ;;  %v62_v43 = vmul.f32 %v27_v37, %v27_v37  ;;  %v63_v46 = vmul.f32 %v28_v41, %v28_v41 }
   0x8   :  { %v33_v18 = vadd.f32 %v32_v14, %v20_v9  ;;  %v66_v20 = vadd.f32 %v65_v16, %v54_v11  ;;  %v29_v59 = vld [vmem:[%s166_s1] sm:$0x1] }
   0x9   :  { %v50_v0 = vld [vmem:[%s167_s2] sm:$0x1] }
   0xa   :  { %v34_v22 = vadd.f32 %v33_v18, %v21_v13  ;;  %v67_v24 = vadd.f32 %v66_v20, %v55_v15 }
   0xc   :  { %v35_v26 = vadd.f32 %v34_v22, %v22_v17  ;;  %v68_v28 = vadd.f32 %v67_v24, %v56_v19 }
   0xe   :  { %v36_v30 = vadd.f32 %v35_v26, %v23_v21  ;;  %v69_v32 = vadd.f32 %v68_v28, %v57_v23 }
  0x10   :  { %v37_v34 = vadd.f32 %v36_v30, %v24_v25  ;;  %v70_v36 = vadd.f32 %v69_v32, %v58_v27 }
  0x12   :  { %v38_v38 = vadd.f32 %v37_v34, %v25_v29  ;;  %v71_v40 = vadd.f32 %v70_v36, %v59_v31 }
  0x14   :  { %v39_v42 = vadd.f32 %v38_v38, %v26_v33  ;;  %v72_v44 = vadd.f32 %v71_v40, %v60_v35 }
  0x16   :  { %v40_v45 = vadd.f32 %v39_v42, %v27_v37  ;;  %v73_v47 = vadd.f32 %v72_v44, %v61_v39 }
  0x18   :  { %v41_v48 = vadd.f32 %v40_v45, %v28_v41  ;;  %v74_v49 = vadd.f32 %v73_v47, %v62_v43 }
  0x1a   :  { %v42_v50 = vrot.slane %v41_v48, 4  ;;  %v75_v51 = vadd.f32 %v74_v49, %v63_v46 }
  0x1c   :  { %v43_v52 = vadd.f32 %v42_v50, %v41_v48  ;;  %v76_v53 = vrot.slane %v75_v51, 4 }
  0x1e   :  { %v44_v54 = vrot.slane %v43_v52, 2  ;;  %v77_v55 = vadd.f32 %v76_v53, %v75_v51 }
  0x20   :  { %v45_v56 = vadd.f32 %v44_v54, %v43_v52  ;;  %v78_v57 = vrot.slane %v77_v55, 2 }
  0x22   :  { %v46_v58 = vrot.slane %v45_v56, 1  ;;  %v79_v60 = vadd.f32 %v78_v57, %v77_v55 }
  0x24   :  { %v47_v61 = vadd.f32 %v46_v58, %v45_v56  ;;  %v80_v62 = vrot.slane %v79_v60, 1 }
  0x26   :  { %v48_v63 = vadd.f32 %v47_v61, %v29_v59  ;;  %v81_v1 = vadd.f32 %v80_v62, %v79_v60 }
  0x28   :  { %49 = vst [vmem:[%s166_s1] sm:$0x1] %v48_v63  ;;  %v82_v2 = vadd.f32 %v81_v1, %v50_v0 }
  0x2a   :  { %83 = vst [vmem:[%s167_s2] sm:$0x1] %v82_v2 }

// kernel: alexnet_forward.25
= control target key start
LH: loop header
LB: loop body
LE: loop exit
PB: predicated region body
PF: predicated region fallthrough
CT: control target
= control target key end

     0   :  { %s2872_s1 = inlined_call_operand.vmem [shape: bf16[1280,128], index: 1, kind: input, shape index: {}]   ;;  %s2873_s0 = inlined_call_operand.vmem [shape: bf16[112,1280], index: 0, kind: input, shape index: {}]   ;;  %s2874_s2 = inlined_call_operand.vmem [shape: f32[1,128], index: 2, kind: input, shape index: {}]   ;;  %s2875_s3 = inlined_call_operand.vmem [shape: f32[112,128], index: 3, kind: output, shape index: {}]  }
   0x1   :  { %v2093_v0 = vld [vmem:[%s2872_s1 + $0x40] sm:$0xff]   ;;  %v2095_v2 = vld [vmem:[%s2872_s1 + $0x48] sm:$0xff]   ;;  %v2097_v4 = vld [vmem:[%s2872_s1 + $0x50] sm:$0xff]  }
   0x2   :  { %v2094_v1 = vld [vmem:[%s2872_s1] sm:$0xff]   ;;  %1787 = vmatprep.subr.bf16.mxu0 %v2093_v0  ;;  %2077 = vmatprep.subr.bf16.mxu1 %v2093_v0  ;;  %v2096_v3 = vld [vmem:[%s2872_s1 + $0x8] sm:$0xff]   ;;  %v2098_v5 = vld [vmem:[%s2872_s1 + $0x10] sm:$0xff]  }
   0x3   :  { %1788 = vmatpush3.bf16.msra.mxu0 %v2094_v1  ;;  %2085 = vmatpush3.bf16.msra.mxu1 %v2094_v1  ;;  %v2099_v6 = vld [vmem:[%s2872_s1 + $0x58] sm:$0xff]   ;;  %v2101_v8 = vld [vmem:[%s2872_s1 + $0x60] sm:$0xff]   ;;  %v2103_v10 = vld [vmem:[%s2872_s1 + $0x68] sm:$0xff]  }
   0x4   :  { %1789 = vmatprep.subr.bf16.mxu0 %v2095_v2  ;;  %2078 = vmatprep.subr.bf16.mxu1 %v2095_v2  ;;  %v2100_v7 = vld [vmem:[%s2872_s1 + $0x18] sm:$0xff]   ;;  %v2102_v9 = vld [vmem:[%s2872_s1 + $0x20] sm:$0xff]   ;;  %v2104_v13 = vld [vmem:[%s2872_s1 + $0x28] sm:$0xff]  }
   0x5   :  { %v2111_v11 = vld [vmem:[%s2873_s0 + $0x4] ss:$40 sps:$4 sm:$0xff]   ;;  %v2105_v14 = vld [vmem:[%s2872_s1 + $0x70] sm:$0xff]   ;;  %v2107_v16 = vld [vmem:[%s2872_s1 + $0x78] sm:$0xff]  }
   0x6   :  { %v2114_v12 = vld [vmem:[%s2873_s0 + $0x144] ss:$40 sps:$4 sm:$0xff]   ;;  %1139 = vmatprep.mubr.bf16.mxu0 %v2111_v11  ;;  %v2106_v15 = vld [vmem:[%s2872_s1 + $0x30] sm:$0xff]   ;;  %v2108_v17 = vld [vmem:[%s2872_s1 + $0x38] sm:$0xff]  }
   0x7   :  { %1790 = vmatpush3.bf16.msra.mxu0 %v2096_v3  ;;  %2086 = vmatpush3.bf16.msra.mxu1 %v2096_v3  ;;  %v2115_v18 = vld [vmem:[%s2872_s1 + $0xc0] sm:$0xff]   ;;  %v2119_v24 = vld [vmem:[%s2872_s1 + $0xc8] sm:$0xff]   ;;  %v2123_v28 = vld [vmem:[%s2873_s0 + $0x54] ss:$40 sps:$4 sm:$0xff]  }
   0x8   :  { %1791 = vmatprep.subr.bf16.mxu0 %v2097_v4  ;;  %2079 = vmatprep.subr.bf16.mxu1 %v2097_v4  ;;  %v2109_v19 = vld [vmem:[%s2873_s0] ss:$40 sps:$4 sm:$0xff]   ;;  %v2132_v29 = vld [vmem:[%s2873_s0 + $0x194] ss:$40 sps:$4 sm:$0xff]   ;;  %v2125_v31 = vld [vmem:[%s2873_s0 + $0x50] ss:$40 sps:$4 sm:$0xff]  }
   0x9   :  { %1171 = vmatprep.mubr.bf16.mxu1 %v2114_v12  ;;  %v2112_v20 = vld [vmem:[%s2873_s0 + $0x140] ss:$40 sps:$4 sm:$0xff]   ;;  %v2126_v30 = vld [vmem:[%s2872_s1 + $0xd0] sm:$0xff]   ;;  %v2130_v36 = vld [vmem:[%s2872_s1 + $0xd8] sm:$0xff]  }
   0xa   :  { %v2116_v21 = vld [vmem:[%s2872_s1 + $0x140] sm:$0xff]   ;;  %v2120_v25 = vld [vmem:[%s2872_s1 + $0x148] sm:$0xff]   ;;  %v2127_v32 = vld [vmem:[%s2872_s1 + $0x150] sm:$0xff]  }
   0xb   :  { %1792 = vmatpush3.bf16.msra.mxu0 %v2098_v5  ;;  %2087 = vmatpush3.bf16.msra.mxu1 %v2098_v5  ;;  %v2117_v22 = vld [vmem:[%s2872_s1 + $0x80] sm:$0xff]   ;;  %v2121_v26 = vld [vmem:[%s2872_s1 + $0x88] sm:$0xff]   ;;  %v2128_v33 = vld [vmem:[%s2872_s1 + $0x90] sm:$0xff]  }
   0xc   :  { %1793 = vmatprep.subr.bf16.mxu0 %v2099_v6  ;;  %2080 = vmatprep.subr.bf16.mxu1 %v2099_v6  ;;  %v2118_v23 = vld [vmem:[%s2872_s1 + $0x100] sm:$0xff]   ;;  %v2122_v27 = vld [vmem:[%s2872_s1 + $0x108] sm:$0xff]   ;;  %v2129_v34 = vld [vmem:[%s2872_s1 + $0x110] sm:$0xff]  }
   0xd   :  { %v2136_v35 = vld [vmem:[%s2873_s0 + $0x190] ss:$40 sps:$4 sm:$0xff]   ;;  %v2137_v39 = vld [vmem:[%s2873_s0 + $0xa4] ss:$40 sps:$4 sm:$0xff]   ;;  %v2139_v42 = vld [vmem:[%s2873_s0 + $0xa0] ss:$40 sps:$4 sm:$0xff]  }
   0xe   :  { %v2131_v37 = vld [vmem:[%s2872_s1 + $0x158] sm:$0xff]   ;;  %v2140_v41 = vld [vmem:[%s2872_s1 + $0xe0] sm:$0xff]   ;;  %v2144_v47 = vld [vmem:[%s2872_s1 + $0xe8] sm:$0xff]  }
   0xf   :  { %1794 = vmatpush3.bf16.msra.mxu0 %v2100_v7  ;;  %2088 = vmatpush3.bf16.msra.mxu1 %v2100_v7  ;;  %v2134_v38 = vld [vmem:[%s2872_s1 + $0x98] sm:$0xff]   ;;  %v2141_v43 = vld [vmem:[%s2872_s1 + $0x160] sm:$0xff]   ;;  %v2145_v49 = vld [vmem:[%s2872_s1 + $0x168] sm:$0xff]  }
  0x10   :  { %1795 = vmatprep.subr.bf16.mxu0 %v2101_v8  ;;  %2081 = vmatprep.subr.bf16.mxu1 %v2101_v8  ;;  %v2135_v40 = vld [vmem:[%s2872_s1 + $0x118] sm:$0xff]   ;;  %v2142_v44 = vld [vmem:[%s2872_s1 + $0xa0] sm:$0xff]   ;;  %v2148_v50 = vld [vmem:[%s2872_s1 + $0xa8] sm:$0xff]  }
  0x11   :  { %v2146_v45 = vld [vmem:[%s2873_s0 + $0x1e4] ss:$40 sps:$4 sm:$0xff]   ;;  %v2150_v48 = vld [vmem:[%s2873_s0 + $0x1e0] ss:$40 sps:$4 sm:$0xff]   ;;  %v2151_v51 = vld [vmem:[%s2873_s0 + $0xf4] ss:$40 sps:$4 sm:$0xff]  }
  0x12   :  { %v2143_v46 = vld [vmem:[%s2872_s1 + $0x120] sm:$0xff]   ;;  %v2149_v52 = vld [vmem:[%s2872_s1 + $0x128] sm:$0xff]   ;;  %v2154_v53 = vld [vmem:[%s2872_s1 + $0xf0] sm:$0xff]  }
  0x13   :  { %1796 = vmatpush3.bf16.msra.mxu0 %v2102_v9  ;;  %2089 = vmatpush3.bf16.msra.mxu1 %v2102_v9  ;;  %v2153_v54 = vld [vmem:[%s2873_s0 + $0xf0] ss:$40 sps:$4 sm:$0xff]   ;;  %v2164_v61 = vld [vmem:[%s2873_s0 + $0xc] ss:$40 sps:$4 sm:$0xff]   ;;  %v2168_v2 = vld [vmem:[%s2872_s1 + $0x1c0] sm:$0xff]  }
  0x14   :  { %1797 = vmatprep.subr.bf16.mxu0 %v2103_v10  ;;  %2082 = vmatprep.subr.bf16.mxu1 %v2103_v10  ;;  %v2155_v55 = vld [vmem:[%s2872_s1 + $0x170] sm:$0xff]   ;;  %v2158_v58 = vld [vmem:[%s2872_s1 + $0xf8] sm:$0xff]   ;;  %v2169_v3 = vld [vmem:[%s2872_s1 + $0x180] sm:$0xff]  }
  0x15   :  { %v2156_v56 = vld [vmem:[%s2872_s1 + $0xb0] sm:$0xff]   ;;  %v2159_v59 = vld [vmem:[%s2872_s1 + $0x178] sm:$0xff]   ;;  %v2170_v4 = vld [vmem:[%s2872_s1 + $0x240] sm:$0xff]  }
  0x16   :  { %v2157_v57 = vld [vmem:[%s2872_s1 + $0x130] sm:$0xff]   ;;  %v2160_v60 = vld [vmem:[%s2872_s1 + $0xb8] sm:$0xff]   ;;  %v2171_v5 = vld [vmem:[%s2872_s1 + $0x200] sm:$0xff]  }
  0x17   :  { %1798 = vmatpush3.bf16.msra.mxu0 %v2104_v13  ;;  %2090 = vmatpush3.bf16.msra.mxu1 %v2104_v13  ;;  %v2161_v62 = vld [vmem:[%s2872_s1 + $0x138] sm:$0xff]   ;;  %v2162_v0 = vld [vmem:[%s2873_s0 + $0x8] ss:$40 sps:$4 sm:$0xff]   ;;  %v2174_v7 = vld [vmem:[%s2873_s0 + $0x64] ss:$40 sps:$4 sm:$0xff]  }
  0x18   :  { %1799 = vmatprep.subr.bf16.mxu0 %v2105_v14  ;;  %2083 = vmatprep.subr.bf16.mxu1 %v2105_v14  ;;  %v2167_v63 = vld [vmem:[%s2873_s0 + $0x14] ss:$40 sps:$4 sm:$0xff]   ;;  %v2165_v1 = vld [vmem:[%s2873_s0 + $0x10] ss:$40 sps:$4 sm:$0xff]   ;;  %v2176_v8 = vld [vmem:[%s2872_s1 + $0x1c8] sm:$0xff]  }
  0x19   :  { %v2172_v6 = vld [vmem:[%s2873_s0 + $0x5c] ss:$40 sps:$4 sm:$0xff]   ;;  %v2177_v9 = vld [vmem:[%s2873_s0 + $0x58] ss:$40 sps:$4 sm:$0xff]   ;;  %v2179_v11 = vld [vmem:[%s2872_s1 + $0x188] sm:$0xff]  }
  0x1a   :  { %v2178_v10 = vld [vmem:[%s2873_s0 + $0x60] ss:$40 sps:$4 sm:$0xff]   ;;  %v2182_v14 = vld [vmem:[%s2872_s1 + $0x1d0] sm:$0xff]  }
  0x1b   :  { %1800 = vmatpush3.bf16.msra.mxu0 %v2106_v15  ;;  %2091 = vmatpush3.bf16.msra.mxu1 %v2106_v15  ;;  %v2180_v12 = vld [vmem:[%s2872_s1 + $0x248] sm:$0xff]  }
  0x1c   :  { %1801 = vmatprep.subr.bf16.mxu0 %v2107_v16  ;;  %2084 = vmatprep.subr.bf16.mxu1 %v2107_v16  ;;  %v2181_v13 = vld [vmem:[%s2872_s1 + $0x208] sm:$0xff]   ;;  %v2185_v16 = vld [vmem:[%s2873_s0 + $0xb4] ss:$40 sps:$4 sm:$0xff]  }
  0x1d   :  { %v2183_v15 = vld [vmem:[%s2873_s0 + $0xac] ss:$40 sps:$4 sm:$0xff]  }
  0x1f   :  { %1802 = vmatpush3.bf16.msra.mxu0 %v2108_v17  ;;  %2092 = vmatpush3.bf16.msra.mxu1 %v2108_v17  ;;  %v2187_v17 = vld [vmem:[%s2872_s1 + $0x190] sm:$0xff]  }
  0x20   :  { %1845 = vmatprep.subr.bf16.mxu1 %v2115_v18  ;;  %1903 = vmatprep.subr.bf16.mxu0 %v2116_v21  ;;  %v2188_v18 = vld [vmem:[%s2873_s0 + $0xa8] ss:$40 sps:$4 sm:$0xff]  }
  0x21   :  { %v2191_v21 = vld [vmem:[%s2872_s1 + $0x210] sm:$0xff]  }
  0x22   :  { %1140 = vmatmul.mubr.bf16.vlgmr.msra.gmra.mrb[0].mxu0 %v2109_v19  ;;  %1172 = vmatmul.mubr.bf16.vlgmr.msra.gmra.mrb[0].mxu1 %v2112_v20  ;;  %v2189_v19 = vld [vmem:[%s2873_s0 + $0xb0] ss:$40 sps:$4 sm:$0xff]  }
  0x23   :  { %1846 = vmatpush3.bf16.msra.mxu1 %v2117_v22  ;;  %1904 = vmatpush3.bf16.msra.mxu0 %v2118_v23  ;;  %v2190_v20 = vld [vmem:[%s2872_s1 + $0x250] sm:$0xff]   ;;  %v2192_v22 = vld [vmem:[%s2872_s1 + $0x1d8] sm:$0xff]  }
  0x24   :  { %1847 = vmatprep.subr.bf16.mxu1 %v2119_v24  ;;  %1905 = vmatprep.subr.bf16.mxu0 %v2120_v25  ;;  %v2193_v23 = vld [vmem:[%s2872_s1 + $0x198] sm:$0xff]   ;;  %v2196_v25 = vld [vmem:[%s2873_s0 + $0x104] ss:$40 sps:$4 sm:$0xff]  }
  0x25   :  { %1147 = vmatprep.mubr.bf16.mxu0 %v2123_v28  ;;  %1179 = vmatprep.mubr.bf16.mxu1 %v2132_v29  ;;  %v2194_v24 = vld [vmem:[%s2873_s0 + $0xfc] ss:$40 sps:$4 sm:$0xff]   ;;  %v2199_v28 = vld [vmem:[%s2873_s0 + $0xf8] ss:$40 sps:$4 sm:$0xff]  }
  0x26   :  { %v2200_v29 = vld [vmem:[%s2873_s0 + $0x100] ss:$40 sps:$4 sm:$0xff]  }
  0x27   :  { %1848 = vmatpush3.bf16.msra.mxu1 %v2121_v26  ;;  %1906 = vmatpush3.bf16.msra.mxu0 %v2122_v27  ;;  %v2198_v26 = vld [vmem:[%s2872_s1 + $0x258] sm:$0xff]  }
  0x28   :  { %1849 = vmatprep.subr.bf16.mxu1 %v2126_v30  ;;  %1907 = vmatprep.subr.bf16.mxu0 %v2127_v32  ;;  %v2201_v27 = vld [vmem:[%s2872_s1 + $0x218] sm:$0xff]   ;;  %v2202_v30 = vld [vmem:[%s2872_s1 + $0x1e0] sm:$0xff]  }
  0x29   :  { %v2204_v32 = vld [vmem:[%s2872_s1 + $0x260] sm:$0xff]  }
  0x2a   :  { %1148 = vmatmul.mubr.bf16.gmra.mrb[4].mxu0 %v2125_v31  ;;  %1180 = vmatmul.mubr.bf16.gmra.mrb[4].mxu1 %v2136_v35  ;;  %v2203_v31 = vld [vmem:[%s2872_s1 + $0x1a0] sm:$0xff]  }
  0x2b   :  { %1850 = vmatpush3.bf16.msra.mxu1 %v2128_v33  ;;  %1908 = vmatpush3.bf16.msra.mxu0 %v2129_v34  ;;  %v2205_v33 = vld [vmem:[%s2873_s0 + $0x14c] ss:$40 sps:$4 sm:$0xff]   ;;  %v2209_v35 = vld [vmem:[%s2872_s1 + $0x220] sm:$0xff]  }
  0x2c   :  { %1851 = vmatprep.subr.bf16.mxu1 %v2130_v36  ;;  %1909 = vmatprep.subr.bf16.mxu0 %v2131_v37  ;;  %v2207_v34 = vld [vmem:[%s2873_s0 + $0x154] ss:$40 sps:$4 sm:$0xff]   ;;  %v2212_v36 = vld [vmem:[%s2872_s1 + $0x1e8] sm:$0xff]  }
  0x2d   :  { %1155 = vmatprep.mubr.bf16.mxu0 %v2137_v39  ;;  %1187 = vmatprep.mubr.bf16.mxu1 %v2146_v45  ;;  %v2210_v37 = vld [vmem:[%s2873_s0 + $0x148] ss:$40 sps:$4 sm:$0xff]  }
  0x2e   :  { %v2213_v39 = vld [vmem:[%s2872_s1 + $0x1a8] sm:$0xff]   ;;  %v2223_v45 = vld [vmem:[%s2872_s1 + $0x1b0] sm:$0xff]  }
  0x2f   :  { %1852 = vmatpush3.bf16.msra.mxu1 %v2134_v38  ;;  %1910 = vmatpush3.bf16.msra.mxu0 %v2135_v40  ;;  %v2211_v38 = vld [vmem:[%s2873_s0 + $0x150] ss:$40 sps:$4 sm:$0xff]   ;;  %v2214_v40 = vld [vmem:[%s2872_s1 + $0x268] sm:$0xff]  }
  0x30   :  { %1853 = vmatprep.subr.bf16.mxu1 %v2140_v41  ;;  %1911 = vmatprep.subr.bf16.mxu0 %v2141_v43  ;;  %v2215_v41 = vld [vmem:[%s2872_s1 + $0x228] sm:$0xff]  }
  0x31   :  { %v2218_v43 = vld [vmem:[%s2873_s0 + $0x1a4] ss:$40 sps:$4 sm:$0xff]  }
  0x32   :  { %1156 = vmatmul.mubr.bf16.gmra.mrb[8].mxu0 %v2139_v42  ;;  %1188 = vmatmul.mubr.bf16.gmra.mrb[8].mxu1 %v2150_v48  ;;  %v2216_v42 = vld [vmem:[%s2873_s0 + $0x19c] ss:$40 sps:$4 sm:$0xff]   ;;  %v2225_v48 = vld [vmem:[%s2872_s1 + $0x230] sm:$0xff]  }
  0x33   :  { %1854 = vmatpush3.bf16.msra.mxu1 %v2142_v44  ;;  %1912 = vmatpush3.bf16.msra.mxu0 %v2143_v46  ;;  %v2222_v44 = vld [vmem:[%s2872_s1 + $0x1f0] sm:$0xff]   ;;  %v2220_v46 = vld [vmem:[%s2873_s0 + $0x198] ss:$40 sps:$4 sm:$0xff]  }
  0x34   :  { %1855 = vmatprep.subr.bf16.mxu1 %v2144_v47  ;;  %1913 = vmatprep.subr.bf16.mxu0 %v2145_v49  ;;  %v2224_v47 = vld [vmem:[%s2872_s1 + $0x270] sm:$0xff]   ;;  %v2221_v49 = vld [vmem:[%s2873_s0 + $0x1a0] ss:$40 sps:$4 sm:$0xff]  }
  0x35   :  { %1163 = vmatprep.mubr.bf16.mxu0 %v2151_v51  ;;  %1228 = vmatprep.mubr.bf16.mxu1 %v2164_v61  ;;  %v2228_v51 = vld [vmem:[%s2873_s0 + $0x1f4] ss:$40 sps:$4 sm:$0xff]   ;;  %v2239_v61 = vld [vmem:[%s2873_s0 + $0x20] ss:$40 sps:$4 sm:$0xff]  }
  0x37   :  { %1856 = vmatpush3.bf16.msra.mxu1 %v2148_v50  ;;  %1914 = vmatpush3.bf16.msra.mxu0 %v2149_v52  ;;  %v2226_v50 = vld [vmem:[%s2873_s0 + $0x1ec] ss:$40 sps:$4 sm:$0xff]   ;;  %v2232_v52 = vld [vmem:[%s2872_s1 + $0x1f8] sm:$0xff]  }
  0x38   :  { %1857 = vmatprep.subr.bf16.mxu1 %v2154_v53  ;;  %1915 = vmatprep.subr.bf16.mxu0 %v2155_v55  ;;  %v2233_v53 = vld [vmem:[%s2872_s1 + $0x1b8] sm:$0xff]  }
  0x39   :  { %v2235_v55 = vld [vmem:[%s2872_s1 + $0x238] sm:$0xff]  }
  0x3a   :  { %1164 = vmatmul.mubr.bf16.gmra.mrb[12].mxu0 %v2153_v54  ;;  %v2234_v54 = vld [vmem:[%s2872_s1 + $0x278] sm:$0xff]  }
  0x3b   :  { %1858 = vmatpush3.bf16.msra.mxu1 %v2156_v56  ;;  %1916 = vmatpush3.bf16.msra.mxu0 %v2157_v57  ;;  %v2230_v56 = vld [vmem:[%s2873_s0 + $0x1e8] ss:$40 sps:$4 sm:$0xff]  }
  0x3c   :  { %1859 = vmatprep.subr.bf16.mxu1 %v2158_v58  ;;  %1917 = vmatprep.subr.bf16.mxu0 %v2159_v59  ;;  %v2231_v57 = vld [vmem:[%s2873_s0 + $0x1f0] ss:$40 sps:$4 sm:$0xff]   ;;  %v2238_v58 = vld [vmem:[%s2873_s0 + $0x1c] ss:$40 sps:$4 sm:$0xff]  }
  0x3d   :  { %1317 = vmatprep.mubr.bf16.mxu0 %v2167_v63  ;;  %v2241_v59 = vld [vmem:[%s2873_s0 + $0x24] ss:$40 sps:$4 sm:$0xff]   ;;  %v2244_v63 = vld [vmem:[%s2873_s0 + $0x74] ss:$40 sps:$4 sm:$0xff]  }
  0x3f   :  { %1860 = vmatpush3.bf16.msra.mxu1 %v2160_v60  ;;  %1918 = vmatpush3.bf16.msra.mxu0 %v2161_v62  ;;  %v2236_v60 = vld [vmem:[%s2873_s0 + $0x18] ss:$40 sps:$4 sm:$0xff]   ;;  %v2242_v62 = vld [vmem:[%s2873_s0 + $0x6c] ss:$40 sps:$4 sm:$0xff]  }
  0x40   :  { %1961 = vmatprep.subr.bf16.mxu1 %v2168_v2  ;;  %2019 = vmatprep.subr.bf16.mxu0 %v2170_v4  ;;  %v2248_v2 = vld [vmem:[%s2873_s0 + $0xbc] ss:$40 sps:$4 sm:$0xff]   ;;  %v2252_v4 = vld [vmem:[%s2873_s0 + $0xb8] ss:$40 sps:$4 sm:$0xff]  }
  0x42   :  { %1229 = vmatmul.mubr.bf16.vlgmr.msra.gmra.mrb[12].mxu1 %v2162_v0  ;;  %1318 = vmatmul.mubr.bf16.vlgmr.msra.gmra.mrb[16].mxu0 %v2165_v1  ;;  %v2246_v0 = vld [vmem:[%s2873_s0 + $0x68] ss:$40 sps:$4 sm:$0xff]  }
  0x43   :  { %1962 = vmatpush3.bf16.msra.mxu1 %v2169_v3  ;;  %2020 = vmatpush3.bf16.msra.mxu0 %v2171_v5  ;;  %v2247_v1 = vld [vmem:[%s2873_s0 + $0x70] ss:$40 sps:$4 sm:$0xff]   ;;  %v2250_v3 = vld [vmem:[%s2873_s0 + $0xc4] ss:$40 sps:$4 sm:$0xff]   ;;  %v2253_v5 = vld [vmem:[%s2873_s0 + $0xc0] ss:$40 sps:$4 sm:$0xff]  }
  0x44   :  { %1236 = vmatprep.mubr.bf16.mxu1 %v2172_v6  ;;  %1325 = vmatprep.mubr.bf16.mxu0 %v2174_v7  ;;  %v2254_v6 = vld [vmem:[%s2873_s0 + $0x10c] ss:$40 sps:$4 sm:$0xff]  }
  0x45   :  { %1963 = vmatprep.subr.bf16.mxu1 %v2176_v8  ;;  %2021 = vmatprep.subr.bf16.mxu0 %v2180_v12  ;;  %v2256_v7 = vld [vmem:[%s2873_s0 + $0x114] ss:$40 sps:$4 sm:$0xff]   ;;  %v2258_v8 = vld [vmem:[%s2873_s0 + $0x108] ss:$40 sps:$4 sm:$0xff]   ;;  %v2264_v12 = vld [vmem:[%s2873_s0 + $0x158] ss:$40 sps:$4 sm:$0xff]  }
  0x47   :  { %1964 = vmatpush3.bf16.msra.mxu1 %v2179_v11  ;;  %2022 = vmatpush3.bf16.msra.mxu0 %v2181_v13  ;;  %v2262_v11 = vld [vmem:[%s2873_s0 + $0x164] ss:$40 sps:$4 sm:$0xff]   ;;  %v2265_v13 = vld [vmem:[%s2873_s0 + $0x160] ss:$40 sps:$4 sm:$0xff]  }
  0x48   :  { %1965 = vmatprep.subr.bf16.mxu1 %v2182_v14  ;;  %2023 = vmatprep.subr.bf16.mxu0 %v2190_v20  ;;  %v2266_v14 = vld [vmem:[%s2873_s0 + $0x1ac] ss:$40 sps:$4 sm:$0xff]   ;;  %v2276_v20 = vld [vmem:[%s2873_s0 + $0x1f8] ss:$40 sps:$4 sm:$0xff]  }
  0x4a   :  { %1237 = vmatmul.mubr.bf16.gmra.mrb[16].mxu1 %v2177_v9  ;;  %1326 = vmatmul.mubr.bf16.gmra.mrb[20].mxu0 %v2178_v10  ;;  %v2259_v9 = vld [vmem:[%s2873_s0 + $0x110] ss:$40 sps:$4 sm:$0xff]   ;;  %v2260_v10 = vld [vmem:[%s2873_s0 + $0x15c] ss:$40 sps:$4 sm:$0xff]  }
  0x4b   :  { %1244 = vmatprep.mubr.bf16.mxu1 %v2183_v15  ;;  %1333 = vmatprep.mubr.bf16.mxu0 %v2185_v16  ;;  %v2268_v15 = vld [vmem:[%s2873_s0 + $0x1b4] ss:$40 sps:$4 sm:$0xff]   ;;  %v2270_v16 = vld [vmem:[%s2873_s0 + $0x1a8] ss:$40 sps:$4 sm:$0xff]  }
  0x4c   :  { %1966 = vmatpush3.bf16.msra.mxu1 %v2187_v17  ;;  %2024 = vmatpush3.bf16.msra.mxu0 %v2191_v21  ;;  %v2271_v17 = vld [vmem:[%s2873_s0 + $0x1b0] ss:$40 sps:$4 sm:$0xff]   ;;  %v2277_v21 = vld [vmem:[%s2873_s0 + $0x200] ss:$40 sps:$4 sm:$0xff]  }
  0x4d   :  { %1967 = vmatprep.subr.bf16.mxu1 %v2192_v22  ;;  %2025 = vmatprep.subr.bf16.mxu0 %v2198_v26 }
  0x50   :  { %1968 = vmatpush3.bf16.msra.mxu1 %v2193_v23  ;;  %2026 = vmatpush3.bf16.msra.mxu0 %v2201_v27 }
  0x51   :  { %1969 = vmatprep.subr.bf16.mxu1 %v2202_v30  ;;  %2027 = vmatprep.subr.bf16.mxu0 %v2204_v32 }
  0x52   :  { %1245 = vmatmul.mubr.bf16.gmra.mrb[20].mxu1 %v2188_v18  ;;  %1334 = vmatmul.mubr.bf16.gmra.mrb[24].mxu0 %v2189_v19  ;;  %v2272_v18 = vld [vmem:[%s2873_s0 + $0x1fc] ss:$40 sps:$4 sm:$0xff]  }
  0x53   :  { %1252 = vmatprep.mubr.bf16.mxu1 %v2194_v24  ;;  %1341 = vmatprep.mubr.bf16.mxu0 %v2196_v25  ;;  %v2274_v19 = vld [vmem:[%s2873_s0 + $0x204] ss:$40 sps:$4 sm:$0xff]  }
  0x54   :  { %1970 = vmatpush3.bf16.msra.mxu1 %v2203_v31  ;;  %2028 = vmatpush3.bf16.msra.mxu0 %v2209_v35 }
  0x55   :  { %1971 = vmatprep.subr.bf16.mxu1 %v2212_v36  ;;  %2029 = vmatprep.subr.bf16.mxu0 %v2214_v40 }
  0x58   :  { %1972 = vmatpush3.bf16.msra.mxu1 %v2213_v39  ;;  %2030 = vmatpush3.bf16.msra.mxu0 %v2215_v41 }
  0x59   :  { %1973 = vmatprep.subr.bf16.mxu1 %v2222_v44  ;;  %2031 = vmatprep.subr.bf16.mxu0 %v2224_v47 }
  0x5a   :  { %1253 = vmatmul.mubr.bf16.gmra.mrb[24].mxu1 %v2199_v28  ;;  %1342 = vmatmul.mubr.bf16.gmra.mrb[28].mxu0 %v2200_v29 }
  0x5b   :  { %1260 = vmatprep.mubr.bf16.mxu1 %v2205_v33  ;;  %1349 = vmatprep.mubr.bf16.mxu0 %v2207_v34 }
  0x5c   :  { %1974 = vmatpush3.bf16.msra.mxu1 %v2223_v45  ;;  %2032 = vmatpush3.bf16.msra.mxu0 %v2225_v48 }
  0x5d   :  { %1975 = vmatprep.subr.bf16.mxu1 %v2232_v52  ;;  %2033 = vmatprep.subr.bf16.mxu0 %v2234_v54 }
  0x60   :  { %1976 = vmatpush3.bf16.msra.mxu1 %v2233_v53  ;;  %2034 = vmatpush3.bf16.msra.mxu0 %v2235_v55 }
  0x62   :  { %1261 = vmatmul.mubr.bf16.gmra.mrb[28].mxu1 %v2210_v37  ;;  %1350 = vmatmul.mubr.bf16.gmra.mrb[32].mxu0 %v2211_v38 }
  0x63   :  { %1268 = vmatprep.mubr.bf16.mxu1 %v2216_v42  ;;  %1357 = vmatprep.mubr.bf16.mxu0 %v2218_v43 }
  0x6a   :  { %1269 = vmatmul.mubr.bf16.gmra.mrb[32].mxu1 %v2220_v46  ;;  %1358 = vmatmul.mubr.bf16.gmra.mrb[36].mxu0 %v2221_v49 }
  0x6b   :  { %1276 = vmatprep.mubr.bf16.mxu1 %v2226_v50  ;;  %1365 = vmatprep.mubr.bf16.mxu0 %v2228_v51 }
  0x72   :  { %1277 = vmatmul.mubr.bf16.gmra.mrb[36].mxu1 %v2230_v56  ;;  %1366 = vmatmul.mubr.bf16.gmra.mrb[40].mxu0 %v2231_v57 }
  0x73   :  { %1406 = vmatprep.mubr.bf16.mxu1 %v2238_v58  ;;  %1495 = vmatprep.mubr.bf16.mxu0 %v2241_v59 }
  0x7a   :  { %1407 = vmatmul.mubr.bf16.vlgmr.msra.gmra.mrb[40].mxu1 %v2236_v60  ;;  %1496 = vmatmul.mubr.bf16.vlgmr.msra.gmra.mrb[44].mxu0 %v2239_v61 }
  0x7b   :  { %1414 = vmatprep.mubr.bf16.mxu1 %v2242_v62  ;;  %1503 = vmatprep.mubr.bf16.mxu0 %v2244_v63 }
  0x82   :  { %1415 = vmatmul.mubr.bf16.gmra.mrb[44].mxu1 %v2246_v0  ;;  %1504 = vmatmul.mubr.bf16.gmra.mrb[48].mxu0 %v2247_v1 }
  0x83   :  { %1422 = vmatprep.mubr.bf16.mxu1 %v2248_v2  ;;  %1511 = vmatprep.mubr.bf16.mxu0 %v2250_v3 }
  0x8a   :  { %1423 = vmatmul.mubr.bf16.gmra.mrb[48].mxu1 %v2252_v4  ;;  %1512 = vmatmul.mubr.bf16.gmra.mrb[52].mxu0 %v2253_v5 }
  0x8b   :  { %1430 = vmatprep.mubr.bf16.mxu1 %v2254_v6  ;;  %1519 = vmatprep.mubr.bf16.mxu0 %v2256_v7 }
  0x92   :  { %1431 = vmatmul.mubr.bf16.gmra.mrb[52].mxu1 %v2258_v8  ;;  %1520 = vmatmul.mubr.bf16.gmra.mrb[56].mxu0 %v2259_v9 }
  0x93   :  { %1438 = vmatprep.mubr.bf16.mxu1 %v2260_v10  ;;  %1527 = vmatprep.mubr.bf16.mxu0 %v2262_v11 }
  0x9a   :  { %1439 = vmatmul.mubr.bf16.gmra.mrb[56].mxu1 %v2264_v12  ;;  %1528 = vmatmul.mubr.bf16.gmra.mrb[60].mxu0 %v2265_v13 }
  0x9b   :  { %1446 = vmatprep.mubr.bf16.mxu1 %v2266_v14  ;;  %1535 = vmatprep.mubr.bf16.mxu0 %v2268_v15 }
  0xa2   :  { %1447 = vmatmul.mubr.bf16.gmra.mrb[60].mxu1 %v2270_v16  ;;  %1536 = vmatmul.mubr.bf16.gmra.mrb[64].mxu0 %v2271_v17 }
  0xa3   :  { %1454 = vmatprep.mubr.bf16.mxu1 %v2272_v18  ;;  %1543 = vmatprep.mubr.bf16.mxu0 %v2274_v19 }
  0xaa   :  { %1455 = vmatmul.mubr.bf16.gmra.mrb[64].mxu1 %v2276_v20  ;;  %1544 = vmatmul.mubr.bf16.gmra.mrb[68].mxu0 %v2277_v21 }
  0xf5   :  { %v1803_v22 = vpop.f32.mrb[0].mxu0  ;;  %v1827_v23 = vpop.f32.mrb[0].mxu1 }
  0xf6   :  { %v1804_v24 = vpop.f32.mrb[1].mxu0  ;;  %v1828_v25 = vpop.f32.mrb[1].mxu1 }
  0xf7   :  { %v1805_v26 = vadd.f32 %v1804_v24, %v1803_v22  ;;  %v2748_v27 = vadd.f32 %v1828_v25, %v1827_v23  ;;  %v1806_v28 = vpop.f32.mrb[2].mxu0  ;;  %v1830_v29 = vpop.f32.mrb[2].mxu1 }
  0xf8   :  { %v1807_v30 = vpop.f32.mrb[3].mxu0  ;;  %v1831_v31 = vpop.f32.mrb[3].mxu1 }
  0xf9   :  { %v1808_v32 = vadd.f32 %v1807_v30, %v1806_v28  ;;  %v2750_v33 = vadd.f32 %v1831_v31, %v1830_v29 }
  0xfd   :  { %v1809_v34 = vpop.f32.mrb[4].mxu0  ;;  %v1833_v35 = vpop.f32.mrb[4].mxu1 }
  0xfe   :  { %v1810_v36 = vpop.f32.mrb[5].mxu0  ;;  %v1834_v37 = vpop.f32.mrb[5].mxu1 }
  0xff   :  { %v1811_v38 = vadd.f32 %v1810_v36, %v1809_v34  ;;  %v1812_v39 = vpop.f32.mrb[6].mxu0  ;;  %v2752_v40 = vadd.f32 %v1834_v37, %v1833_v35  ;;  %v1836_v41 = vpop.f32.mrb[6].mxu1 }
 0x100   :  { %v1813_v42 = vpop.f32.mrb[7].mxu0  ;;  %v1837_v43 = vpop.f32.mrb[7].mxu1 }
 0x101   :  { %v1814_v44 = vadd.f32 %v1813_v42, %v1812_v39  ;;  %v2754_v45 = vadd.f32 %v1837_v43, %v1836_v41 }
 0x105   :  { %v1815_v46 = vpop.f32.mrb[8].mxu0  ;;  %v1839_v47 = vpop.f32.mrb[8].mxu1 }
 0x106   :  { %v1816_v48 = vpop.f32.mrb[9].mxu0  ;;  %v1840_v49 = vpop.f32.mrb[9].mxu1 }
 0x107   :  { %v1817_v50 = vadd.f32 %v1816_v48, %v1815_v46  ;;  %v1818_v51 = vpop.f32.mrb[10].mxu0  ;;  %v2756_v52 = vadd.f32 %v1840_v49, %v1839_v47  ;;  %v1842_v53 = vpop.f32.mrb[10].mxu1 }
 0x108   :  { %v1819_v54 = vpop.f32.mrb[11].mxu0  ;;  %v1843_v55 = vpop.f32.mrb[11].mxu1 }
 0x109   :  { %v1820_v56 = vadd.f32 %v1819_v54, %v1818_v51  ;;  %v2758_v57 = vadd.f32 %v1843_v55, %v1842_v53 }
 0x10d   :  { %v1821_v58 = vpop.f32.mrb[12].mxu0 }
 0x10e   :  { %v1822_v59 = vpop.f32.mrb[13].mxu0 }
 0x10f   :  { %v1823_v60 = vadd.f32 %v1822_v59, %v1821_v58  ;;  %v1824_v61 = vpop.f32.mrb[14].mxu0 }
 0x110   :  { %v1825_v62 = vpop.f32.mrb[15].mxu0 }
 0x111   :  { %v2760_v63 = vadd.f32 %v1825_v62, %v1824_v61 }
 0x115   :  { %v1861_v0 = vpop.f32.mrb[12].mxu1  ;;  %v1919_v1 = vpop.f32.mrb[16].mxu0 }
 0x116   :  { %v1862_v2 = vpop.f32.mrb[13].mxu1  ;;  %v1920_v3 = vpop.f32.mrb[17].mxu0 }
 0x117   :  { %v1863_v4 = vadd.f32 %v1862_v2, %v1861_v0  ;;  %v1921_v5 = vadd.f32 %v1920_v3, %v1919_v1  ;;  %v1864_v6 = vpop.f32.mrb[14].mxu1  ;;  %v1922_v7 = vpop.f32.mrb[18].mxu0 }
 0x118   :  { %v1865_v8 = vpop.f32.mrb[15].mxu1  ;;  %v1923_v9 = vpop.f32.mrb[19].mxu0 }
 0x119   :  { %v1231_v10 = vadd.f32 %v1863_v4, %v1805_v26  ;;  %v1866_v11 = vadd.f32 %v1865_v8, %v1864_v6  ;;  %v1924_v12 = vadd.f32 %v1923_v9, %v1922_v7 }
 0x11b   :  { %v2762_v13 = vadd.f32 %v1921_v5, %v1231_v10  ;;  %v1234_v14 = vadd.f32 %v1866_v11, %v1808_v32 }
 0x11d   :  { %v2764_v15 = vadd.f32 %v1924_v12, %v1234_v14  ;;  %v1867_v16 = vpop.f32.mrb[16].mxu1  ;;  %v1925_v17 = vpop.f32.mrb[20].mxu0 }
 0x11e   :  { %v1868_v18 = vpop.f32.mrb[17].mxu1  ;;  %v1926_v19 = vpop.f32.mrb[21].mxu0 }
 0x11f   :  { %v1869_v20 = vadd.f32 %v1868_v18, %v1867_v16  ;;  %v1927_v21 = vadd.f32 %v1926_v19, %v1925_v17  ;;  %v1870_v22 = vpop.f32.mrb[18].mxu1  ;;  %v1928_v23 = vpop.f32.mrb[22].mxu0 }
 0x120   :  { %v1871_v24 = vpop.f32.mrb[19].mxu1  ;;  %v1929_v25 = vpop.f32.mrb[23].mxu0 }
 0x121   :  { %v1239_v28 = vadd.f32 %v1869_v20, %v1811_v38  ;;  %v1872_v29 = vadd.f32 %v1871_v24, %v1870_v22  ;;  %v1930_v26 = vadd.f32 %v1929_v25, %v1928_v23 }
 0x123   :  { %v2766_v30 = vadd.f32 %v1927_v21, %v1239_v28  ;;  %v1242_v31 = vadd.f32 %v1872_v29, %v1814_v44 }
 0x125   :  { %v2768_v34 = vadd.f32 %v1930_v26, %v1242_v31  ;;  %v1873_v32 = vpop.f32.mrb[20].mxu1  ;;  %v1931_v35 = vpop.f32.mrb[24].mxu0 }
 0x126   :  { %v1874_v36 = vpop.f32.mrb[21].mxu1  ;;  %v1932_v37 = vpop.f32.mrb[25].mxu0 }
 0x127   :  { %v1875_v39 = vadd.f32 %v1874_v36, %v1873_v32  ;;  %v1933_v41 = vadd.f32 %v1932_v37, %v1931_v35  ;;  %v1876_v42 = vpop.f32.mrb[22].mxu1  ;;  %v1934_v43 = vpop.f32.mrb[26].mxu0 }
 0x128   :  { %v1877_v46 = vpop.f32.mrb[23].mxu1  ;;  %v1935_v47 = vpop.f32.mrb[27].mxu0 }
 0x129   :  { %v1247_v48 = vadd.f32 %v1875_v39, %v1817_v50  ;;  %v1878_v49 = vadd.f32 %v1877_v46, %v1876_v42  ;;  %v1936_v38 = vadd.f32 %v1935_v47, %v1934_v43 }
 0x12b   :  { %v2770_v51 = vadd.f32 %v1933_v41, %v1247_v48  ;;  %v1250_v53 = vadd.f32 %v1878_v49, %v1820_v56 }
 0x12d   :  { %v2772_v54 = vadd.f32 %v1936_v38, %v1250_v53  ;;  %v1879_v44 = vpop.f32.mrb[24].mxu1  ;;  %v1937_v55 = vpop.f32.mrb[28].mxu0 }
 0x12e   :  { %v1880_v58 = vpop.f32.mrb[25].mxu1  ;;  %v1938_v59 = vpop.f32.mrb[29].mxu0 }
 0x12f   :  { %v1881_v61 = vadd.f32 %v1880_v58, %v1879_v44  ;;  %v1939_v62 = vadd.f32 %v1938_v59, %v1937_v55  ;;  %v1882_v0 = vpop.f32.mrb[26].mxu1  ;;  %v1940_v1 = vpop.f32.mrb[30].mxu0 }
 0x130   :  { %v1883_v2 = vpop.f32.mrb[27].mxu1  ;;  %v1941_v3 = vpop.f32.mrb[31].mxu0 }
 0x131   :  { %v1255_v4 = vadd.f32 %v1881_v61, %v1823_v60  ;;  %v1884_v5 = vadd.f32 %v1883_v2, %v1882_v0  ;;  %v1942_v50 = vadd.f32 %v1941_v3, %v1940_v1 }
 0x133   :  { %v2774_v6 = vadd.f32 %v1939_v62, %v1255_v4  ;;  %v1258_v7 = vadd.f32 %v1884_v5, %v2760_v63 }
 0x135   :  { %v2777_v56 = vadd.f32 %v1942_v50, %v1258_v7  ;;  %v1885_v8 = vpop.f32.mrb[28].mxu1  ;;  %v1943_v9 = vpop.f32.mrb[32].mxu0 }
 0x136   :  { %v1886_v10 = vpop.f32.mrb[29].mxu1  ;;  %v1944_v11 = vpop.f32.mrb[33].mxu0 }
 0x137   :  { %v1887_v12 = vadd.f32 %v1886_v10, %v1885_v8  ;;  %v1945_v14 = vadd.f32 %v1944_v11, %v1943_v9  ;;  %v1888_v16 = vpop.f32.mrb[30].mxu1  ;;  %v1946_v17 = vpop.f32.mrb[34].mxu0 }
 0x138   :  { %v1889_v18 = vpop.f32.mrb[31].mxu1  ;;  %v1947_v19 = vpop.f32.mrb[35].mxu0 }
 0x139   :  { %v1263_v60 = vadd.f32 %v1887_v12, %v2748_v27  ;;  %v1890_v20 = vadd.f32 %v1889_v18, %v1888_v16  ;;  %v1948_v21 = vadd.f32 %v1947_v19, %v1946_v17 }
 0x13b   :  { %v2780_v22 = vadd.f32 %v1945_v14, %v1263_v60  ;;  %v1266_v63 = vadd.f32 %v1890_v20, %v2750_v33 }
 0x13d   :  { %v2783_v23 = vadd.f32 %v1948_v21, %v1266_v63  ;;  %v1891_v24 = vpop.f32.mrb[32].mxu1  ;;  %v1949_v25 = vpop.f32.mrb[36].mxu0 }
 0x13e   :  { %v1892_v28 = vpop.f32.mrb[33].mxu1  ;;  %v1950_v29 = vpop.f32.mrb[37].mxu0 }
 0x13f   :  { %v1893_v26 = vadd.f32 %v1892_v28, %v1891_v24  ;;  %v1951_v31 = vadd.f32 %v1950_v29, %v1949_v25  ;;  %v1894_v32 = vpop.f32.mrb[34].mxu1  ;;  %v1952_v35 = vpop.f32.mrb[38].mxu0 }
 0x140   :  { %v1895_v36 = vpop.f32.mrb[35].mxu1  ;;  %v1953_v37 = vpop.f32.mrb[39].mxu0 }
 0x141   :  { %v1271_v27 = vadd.f32 %v1893_v26, %v2752_v40  ;;  %v1896_v39 = vadd.f32 %v1895_v36, %v1894_v32  ;;  %v1954_v41 = vadd.f32 %v1953_v37, %v1952_v35 }
 0x143   :  { %v2786_v42 = vadd.f32 %v1951_v31, %v1271_v27  ;;  %v1274_v33 = vadd.f32 %v1896_v39, %v2754_v45 }
 0x145   :  { %v2789_v43 = vadd.f32 %v1954_v41, %v1274_v33  ;;  %v1897_v46 = vpop.f32.mrb[36].mxu1  ;;  %v1955_v47 = vpop.f32.mrb[40].mxu0 }
 0x146   :  { %v1898_v48 = vpop.f32.mrb[37].mxu1  ;;  %v1956_v49 = vpop.f32.mrb[41].mxu0 }
 0x147   :  { %v1899_v38 = vadd.f32 %v1898_v48, %v1897_v46  ;;  %v1957_v53 = vadd.f32 %v1956_v49, %v1955_v47  ;;  %v1900_v44 = vpop.f32.mrb[38].mxu1  ;;  %v1958_v55 = vpop.f32.mrb[42].mxu0 }
 0x148   :  { %v1901_v58 = vpop.f32.mrb[39].mxu1  ;;  %v1959_v59 = vpop.f32.mrb[43].mxu0 }
 0x149   :  { %v1279_v40 = vadd.f32 %v1899_v38, %v2756_v52  ;;  %v1902_v61 = vadd.f32 %v1901_v58, %v1900_v44  ;;  %v1960_v62 = vadd.f32 %v1959_v59, %v1958_v55 }
 0x14b   :  { %v2792_v0 = vadd.f32 %v1957_v53, %v1279_v40  ;;  %v1282_v45 = vadd.f32 %v1902_v61, %v2758_v57  ;;  %v2801_v57 = vld [vmem:[%s2874_s2] ss:$0 sm:$0xff] }
 0x14d   :  { %v2795_v1 = vadd.f32 %v1960_v62, %v1282_v45  ;;  %v1977_v2 = vpop.f32.mrb[40].mxu1  ;;  %v2035_v3 = vpop.f32.mrb[44].mxu0 }
 0x14e   :  { %v1978_v4 = vpop.f32.mrb[41].mxu1  ;;  %v2036_v5 = vpop.f32.mrb[45].mxu0 }
 0x14f   :  { %v1979_v50 = vadd.f32 %v1978_v4, %v1977_v2  ;;  %v2037_v7 = vadd.f32 %v2036_v5, %v2035_v3  ;;  %v1980_v8 = vpop.f32.mrb[42].mxu1  ;;  %v2038_v9 = vpop.f32.mrb[46].mxu0 }
 0x150   :  { %v1981_v10 = vpop.f32.mrb[43].mxu1  ;;  %v2039_v11 = vpop.f32.mrb[47].mxu0 }
 0x151   :  { %v1409_v52 = vadd.f32 %v1979_v50, %v2762_v13  ;;  %v1982_v12 = vadd.f32 %v1981_v10, %v1980_v8  ;;  %v2040_v14 = vadd.f32 %v2039_v11, %v2038_v9 }
 0x153   :  { %v1498_v16 = vadd.f32 %v2037_v7, %v1409_v52  ;;  %v1412_v17 = vadd.f32 %v1982_v12, %v2764_v15 }
 0x155   :  { %v1604_v18 = vadd.f32 %v2801_v57, %v1498_v16  ;;  %v1501_v19 = vadd.f32 %v2040_v14, %v1412_v17  ;;  %v1983_v60 = vpop.f32.mrb[44].mxu1  ;;  %v2041_v20 = vpop.f32.mrb[48].mxu0 }
 0x156   :  { %v1984_v21 = vpop.f32.mrb[45].mxu1  ;;  %v2042_v63 = vpop.f32.mrb[49].mxu0 }
 0x157   :  { %1618 = vst [vmem:[%s2875_s3] sm:$0xff] %v1604_v18  ;;  %v1605_v13 = vadd.f32 %v2801_v57, %v1501_v19  ;;  %v1985_v24 = vadd.f32 %v1984_v21, %v1983_v60  ;;  %v2043_v25 = vadd.f32 %v2042_v63, %v2041_v20  ;;  %v1986_v28 = vpop.f32.mrb[46].mxu1  ;;  %v2044_v29 = vpop.f32.mrb[50].mxu0 }
 0x158   :  { %v1987_v26 = vpop.f32.mrb[47].mxu1  ;;  %v2045_v31 = vpop.f32.mrb[51].mxu0 }
 0x159   :  { %1619 = vst [vmem:[%s2875_s3 + $0x8] sm:$0xff] %v1605_v13  ;;  %v1417_v15 = vadd.f32 %v1985_v24, %v2766_v30  ;;  %v1988_v32 = vadd.f32 %v1987_v26, %v1986_v28  ;;  %v2046_v35 = vadd.f32 %v2045_v31, %v2044_v29 }
 0x15b   :  { %v1506_v36 = vadd.f32 %v2043_v25, %v1417_v15  ;;  %v1420_v37 = vadd.f32 %v1988_v32, %v2768_v34 }
 0x15d   :  { %v1606_v27 = vadd.f32 %v2801_v57, %v1506_v36  ;;  %v1509_v39 = vadd.f32 %v2046_v35, %v1420_v37  ;;  %v1989_v41 = vpop.f32.mrb[48].mxu1  ;;  %v2047_v33 = vpop.f32.mrb[52].mxu0 }
 0x15e   :  { %v1990_v46 = vpop.f32.mrb[49].mxu1  ;;  %v2048_v47 = vpop.f32.mrb[53].mxu0 }
 0x15f   :  { %1620 = vst [vmem:[%s2875_s3 + $0x10] sm:$0xff] %v1606_v27  ;;  %v1607_v48 = vadd.f32 %v2801_v57, %v1509_v39  ;;  %v1991_v49 = vadd.f32 %v1990_v46, %v1989_v41  ;;  %v2049_v30 = vadd.f32 %v2048_v47, %v2047_v33  ;;  %v1992_v38 = vpop.f32.mrb[50].mxu1  ;;  %v2050_v53 = vpop.f32.mrb[54].mxu0 }
 0x160   :  { %v1993_v44 = vpop.f32.mrb[51].mxu1  ;;  %v2051_v55 = vpop.f32.mrb[55].mxu0 }
 0x161   :  { %1621 = vst [vmem:[%s2875_s3 + $0x18] sm:$0xff] %v1607_v48  ;;  %v1425_v34 = vadd.f32 %v1991_v49, %v2770_v51  ;;  %v1994_v58 = vadd.f32 %v1993_v44, %v1992_v38  ;;  %v2052_v59 = vadd.f32 %v2051_v55, %v2050_v53 }
 0x163   :  { %v1514_v40 = vadd.f32 %v2049_v30, %v1425_v34  ;;  %v1428_v61 = vadd.f32 %v1994_v58, %v2772_v54 }
 0x165   :  { %v1608_v62 = vadd.f32 %v2801_v57, %v1514_v40  ;;  %v1517_v45 = vadd.f32 %v2052_v59, %v1428_v61  ;;  %v1995_v2 = vpop.f32.mrb[52].mxu1  ;;  %v2053_v3 = vpop.f32.mrb[56].mxu0 }
 0x166   :  { %v1996_v4 = vpop.f32.mrb[53].mxu1  ;;  %v2054_v5 = vpop.f32.mrb[57].mxu0 }
 0x167   :  { %1622 = vst [vmem:[%s2875_s3 + $0x20] sm:$0xff] %v1608_v62  ;;  %v1609_v50 = vadd.f32 %v2801_v57, %v1517_v45  ;;  %v1997_v7 = vadd.f32 %v1996_v4, %v1995_v2  ;;  %v2055_v51 = vadd.f32 %v2054_v5, %v2053_v3  ;;  %v1998_v8 = vpop.f32.mrb[54].mxu1  ;;  %v2056_v9 = vpop.f32.mrb[58].mxu0 }
 0x168   :  { %v1999_v10 = vpop.f32.mrb[55].mxu1  ;;  %v2057_v11 = vpop.f32.mrb[59].mxu0 }
 0x169   :  { %1623 = vst [vmem:[%s2875_s3 + $0x28] sm:$0xff] %v1609_v50  ;;  %v1433_v54 = vadd.f32 %v1997_v7, %v2774_v6  ;;  %v2000_v52 = vadd.f32 %v1999_v10, %v1998_v8  ;;  %v2058_v12 = vadd.f32 %v2057_v11, %v2056_v9 }
 0x16b   :  { %v1522_v14 = vadd.f32 %v2055_v51, %v1433_v54  ;;  %v1436_v16 = vadd.f32 %v2000_v52, %v2777_v56 }
 0x16d   :  { %v1610_v17 = vadd.f32 %v2801_v57, %v1522_v14  ;;  %v1525_v18 = vadd.f32 %v2058_v12, %v1436_v16  ;;  %v2001_v19 = vpop.f32.mrb[56].mxu1  ;;  %v2059_v60 = vpop.f32.mrb[60].mxu0 }
 0x16e   :  { %v2002_v20 = vpop.f32.mrb[57].mxu1  ;;  %v2060_v21 = vpop.f32.mrb[61].mxu0 }
 0x16f   :  { %1624 = vst [vmem:[%s2875_s3 + $0x30] sm:$0xff] %v1610_v17  ;;  %v1611_v63 = vadd.f32 %v2801_v57, %v1525_v18  ;;  %v2003_v13 = vadd.f32 %v2002_v20, %v2001_v19  ;;  %v2061_v6 = vadd.f32 %v2060_v21, %v2059_v60  ;;  %v2004_v24 = vpop.f32.mrb[58].mxu1  ;;  %v2062_v25 = vpop.f32.mrb[62].mxu0 }
 0x170   :  { %v2005_v28 = vpop.f32.mrb[59].mxu1  ;;  %v2063_v29 = vpop.f32.mrb[63].mxu0 }
 0x171   :  { %1625 = vst [vmem:[%s2875_s3 + $0x38] sm:$0xff] %v1611_v63  ;;  %v1441_v56 = vadd.f32 %v2003_v13, %v2780_v22  ;;  %v2006_v26 = vadd.f32 %v2005_v28, %v2004_v24  ;;  %v2064_v31 = vadd.f32 %v2063_v29, %v2062_v25 }
 0x173   :  { %v1530_v15 = vadd.f32 %v2061_v6, %v1441_v56  ;;  %v1444_v32 = vadd.f32 %v2006_v26, %v2783_v23 }
 0x175   :  { %v1612_v35 = vadd.f32 %v2801_v57, %v1530_v15  ;;  %v1533_v36 = vadd.f32 %v2064_v31, %v1444_v32  ;;  %v2007_v37 = vpop.f32.mrb[60].mxu1  ;;  %v2065_v27 = vpop.f32.mrb[64].mxu0 }
 0x176   :  { %v2008_v39 = vpop.f32.mrb[61].mxu1  ;;  %v2066_v41 = vpop.f32.mrb[65].mxu0 }
 0x177   :  { %1626 = vst [vmem:[%s2875_s3 + $0x40] sm:$0xff] %v1612_v35  ;;  %v1613_v33 = vadd.f32 %v2801_v57, %v1533_v36  ;;  %v2009_v46 = vadd.f32 %v2008_v39, %v2007_v37  ;;  %v2067_v22 = vadd.f32 %v2066_v41, %v2065_v27  ;;  %v2010_v47 = vpop.f32.mrb[62].mxu1  ;;  %v2068_v48 = vpop.f32.mrb[66].mxu0 }
 0x178   :  { %v2011_v49 = vpop.f32.mrb[63].mxu1  ;;  %v2069_v30 = vpop.f32.mrb[67].mxu0 }
 0x179   :  { %1627 = vst [vmem:[%s2875_s3 + $0x48] sm:$0xff] %v1613_v33  ;;  %v1449_v23 = vadd.f32 %v2009_v46, %v2786_v42  ;;  %v2012_v38 = vadd.f32 %v2011_v49, %v2010_v47  ;;  %v2070_v53 = vadd.f32 %v2069_v30, %v2068_v48 }
 0x17b   :  { %v1538_v44 = vadd.f32 %v2067_v22, %v1449_v23  ;;  %v1452_v55 = vadd.f32 %v2012_v38, %v2789_v43 }
 0x17d   :  { %v1614_v34 = vadd.f32 %v2801_v57, %v1538_v44  ;;  %v1541_v58 = vadd.f32 %v2070_v53, %v1452_v55  ;;  %v2013_v59 = vpop.f32.mrb[64].mxu1  ;;  %v2071_v40 = vpop.f32.mrb[68].mxu0 }
 0x17e   :  { %v2014_v61 = vpop.f32.mrb[65].mxu1  ;;  %v2072_v62 = vpop.f32.mrb[69].mxu0 }
 0x17f   :  { %1628 = vst [vmem:[%s2875_s3 + $0x50] sm:$0xff] %v1614_v34  ;;  %v1615_v45 = vadd.f32 %v2801_v57, %v1541_v58  ;;  %v2015_v2 = vadd.f32 %v2014_v61, %v2013_v59  ;;  %v2073_v42 = vadd.f32 %v2072_v62, %v2071_v40  ;;  %v2016_v3 = vpop.f32.mrb[66].mxu1  ;;  %v2074_v4 = vpop.f32.mrb[70].mxu0 }
 0x180   :  { %v2017_v5 = vpop.f32.mrb[67].mxu1  ;;  %v2075_v50 = vpop.f32.mrb[71].mxu0 }
 0x181   :  { %1629 = vst [vmem:[%s2875_s3 + $0x58] sm:$0xff] %v1615_v45  ;;  %v1457_v43 = vadd.f32 %v2015_v2, %v2792_v0  ;;  %v2018_v7 = vadd.f32 %v2017_v5, %v2016_v3  ;;  %v2076_v51 = vadd.f32 %v2075_v50, %v2074_v4 }
 0x183   :  { %v1546_v8 = vadd.f32 %v2073_v42, %v1457_v43  ;;  %v1460_v9 = vadd.f32 %v2018_v7, %v2795_v1 }
 0x185   :  { %v1616_v10 = vadd.f32 %v2801_v57, %v1546_v8  ;;  %v1549_v11 = vadd.f32 %v2076_v51, %v1460_v9 }
 0x187   :  { %1630 = vst [vmem:[%s2875_s3 + $0x60] sm:$0xff] %v1616_v10  ;;  %v1617_v54 = vadd.f32 %v2801_v57, %v1549_v11 }
 0x189   :  { %1631 = vst [vmem:[%s2875_s3 + $0x68] sm:$0xff] %v1617_v54 }

// kernel: alexnet_forward.27
= control target key start
LH: loop header
LB: loop body
LE: loop exit
PB: predicated region body
PF: predicated region fallthrough
CT: control target
= control target key end

     0   :  { %s203_s0 = inlined_call_operand.vmem [shape: f32[104,128], index: 0, kind: input, shape index: {}]   ;;  %s204_s1 = inlined_call_operand.vmem [shape: f32[1,128], index: 1, kind: input, shape index: {}]   ;;  %s205_s2 = inlined_call_operand.vmem [shape: f32[1,128], index: 2, kind: input, shape index: {}]   ;;  %s206_s3 = inlined_call_operand.vmem [shape: f32[104,128], index: 3, kind: output, shape index: {}]  }
   0x1   :  { %v14_v0 = vld [vmem:[%s203_s0] sm:$0xff]  ;;  %v15_v4 = vld [vmem:[%s203_s0 + $0x8] sm:$0xff]  ;;  %v16_v5 = vld [vmem:[%s203_s0 + $0x10] sm:$0xff] }
   0x2   :  { %v97_v1 = vld [vmem:[%s204_s1] ss:$0 sm:$0xff]  ;;  %v17_v6 = vld [vmem:[%s203_s0 + $0x18] sm:$0xff]  ;;  %v19_v11 = vld [vmem:[%s203_s0 + $0x28] sm:$0xff] }
   0x3   :  { %v98_v2 = vld [vmem:[%s205_s2] ss:$0 sm:$0xff]  ;;  %v34_v3 = vmul.f32 %v97_v1, %v14_v0  ;;  %v35_v7 = vmul.f32 %v97_v1, %v15_v4  ;;  %v36_v8 = vmul.f32 %v97_v1, %v16_v5  ;;  %v37_v9 = vmul.f32 %v97_v1, %v17_v6  ;;  %v20_v12 = vld [vmem:[%s203_s0 + $0x30] sm:$0xff]  ;;  %v21_v17 = vld [vmem:[%s203_s0 + $0x38] sm:$0xff] }
   0x4   :  { %v18_v10 = vld [vmem:[%s203_s0 + $0x20] sm:$0xff]  ;;  %v39_v15 = vmul.f32 %v97_v1, %v19_v11  ;;  %v40_v16 = vmul.f32 %v97_v1, %v20_v12  ;;  %v41_v21 = vmul.f32 %v97_v1, %v21_v17  ;;  %v23_v27 = vld [vmem:[%s203_s0 + $0x48] sm:$0xff]  ;;  %v24_v28 = vld [vmem:[%s203_s0 + $0x50] sm:$0xff] }
   0x5   :  { %v54_v13 = vadd.f32 %v98_v2, %v34_v3  ;;  %v38_v14 = vmul.f32 %v97_v1, %v18_v10  ;;  %v55_v18 = vadd.f32 %v98_v2, %v35_v7  ;;  %v56_v19 = vadd.f32 %v98_v2, %v36_v8  ;;  %v22_v22 = vld [vmem:[%s203_s0 + $0x40] sm:$0xff]  ;;  %v25_v29 = vld [vmem:[%s203_s0 + $0x58] sm:$0xff] }
   0x6   :  { %v57_v20 = vadd.f32 %v98_v2, %v37_v9  ;;  %v59_v25 = vadd.f32 %v98_v2, %v39_v15  ;;  %v60_v26 = vadd.f32 %v98_v2, %v40_v16  ;;  %v61_v33 = vadd.f32 %v98_v2, %v41_v21  ;;  %v26_v34 = vld [vmem:[%s203_s0 + $0x60] sm:$0xff] }
   0x7   :  { %v67_v23 = vmax.f32 %v54_v13, 0.0  ;;  %v58_v24 = vadd.f32 %v98_v2, %v38_v14  ;;  %v68_v30 = vmax.f32 %v55_v18, 0.0  ;;  %v69_v31 = vmax.f32 %v56_v19, 0.0 }
   0x8   :  { %v70_v32 = vmax.f32 %v57_v20, 0.0  ;;  %v72_v36 = vmax.f32 %v59_v25, 0.0  ;;  %v73_v37 = vmax.f32 %v60_v26, 0.0  ;;  %v42_v38 = vmul.f32 %v97_v1, %v22_v22 }
   0x9   :  { %80 = vst [vmem:[%s206_s3] sm:$0xff] %v67_v23  ;;  %v71_v35 = vmax.f32 %v58_v24, 0.0  ;;  %81 = vst [vmem:[%s206_s3 + $0x8] sm:$0xff] %v68_v30  ;;  %v74_v39 = vmax.f32 %v61_v33, 0.0  ;;  %v43_v40 = vmul.f32 %v97_v1, %v23_v27  ;;  %v44_v41 = vmul.f32 %v97_v1, %v24_v28 }
   0xa   :  { %82 = vst [vmem:[%s206_s3 + $0x10] sm:$0xff] %v69_v31  ;;  %83 = vst [vmem:[%s206_s3 + $0x18] sm:$0xff] %v70_v32  ;;  %v45_v42 = vmul.f32 %v97_v1, %v25_v29  ;;  %v62_v43 = vadd.f32 %v98_v2, %v42_v38  ;;  %v46_v44 = vmul.f32 %v97_v1, %v26_v34 }
   0xb   :  { %84 = vst [vmem:[%s206_s3 + $0x20] sm:$0xff] %v71_v35  ;;  %85 = vst [vmem:[%s206_s3 + $0x28] sm:$0xff] %v72_v36  ;;  %v63_v45 = vadd.f32 %v98_v2, %v43_v40  ;;  %v64_v46 = vadd.f32 %v98_v2, %v44_v41 }
   0xc   :  { %86 = vst [vmem:[%s206_s3 + $0x30] sm:$0xff] %v73_v37  ;;  %87 = vst [vmem:[%s206_s3 + $0x38] sm:$0xff] %v74_v39  ;;  %v65_v47 = vadd.f32 %v98_v2, %v45_v42  ;;  %v75_v48 = vmax.f32 %v62_v43, 0.0  ;;  %v66_v49 = vadd.f32 %v98_v2, %v46_v44 }
   0xd   :  { %v76_v50 = vmax.f32 %v63_v45, 0.0  ;;  %v77_v51 = vmax.f32 %v64_v46, 0.0 }
   0xe   :  { %v78_v52 = vmax.f32 %v65_v47, 0.0  ;;  %88 = vst [vmem:[%s206_s3 + $0x40] sm:$0xff] %v75_v48  ;;  %v79_v53 = vmax.f32 %v66_v49, 0.0 }
   0xf   :  { %89 = vst [vmem:[%s206_s3 + $0x48] sm:$0xff] %v76_v50  ;;  %90 = vst [vmem:[%s206_s3 + $0x50] sm:$0xff] %v77_v51 }
  0x10   :  { %91 = vst [vmem:[%s206_s3 + $0x58] sm:$0xff] %v78_v52  ;;  %92 = vst [vmem:[%s206_s3 + $0x60] sm:$0xff] %v79_v53 }

// kernel: alexnet_forward.28
= control target key start
LH: loop header
LB: loop body
LE: loop exit
PB: predicated region body
PF: predicated region fallthrough
CT: control target
= control target key end

     0   :  { %s76_s0 = inlined_call_operand.vmem [shape: f32[3,24,128], index: 0, kind: input, shape index: {}]   ;;  %s77_s1 = inlined_call_operand.vmem [shape: f32[24,128], index: 1, kind: output, shape index: {}]  }
   0x1   :  { %v8_v0 = vld [vmem:[%s76_s0] sm:$0xff]  ;;  %v11_v1 = vld [vmem:[%s76_s0 + $0x18] sm:$0xff]  ;;  %v14_v2 = vld [vmem:[%s76_s0 + $0x30] sm:$0xff] }
   0x2   :  { %v17_v3 = vmax.f32 %v8_v0, %v14_v2  ;;  %v9_v4 = vld [vmem:[%s76_s0 + $0x8] sm:$0xff]  ;;  %v12_v5 = vld [vmem:[%s76_s0 + $0x20] sm:$0xff]  ;;  %v15_v6 = vld [vmem:[%s76_s0 + $0x38] sm:$0xff] }
   0x3   :  { %v19_v7 = vmax.f32 %v9_v4, %v15_v6  ;;  %v10_v8 = vld [vmem:[%s76_s0 + $0x10] sm:$0xff]  ;;  %v13_v9 = vld [vmem:[%s76_s0 + $0x28] sm:$0xff]  ;;  %v16_v10 = vld [vmem:[%s76_s0 + $0x40] sm:$0xff] }
   0x4   :  { %v18_v11 = vmax.f32 %v17_v3, %v11_v1  ;;  %v21_v12 = vmax.f32 %v10_v8, %v16_v10 }
   0x5   :  { %v20_v13 = vmax.f32 %v19_v7, %v12_v5 }
   0x6   :  { %23 = vst [vmem:[%s77_s1] sm:$0xff] %v18_v11  ;;  %v22_v14 = vmax.f32 %v21_v12, %v13_v9 }
   0x7   :  { %24 = vst [vmem:[%s77_s1 + $0x8] sm:$0xff] %v20_v13 }
   0x8   :  { %25 = vst [vmem:[%s77_s1 + $0x10] sm:$0xff] %v22_v14 }

// kernel: alexnet_forward.30
= control target key start
LH: loop header
LB: loop body
LE: loop exit
PB: predicated region body
PF: predicated region fallthrough
CT: control target
= control target key end

     0   :  { %v14_v0 = vlaneseq  ;;  %v120_v10 = vmov 0.0   ;;  %v121_v27 = vmov 1966171168   ;;  %s185_s0 = inlined_call_operand.vmem [shape: f32[24,256], index: 0, kind: input, shape index: {}]   ;;  %s186_s1 = inlined_call_operand.vmem [shape: f32[1,256], index: 1, kind: output, shape index: {0}]   ;;  %s187_s2 = inlined_call_operand.vmem [shape: f32[1,256], index: 2, kind: output, shape index: {1}]  }
   0x1   :  { %v20_v1 = vld [vmem:[%s185_s0] sm:$0xff]  ;;  %v21_v2 = vld [vmem:[%s185_s0 + $0x8] sm:$0xff]  ;;  %v22_v3 = vld [vmem:[%s185_s0 + $0x10] sm:$0xff]  ;;  %v47_v28 = vunpack.c.l.s4 %v121_v27 }
   0x2   :  { %vm146_vm0 = vcmp.lt.s32.totalorder %v14_v0, 256  ;;  %v23_v5 = vld [vmem:[%s185_s0 + $0x18] sm:$0xff]  ;;  %v24_v6 = vld [vmem:[%s185_s0 + $0x20] sm:$0xff]  ;;  %v25_v7 = vld [vmem:[%s185_s0 + $0x28] sm:$0xff]  ;;  %v27_v8 = vadd.f32 %v22_v3, %v20_v1  ;;  %v68_v9 = vmul.f32 %v20_v1, %v20_v1  ;;  %v69_v12 = vmul.f32 %v21_v2, %v21_v2 }
   0x3   :  { %18 = vst.msk [vmem:[%s186_s1] sm:$0x3] %vm146_vm0, %v120_v10  ;;  %v35_v11 = vadd.f32 %v23_v5, %v21_v2  ;;  %19 = vst.msk [vmem:[%s187_s2] sm:$0x3] %vm146_vm0, %v120_v10  ;;  %v70_v13 = vmul.f32 %v22_v3, %v22_v3  ;;  %v71_v15 = vmul.f32 %v23_v5, %v23_v5  ;;  %v48_v37 = vunpack.c.0.s8 %v47_v28 }
   0x4   :  { %v28_v14 = vadd.f32 %v27_v8, %v24_v6  ;;  %v72_v16 = vmul.f32 %v24_v6, %v24_v6  ;;  %v73_v17 = vmul.f32 %v25_v7, %v25_v7  ;;  %v50_v38 = vshrl.u32 %v14_v0, 7 }
   0x5   :  { %v36_v18 = vadd.f32 %v35_v11, %v25_v7  ;;  %v74_v19 = vadd.f32 %v70_v13, %v68_v9  ;;  %v82_v21 = vadd.f32 %v71_v15, %v69_v12 }
   0x6   :  { %v29_v20 = vrot.slane %v28_v14, 4  ;;  %v51_v47 = vsub.s32 %v48_v37, %v50_v38 }
   0x7   :  { %v37_v22 = vrot.slane %v36_v18, 4  ;;  %v75_v23 = vadd.f32 %v74_v19, %v72_v16  ;;  %v83_v25 = vadd.f32 %v82_v21, %v73_v17 }
   0x8   :  { %v30_v24 = vadd.f32 %v29_v20, %v28_v14 }
   0x9   :  { %v38_v26 = vadd.f32 %v37_v22, %v36_v18  ;;  %v76_v29 = vrot.slane %v75_v23, 4  ;;  %v84_v31 = vrot.slane %v83_v25, 4 }
   0xa   :  { %v31_v30 = vrot.slane %v30_v24, 2  ;;  %v26_v54 = vld [vmem:[%s186_s1] sm:$0x3] }
   0xb   :  { %v39_v32 = vrot.slane %v38_v26, 2  ;;  %v77_v33 = vadd.f32 %v76_v29, %v75_v23  ;;  %v85_v35 = vadd.f32 %v84_v31, %v83_v25  ;;  %v67_v59 = vld [vmem:[%s187_s2] sm:$0x3] }
   0xc   :  { %v32_v34 = vadd.f32 %v31_v30, %v30_v24 }
   0xd   :  { %v40_v36 = vadd.f32 %v39_v32, %v38_v26  ;;  %v78_v39 = vrot.slane %v77_v33, 2  ;;  %v86_v41 = vrot.slane %v85_v35, 2 }
   0xe   :  { %v33_v40 = vrot.slane %v32_v34, 1 }
   0xf   :  { %v41_v42 = vrot.slane %v40_v36, 1  ;;  %v79_v43 = vadd.f32 %v78_v39, %v77_v33  ;;  %v87_v45 = vadd.f32 %v86_v41, %v85_v35 }
  0x10   :  { %v34_v44 = vadd.f32 %v33_v40, %v32_v34 }
  0x11   :  { %v42_v46 = vadd.f32 %v41_v42, %v40_v36  ;;  %v80_v48 = vrot.slane %v79_v43, 1  ;;  %v88_v49 = vrot.slane %v87_v45, 1 }
  0x13   :  { %v45_v50 = vcombine.low %v34_v44, %v42_v46  ;;  %v81_v51 = vadd.f32 %v80_v48, %v79_v43  ;;  %v89_v52 = vadd.f32 %v88_v49, %v87_v45 }
  0x15   :  { %v52_v53 = vrot.slane %v45_v50, %v51_v47  ;;  %v92_v55 = vcombine.low %v81_v51, %v89_v52 }
  0x17   :  { %v59_v56 = vrot.slane %v52_v53, %v51_v47  ;;  %v99_v57 = vrot.slane %v92_v55, %v51_v47 }
  0x19   :  { %v61_v58 = vadd.f32 %v59_v56, %v26_v54  ;;  %v106_v60 = vrot.slane %v99_v57, %v51_v47 }
  0x1b   :  { %66 = vst.msk [vmem:[%s186_s1] sm:$0x3] %vm146_vm0, %v61_v58  ;;  %v108_v61 = vadd.f32 %v106_v60, %v67_v59 }
  0x1d   :  { %109 = vst.msk [vmem:[%s187_s2] sm:$0x3] %vm146_vm0, %v108_v61 }

// kernel: alexnet_forward.29
= control target key start
LH: loop header
LB: loop body
LE: loop exit
PB: predicated region body
PF: predicated region fallthrough
CT: control target
= control target key end

     0   :  { %s2322_s1 = inlined_call_operand.vmem [shape: bf16[1152,256], index: 1, kind: input, shape index: {}]   ;;  %s2323_s0 = inlined_call_operand.vmem [shape: bf16[32,1152], index: 0, kind: input, shape index: {}]   ;;  %s2324_s2 = inlined_call_operand.vmem [shape: f32[1,256], index: 2, kind: input, shape index: {}]   ;;  %s2325_s3 = inlined_call_operand.vmem [shape: f32[32,256], index: 3, kind: output, shape index: {}]  }
   0x1   :  { %v1546_v0 = vld [vmem:[%s2322_s1 + $0x4] ss:$8 sps:$4 sm:$0xff]   ;;  %v1550_v2 = vld [vmem:[%s2322_s1] ss:$8 sps:$4 sm:$0xff]   ;;  %v1552_v4 = vld [vmem:[%s2322_s1 + $0x14] ss:$8 sps:$4 sm:$0xff]  }
   0x2   :  { %v1548_v1 = vld [vmem:[%s2322_s1 + $0x204] ss:$8 sps:$4 sm:$0xff]   ;;  %1011 = vmatprep.subr.bf16.mxu1 %v1546_v0  ;;  %v1551_v3 = vld [vmem:[%s2322_s1 + $0x200] ss:$8 sps:$4 sm:$0xff]   ;;  %v1554_v5 = vld [vmem:[%s2322_s1 + $0x214] ss:$8 sps:$4 sm:$0xff]  }
   0x3   :  { %1117 = vmatprep.subr.bf16.mxu0 %v1548_v1  ;;  %1012 = vmatpush1.bf16.msra.mxu1 %v1550_v2  ;;  %v1556_v6 = vld [vmem:[%s2322_s1 + $0x10] ss:$8 sps:$4 sm:$0xff]   ;;  %v1558_v8 = vld [vmem:[%s2322_s1 + $0x24] ss:$8 sps:$4 sm:$0xff]   ;;  %v1562_v10 = vld [vmem:[%s2322_s1 + $0x20] ss:$8 sps:$4 sm:$0xff]  }
   0x4   :  { %1118 = vmatpush1.bf16.msra.mxu0 %v1551_v3  ;;  %1013 = vmatprep.subr.bf16.mxu1 %v1552_v4  ;;  %v1557_v7 = vld [vmem:[%s2322_s1 + $0x210] ss:$8 sps:$4 sm:$0xff]   ;;  %v1560_v9 = vld [vmem:[%s2322_s1 + $0x224] ss:$8 sps:$4 sm:$0xff]   ;;  %v1563_v11 = vld [vmem:[%s2322_s1 + $0x220] ss:$8 sps:$4 sm:$0xff]  }
   0x5   :  { %1119 = vmatprep.subr.bf16.mxu0 %v1554_v5  ;;  %v1564_v12 = vld [vmem:[%s2322_s1 + $0x34] ss:$8 sps:$4 sm:$0xff]   ;;  %v1568_v14 = vld [vmem:[%s2322_s1 + $0x30] ss:$8 sps:$4 sm:$0xff]   ;;  %v1570_v16 = vld [vmem:[%s2322_s1 + $0x44] ss:$8 sps:$4 sm:$0xff]  }
   0x6   :  { %v1566_v13 = vld [vmem:[%s2322_s1 + $0x234] ss:$8 sps:$4 sm:$0xff]   ;;  %v1569_v15 = vld [vmem:[%s2322_s1 + $0x230] ss:$8 sps:$4 sm:$0xff]   ;;  %v1572_v17 = vld [vmem:[%s2322_s1 + $0x244] ss:$8 sps:$4 sm:$0xff]  }
   0x7   :  { %1014 = vmatpush1.bf16.msra.mxu1 %v1556_v6  ;;  %v1574_v18 = vld [vmem:[%s2322_s1 + $0x40] ss:$8 sps:$4 sm:$0xff]   ;;  %v1576_v20 = vld [vmem:[%s2322_s1 + $0x54] ss:$8 sps:$4 sm:$0xff]   ;;  %v1580_v22 = vld [vmem:[%s2322_s1 + $0x50] ss:$8 sps:$4 sm:$0xff]  }
   0x8   :  { %1120 = vmatpush1.bf16.msra.mxu0 %v1557_v7  ;;  %1015 = vmatprep.subr.bf16.mxu1 %v1558_v8  ;;  %v1575_v19 = vld [vmem:[%s2322_s1 + $0x240] ss:$8 sps:$4 sm:$0xff]   ;;  %v1578_v21 = vld [vmem:[%s2322_s1 + $0x254] ss:$8 sps:$4 sm:$0xff]   ;;  %v1581_v23 = vld [vmem:[%s2322_s1 + $0x250] ss:$8 sps:$4 sm:$0xff]  }
   0x9   :  { %1121 = vmatprep.subr.bf16.mxu0 %v1560_v9  ;;  %v1582_v24 = vld [vmem:[%s2322_s1 + $0x64] ss:$8 sps:$4 sm:$0xff]   ;;  %v1586_v26 = vld [vmem:[%s2322_s1 + $0x60] ss:$8 sps:$4 sm:$0xff]   ;;  %v1588_v28 = vld [vmem:[%s2322_s1 + $0x74] ss:$8 sps:$4 sm:$0xff]  }
   0xa   :  { %v1584_v25 = vld [vmem:[%s2322_s1 + $0x264] ss:$8 sps:$4 sm:$0xff]   ;;  %v1587_v27 = vld [vmem:[%s2322_s1 + $0x260] ss:$8 sps:$4 sm:$0xff]   ;;  %v1590_v29 = vld [vmem:[%s2322_s1 + $0x274] ss:$8 sps:$4 sm:$0xff]  }
   0xb   :  { %1016 = vmatpush1.bf16.msra.mxu1 %v1562_v10  ;;  %v1592_v30 = vld [vmem:[%s2322_s1 + $0x70] ss:$8 sps:$4 sm:$0xff]   ;;  %v1594_v32 = vld [vmem:[%s2322_s1 + $0x84] ss:$8 sps:$4 sm:$0xff]   ;;  %v1598_v34 = vld [vmem:[%s2322_s1 + $0x80] ss:$8 sps:$4 sm:$0xff]  }
   0xc   :  { %1122 = vmatpush1.bf16.msra.mxu0 %v1563_v11  ;;  %1017 = vmatprep.subr.bf16.mxu1 %v1564_v12  ;;  %v1593_v31 = vld [vmem:[%s2322_s1 + $0x270] ss:$8 sps:$4 sm:$0xff]   ;;  %v1596_v33 = vld [vmem:[%s2322_s1 + $0x284] ss:$8 sps:$4 sm:$0xff]   ;;  %v1599_v35 = vld [vmem:[%s2322_s1 + $0x280] ss:$8 sps:$4 sm:$0xff]  }
   0xd   :  { %1123 = vmatprep.subr.bf16.mxu0 %v1566_v13  ;;  %v1600_v36 = vld [vmem:[%s2322_s1 + $0x94] ss:$8 sps:$4 sm:$0xff]   ;;  %v1604_v38 = vld [vmem:[%s2322_s1 + $0x90] ss:$8 sps:$4 sm:$0xff]   ;;  %v1606_v40 = vld [vmem:[%s2322_s1 + $0xa4] ss:$8 sps:$4 sm:$0xff]  }
   0xe   :  { %v1602_v37 = vld [vmem:[%s2322_s1 + $0x294] ss:$8 sps:$4 sm:$0xff]   ;;  %v1605_v39 = vld [vmem:[%s2322_s1 + $0x290] ss:$8 sps:$4 sm:$0xff]   ;;  %v1608_v41 = vld [vmem:[%s2322_s1 + $0x2a4] ss:$8 sps:$4 sm:$0xff]  }
   0xf   :  { %1018 = vmatpush1.bf16.msra.mxu1 %v1568_v14  ;;  %v1610_v42 = vld [vmem:[%s2322_s1 + $0xa0] ss:$8 sps:$4 sm:$0xff]   ;;  %v1612_v44 = vld [vmem:[%s2322_s1 + $0xb4] ss:$8 sps:$4 sm:$0xff]   ;;  %v1616_v46 = vld [vmem:[%s2322_s1 + $0xb0] ss:$8 sps:$4 sm:$0xff]  }
  0x10   :  { %1124 = vmatpush1.bf16.msra.mxu0 %v1569_v15  ;;  %1019 = vmatprep.subr.bf16.mxu1 %v1570_v16  ;;  %v1611_v43 = vld [vmem:[%s2322_s1 + $0x2a0] ss:$8 sps:$4 sm:$0xff]   ;;  %v1614_v45 = vld [vmem:[%s2322_s1 + $0x2b4] ss:$8 sps:$4 sm:$0xff]   ;;  %v1617_v47 = vld [vmem:[%s2322_s1 + $0x2b0] ss:$8 sps:$4 sm:$0xff]  }
  0x11   :  { %1125 = vmatprep.subr.bf16.mxu0 %v1572_v17  ;;  %v1644_v48 = vld [vmem:[%s2323_s0 + $0x4] ss:$36 sps:$4 sm:$0xff]   ;;  %v1650_v51 = vld [vmem:[%s2323_s0 + $0x14] ss:$36 sps:$4 sm:$0xff]  }
  0x12   :  { %v1618_v49 = vld [vmem:[%s2322_s1 + $0xc4] ss:$8 sps:$4 sm:$0xff]   ;;  %1043 = vmatprep.mubr.bf16.mxu1 %v1644_v48  ;;  %v1622_v52 = vld [vmem:[%s2322_s1 + $0xc0] ss:$8 sps:$4 sm:$0xff]   ;;  %v1624_v54 = vld [vmem:[%s2322_s1 + $0xd4] ss:$8 sps:$4 sm:$0xff]   ;;  %1149 = vmatprep.mubr.bf16.mxu0 %v1650_v51 }
  0x13   :  { %1020 = vmatpush1.bf16.msra.mxu1 %v1574_v18  ;;  %v1620_v50 = vld [vmem:[%s2322_s1 + $0x2c4] ss:$8 sps:$4 sm:$0xff]   ;;  %v1623_v53 = vld [vmem:[%s2322_s1 + $0x2c0] ss:$8 sps:$4 sm:$0xff]   ;;  %v1626_v55 = vld [vmem:[%s2322_s1 + $0x2d4] ss:$8 sps:$4 sm:$0xff]  }
  0x14   :  { %1126 = vmatpush1.bf16.msra.mxu0 %v1575_v19  ;;  %1021 = vmatprep.subr.bf16.mxu1 %v1576_v20  ;;  %v1628_v56 = vld [vmem:[%s2322_s1 + $0xd0] ss:$8 sps:$4 sm:$0xff]   ;;  %v1630_v58 = vld [vmem:[%s2322_s1 + $0xe4] ss:$8 sps:$4 sm:$0xff]   ;;  %v1634_v60 = vld [vmem:[%s2322_s1 + $0xe0] ss:$8 sps:$4 sm:$0xff]  }
  0x15   :  { %1127 = vmatprep.subr.bf16.mxu0 %v1578_v21  ;;  %v1629_v57 = vld [vmem:[%s2322_s1 + $0x2d0] ss:$8 sps:$4 sm:$0xff]   ;;  %v1632_v59 = vld [vmem:[%s2322_s1 + $0x2e4] ss:$8 sps:$4 sm:$0xff]   ;;  %v1635_v61 = vld [vmem:[%s2322_s1 + $0x2e0] ss:$8 sps:$4 sm:$0xff]  }
  0x16   :  { %v1636_v62 = vld [vmem:[%s2322_s1 + $0xf4] ss:$8 sps:$4 sm:$0xff]   ;;  %v1640_v0 = vld [vmem:[%s2322_s1 + $0xf0] ss:$8 sps:$4 sm:$0xff]   ;;  %v1647_v2 = vld [vmem:[%s2322_s1 + $0x104] ss:$8 sps:$4 sm:$0xff]  }
  0x17   :  { %1022 = vmatpush1.bf16.msra.mxu1 %v1580_v22  ;;  %v1638_v63 = vld [vmem:[%s2322_s1 + $0x2f4] ss:$8 sps:$4 sm:$0xff]   ;;  %v1641_v1 = vld [vmem:[%s2322_s1 + $0x2f0] ss:$8 sps:$4 sm:$0xff]   ;;  %v1653_v3 = vld [vmem:[%s2322_s1 + $0x304] ss:$8 sps:$4 sm:$0xff]  }
  0x18   :  { %1128 = vmatpush1.bf16.msra.mxu0 %v1581_v23  ;;  %1023 = vmatprep.subr.bf16.mxu1 %v1582_v24  ;;  %v1642_v4 = vld [vmem:[%s2323_s0] ss:$36 sps:$4 sm:$0xff]   ;;  %v1648_v6 = vld [vmem:[%s2323_s0 + $0x10] ss:$36 sps:$4 sm:$0xff]  }
  0x19   :  { %1129 = vmatprep.subr.bf16.mxu0 %v1584_v25  ;;  %v1645_v5 = vld [vmem:[%s2322_s1 + $0x100] ss:$8 sps:$4 sm:$0xff]   ;;  %v1656_v8 = vld [vmem:[%s2322_s1 + $0x114] ss:$8 sps:$4 sm:$0xff]   ;;  %v1654_v10 = vld [vmem:[%s2322_s1 + $0x110] ss:$8 sps:$4 sm:$0xff]  }
  0x1a   :  { %v1651_v7 = vld [vmem:[%s2322_s1 + $0x300] ss:$8 sps:$4 sm:$0xff]   ;;  %v1659_v9 = vld [vmem:[%s2322_s1 + $0x314] ss:$8 sps:$4 sm:$0xff]   ;;  %v1657_v11 = vld [vmem:[%s2322_s1 + $0x310] ss:$8 sps:$4 sm:$0xff]  }
  0x1b   :  { %1024 = vmatpush1.bf16.msra.mxu1 %v1586_v26  ;;  %v1662_v12 = vld [vmem:[%s2322_s1 + $0x124] ss:$8 sps:$4 sm:$0xff]   ;;  %v1660_v14 = vld [vmem:[%s2322_s1 + $0x120] ss:$8 sps:$4 sm:$0xff]   ;;  %v1668_v16 = vld [vmem:[%s2322_s1 + $0x134] ss:$8 sps:$4 sm:$0xff]  }
  0x1c   :  { %1130 = vmatpush1.bf16.msra.mxu0 %v1587_v27  ;;  %1025 = vmatprep.subr.bf16.mxu1 %v1588_v28  ;;  %v1665_v13 = vld [vmem:[%s2322_s1 + $0x324] ss:$8 sps:$4 sm:$0xff]   ;;  %v1663_v15 = vld [vmem:[%s2322_s1 + $0x320] ss:$8 sps:$4 sm:$0xff]   ;;  %v1671_v17 = vld [vmem:[%s2322_s1 + $0x334] ss:$8 sps:$4 sm:$0xff]  }
  0x1d   :  { %1131 = vmatprep.subr.bf16.mxu0 %v1590_v29  ;;  %v1666_v18 = vld [vmem:[%s2322_s1 + $0x130] ss:$8 sps:$4 sm:$0xff]   ;;  %v1674_v20 = vld [vmem:[%s2322_s1 + $0x144] ss:$8 sps:$4 sm:$0xff]   ;;  %v1672_v22 = vld [vmem:[%s2322_s1 + $0x140] ss:$8 sps:$4 sm:$0xff]  }
  0x1e   :  { %v1669_v19 = vld [vmem:[%s2322_s1 + $0x330] ss:$8 sps:$4 sm:$0xff]   ;;  %v1677_v21 = vld [vmem:[%s2322_s1 + $0x344] ss:$8 sps:$4 sm:$0xff]   ;;  %v1675_v23 = vld [vmem:[%s2322_s1 + $0x340] ss:$8 sps:$4 sm:$0xff]  }
  0x1f   :  { %1026 = vmatpush1.bf16.msra.mxu1 %v1592_v30  ;;  %v1680_v24 = vld [vmem:[%s2322_s1 + $0x154] ss:$8 sps:$4 sm:$0xff]   ;;  %v1678_v26 = vld [vmem:[%s2322_s1 + $0x150] ss:$8 sps:$4 sm:$0xff]   ;;  %v1686_v28 = vld [vmem:[%s2322_s1 + $0x164] ss:$8 sps:$4 sm:$0xff]  }
  0x20   :  { %1132 = vmatpush1.bf16.msra.mxu0 %v1593_v31  ;;  %1027 = vmatprep.subr.bf16.mxu1 %v1594_v32  ;;  %v1683_v25 = vld [vmem:[%s2322_s1 + $0x354] ss:$8 sps:$4 sm:$0xff]   ;;  %v1681_v27 = vld [vmem:[%s2322_s1 + $0x350] ss:$8 sps:$4 sm:$0xff]   ;;  %v1736_v31 = vld [vmem:[%s2323_s0 + $0x48] ss:$36 sps:$4 sm:$0xff]  }
  0x21   :  { %1133 = vmatprep.subr.bf16.mxu0 %v1596_v33  ;;  %v1732_v29 = vld [vmem:[%s2323_s0 + $0x4c] ss:$36 sps:$4 sm:$0xff]   ;;  %v1734_v30 = vld [vmem:[%s2323_s0 + $0x5c] ss:$36 sps:$4 sm:$0xff]  }
  0x22   :  { %v1689_v32 = vld [vmem:[%s2322_s1 + $0x364] ss:$8 sps:$4 sm:$0xff]   ;;  %v1740_v33 = vld [vmem:[%s2323_s0 + $0x58] ss:$36 sps:$4 sm:$0xff]  }
  0x23   :  { %1028 = vmatpush1.bf16.msra.mxu1 %v1598_v34  ;;  %v1684_v34 = vld [vmem:[%s2322_s1 + $0x160] ss:$8 sps:$4 sm:$0xff]   ;;  %v1702_v48 = vld [vmem:[%s2322_s1 + $0x190] ss:$8 sps:$4 sm:$0xff]   ;;  %v1713_v51 = vld [vmem:[%s2322_s1 + $0x3a4] ss:$8 sps:$4 sm:$0xff]  }
  0x24   :  { %1134 = vmatpush1.bf16.msra.mxu0 %v1599_v35  ;;  %1029 = vmatprep.subr.bf16.mxu1 %v1600_v36  ;;  %v1687_v35 = vld [vmem:[%s2322_s1 + $0x360] ss:$8 sps:$4 sm:$0xff]   ;;  %v1692_v36 = vld [vmem:[%s2322_s1 + $0x174] ss:$8 sps:$4 sm:$0xff]  }
  0x25   :  { %1135 = vmatprep.subr.bf16.mxu0 %v1602_v37  ;;  %v1695_v37 = vld [vmem:[%s2322_s1 + $0x374] ss:$8 sps:$4 sm:$0xff]  }
  0x27   :  { %1030 = vmatpush1.bf16.msra.mxu1 %v1604_v38  ;;  %v1690_v38 = vld [vmem:[%s2322_s1 + $0x170] ss:$8 sps:$4 sm:$0xff]  }
  0x28   :  { %1136 = vmatpush1.bf16.msra.mxu0 %v1605_v39  ;;  %1031 = vmatprep.subr.bf16.mxu1 %v1606_v40  ;;  %v1693_v39 = vld [vmem:[%s2322_s1 + $0x370] ss:$8 sps:$4 sm:$0xff]   ;;  %v1698_v40 = vld [vmem:[%s2322_s1 + $0x184] ss:$8 sps:$4 sm:$0xff]  }
  0x29   :  { %1137 = vmatprep.subr.bf16.mxu0 %v1608_v41  ;;  %v1752_v41 = vld [vmem:[%s2323_s0 + $0xc] ss:$36 sps:$4 sm:$0xff]  }
  0x2b   :  { %1032 = vmatpush1.bf16.msra.mxu1 %v1610_v42  ;;  %v1701_v42 = vld [vmem:[%s2322_s1 + $0x384] ss:$8 sps:$4 sm:$0xff]  }
  0x2c   :  { %1138 = vmatpush1.bf16.msra.mxu0 %v1611_v43  ;;  %1033 = vmatprep.subr.bf16.mxu1 %v1612_v44  ;;  %v1755_v43 = vld [vmem:[%s2323_s0 + $0x1c] ss:$36 sps:$4 sm:$0xff]  }
  0x2d   :  { %1139 = vmatprep.subr.bf16.mxu0 %v1614_v45  ;;  %v1696_v44 = vld [vmem:[%s2322_s1 + $0x180] ss:$8 sps:$4 sm:$0xff]  }
  0x2e   :  { %v1699_v45 = vld [vmem:[%s2322_s1 + $0x380] ss:$8 sps:$4 sm:$0xff]  }
  0x2f   :  { %1034 = vmatpush1.bf16.msra.mxu1 %v1616_v46  ;;  %v1704_v46 = vld [vmem:[%s2322_s1 + $0x194] ss:$8 sps:$4 sm:$0xff]  }
  0x30   :  { %1140 = vmatpush1.bf16.msra.mxu0 %v1617_v47  ;;  %1035 = vmatprep.subr.bf16.mxu1 %v1618_v49  ;;  %v1707_v47 = vld [vmem:[%s2322_s1 + $0x394] ss:$8 sps:$4 sm:$0xff]   ;;  %v1705_v49 = vld [vmem:[%s2322_s1 + $0x390] ss:$8 sps:$4 sm:$0xff]  }
  0x31   :  { %1141 = vmatprep.subr.bf16.mxu0 %v1620_v50  ;;  %v1710_v50 = vld [vmem:[%s2322_s1 + $0x1a4] ss:$8 sps:$4 sm:$0xff]  }
  0x33   :  { %1036 = vmatpush1.bf16.msra.mxu1 %v1622_v52  ;;  %v1708_v52 = vld [vmem:[%s2322_s1 + $0x1a0] ss:$8 sps:$4 sm:$0xff]  }
  0x34   :  { %1142 = vmatpush1.bf16.msra.mxu0 %v1623_v53  ;;  %1037 = vmatprep.subr.bf16.mxu1 %v1624_v54  ;;  %v1711_v53 = vld [vmem:[%s2322_s1 + $0x3a0] ss:$8 sps:$4 sm:$0xff]   ;;  %v1716_v54 = vld [vmem:[%s2322_s1 + $0x1b4] ss:$8 sps:$4 sm:$0xff]  }
  0x35   :  { %1143 = vmatprep.subr.bf16.mxu0 %v1626_v55  ;;  %v1719_v55 = vld [vmem:[%s2322_s1 + $0x3b4] ss:$8 sps:$4 sm:$0xff]  }
  0x37   :  { %1038 = vmatpush1.bf16.msra.mxu1 %v1628_v56  ;;  %v1714_v56 = vld [vmem:[%s2322_s1 + $0x1b0] ss:$8 sps:$4 sm:$0xff]  }
  0x38   :  { %1144 = vmatpush1.bf16.msra.mxu0 %v1629_v57  ;;  %1039 = vmatprep.subr.bf16.mxu1 %v1630_v58  ;;  %v1717_v57 = vld [vmem:[%s2322_s1 + $0x3b0] ss:$8 sps:$4 sm:$0xff]   ;;  %v1722_v58 = vld [vmem:[%s2322_s1 + $0x1c4] ss:$8 sps:$4 sm:$0xff]  }
  0x39   :  { %1145 = vmatprep.subr.bf16.mxu0 %v1632_v59  ;;  %v1725_v59 = vld [vmem:[%s2322_s1 + $0x3c4] ss:$8 sps:$4 sm:$0xff]  }
  0x3b   :  { %1040 = vmatpush1.bf16.msra.mxu1 %v1634_v60  ;;  %v1720_v60 = vld [vmem:[%s2322_s1 + $0x1c0] ss:$8 sps:$4 sm:$0xff]  }
  0x3c   :  { %1146 = vmatpush1.bf16.msra.mxu0 %v1635_v61  ;;  %1041 = vmatprep.subr.bf16.mxu1 %v1636_v62  ;;  %v1723_v61 = vld [vmem:[%s2322_s1 + $0x3c0] ss:$8 sps:$4 sm:$0xff]   ;;  %v1728_v62 = vld [vmem:[%s2322_s1 + $0x1d4] ss:$8 sps:$4 sm:$0xff]  }
  0x3d   :  { %1147 = vmatprep.subr.bf16.mxu0 %v1638_v63  ;;  %v1731_v63 = vld [vmem:[%s2322_s1 + $0x3d4] ss:$8 sps:$4 sm:$0xff]  }
  0x3f   :  { %1042 = vmatpush1.bf16.msra.mxu1 %v1640_v0  ;;  %v1726_v0 = vld [vmem:[%s2322_s1 + $0x1d0] ss:$8 sps:$4 sm:$0xff]  }
  0x40   :  { %1148 = vmatpush1.bf16.msra.mxu0 %v1641_v1  ;;  %1064 = vmatprep.subr.bf16.mxu1 %v1647_v2  ;;  %v1729_v1 = vld [vmem:[%s2322_s1 + $0x3d0] ss:$8 sps:$4 sm:$0xff]   ;;  %v1739_v2 = vld [vmem:[%s2322_s1 + $0x1e4] ss:$8 sps:$4 sm:$0xff]  }
  0x41   :  { %1170 = vmatprep.subr.bf16.mxu0 %v1653_v3  ;;  %v1743_v3 = vld [vmem:[%s2322_s1 + $0x3e4] ss:$8 sps:$4 sm:$0xff]  }
  0x42   :  { %1044 = vmatmul.mubr.bf16.vlgmr.msra.gmra.mrb[0].mxu1 %v1642_v4  ;;  %v1737_v4 = vld [vmem:[%s2322_s1 + $0x1e0] ss:$8 sps:$4 sm:$0xff]  }
  0x43   :  { %1150 = vmatmul.mubr.bf16.vlgmr.msra.gmra.mrb[0].mxu0 %v1648_v6  ;;  %1065 = vmatpush1.bf16.msra.mxu1 %v1645_v5  ;;  %v1741_v5 = vld [vmem:[%s2322_s1 + $0x3e0] ss:$8 sps:$4 sm:$0xff]   ;;  %v1746_v6 = vld [vmem:[%s2322_s1 + $0x1f4] ss:$8 sps:$4 sm:$0xff]  }
  0x44   :  { %1171 = vmatpush1.bf16.msra.mxu0 %v1651_v7  ;;  %1066 = vmatprep.subr.bf16.mxu1 %v1656_v8  ;;  %v1749_v7 = vld [vmem:[%s2322_s1 + $0x3f4] ss:$8 sps:$4 sm:$0xff]   ;;  %v1744_v8 = vld [vmem:[%s2322_s1 + $0x1f0] ss:$8 sps:$4 sm:$0xff]  }
  0x45   :  { %1172 = vmatprep.subr.bf16.mxu0 %v1659_v9  ;;  %1053 = vmatprep.mubr.bf16.mxu1 %v1732_v29  ;;  %v1747_v9 = vld [vmem:[%s2322_s1 + $0x3f0] ss:$8 sps:$4 sm:$0xff]   ;;  %v1782_v29 = vld [vmem:[%s2322_s1 + $0x464] ss:$8 sps:$4 sm:$0xff]  }
  0x46   :  { %1159 = vmatprep.mubr.bf16.mxu0 %v1734_v30  ;;  %v1780_v30 = vld [vmem:[%s2322_s1 + $0x460] ss:$8 sps:$4 sm:$0xff]  }
  0x47   :  { %1067 = vmatpush1.bf16.msra.mxu1 %v1654_v10  ;;  %v1758_v10 = vld [vmem:[%s2322_s1 + $0x404] ss:$8 sps:$4 sm:$0xff]  }
  0x48   :  { %1173 = vmatpush1.bf16.msra.mxu0 %v1657_v11  ;;  %1068 = vmatprep.subr.bf16.mxu1 %v1662_v12  ;;  %v1750_v11 = vld [vmem:[%s2323_s0 + $0x8] ss:$36 sps:$4 sm:$0xff]   ;;  %v1753_v12 = vld [vmem:[%s2323_s0 + $0x18] ss:$36 sps:$4 sm:$0xff]  }
  0x49   :  { %1174 = vmatprep.subr.bf16.mxu0 %v1665_v13  ;;  %v1756_v13 = vld [vmem:[%s2322_s1 + $0x400] ss:$8 sps:$4 sm:$0xff]  }
  0x4a   :  { %1054 = vmatmul.mubr.bf16.gmra.mrb[4].mxu1 %v1736_v31  ;;  %v1785_v31 = vld [vmem:[%s2322_s1 + $0x474] ss:$8 sps:$4 sm:$0xff]  }
  0x4b   :  { %1069 = vmatpush1.bf16.msra.mxu1 %v1660_v14  ;;  %1160 = vmatmul.mubr.bf16.gmra.mrb[4].mxu0 %v1740_v33  ;;  %v1761_v14 = vld [vmem:[%s2322_s1 + $0x414] ss:$8 sps:$4 sm:$0xff]   ;;  %v1786_v33 = vld [vmem:[%s2323_s0 + $0x20] ss:$36 sps:$4 sm:$0xff]  }
  0x4c   :  { %1175 = vmatpush1.bf16.msra.mxu0 %v1663_v15  ;;  %1070 = vmatprep.subr.bf16.mxu1 %v1668_v16  ;;  %v1762_v15 = vld [vmem:[%s2323_s0 + $0x54] ss:$36 sps:$4 sm:$0xff]   ;;  %v1764_v16 = vld [vmem:[%s2323_s0 + $0x64] ss:$36 sps:$4 sm:$0xff]  }
  0x4d   :  { %1176 = vmatprep.subr.bf16.mxu0 %v1671_v17  ;;  %1096 = vmatprep.mubr.bf16.mxu1 %v1752_v41  ;;  %v1759_v17 = vld [vmem:[%s2322_s1 + $0x410] ss:$8 sps:$4 sm:$0xff]  }
  0x4e   :  { %1202 = vmatprep.mubr.bf16.mxu0 %v1755_v43 }
  0x4f   :  { %1071 = vmatpush1.bf16.msra.mxu1 %v1666_v18  ;;  %v1770_v18 = vld [vmem:[%s2322_s1 + $0x424] ss:$8 sps:$4 sm:$0xff]  }
  0x50   :  { %1177 = vmatpush1.bf16.msra.mxu0 %v1669_v19  ;;  %1072 = vmatprep.subr.bf16.mxu1 %v1674_v20  ;;  %v1766_v19 = vld [vmem:[%s2323_s0 + $0x50] ss:$36 sps:$4 sm:$0xff]   ;;  %v1767_v20 = vld [vmem:[%s2323_s0 + $0x60] ss:$36 sps:$4 sm:$0xff]  }
  0x51   :  { %1178 = vmatprep.subr.bf16.mxu0 %v1677_v21  ;;  %v1768_v21 = vld [vmem:[%s2322_s1 + $0x420] ss:$8 sps:$4 sm:$0xff]  }
  0x53   :  { %1073 = vmatpush1.bf16.msra.mxu1 %v1672_v22  ;;  %v1773_v22 = vld [vmem:[%s2322_s1 + $0x434] ss:$8 sps:$4 sm:$0xff]  }
  0x54   :  { %1179 = vmatpush1.bf16.msra.mxu0 %v1675_v23  ;;  %1074 = vmatprep.subr.bf16.mxu1 %v1680_v24  ;;  %v1771_v23 = vld [vmem:[%s2322_s1 + $0x430] ss:$8 sps:$4 sm:$0xff]   ;;  %v1776_v24 = vld [vmem:[%s2322_s1 + $0x444] ss:$8 sps:$4 sm:$0xff]  }
  0x55   :  { %1180 = vmatprep.subr.bf16.mxu0 %v1683_v25  ;;  %v1788_v25 = vmov 0  }
  0x57   :  { %1075 = vmatpush1.bf16.msra.mxu1 %v1678_v26  ;;  %v1774_v26 = vld [vmem:[%s2322_s1 + $0x440] ss:$8 sps:$4 sm:$0xff]  }
  0x58   :  { %1181 = vmatpush1.bf16.msra.mxu0 %v1681_v27  ;;  %1076 = vmatprep.subr.bf16.mxu1 %v1686_v28  ;;  %v1779_v27 = vld [vmem:[%s2322_s1 + $0x454] ss:$8 sps:$4 sm:$0xff]   ;;  %v1777_v28 = vld [vmem:[%s2322_s1 + $0x450] ss:$8 sps:$4 sm:$0xff]  }
  0x59   :  { %1182 = vmatprep.subr.bf16.mxu0 %v1689_v32  ;;  %v1783_v32 = vld [vmem:[%s2322_s1 + $0x470] ss:$8 sps:$4 sm:$0xff]  }
  0x5b   :  { %1077 = vmatpush1.bf16.msra.mxu1 %v1684_v34  ;;  %v1787_v34 = vld [vmem:[%s2323_s0 + $0x68] ss:$36 sps:$4 sm:$0xff]  }
  0x5c   :  { %1183 = vmatpush1.bf16.msra.mxu0 %v1687_v35  ;;  %1078 = vmatprep.subr.bf16.mxu1 %v1692_v36 }
  0x5d   :  { %1184 = vmatprep.subr.bf16.mxu0 %v1695_v37 }
  0x5f   :  { %1079 = vmatpush1.bf16.msra.mxu1 %v1690_v38 }
  0x60   :  { %1185 = vmatpush1.bf16.msra.mxu0 %v1693_v39  ;;  %1080 = vmatprep.subr.bf16.mxu1 %v1698_v40 }
  0x61   :  { %1186 = vmatprep.subr.bf16.mxu0 %v1701_v42 }
  0x63   :  { %1081 = vmatpush1.bf16.msra.mxu1 %v1696_v44 }
  0x64   :  { %1187 = vmatpush1.bf16.msra.mxu0 %v1699_v45  ;;  %1082 = vmatprep.subr.bf16.mxu1 %v1704_v46 }
  0x65   :  { %1188 = vmatprep.subr.bf16.mxu0 %v1707_v47 }
  0x67   :  { %1083 = vmatpush1.bf16.msra.mxu1 %v1702_v48 }
  0x68   :  { %1189 = vmatpush1.bf16.msra.mxu0 %v1705_v49  ;;  %1084 = vmatprep.subr.bf16.mxu1 %v1710_v50 }
  0x69   :  { %1190 = vmatprep.subr.bf16.mxu0 %v1713_v51  ;;  %v1305_v51 = vlaneseq }
  0x6b   :  { %1085 = vmatpush1.bf16.msra.mxu1 %v1708_v52  ;;  %v1306_v52 = vshrl.u32 %v1305_v51, 7 }
  0x6c   :  { %1191 = vmatpush1.bf16.msra.mxu0 %v1711_v53  ;;  %1086 = vmatprep.subr.bf16.mxu1 %v1716_v54  ;;  %v1303_v54 = vld [vmem:[%s2324_s2] sm:$0x3] }
  0x6d   :  { %1192 = vmatprep.subr.bf16.mxu0 %v1719_v55  ;;  %v1307_v53 = vsub.s32 0, %v1306_v52  ;;  %v1311_v55 = vsub.s32 1, %v1306_v52 }
  0x6f   :  { %1087 = vmatpush1.bf16.msra.mxu1 %v1714_v56  ;;  %v1308_v56 = vrot.slane %v1303_v54, %v1307_v53 }
  0x70   :  { %1193 = vmatpush1.bf16.msra.mxu0 %v1717_v57  ;;  %1088 = vmatprep.subr.bf16.mxu1 %v1722_v58 }
  0x71   :  { %1194 = vmatprep.subr.bf16.mxu0 %v1725_v59  ;;  %v1312_v59 = vrot.slane %v1303_v54, %v1311_v55 }
  0x73   :  { %1089 = vmatpush1.bf16.msra.mxu1 %v1720_v60 }
  0x74   :  { %1195 = vmatpush1.bf16.msra.mxu0 %v1723_v61  ;;  %1090 = vmatprep.subr.bf16.mxu1 %v1728_v62 }
  0x75   :  { %1196 = vmatprep.subr.bf16.mxu0 %v1731_v63 }
  0x77   :  { %1091 = vmatpush1.bf16.msra.mxu1 %v1726_v0 }
  0x78   :  { %1197 = vmatpush1.bf16.msra.mxu0 %v1729_v1  ;;  %1092 = vmatprep.subr.bf16.mxu1 %v1739_v2 }
  0x79   :  { %1198 = vmatprep.subr.bf16.mxu0 %v1743_v3 }
  0x7b   :  { %1093 = vmatpush1.bf16.msra.mxu1 %v1737_v4 }
  0x7c   :  { %1199 = vmatpush1.bf16.msra.mxu0 %v1741_v5  ;;  %1094 = vmatprep.subr.bf16.mxu1 %v1746_v6 }
  0x7d   :  { %1200 = vmatprep.subr.bf16.mxu0 %v1749_v7 }
  0x7f   :  { %1095 = vmatpush1.bf16.msra.mxu1 %v1744_v8 }
  0x80   :  { %1201 = vmatpush1.bf16.msra.mxu0 %v1747_v9  ;;  %1497 = vmatprep.subr.bf16.mxu1 %v1758_v10 }
  0x81   :  { %1223 = vmatprep.subr.bf16.mxu0 %v1758_v10 }
  0x82   :  { %1097 = vmatmul.mubr.bf16.vlgmr.msra.gmra.mrb[0].mxu1 %v1750_v11 }
  0x83   :  { %1203 = vmatmul.mubr.bf16.vlgmr.msra.gmra.mrb[0].mxu0 %v1753_v12  ;;  %1505 = vmatpush1.bf16.msra.mxu1 %v1756_v13 }
  0x84   :  { %1224 = vmatpush1.bf16.msra.mxu0 %v1756_v13  ;;  %1498 = vmatprep.subr.bf16.mxu1 %v1761_v14 }
  0x85   :  { %1225 = vmatprep.subr.bf16.mxu0 %v1761_v14  ;;  %1106 = vmatprep.mubr.bf16.mxu1 %v1762_v15 }
  0x86   :  { %1212 = vmatprep.mubr.bf16.mxu0 %v1764_v16 }
  0x87   :  { %1506 = vmatpush1.bf16.msra.mxu1 %v1759_v17 }
  0x88   :  { %1226 = vmatpush1.bf16.msra.mxu0 %v1759_v17  ;;  %1499 = vmatprep.subr.bf16.mxu1 %v1770_v18 }
  0x89   :  { %1227 = vmatprep.subr.bf16.mxu0 %v1770_v18 }
  0x8a   :  { %1107 = vmatmul.mubr.bf16.gmra.mrb[4].mxu1 %v1766_v19 }
  0x8b   :  { %1213 = vmatmul.mubr.bf16.gmra.mrb[4].mxu0 %v1767_v20  ;;  %1507 = vmatpush1.bf16.msra.mxu1 %v1768_v21 }
  0x8c   :  { %1228 = vmatpush1.bf16.msra.mxu0 %v1768_v21  ;;  %1500 = vmatprep.subr.bf16.mxu1 %v1773_v22 }
  0x8d   :  { %1229 = vmatprep.subr.bf16.mxu0 %v1773_v22  ;;  %1255 = vmatprep.mubr.bf16.mxu0 %v1788_v25 }
  0x8e   :  { %1265 = vmatprep.mubr.bf16.mxu1 %v1788_v25 }
  0x8f   :  { %1508 = vmatpush1.bf16.msra.mxu1 %v1771_v23 }
  0x90   :  { %1230 = vmatpush1.bf16.msra.mxu0 %v1771_v23  ;;  %1501 = vmatprep.subr.bf16.mxu1 %v1776_v24 }
  0x91   :  { %1231 = vmatprep.subr.bf16.mxu0 %v1776_v24 }
  0x93   :  { %1509 = vmatpush1.bf16.msra.mxu1 %v1774_v26 }
  0x94   :  { %1232 = vmatpush1.bf16.msra.mxu0 %v1774_v26  ;;  %1502 = vmatprep.subr.bf16.mxu1 %v1779_v27 }
  0x95   :  { %1233 = vmatprep.subr.bf16.mxu0 %v1779_v27 }
  0x97   :  { %1510 = vmatpush1.bf16.msra.mxu1 %v1777_v28 }
  0x98   :  { %1234 = vmatpush1.bf16.msra.mxu0 %v1777_v28  ;;  %1503 = vmatprep.subr.bf16.mxu1 %v1782_v29 }
  0x99   :  { %1235 = vmatprep.subr.bf16.mxu0 %v1782_v29 }
  0x9b   :  { %1511 = vmatpush1.bf16.msra.mxu1 %v1780_v30 }
  0x9c   :  { %1236 = vmatpush1.bf16.msra.mxu0 %v1780_v30  ;;  %1504 = vmatprep.subr.bf16.mxu1 %v1785_v31 }
  0x9d   :  { %1237 = vmatprep.subr.bf16.mxu0 %v1785_v31 }
  0x9f   :  { %1512 = vmatpush1.bf16.msra.mxu1 %v1783_v32 }
  0xa0   :  { %1238 = vmatpush1.bf16.msra.mxu0 %v1783_v32 }
  0xa2   :  { %1266 = vmatmul.mubr.bf16.vlgmr.msra.gmra.mrb[8].mxu1 %v1787_v34 }
  0xa3   :  { %1256 = vmatmul.mubr.bf16.vlgmr.msra.gmra.mrb[0].mxu0 %v1786_v33 }
 0x155   :  { %v1098_v35 = vpop.f32.mrb[0].mxu1 }
 0x156   :  { %v1100_v36 = vpop.f32.mrb[1].mxu1 }
 0x157   :  { %v1102_v37 = vpop.f32.mrb[2].mxu1 }
 0x158   :  { %v1104_v38 = vpop.f32.mrb[3].mxu1 }
 0x15d   :  { %v1108_v39 = vpop.f32.mrb[4].mxu1 }
 0x15e   :  { %v1214_v40 = vpop.f32.mrb[4].mxu0  ;;  %v1110_v42 = vpop.f32.mrb[5].mxu1 }
 0x15f   :  { %v1517_v41 = vadd.f32 %v1214_v40, %v1108_v39  ;;  %v1216_v43 = vpop.f32.mrb[5].mxu0  ;;  %v1112_v45 = vpop.f32.mrb[6].mxu1 }
 0x160   :  { %v1519_v44 = vadd.f32 %v1216_v43, %v1110_v42  ;;  %v1218_v46 = vpop.f32.mrb[6].mxu0  ;;  %v1114_v48 = vpop.f32.mrb[7].mxu1 }
 0x161   :  { %v1521_v47 = vadd.f32 %v1218_v46, %v1112_v45  ;;  %v1220_v49 = vpop.f32.mrb[7].mxu0 }
 0x162   :  { %v1523_v50 = vadd.f32 %v1220_v49, %v1114_v48 }
 0x175   :  { %v1267_v58 = vpop.f32.mrb[8].mxu1 }
 0x176   :  { %v1257_v57 = vpop.f32.mrb[0].mxu0  ;;  %v1518_v61 = vadd.f32 %v1517_v41, %v1267_v58  ;;  %v1269_v63 = vpop.f32.mrb[9].mxu1 }
 0x177   :  { %v1513_v60 = vadd.f32 %v1257_v57, %v1098_v35  ;;  %v1259_v62 = vpop.f32.mrb[1].mxu0  ;;  %v1520_v1 = vadd.f32 %v1519_v44, %v1269_v63  ;;  %v1271_v3 = vpop.f32.mrb[10].mxu1 }
 0x178   :  { %v1514_v0 = vadd.f32 %v1259_v62, %v1100_v36  ;;  %v1261_v2 = vpop.f32.mrb[2].mxu0  ;;  %v1319_v5 = vadd.f32 %v1518_v61, %v1308_v56  ;;  %v1522_v7 = vadd.f32 %v1521_v47, %v1271_v3  ;;  %v1273_v9 = vpop.f32.mrb[11].mxu1 }
 0x179   :  { %v1315_v4 = vadd.f32 %v1513_v60, %v1308_v56  ;;  %v1515_v6 = vadd.f32 %v1261_v2, %v1102_v37  ;;  %v1263_v8 = vpop.f32.mrb[3].mxu0  ;;  %v1320_v11 = vadd.f32 %v1520_v1, %v1312_v59  ;;  %v1524_v13 = vadd.f32 %v1523_v50, %v1273_v9 }
 0x17a   :  { %v1316_v10 = vadd.f32 %v1514_v0, %v1312_v59  ;;  %v1516_v12 = vadd.f32 %v1263_v8, %v1104_v38  ;;  %1327 = vst [vmem:[%s2325_s3 + $0x20] sm:$0xff] %v1319_v5  ;;  %v1321_v15 = vadd.f32 %v1522_v7, %v1308_v56 }
 0x17b   :  { %1323 = vst [vmem:[%s2325_s3] sm:$0xff] %v1315_v4  ;;  %v1317_v14 = vadd.f32 %v1515_v6, %v1308_v56  ;;  %1328 = vst [vmem:[%s2325_s3 + $0x28] sm:$0xff] %v1320_v11  ;;  %v1322_v17 = vadd.f32 %v1524_v13, %v1312_v59 }
 0x17c   :  { %1324 = vst [vmem:[%s2325_s3 + $0x8] sm:$0xff] %v1316_v10  ;;  %v1318_v16 = vadd.f32 %v1516_v12, %v1312_v59  ;;  %1329 = vst [vmem:[%s2325_s3 + $0x30] sm:$0xff] %v1321_v15 }
 0x17d   :  { %1325 = vst [vmem:[%s2325_s3 + $0x10] sm:$0xff] %v1317_v14  ;;  %1330 = vst [vmem:[%s2325_s3 + $0x38] sm:$0xff] %v1322_v17 }
 0x17e   :  { %1326 = vst [vmem:[%s2325_s3 + $0x18] sm:$0xff] %v1318_v16 }

// kernel: alexnet_forward.31
= control target key start
LH: loop header
LB: loop body
LE: loop exit
PB: predicated region body
PF: predicated region fallthrough
CT: control target
= control target key end

     0   :  { %v22_v0 = vlaneseq  ;;  %s134_s1 = inlined_call_operand.vmem [shape: f32[1,256], index: 1, kind: input, shape index: {}]   ;;  %s135_s2 = inlined_call_operand.vmem [shape: f32[1,256], index: 2, kind: input, shape index: {}]   ;;  %s136_s0 = inlined_call_operand.vmem [shape: f32[24,256], index: 0, kind: input, shape index: {}]   ;;  %s137_s3 = inlined_call_operand.vmem [shape: f32[24,256], index: 3, kind: output, shape index: {}]  }
   0x1   :  { %v20_v2 = vld [vmem:[%s134_s1] sm:$0x3]  ;;  %v15_v7 = vld [vmem:[%s136_s0 + $0x8] sm:$0xff]  ;;  %v16_v8 = vld [vmem:[%s136_s0 + $0x10] sm:$0xff] }
   0x2   :  { %v23_v1 = vshrl.u32 %v22_v0, 7  ;;  %v38_v3 = vld [vmem:[%s135_s2] sm:$0x3]  ;;  %v17_v9 = vld [vmem:[%s136_s0 + $0x18] sm:$0xff]  ;;  %v19_v15 = vld [vmem:[%s136_s0 + $0x28] sm:$0xff] }
   0x3   :  { %v14_v4 = vld [vmem:[%s136_s0] sm:$0xff] }
   0x4   :  { %v24_v5 = vsub.s32 0, %v23_v1  ;;  %v28_v6 = vsub.s32 1, %v23_v1  ;;  %v18_v14 = vld [vmem:[%s136_s0 + $0x20] sm:$0xff] }
   0x6   :  { %v25_v10 = vrot.slane %v20_v2, %v24_v5  ;;  %v43_v11 = vrot.slane %v38_v3, %v24_v5  ;;  %v29_v12 = vrot.slane %v20_v2, %v28_v6  ;;  %v47_v13 = vrot.slane %v38_v3, %v28_v6 }
   0x8   :  { %v32_v16 = vmul.f32 %v25_v10, %v14_v4  ;;  %v33_v17 = vmul.f32 %v29_v12, %v15_v7  ;;  %v34_v18 = vmul.f32 %v25_v10, %v16_v8  ;;  %v35_v19 = vmul.f32 %v29_v12, %v17_v9 }
   0x9   :  { %v36_v20 = vmul.f32 %v25_v10, %v18_v14  ;;  %v37_v21 = vmul.f32 %v29_v12, %v19_v15 }
   0xa   :  { %v50_v22 = vadd.f32 %v43_v11, %v32_v16  ;;  %v51_v23 = vadd.f32 %v47_v13, %v33_v17  ;;  %v52_v24 = vadd.f32 %v43_v11, %v34_v18  ;;  %v53_v25 = vadd.f32 %v47_v13, %v35_v19 }
   0xb   :  { %v54_v26 = vadd.f32 %v43_v11, %v36_v20  ;;  %v55_v27 = vadd.f32 %v47_v13, %v37_v21 }
   0xc   :  { %v56_v28 = vmax.f32 %v50_v22, 0.0  ;;  %v57_v29 = vmax.f32 %v51_v23, 0.0  ;;  %v58_v30 = vmax.f32 %v52_v24, 0.0  ;;  %v59_v31 = vmax.f32 %v53_v25, 0.0 }
   0xd   :  { %v60_v32 = vmax.f32 %v54_v26, 0.0  ;;  %v61_v33 = vmax.f32 %v55_v27, 0.0 }
   0xe   :  { %62 = vst [vmem:[%s137_s3] sm:$0xff] %v56_v28  ;;  %63 = vst [vmem:[%s137_s3 + $0x8] sm:$0xff] %v57_v29 }
   0xf   :  { %64 = vst [vmem:[%s137_s3 + $0x10] sm:$0xff] %v58_v30  ;;  %65 = vst [vmem:[%s137_s3 + $0x18] sm:$0xff] %v59_v31 }
  0x10   :  { %66 = vst [vmem:[%s137_s3 + $0x20] sm:$0xff] %v60_v32  ;;  %67 = vst [vmem:[%s137_s3 + $0x28] sm:$0xff] %v61_v33 }

// kernel: alexnet_forward.32
= control target key start
LH: loop header
LB: loop body
LE: loop exit
PB: predicated region body
PF: predicated region fallthrough
CT: control target
= control target key end

     0   :  { %s3489_s1 = inlined_call_operand.vmem [shape: bf16[1792,256], index: 1, kind: input, shape index: {}]   ;;  %s3490_s0 = inlined_call_operand.vmem [shape: bf16[32,1792], index: 0, kind: input, shape index: {}]   ;;  %s3491_s2 = inlined_call_operand.vmem [shape: f32[1,256], index: 2, kind: input, shape index: {}]   ;;  %s3492_s3 = inlined_call_operand.vmem [shape: f32[32,256], index: 3, kind: output, shape index: {}]  }
   0x1   :  { %v2308_v0 = vld [vmem:[%s3489_s1 + $0x4] ss:$8 sps:$4 sm:$0xff]   ;;  %v2312_v2 = vld [vmem:[%s3489_s1] ss:$8 sps:$4 sm:$0xff]   ;;  %v2314_v4 = vld [vmem:[%s3489_s1 + $0x14] ss:$8 sps:$4 sm:$0xff]  }
   0x2   :  { %v2310_v1 = vld [vmem:[%s3489_s1 + $0x304] ss:$8 sps:$4 sm:$0xff]   ;;  %1546 = vmatprep.subr.bf16.mxu1 %v2308_v0  ;;  %v2313_v3 = vld [vmem:[%s3489_s1 + $0x300] ss:$8 sps:$4 sm:$0xff]   ;;  %v2316_v5 = vld [vmem:[%s3489_s1 + $0x314] ss:$8 sps:$4 sm:$0xff]  }
   0x3   :  { %1705 = vmatprep.subr.bf16.mxu0 %v2310_v1  ;;  %1547 = vmatpush1.bf16.msra.mxu1 %v2312_v2  ;;  %v2318_v6 = vld [vmem:[%s3489_s1 + $0x10] ss:$8 sps:$4 sm:$0xff]   ;;  %v2320_v8 = vld [vmem:[%s3489_s1 + $0x24] ss:$8 sps:$4 sm:$0xff]   ;;  %v2324_v10 = vld [vmem:[%s3489_s1 + $0x20] ss:$8 sps:$4 sm:$0xff]  }
   0x4   :  { %1706 = vmatpush1.bf16.msra.mxu0 %v2313_v3  ;;  %1548 = vmatprep.subr.bf16.mxu1 %v2314_v4  ;;  %v2319_v7 = vld [vmem:[%s3489_s1 + $0x310] ss:$8 sps:$4 sm:$0xff]   ;;  %v2322_v9 = vld [vmem:[%s3489_s1 + $0x324] ss:$8 sps:$4 sm:$0xff]   ;;  %v2325_v11 = vld [vmem:[%s3489_s1 + $0x320] ss:$8 sps:$4 sm:$0xff]  }
   0x5   :  { %1707 = vmatprep.subr.bf16.mxu0 %v2316_v5  ;;  %v2326_v12 = vld [vmem:[%s3489_s1 + $0x34] ss:$8 sps:$4 sm:$0xff]   ;;  %v2330_v14 = vld [vmem:[%s3489_s1 + $0x30] ss:$8 sps:$4 sm:$0xff]   ;;  %v2332_v16 = vld [vmem:[%s3489_s1 + $0x44] ss:$8 sps:$4 sm:$0xff]  }
   0x6   :  { %v2328_v13 = vld [vmem:[%s3489_s1 + $0x334] ss:$8 sps:$4 sm:$0xff]   ;;  %v2331_v15 = vld [vmem:[%s3489_s1 + $0x330] ss:$8 sps:$4 sm:$0xff]   ;;  %v2334_v17 = vld [vmem:[%s3489_s1 + $0x344] ss:$8 sps:$4 sm:$0xff]  }
   0x7   :  { %1549 = vmatpush1.bf16.msra.mxu1 %v2318_v6  ;;  %v2336_v18 = vld [vmem:[%s3489_s1 + $0x40] ss:$8 sps:$4 sm:$0xff]   ;;  %v2338_v20 = vld [vmem:[%s3489_s1 + $0x54] ss:$8 sps:$4 sm:$0xff]   ;;  %v2342_v22 = vld [vmem:[%s3489_s1 + $0x50] ss:$8 sps:$4 sm:$0xff]  }
   0x8   :  { %1708 = vmatpush1.bf16.msra.mxu0 %v2319_v7  ;;  %1550 = vmatprep.subr.bf16.mxu1 %v2320_v8  ;;  %v2337_v19 = vld [vmem:[%s3489_s1 + $0x340] ss:$8 sps:$4 sm:$0xff]   ;;  %v2340_v21 = vld [vmem:[%s3489_s1 + $0x354] ss:$8 sps:$4 sm:$0xff]   ;;  %v2343_v23 = vld [vmem:[%s3489_s1 + $0x350] ss:$8 sps:$4 sm:$0xff]  }
   0x9   :  { %1709 = vmatprep.subr.bf16.mxu0 %v2322_v9  ;;  %v2344_v24 = vld [vmem:[%s3489_s1 + $0x64] ss:$8 sps:$4 sm:$0xff]   ;;  %v2348_v26 = vld [vmem:[%s3489_s1 + $0x60] ss:$8 sps:$4 sm:$0xff]   ;;  %v2350_v28 = vld [vmem:[%s3489_s1 + $0x74] ss:$8 sps:$4 sm:$0xff]  }
   0xa   :  { %v2346_v25 = vld [vmem:[%s3489_s1 + $0x364] ss:$8 sps:$4 sm:$0xff]   ;;  %v2349_v27 = vld [vmem:[%s3489_s1 + $0x360] ss:$8 sps:$4 sm:$0xff]   ;;  %v2352_v29 = vld [vmem:[%s3489_s1 + $0x374] ss:$8 sps:$4 sm:$0xff]  }
   0xb   :  { %1551 = vmatpush1.bf16.msra.mxu1 %v2324_v10  ;;  %v2354_v30 = vld [vmem:[%s3489_s1 + $0x70] ss:$8 sps:$4 sm:$0xff]   ;;  %v2356_v32 = vld [vmem:[%s3489_s1 + $0x84] ss:$8 sps:$4 sm:$0xff]   ;;  %v2360_v34 = vld [vmem:[%s3489_s1 + $0x80] ss:$8 sps:$4 sm:$0xff]  }
   0xc   :  { %1710 = vmatpush1.bf16.msra.mxu0 %v2325_v11  ;;  %1552 = vmatprep.subr.bf16.mxu1 %v2326_v12  ;;  %v2355_v31 = vld [vmem:[%s3489_s1 + $0x370] ss:$8 sps:$4 sm:$0xff]   ;;  %v2358_v33 = vld [vmem:[%s3489_s1 + $0x384] ss:$8 sps:$4 sm:$0xff]   ;;  %v2361_v35 = vld [vmem:[%s3489_s1 + $0x380] ss:$8 sps:$4 sm:$0xff]  }
   0xd   :  { %1711 = vmatprep.subr.bf16.mxu0 %v2328_v13  ;;  %v2362_v36 = vld [vmem:[%s3489_s1 + $0x94] ss:$8 sps:$4 sm:$0xff]   ;;  %v2366_v38 = vld [vmem:[%s3489_s1 + $0x90] ss:$8 sps:$4 sm:$0xff]   ;;  %v2368_v40 = vld [vmem:[%s3489_s1 + $0xa4] ss:$8 sps:$4 sm:$0xff]  }
   0xe   :  { %v2364_v37 = vld [vmem:[%s3489_s1 + $0x394] ss:$8 sps:$4 sm:$0xff]   ;;  %v2367_v39 = vld [vmem:[%s3489_s1 + $0x390] ss:$8 sps:$4 sm:$0xff]   ;;  %v2370_v41 = vld [vmem:[%s3489_s1 + $0x3a4] ss:$8 sps:$4 sm:$0xff]  }
   0xf   :  { %1553 = vmatpush1.bf16.msra.mxu1 %v2330_v14  ;;  %v2372_v42 = vld [vmem:[%s3489_s1 + $0xa0] ss:$8 sps:$4 sm:$0xff]   ;;  %v2374_v44 = vld [vmem:[%s3489_s1 + $0xb4] ss:$8 sps:$4 sm:$0xff]   ;;  %v2378_v46 = vld [vmem:[%s3489_s1 + $0xb0] ss:$8 sps:$4 sm:$0xff]  }
  0x10   :  { %1712 = vmatpush1.bf16.msra.mxu0 %v2331_v15  ;;  %1554 = vmatprep.subr.bf16.mxu1 %v2332_v16  ;;  %v2373_v43 = vld [vmem:[%s3489_s1 + $0x3a0] ss:$8 sps:$4 sm:$0xff]   ;;  %v2376_v45 = vld [vmem:[%s3489_s1 + $0x3b4] ss:$8 sps:$4 sm:$0xff]   ;;  %v2379_v47 = vld [vmem:[%s3489_s1 + $0x3b0] ss:$8 sps:$4 sm:$0xff]  }
  0x11   :  { %1713 = vmatprep.subr.bf16.mxu0 %v2334_v17  ;;  %v2406_v48 = vld [vmem:[%s3490_s0 + $0x4] ss:$56 sps:$4 sm:$0xff]   ;;  %v2384_v52 = vld [vmem:[%s3489_s1 + $0xc0] ss:$8 sps:$4 sm:$0xff]   ;;  %v2390_v56 = vld [vmem:[%s3489_s1 + $0xd0] ss:$8 sps:$4 sm:$0xff]  }
  0x12   :  { %v2380_v49 = vld [vmem:[%s3489_s1 + $0xc4] ss:$8 sps:$4 sm:$0xff]   ;;  %1578 = vmatprep.mubr.bf16.mxu1 %v2406_v48  ;;  %v2412_v51 = vld [vmem:[%s3490_s0 + $0x1c] ss:$56 sps:$4 sm:$0xff]   ;;  %v2385_v53 = vld [vmem:[%s3489_s1 + $0x3c0] ss:$8 sps:$4 sm:$0xff]  }
  0x13   :  { %1555 = vmatpush1.bf16.msra.mxu1 %v2336_v18  ;;  %v2382_v50 = vld [vmem:[%s3489_s1 + $0x3c4] ss:$8 sps:$4 sm:$0xff]   ;;  %v2386_v54 = vld [vmem:[%s3489_s1 + $0xd4] ss:$8 sps:$4 sm:$0xff]   ;;  %1737 = vmatprep.mubr.bf16.mxu0 %v2412_v51  ;;  %v2391_v57 = vld [vmem:[%s3489_s1 + $0x3d0] ss:$8 sps:$4 sm:$0xff]  }
  0x14   :  { %1714 = vmatpush1.bf16.msra.mxu0 %v2337_v19  ;;  %1556 = vmatprep.subr.bf16.mxu1 %v2338_v20  ;;  %v2388_v55 = vld [vmem:[%s3489_s1 + $0x3d4] ss:$8 sps:$4 sm:$0xff]   ;;  %v2392_v58 = vld [vmem:[%s3489_s1 + $0xe4] ss:$8 sps:$4 sm:$0xff]   ;;  %v2396_v60 = vld [vmem:[%s3489_s1 + $0xe0] ss:$8 sps:$4 sm:$0xff]  }
  0x15   :  { %1715 = vmatprep.subr.bf16.mxu0 %v2340_v21  ;;  %v2394_v59 = vld [vmem:[%s3489_s1 + $0x3e4] ss:$8 sps:$4 sm:$0xff]   ;;  %v2397_v61 = vld [vmem:[%s3489_s1 + $0x3e0] ss:$8 sps:$4 sm:$0xff]   ;;  %v2398_v62 = vld [vmem:[%s3489_s1 + $0xf4] ss:$8 sps:$4 sm:$0xff]  }
  0x16   :  { %v2400_v63 = vld [vmem:[%s3489_s1 + $0x3f4] ss:$8 sps:$4 sm:$0xff]   ;;  %v2402_v0 = vld [vmem:[%s3489_s1 + $0xf0] ss:$8 sps:$4 sm:$0xff]   ;;  %v2409_v2 = vld [vmem:[%s3489_s1 + $0x104] ss:$8 sps:$4 sm:$0xff]  }
  0x17   :  { %1557 = vmatpush1.bf16.msra.mxu1 %v2342_v22  ;;  %v2403_v1 = vld [vmem:[%s3489_s1 + $0x3f0] ss:$8 sps:$4 sm:$0xff]   ;;  %v2415_v3 = vld [vmem:[%s3489_s1 + $0x404] ss:$8 sps:$4 sm:$0xff]   ;;  %v2407_v5 = vld [vmem:[%s3489_s1 + $0x100] ss:$8 sps:$4 sm:$0xff]  }
  0x18   :  { %1716 = vmatpush1.bf16.msra.mxu0 %v2343_v23  ;;  %1558 = vmatprep.subr.bf16.mxu1 %v2344_v24  ;;  %v2404_v4 = vld [vmem:[%s3490_s0] ss:$56 sps:$4 sm:$0xff]   ;;  %v2418_v8 = vld [vmem:[%s3489_s1 + $0x114] ss:$8 sps:$4 sm:$0xff]   ;;  %v2424_v12 = vld [vmem:[%s3489_s1 + $0x124] ss:$8 sps:$4 sm:$0xff]  }
  0x19   :  { %1717 = vmatprep.subr.bf16.mxu0 %v2346_v25  ;;  %v2410_v6 = vld [vmem:[%s3490_s0 + $0x18] ss:$56 sps:$4 sm:$0xff]   ;;  %v2413_v7 = vld [vmem:[%s3489_s1 + $0x400] ss:$8 sps:$4 sm:$0xff]   ;;  %v2421_v9 = vld [vmem:[%s3489_s1 + $0x414] ss:$8 sps:$4 sm:$0xff]  }
  0x1a   :  { %v2416_v10 = vld [vmem:[%s3489_s1 + $0x110] ss:$8 sps:$4 sm:$0xff]   ;;  %v2427_v13 = vld [vmem:[%s3489_s1 + $0x424] ss:$8 sps:$4 sm:$0xff]   ;;  %v2422_v14 = vld [vmem:[%s3489_s1 + $0x120] ss:$8 sps:$4 sm:$0xff]  }
  0x1b   :  { %1559 = vmatpush1.bf16.msra.mxu1 %v2348_v26  ;;  %v2419_v11 = vld [vmem:[%s3489_s1 + $0x410] ss:$8 sps:$4 sm:$0xff]   ;;  %v2425_v15 = vld [vmem:[%s3489_s1 + $0x420] ss:$8 sps:$4 sm:$0xff]   ;;  %v2430_v16 = vld [vmem:[%s3489_s1 + $0x134] ss:$8 sps:$4 sm:$0xff]  }
  0x1c   :  { %1718 = vmatpush1.bf16.msra.mxu0 %v2349_v27  ;;  %1560 = vmatprep.subr.bf16.mxu1 %v2350_v28  ;;  %v2433_v17 = vld [vmem:[%s3489_s1 + $0x434] ss:$8 sps:$4 sm:$0xff]   ;;  %v2428_v18 = vld [vmem:[%s3489_s1 + $0x130] ss:$8 sps:$4 sm:$0xff]   ;;  %v2436_v20 = vld [vmem:[%s3489_s1 + $0x144] ss:$8 sps:$4 sm:$0xff]  }
  0x1d   :  { %1719 = vmatprep.subr.bf16.mxu0 %v2352_v29  ;;  %v2431_v19 = vld [vmem:[%s3489_s1 + $0x430] ss:$8 sps:$4 sm:$0xff]   ;;  %v2439_v21 = vld [vmem:[%s3489_s1 + $0x444] ss:$8 sps:$4 sm:$0xff]   ;;  %v2434_v22 = vld [vmem:[%s3489_s1 + $0x140] ss:$8 sps:$4 sm:$0xff]  }
  0x1e   :  { %v2437_v23 = vld [vmem:[%s3489_s1 + $0x440] ss:$8 sps:$4 sm:$0xff]   ;;  %v2442_v24 = vld [vmem:[%s3489_s1 + $0x154] ss:$8 sps:$4 sm:$0xff]   ;;  %v2440_v26 = vld [vmem:[%s3489_s1 + $0x150] ss:$8 sps:$4 sm:$0xff]  }
  0x1f   :  { %1561 = vmatpush1.bf16.msra.mxu1 %v2354_v30  ;;  %v2445_v25 = vld [vmem:[%s3489_s1 + $0x454] ss:$8 sps:$4 sm:$0xff]   ;;  %v2443_v27 = vld [vmem:[%s3489_s1 + $0x450] ss:$8 sps:$4 sm:$0xff]   ;;  %v2448_v29 = vld [vmem:[%s3489_s1 + $0x164] ss:$8 sps:$4 sm:$0xff]  }
  0x20   :  { %1720 = vmatpush1.bf16.msra.mxu0 %v2355_v31  ;;  %1562 = vmatprep.subr.bf16.mxu1 %v2356_v32  ;;  %v2494_v28 = vld [vmem:[%s3490_s0 + $0x74] ss:$56 sps:$4 sm:$0xff]   ;;  %v2446_v32 = vld [vmem:[%s3489_s1 + $0x160] ss:$8 sps:$4 sm:$0xff]   ;;  %v2464_v48 = vld [vmem:[%s3489_s1 + $0x190] ss:$8 sps:$4 sm:$0xff]  }
  0x21   :  { %1721 = vmatprep.subr.bf16.mxu0 %v2358_v33  ;;  %v2451_v30 = vld [vmem:[%s3489_s1 + $0x464] ss:$8 sps:$4 sm:$0xff]   ;;  %v2449_v33 = vld [vmem:[%s3489_s1 + $0x460] ss:$8 sps:$4 sm:$0xff]  }
  0x22   :  { %v2499_v31 = vld [vmem:[%s3490_s0 + $0x8c] ss:$56 sps:$4 sm:$0xff]  }
  0x23   :  { %1563 = vmatpush1.bf16.msra.mxu1 %v2360_v34  ;;  %v2504_v34 = vld [vmem:[%s3490_s0 + $0x70] ss:$56 sps:$4 sm:$0xff]   ;;  %v2475_v51 = vld [vmem:[%s3489_s1 + $0x4a4] ss:$8 sps:$4 sm:$0xff]  }
  0x24   :  { %1722 = vmatpush1.bf16.msra.mxu0 %v2361_v35  ;;  %1564 = vmatprep.subr.bf16.mxu1 %v2362_v36  ;;  %v2505_v35 = vld [vmem:[%s3490_s0 + $0x88] ss:$56 sps:$4 sm:$0xff]   ;;  %v2454_v36 = vld [vmem:[%s3489_s1 + $0x174] ss:$8 sps:$4 sm:$0xff]  }
  0x25   :  { %1723 = vmatprep.subr.bf16.mxu0 %v2364_v37  ;;  %v2457_v37 = vld [vmem:[%s3489_s1 + $0x474] ss:$8 sps:$4 sm:$0xff]  }
  0x27   :  { %1565 = vmatpush1.bf16.msra.mxu1 %v2366_v38  ;;  %v2452_v38 = vld [vmem:[%s3489_s1 + $0x170] ss:$8 sps:$4 sm:$0xff]  }
  0x28   :  { %1724 = vmatpush1.bf16.msra.mxu0 %v2367_v39  ;;  %1566 = vmatprep.subr.bf16.mxu1 %v2368_v40  ;;  %v2455_v39 = vld [vmem:[%s3489_s1 + $0x470] ss:$8 sps:$4 sm:$0xff]   ;;  %v2514_v40 = vld [vmem:[%s3490_s0 + $0xc] ss:$56 sps:$4 sm:$0xff]  }
  0x29   :  { %1725 = vmatprep.subr.bf16.mxu0 %v2370_v41  ;;  %v2460_v41 = vld [vmem:[%s3489_s1 + $0x184] ss:$8 sps:$4 sm:$0xff]  }
  0x2b   :  { %1567 = vmatpush1.bf16.msra.mxu1 %v2372_v42  ;;  %v2463_v42 = vld [vmem:[%s3489_s1 + $0x484] ss:$8 sps:$4 sm:$0xff]  }
  0x2c   :  { %1726 = vmatpush1.bf16.msra.mxu0 %v2373_v43  ;;  %1568 = vmatprep.subr.bf16.mxu1 %v2374_v44  ;;  %v2520_v43 = vld [vmem:[%s3490_s0 + $0x24] ss:$56 sps:$4 sm:$0xff]   ;;  %v2458_v44 = vld [vmem:[%s3489_s1 + $0x180] ss:$8 sps:$4 sm:$0xff]  }
  0x2d   :  { %1727 = vmatprep.subr.bf16.mxu0 %v2376_v45  ;;  %v2461_v45 = vld [vmem:[%s3489_s1 + $0x480] ss:$8 sps:$4 sm:$0xff]  }
  0x2f   :  { %1569 = vmatpush1.bf16.msra.mxu1 %v2378_v46  ;;  %v2466_v46 = vld [vmem:[%s3489_s1 + $0x194] ss:$8 sps:$4 sm:$0xff]  }
  0x30   :  { %1728 = vmatpush1.bf16.msra.mxu0 %v2379_v47  ;;  %1570 = vmatprep.subr.bf16.mxu1 %v2380_v49  ;;  %v2469_v47 = vld [vmem:[%s3489_s1 + $0x494] ss:$8 sps:$4 sm:$0xff]   ;;  %v2467_v49 = vld [vmem:[%s3489_s1 + $0x490] ss:$8 sps:$4 sm:$0xff]  }
  0x31   :  { %1729 = vmatprep.subr.bf16.mxu0 %v2382_v50  ;;  %v2472_v50 = vld [vmem:[%s3489_s1 + $0x1a4] ss:$8 sps:$4 sm:$0xff]  }
  0x33   :  { %1571 = vmatpush1.bf16.msra.mxu1 %v2384_v52  ;;  %v2470_v52 = vld [vmem:[%s3489_s1 + $0x1a0] ss:$8 sps:$4 sm:$0xff]  }
  0x34   :  { %1730 = vmatpush1.bf16.msra.mxu0 %v2385_v53  ;;  %1572 = vmatprep.subr.bf16.mxu1 %v2386_v54  ;;  %v2473_v53 = vld [vmem:[%s3489_s1 + $0x4a0] ss:$8 sps:$4 sm:$0xff]   ;;  %v2478_v54 = vld [vmem:[%s3489_s1 + $0x1b4] ss:$8 sps:$4 sm:$0xff]  }
  0x35   :  { %1731 = vmatprep.subr.bf16.mxu0 %v2388_v55  ;;  %v2481_v55 = vld [vmem:[%s3489_s1 + $0x4b4] ss:$8 sps:$4 sm:$0xff]  }
  0x37   :  { %1573 = vmatpush1.bf16.msra.mxu1 %v2390_v56  ;;  %v2476_v56 = vld [vmem:[%s3489_s1 + $0x1b0] ss:$8 sps:$4 sm:$0xff]  }
  0x38   :  { %1732 = vmatpush1.bf16.msra.mxu0 %v2391_v57  ;;  %1574 = vmatprep.subr.bf16.mxu1 %v2392_v58  ;;  %v2479_v57 = vld [vmem:[%s3489_s1 + $0x4b0] ss:$8 sps:$4 sm:$0xff]   ;;  %v2484_v58 = vld [vmem:[%s3489_s1 + $0x1c4] ss:$8 sps:$4 sm:$0xff]  }
  0x39   :  { %1733 = vmatprep.subr.bf16.mxu0 %v2394_v59  ;;  %v2487_v59 = vld [vmem:[%s3489_s1 + $0x4c4] ss:$8 sps:$4 sm:$0xff]  }
  0x3b   :  { %1575 = vmatpush1.bf16.msra.mxu1 %v2396_v60  ;;  %v2482_v60 = vld [vmem:[%s3489_s1 + $0x1c0] ss:$8 sps:$4 sm:$0xff]  }
  0x3c   :  { %1734 = vmatpush1.bf16.msra.mxu0 %v2397_v61  ;;  %1576 = vmatprep.subr.bf16.mxu1 %v2398_v62  ;;  %v2485_v61 = vld [vmem:[%s3489_s1 + $0x4c0] ss:$8 sps:$4 sm:$0xff]   ;;  %v2490_v62 = vld [vmem:[%s3489_s1 + $0x1d4] ss:$8 sps:$4 sm:$0xff]  }
  0x3d   :  { %1735 = vmatprep.subr.bf16.mxu0 %v2400_v63  ;;  %v2493_v63 = vld [vmem:[%s3489_s1 + $0x4d4] ss:$8 sps:$4 sm:$0xff]  }
  0x3f   :  { %1577 = vmatpush1.bf16.msra.mxu1 %v2402_v0  ;;  %v2488_v0 = vld [vmem:[%s3489_s1 + $0x1d0] ss:$8 sps:$4 sm:$0xff]  }
  0x40   :  { %1736 = vmatpush1.bf16.msra.mxu0 %v2403_v1  ;;  %1599 = vmatprep.subr.bf16.mxu1 %v2409_v2  ;;  %v2491_v1 = vld [vmem:[%s3489_s1 + $0x4d0] ss:$8 sps:$4 sm:$0xff]   ;;  %v2498_v2 = vld [vmem:[%s3489_s1 + $0x1e4] ss:$8 sps:$4 sm:$0xff]  }
  0x41   :  { %1758 = vmatprep.subr.bf16.mxu0 %v2415_v3  ;;  %v2503_v3 = vld [vmem:[%s3489_s1 + $0x4e4] ss:$8 sps:$4 sm:$0xff]  }
  0x42   :  { %1579 = vmatmul.mubr.bf16.vlgmr.msra.gmra.mrb[0].mxu1 %v2404_v4  ;;  %v2496_v4 = vld [vmem:[%s3489_s1 + $0x1e0] ss:$8 sps:$4 sm:$0xff]  }
  0x43   :  { %1738 = vmatmul.mubr.bf16.vlgmr.msra.gmra.mrb[0].mxu0 %v2410_v6  ;;  %1600 = vmatpush1.bf16.msra.mxu1 %v2407_v5  ;;  %v2501_v5 = vld [vmem:[%s3489_s1 + $0x4e0] ss:$8 sps:$4 sm:$0xff]   ;;  %v2508_v6 = vld [vmem:[%s3489_s1 + $0x1f4] ss:$8 sps:$4 sm:$0xff]  }
  0x44   :  { %1759 = vmatpush1.bf16.msra.mxu0 %v2413_v7  ;;  %1601 = vmatprep.subr.bf16.mxu1 %v2418_v8  ;;  %v2511_v7 = vld [vmem:[%s3489_s1 + $0x4f4] ss:$8 sps:$4 sm:$0xff]   ;;  %v2506_v8 = vld [vmem:[%s3489_s1 + $0x1f0] ss:$8 sps:$4 sm:$0xff]  }
  0x45   :  { %1760 = vmatprep.subr.bf16.mxu0 %v2421_v9  ;;  %1588 = vmatprep.mubr.bf16.mxu1 %v2494_v28  ;;  %v2509_v9 = vld [vmem:[%s3489_s1 + $0x4f0] ss:$8 sps:$4 sm:$0xff]   ;;  %v2538_v28 = vld [vmem:[%s3489_s1 + $0x234] ss:$8 sps:$4 sm:$0xff]  }
  0x46   :  { %1747 = vmatprep.mubr.bf16.mxu0 %v2499_v31  ;;  %v2539_v31 = vld [vmem:[%s3489_s1 + $0x530] ss:$8 sps:$4 sm:$0xff]  }
  0x47   :  { %1602 = vmatpush1.bf16.msra.mxu1 %v2416_v10  ;;  %v2517_v10 = vld [vmem:[%s3489_s1 + $0x204] ss:$8 sps:$4 sm:$0xff]  }
  0x48   :  { %1761 = vmatpush1.bf16.msra.mxu0 %v2419_v11  ;;  %1603 = vmatprep.subr.bf16.mxu1 %v2424_v12  ;;  %v2523_v11 = vld [vmem:[%s3489_s1 + $0x504] ss:$8 sps:$4 sm:$0xff]   ;;  %v2512_v12 = vld [vmem:[%s3490_s0 + $0x8] ss:$56 sps:$4 sm:$0xff]  }
  0x49   :  { %1762 = vmatprep.subr.bf16.mxu0 %v2427_v13  ;;  %v2515_v13 = vld [vmem:[%s3489_s1 + $0x200] ss:$8 sps:$4 sm:$0xff]  }
  0x4a   :  { %1589 = vmatmul.mubr.bf16.gmra.mrb[4].mxu1 %v2504_v34  ;;  %v2547_v34 = vld [vmem:[%s3489_s1 + $0x544] ss:$8 sps:$4 sm:$0xff]  }
  0x4b   :  { %1604 = vmatpush1.bf16.msra.mxu1 %v2422_v14  ;;  %1748 = vmatmul.mubr.bf16.gmra.mrb[4].mxu0 %v2505_v35  ;;  %v2518_v14 = vld [vmem:[%s3490_s0 + $0x20] ss:$56 sps:$4 sm:$0xff]   ;;  %v2625_v35 = vld [vmem:[%s3490_s0 + $0x2c] ss:$56 sps:$4 sm:$0xff]  }
  0x4c   :  { %1763 = vmatpush1.bf16.msra.mxu0 %v2425_v15  ;;  %1605 = vmatprep.subr.bf16.mxu1 %v2430_v16  ;;  %v2521_v15 = vld [vmem:[%s3489_s1 + $0x500] ss:$8 sps:$4 sm:$0xff]   ;;  %v2526_v16 = vld [vmem:[%s3489_s1 + $0x214] ss:$8 sps:$4 sm:$0xff]  }
  0x4d   :  { %1764 = vmatprep.subr.bf16.mxu0 %v2433_v17  ;;  %1631 = vmatprep.mubr.bf16.mxu1 %v2514_v40  ;;  %v2529_v17 = vld [vmem:[%s3489_s1 + $0x514] ss:$8 sps:$4 sm:$0xff]   ;;  %v2548_v40 = vld [vmem:[%s3489_s1 + $0x250] ss:$8 sps:$4 sm:$0xff]  }
  0x4e   :  { %1790 = vmatprep.mubr.bf16.mxu0 %v2520_v43  ;;  %v2559_v43 = vld [vmem:[%s3489_s1 + $0x564] ss:$8 sps:$4 sm:$0xff]  }
  0x4f   :  { %1606 = vmatpush1.bf16.msra.mxu1 %v2428_v18  ;;  %v2524_v18 = vld [vmem:[%s3489_s1 + $0x210] ss:$8 sps:$4 sm:$0xff]  }
  0x50   :  { %1765 = vmatpush1.bf16.msra.mxu0 %v2431_v19  ;;  %1607 = vmatprep.subr.bf16.mxu1 %v2436_v20  ;;  %v2527_v19 = vld [vmem:[%s3489_s1 + $0x510] ss:$8 sps:$4 sm:$0xff]   ;;  %v2602_v20 = vld [vmem:[%s3490_s0 + $0x7c] ss:$56 sps:$4 sm:$0xff]  }
  0x51   :  { %1766 = vmatprep.subr.bf16.mxu0 %v2439_v21  ;;  %v2532_v21 = vld [vmem:[%s3489_s1 + $0x224] ss:$8 sps:$4 sm:$0xff]  }
  0x53   :  { %1608 = vmatpush1.bf16.msra.mxu1 %v2434_v22  ;;  %v2604_v22 = vld [vmem:[%s3490_s0 + $0x94] ss:$56 sps:$4 sm:$0xff]  }
  0x54   :  { %1767 = vmatpush1.bf16.msra.mxu0 %v2437_v23  ;;  %1609 = vmatprep.subr.bf16.mxu1 %v2442_v24  ;;  %v2535_v23 = vld [vmem:[%s3489_s1 + $0x524] ss:$8 sps:$4 sm:$0xff]   ;;  %v2530_v24 = vld [vmem:[%s3489_s1 + $0x220] ss:$8 sps:$4 sm:$0xff]  }
  0x55   :  { %1768 = vmatprep.subr.bf16.mxu0 %v2445_v25  ;;  %v2533_v25 = vld [vmem:[%s3489_s1 + $0x520] ss:$8 sps:$4 sm:$0xff]  }
  0x57   :  { %1610 = vmatpush1.bf16.msra.mxu1 %v2440_v26  ;;  %v2606_v26 = vld [vmem:[%s3490_s0 + $0x78] ss:$56 sps:$4 sm:$0xff]  }
  0x58   :  { %1769 = vmatpush1.bf16.msra.mxu0 %v2443_v27  ;;  %1611 = vmatprep.subr.bf16.mxu1 %v2448_v29  ;;  %v2610_v27 = vld [vmem:[%s3490_s0 + $0x90] ss:$56 sps:$4 sm:$0xff]   ;;  %v2541_v29 = vld [vmem:[%s3489_s1 + $0x534] ss:$8 sps:$4 sm:$0xff]  }
  0x59   :  { %1770 = vmatprep.subr.bf16.mxu0 %v2451_v30  ;;  %v2536_v30 = vld [vmem:[%s3489_s1 + $0x230] ss:$8 sps:$4 sm:$0xff]  }
  0x5b   :  { %1612 = vmatpush1.bf16.msra.mxu1 %v2446_v32  ;;  %v2544_v32 = vld [vmem:[%s3489_s1 + $0x244] ss:$8 sps:$4 sm:$0xff]  }
  0x5c   :  { %1771 = vmatpush1.bf16.msra.mxu0 %v2449_v33  ;;  %1613 = vmatprep.subr.bf16.mxu1 %v2454_v36  ;;  %v2622_v33 = vld [vmem:[%s3490_s0 + $0x14] ss:$56 sps:$4 sm:$0xff]   ;;  %v2542_v36 = vld [vmem:[%s3489_s1 + $0x240] ss:$8 sps:$4 sm:$0xff]  }
  0x5d   :  { %1772 = vmatprep.subr.bf16.mxu0 %v2457_v37  ;;  %v2545_v37 = vld [vmem:[%s3489_s1 + $0x540] ss:$8 sps:$4 sm:$0xff]  }
  0x5f   :  { %1614 = vmatpush1.bf16.msra.mxu1 %v2452_v38  ;;  %v2550_v38 = vld [vmem:[%s3489_s1 + $0x254] ss:$8 sps:$4 sm:$0xff]  }
  0x60   :  { %1773 = vmatpush1.bf16.msra.mxu0 %v2455_v39  ;;  %1615 = vmatprep.subr.bf16.mxu1 %v2460_v41  ;;  %v2553_v39 = vld [vmem:[%s3489_s1 + $0x554] ss:$8 sps:$4 sm:$0xff]   ;;  %v2551_v41 = vld [vmem:[%s3489_s1 + $0x550] ss:$8 sps:$4 sm:$0xff]  }
  0x61   :  { %1774 = vmatprep.subr.bf16.mxu0 %v2463_v42  ;;  %v2556_v42 = vld [vmem:[%s3489_s1 + $0x264] ss:$8 sps:$4 sm:$0xff]  }
  0x63   :  { %1616 = vmatpush1.bf16.msra.mxu1 %v2458_v44  ;;  %v2554_v44 = vld [vmem:[%s3489_s1 + $0x260] ss:$8 sps:$4 sm:$0xff]  }
  0x64   :  { %1775 = vmatpush1.bf16.msra.mxu0 %v2461_v45  ;;  %1617 = vmatprep.subr.bf16.mxu1 %v2466_v46  ;;  %v2557_v45 = vld [vmem:[%s3489_s1 + $0x560] ss:$8 sps:$4 sm:$0xff]   ;;  %v2562_v46 = vld [vmem:[%s3489_s1 + $0x274] ss:$8 sps:$4 sm:$0xff]  }
  0x65   :  { %1776 = vmatprep.subr.bf16.mxu0 %v2469_v47  ;;  %v2565_v47 = vld [vmem:[%s3489_s1 + $0x574] ss:$8 sps:$4 sm:$0xff]  }
  0x67   :  { %1618 = vmatpush1.bf16.msra.mxu1 %v2464_v48  ;;  %v2560_v48 = vld [vmem:[%s3489_s1 + $0x270] ss:$8 sps:$4 sm:$0xff]  }
  0x68   :  { %1777 = vmatpush1.bf16.msra.mxu0 %v2467_v49  ;;  %1619 = vmatprep.subr.bf16.mxu1 %v2472_v50  ;;  %v2563_v49 = vld [vmem:[%s3489_s1 + $0x570] ss:$8 sps:$4 sm:$0xff]   ;;  %v2568_v50 = vld [vmem:[%s3489_s1 + $0x284] ss:$8 sps:$4 sm:$0xff]  }
  0x69   :  { %1778 = vmatprep.subr.bf16.mxu0 %v2475_v51  ;;  %v2571_v51 = vld [vmem:[%s3489_s1 + $0x584] ss:$8 sps:$4 sm:$0xff]  }
  0x6b   :  { %1620 = vmatpush1.bf16.msra.mxu1 %v2470_v52  ;;  %v2566_v52 = vld [vmem:[%s3489_s1 + $0x280] ss:$8 sps:$4 sm:$0xff]  }
  0x6c   :  { %1779 = vmatpush1.bf16.msra.mxu0 %v2473_v53  ;;  %1621 = vmatprep.subr.bf16.mxu1 %v2478_v54  ;;  %v2569_v53 = vld [vmem:[%s3489_s1 + $0x580] ss:$8 sps:$4 sm:$0xff]   ;;  %v2574_v54 = vld [vmem:[%s3489_s1 + $0x294] ss:$8 sps:$4 sm:$0xff]  }
  0x6d   :  { %1780 = vmatprep.subr.bf16.mxu0 %v2481_v55  ;;  %v2577_v55 = vld [vmem:[%s3489_s1 + $0x594] ss:$8 sps:$4 sm:$0xff]  }
  0x6f   :  { %1622 = vmatpush1.bf16.msra.mxu1 %v2476_v56  ;;  %v2572_v56 = vld [vmem:[%s3489_s1 + $0x290] ss:$8 sps:$4 sm:$0xff]  }
  0x70   :  { %1781 = vmatpush1.bf16.msra.mxu0 %v2479_v57  ;;  %1623 = vmatprep.subr.bf16.mxu1 %v2484_v58  ;;  %v2575_v57 = vld [vmem:[%s3489_s1 + $0x590] ss:$8 sps:$4 sm:$0xff]   ;;  %v2580_v58 = vld [vmem:[%s3489_s1 + $0x2a4] ss:$8 sps:$4 sm:$0xff]  }
  0x71   :  { %1782 = vmatprep.subr.bf16.mxu0 %v2487_v59  ;;  %v2583_v59 = vld [vmem:[%s3489_s1 + $0x5a4] ss:$8 sps:$4 sm:$0xff]  }
  0x73   :  { %1624 = vmatpush1.bf16.msra.mxu1 %v2482_v60  ;;  %v2578_v60 = vld [vmem:[%s3489_s1 + $0x2a0] ss:$8 sps:$4 sm:$0xff]  }
  0x74   :  { %1783 = vmatpush1.bf16.msra.mxu0 %v2485_v61  ;;  %1625 = vmatprep.subr.bf16.mxu1 %v2490_v62  ;;  %v2581_v61 = vld [vmem:[%s3489_s1 + $0x5a0] ss:$8 sps:$4 sm:$0xff]   ;;  %v2586_v62 = vld [vmem:[%s3489_s1 + $0x2b4] ss:$8 sps:$4 sm:$0xff]  }
  0x75   :  { %1784 = vmatprep.subr.bf16.mxu0 %v2493_v63  ;;  %v2589_v63 = vld [vmem:[%s3489_s1 + $0x5b4] ss:$8 sps:$4 sm:$0xff]  }
  0x77   :  { %1626 = vmatpush1.bf16.msra.mxu1 %v2488_v0  ;;  %v2584_v0 = vld [vmem:[%s3489_s1 + $0x2b0] ss:$8 sps:$4 sm:$0xff]  }
  0x78   :  { %1785 = vmatpush1.bf16.msra.mxu0 %v2491_v1  ;;  %1627 = vmatprep.subr.bf16.mxu1 %v2498_v2  ;;  %v2587_v1 = vld [vmem:[%s3489_s1 + $0x5b0] ss:$8 sps:$4 sm:$0xff]   ;;  %v2592_v2 = vld [vmem:[%s3489_s1 + $0x2c4] ss:$8 sps:$4 sm:$0xff]  }
  0x79   :  { %1786 = vmatprep.subr.bf16.mxu0 %v2503_v3  ;;  %v2595_v3 = vld [vmem:[%s3489_s1 + $0x5c4] ss:$8 sps:$4 sm:$0xff]  }
  0x7b   :  { %1628 = vmatpush1.bf16.msra.mxu1 %v2496_v4  ;;  %v2590_v4 = vld [vmem:[%s3489_s1 + $0x2c0] ss:$8 sps:$4 sm:$0xff]  }
  0x7c   :  { %1787 = vmatpush1.bf16.msra.mxu0 %v2501_v5  ;;  %1629 = vmatprep.subr.bf16.mxu1 %v2508_v6  ;;  %v2593_v5 = vld [vmem:[%s3489_s1 + $0x5c0] ss:$8 sps:$4 sm:$0xff]   ;;  %v2598_v6 = vld [vmem:[%s3489_s1 + $0x2d4] ss:$8 sps:$4 sm:$0xff]  }
  0x7d   :  { %1788 = vmatprep.subr.bf16.mxu0 %v2511_v7  ;;  %v2601_v7 = vld [vmem:[%s3489_s1 + $0x5d4] ss:$8 sps:$4 sm:$0xff]  }
  0x7f   :  { %1630 = vmatpush1.bf16.msra.mxu1 %v2506_v8  ;;  %v2596_v8 = vld [vmem:[%s3489_s1 + $0x2d0] ss:$8 sps:$4 sm:$0xff]  }
  0x80   :  { %1789 = vmatpush1.bf16.msra.mxu0 %v2509_v9  ;;  %1652 = vmatprep.subr.bf16.mxu1 %v2517_v10  ;;  %v2599_v9 = vld [vmem:[%s3489_s1 + $0x5d0] ss:$8 sps:$4 sm:$0xff]   ;;  %v2609_v10 = vld [vmem:[%s3489_s1 + $0x2e4] ss:$8 sps:$4 sm:$0xff]  }
  0x81   :  { %1811 = vmatprep.subr.bf16.mxu0 %v2523_v11  ;;  %v2613_v11 = vld [vmem:[%s3489_s1 + $0x5e4] ss:$8 sps:$4 sm:$0xff]  }
  0x82   :  { %1632 = vmatmul.mubr.bf16.vlgmr.msra.gmra.mrb[0].mxu1 %v2512_v12  ;;  %v2607_v12 = vld [vmem:[%s3489_s1 + $0x2e0] ss:$8 sps:$4 sm:$0xff]  }
  0x83   :  { %1791 = vmatmul.mubr.bf16.vlgmr.msra.gmra.mrb[0].mxu0 %v2518_v14  ;;  %1653 = vmatpush1.bf16.msra.mxu1 %v2515_v13  ;;  %v2611_v13 = vld [vmem:[%s3489_s1 + $0x5e0] ss:$8 sps:$4 sm:$0xff]   ;;  %v2616_v14 = vld [vmem:[%s3489_s1 + $0x2f4] ss:$8 sps:$4 sm:$0xff]  }
  0x84   :  { %1812 = vmatpush1.bf16.msra.mxu0 %v2521_v15  ;;  %1654 = vmatprep.subr.bf16.mxu1 %v2526_v16  ;;  %v2619_v15 = vld [vmem:[%s3489_s1 + $0x5f4] ss:$8 sps:$4 sm:$0xff]   ;;  %v2614_v16 = vld [vmem:[%s3489_s1 + $0x2f0] ss:$8 sps:$4 sm:$0xff]  }
  0x85   :  { %1813 = vmatprep.subr.bf16.mxu0 %v2529_v17  ;;  %1641 = vmatprep.mubr.bf16.mxu1 %v2602_v20  ;;  %v2617_v17 = vld [vmem:[%s3489_s1 + $0x5f0] ss:$8 sps:$4 sm:$0xff]   ;;  %v2623_v20 = vld [vmem:[%s3490_s0 + $0x28] ss:$56 sps:$4 sm:$0xff]  }
  0x86   :  { %1800 = vmatprep.mubr.bf16.mxu0 %v2604_v22  ;;  %v2631_v22 = vld [vmem:[%s3489_s1 + $0x614] ss:$8 sps:$4 sm:$0xff]  }
  0x87   :  { %1655 = vmatpush1.bf16.msra.mxu1 %v2524_v18  ;;  %v2628_v18 = vld [vmem:[%s3489_s1 + $0x604] ss:$8 sps:$4 sm:$0xff]  }
  0x88   :  { %1814 = vmatpush1.bf16.msra.mxu0 %v2527_v19  ;;  %1656 = vmatprep.subr.bf16.mxu1 %v2532_v21  ;;  %v2620_v19 = vld [vmem:[%s3490_s0 + $0x10] ss:$56 sps:$4 sm:$0xff]  }
  0x89   :  { %1815 = vmatprep.subr.bf16.mxu0 %v2535_v23  ;;  %v2626_v21 = vld [vmem:[%s3489_s1 + $0x600] ss:$8 sps:$4 sm:$0xff]   ;;  %v2632_v23 = vld [vmem:[%s3490_s0 + $0x84] ss:$56 sps:$4 sm:$0xff]  }
  0x8a   :  { %1642 = vmatmul.mubr.bf16.gmra.mrb[4].mxu1 %v2606_v26  ;;  %v2640_v26 = vld [vmem:[%s3489_s1 + $0x624] ss:$8 sps:$4 sm:$0xff]  }
  0x8b   :  { %1801 = vmatmul.mubr.bf16.gmra.mrb[4].mxu0 %v2610_v27  ;;  %1657 = vmatpush1.bf16.msra.mxu1 %v2530_v24  ;;  %v2634_v24 = vld [vmem:[%s3490_s0 + $0x9c] ss:$56 sps:$4 sm:$0xff]   ;;  %v2636_v27 = vld [vmem:[%s3490_s0 + $0x80] ss:$56 sps:$4 sm:$0xff]  }
  0x8c   :  { %1816 = vmatpush1.bf16.msra.mxu0 %v2533_v25  ;;  %1658 = vmatprep.subr.bf16.mxu1 %v2538_v28  ;;  %v2629_v25 = vld [vmem:[%s3489_s1 + $0x610] ss:$8 sps:$4 sm:$0xff]  }
  0x8d   :  { %1817 = vmatprep.subr.bf16.mxu0 %v2541_v29  ;;  %1684 = vmatprep.mubr.bf16.mxu1 %v2622_v33  ;;  %v2637_v28 = vld [vmem:[%s3490_s0 + $0x98] ss:$56 sps:$4 sm:$0xff]   ;;  %v2638_v29 = vld [vmem:[%s3489_s1 + $0x620] ss:$8 sps:$4 sm:$0xff]  }
  0x8e   :  { %1843 = vmatprep.mubr.bf16.mxu0 %v2625_v35  ;;  %v2641_v33 = vld [vmem:[%s3489_s1 + $0x630] ss:$8 sps:$4 sm:$0xff]   ;;  %v2644_v35 = vld [vmem:[%s3489_s1 + $0x640] ss:$8 sps:$4 sm:$0xff]  }
  0x8f   :  { %1659 = vmatpush1.bf16.msra.mxu1 %v2536_v30  ;;  %v2643_v30 = vld [vmem:[%s3489_s1 + $0x634] ss:$8 sps:$4 sm:$0xff]  }
  0x90   :  { %1818 = vmatpush1.bf16.msra.mxu0 %v2539_v31  ;;  %1660 = vmatprep.subr.bf16.mxu1 %v2544_v32  ;;  %v2682_v31 = vld [vmem:[%s3490_s0 + $0x34] ss:$56 sps:$4 sm:$0xff]   ;;  %v2685_v32 = vld [vmem:[%s3490_s0 + $0xa4] ss:$56 sps:$4 sm:$0xff]  }
  0x91   :  { %1819 = vmatprep.subr.bf16.mxu0 %v2547_v34  ;;  %v2646_v34 = vld [vmem:[%s3489_s1 + $0x644] ss:$8 sps:$4 sm:$0xff]  }
  0x93   :  { %1661 = vmatpush1.bf16.msra.mxu1 %v2542_v36  ;;  %v2649_v36 = vld [vmem:[%s3489_s1 + $0x654] ss:$8 sps:$4 sm:$0xff]  }
  0x94   :  { %1820 = vmatpush1.bf16.msra.mxu0 %v2545_v37  ;;  %1662 = vmatprep.subr.bf16.mxu1 %v2550_v38  ;;  %v2647_v37 = vld [vmem:[%s3489_s1 + $0x650] ss:$8 sps:$4 sm:$0xff]   ;;  %v2652_v38 = vld [vmem:[%s3489_s1 + $0x664] ss:$8 sps:$4 sm:$0xff]  }
  0x95   :  { %1821 = vmatprep.subr.bf16.mxu0 %v2553_v39  ;;  %v2650_v39 = vld [vmem:[%s3489_s1 + $0x660] ss:$8 sps:$4 sm:$0xff]  }
  0x97   :  { %1663 = vmatpush1.bf16.msra.mxu1 %v2548_v40  ;;  %v2655_v40 = vld [vmem:[%s3489_s1 + $0x674] ss:$8 sps:$4 sm:$0xff]  }
  0x98   :  { %1822 = vmatpush1.bf16.msra.mxu0 %v2551_v41  ;;  %1664 = vmatprep.subr.bf16.mxu1 %v2556_v42  ;;  %v2653_v41 = vld [vmem:[%s3489_s1 + $0x670] ss:$8 sps:$4 sm:$0xff]   ;;  %v2658_v42 = vld [vmem:[%s3489_s1 + $0x684] ss:$8 sps:$4 sm:$0xff]  }
  0x99   :  { %1823 = vmatprep.subr.bf16.mxu0 %v2559_v43  ;;  %v2656_v43 = vld [vmem:[%s3489_s1 + $0x680] ss:$8 sps:$4 sm:$0xff]  }
  0x9b   :  { %1665 = vmatpush1.bf16.msra.mxu1 %v2554_v44  ;;  %v2661_v44 = vld [vmem:[%s3489_s1 + $0x694] ss:$8 sps:$4 sm:$0xff]  }
  0x9c   :  { %1824 = vmatpush1.bf16.msra.mxu0 %v2557_v45  ;;  %1666 = vmatprep.subr.bf16.mxu1 %v2562_v46  ;;  %v2659_v45 = vld [vmem:[%s3489_s1 + $0x690] ss:$8 sps:$4 sm:$0xff]   ;;  %v2664_v46 = vld [vmem:[%s3489_s1 + $0x6a4] ss:$8 sps:$4 sm:$0xff]  }
  0x9d   :  { %1825 = vmatprep.subr.bf16.mxu0 %v2565_v47  ;;  %v2662_v47 = vld [vmem:[%s3489_s1 + $0x6a0] ss:$8 sps:$4 sm:$0xff]  }
  0x9f   :  { %1667 = vmatpush1.bf16.msra.mxu1 %v2560_v48  ;;  %v2667_v48 = vld [vmem:[%s3489_s1 + $0x6b4] ss:$8 sps:$4 sm:$0xff]  }
  0xa0   :  { %1826 = vmatpush1.bf16.msra.mxu0 %v2563_v49  ;;  %1668 = vmatprep.subr.bf16.mxu1 %v2568_v50  ;;  %v2665_v49 = vld [vmem:[%s3489_s1 + $0x6b0] ss:$8 sps:$4 sm:$0xff]   ;;  %v2670_v50 = vld [vmem:[%s3489_s1 + $0x6c4] ss:$8 sps:$4 sm:$0xff]  }
  0xa1   :  { %1827 = vmatprep.subr.bf16.mxu0 %v2571_v51  ;;  %v2668_v51 = vld [vmem:[%s3489_s1 + $0x6c0] ss:$8 sps:$4 sm:$0xff]  }
  0xa3   :  { %1669 = vmatpush1.bf16.msra.mxu1 %v2566_v52  ;;  %v2673_v52 = vld [vmem:[%s3489_s1 + $0x6d4] ss:$8 sps:$4 sm:$0xff]  }
  0xa4   :  { %1828 = vmatpush1.bf16.msra.mxu0 %v2569_v53  ;;  %1670 = vmatprep.subr.bf16.mxu1 %v2574_v54  ;;  %v2671_v53 = vld [vmem:[%s3489_s1 + $0x6d0] ss:$8 sps:$4 sm:$0xff]   ;;  %v2676_v54 = vld [vmem:[%s3489_s1 + $0x6e4] ss:$8 sps:$4 sm:$0xff]  }
  0xa5   :  { %1829 = vmatprep.subr.bf16.mxu0 %v2577_v55  ;;  %v2674_v55 = vld [vmem:[%s3489_s1 + $0x6e0] ss:$8 sps:$4 sm:$0xff]  }
  0xa7   :  { %1671 = vmatpush1.bf16.msra.mxu1 %v2572_v56  ;;  %v2679_v56 = vld [vmem:[%s3489_s1 + $0x6f4] ss:$8 sps:$4 sm:$0xff]  }
  0xa8   :  { %1830 = vmatpush1.bf16.msra.mxu0 %v2575_v57  ;;  %1672 = vmatprep.subr.bf16.mxu1 %v2580_v58  ;;  %v2677_v57 = vld [vmem:[%s3489_s1 + $0x6f0] ss:$8 sps:$4 sm:$0xff]  }
  0xa9   :  { %1831 = vmatprep.subr.bf16.mxu0 %v2583_v59  ;;  %v2680_v58 = vld [vmem:[%s3490_s0 + $0x30] ss:$56 sps:$4 sm:$0xff]   ;;  %v2683_v59 = vld [vmem:[%s3490_s0 + $0xa0] ss:$56 sps:$4 sm:$0xff]  }
  0xab   :  { %1673 = vmatpush1.bf16.msra.mxu1 %v2578_v60 }
  0xac   :  { %1832 = vmatpush1.bf16.msra.mxu0 %v2581_v61  ;;  %1674 = vmatprep.subr.bf16.mxu1 %v2586_v62 }
  0xad   :  { %1833 = vmatprep.subr.bf16.mxu0 %v2589_v63 }
  0xaf   :  { %1675 = vmatpush1.bf16.msra.mxu1 %v2584_v0 }
  0xb0   :  { %1834 = vmatpush1.bf16.msra.mxu0 %v2587_v1  ;;  %1676 = vmatprep.subr.bf16.mxu1 %v2592_v2 }
  0xb1   :  { %1835 = vmatprep.subr.bf16.mxu0 %v2595_v3 }
  0xb3   :  { %1677 = vmatpush1.bf16.msra.mxu1 %v2590_v4 }
  0xb4   :  { %1836 = vmatpush1.bf16.msra.mxu0 %v2593_v5  ;;  %1678 = vmatprep.subr.bf16.mxu1 %v2598_v6 }
  0xb5   :  { %1837 = vmatprep.subr.bf16.mxu0 %v2601_v7 }
  0xb7   :  { %1679 = vmatpush1.bf16.msra.mxu1 %v2596_v8 }
  0xb8   :  { %1838 = vmatpush1.bf16.msra.mxu0 %v2599_v9  ;;  %1680 = vmatprep.subr.bf16.mxu1 %v2609_v10 }
  0xb9   :  { %1839 = vmatprep.subr.bf16.mxu0 %v2613_v11 }
  0xbb   :  { %1681 = vmatpush1.bf16.msra.mxu1 %v2607_v12  ;;  %v1946_v12 = vlaneseq }
  0xbc   :  { %1840 = vmatpush1.bf16.msra.mxu0 %v2611_v13  ;;  %1682 = vmatprep.subr.bf16.mxu1 %v2616_v14 }
  0xbd   :  { %1841 = vmatprep.subr.bf16.mxu0 %v2619_v15  ;;  %v1947_v13 = vshrl.u32 %v1946_v12, 7  ;;  %v1944_v15 = vld [vmem:[%s3491_s2] sm:$0x3] }
  0xbf   :  { %1683 = vmatpush1.bf16.msra.mxu1 %v2614_v16  ;;  %v1948_v14 = vsub.s32 0, %v1947_v13  ;;  %v1952_v16 = vsub.s32 1, %v1947_v13 }
  0xc0   :  { %1842 = vmatpush1.bf16.msra.mxu0 %v2617_v17  ;;  %2228 = vmatprep.subr.bf16.mxu1 %v2628_v18 }
  0xc1   :  { %1864 = vmatprep.subr.bf16.mxu0 %v2628_v18  ;;  %v1949_v17 = vrot.slane %v1944_v15, %v1948_v14 }
  0xc2   :  { %1685 = vmatmul.mubr.bf16.vlgmr.msra.gmra.mrb[0].mxu1 %v2620_v19 }
  0xc3   :  { %1844 = vmatmul.mubr.bf16.vlgmr.msra.gmra.mrb[0].mxu0 %v2623_v20  ;;  %2244 = vmatpush1.bf16.msra.mxu1 %v2626_v21  ;;  %v1953_v20 = vrot.slane %v1944_v15, %v1952_v16 }
  0xc4   :  { %1865 = vmatpush1.bf16.msra.mxu0 %v2626_v21  ;;  %2229 = vmatprep.subr.bf16.mxu1 %v2631_v22 }
  0xc5   :  { %1866 = vmatprep.subr.bf16.mxu0 %v2631_v22  ;;  %1694 = vmatprep.mubr.bf16.mxu1 %v2632_v23 }
  0xc6   :  { %1853 = vmatprep.mubr.bf16.mxu0 %v2634_v24 }
  0xc7   :  { %2245 = vmatpush1.bf16.msra.mxu1 %v2629_v25 }
  0xc8   :  { %1867 = vmatpush1.bf16.msra.mxu0 %v2629_v25  ;;  %2230 = vmatprep.subr.bf16.mxu1 %v2640_v26 }
  0xc9   :  { %1868 = vmatprep.subr.bf16.mxu0 %v2640_v26 }
  0xca   :  { %1695 = vmatmul.mubr.bf16.gmra.mrb[4].mxu1 %v2636_v27 }
  0xcb   :  { %1854 = vmatmul.mubr.bf16.gmra.mrb[4].mxu0 %v2637_v28  ;;  %2246 = vmatpush1.bf16.msra.mxu1 %v2638_v29 }
  0xcc   :  { %1869 = vmatpush1.bf16.msra.mxu0 %v2638_v29  ;;  %2231 = vmatprep.subr.bf16.mxu1 %v2643_v30 }
  0xcd   :  { %1870 = vmatprep.subr.bf16.mxu0 %v2643_v30  ;;  %1896 = vmatprep.mubr.bf16.mxu0 %v2682_v31 }
  0xce   :  { %1906 = vmatprep.mubr.bf16.mxu1 %v2685_v32 }
  0xcf   :  { %2247 = vmatpush1.bf16.msra.mxu1 %v2641_v33 }
  0xd0   :  { %1871 = vmatpush1.bf16.msra.mxu0 %v2641_v33  ;;  %2232 = vmatprep.subr.bf16.mxu1 %v2646_v34 }
  0xd1   :  { %1872 = vmatprep.subr.bf16.mxu0 %v2646_v34 }
  0xd3   :  { %2248 = vmatpush1.bf16.msra.mxu1 %v2644_v35 }
  0xd4   :  { %1873 = vmatpush1.bf16.msra.mxu0 %v2644_v35  ;;  %2233 = vmatprep.subr.bf16.mxu1 %v2649_v36 }
  0xd5   :  { %1874 = vmatprep.subr.bf16.mxu0 %v2649_v36 }
  0xd7   :  { %2249 = vmatpush1.bf16.msra.mxu1 %v2647_v37 }
  0xd8   :  { %1875 = vmatpush1.bf16.msra.mxu0 %v2647_v37  ;;  %2234 = vmatprep.subr.bf16.mxu1 %v2652_v38 }
  0xd9   :  { %1876 = vmatprep.subr.bf16.mxu0 %v2652_v38 }
  0xdb   :  { %2250 = vmatpush1.bf16.msra.mxu1 %v2650_v39 }
  0xdc   :  { %1877 = vmatpush1.bf16.msra.mxu0 %v2650_v39  ;;  %2235 = vmatprep.subr.bf16.mxu1 %v2655_v40 }
  0xdd   :  { %1878 = vmatprep.subr.bf16.mxu0 %v2655_v40 }
  0xdf   :  { %2251 = vmatpush1.bf16.msra.mxu1 %v2653_v41 }
  0xe0   :  { %1879 = vmatpush1.bf16.msra.mxu0 %v2653_v41  ;;  %2236 = vmatprep.subr.bf16.mxu1 %v2658_v42 }
  0xe1   :  { %1880 = vmatprep.subr.bf16.mxu0 %v2658_v42 }
  0xe3   :  { %2252 = vmatpush1.bf16.msra.mxu1 %v2656_v43 }
  0xe4   :  { %1881 = vmatpush1.bf16.msra.mxu0 %v2656_v43  ;;  %2237 = vmatprep.subr.bf16.mxu1 %v2661_v44 }
  0xe5   :  { %1882 = vmatprep.subr.bf16.mxu0 %v2661_v44 }
  0xe7   :  { %2253 = vmatpush1.bf16.msra.mxu1 %v2659_v45 }
  0xe8   :  { %1883 = vmatpush1.bf16.msra.mxu0 %v2659_v45  ;;  %2238 = vmatprep.subr.bf16.mxu1 %v2664_v46 }
  0xe9   :  { %1884 = vmatprep.subr.bf16.mxu0 %v2664_v46 }
  0xeb   :  { %2254 = vmatpush1.bf16.msra.mxu1 %v2662_v47 }
  0xec   :  { %1885 = vmatpush1.bf16.msra.mxu0 %v2662_v47  ;;  %2239 = vmatprep.subr.bf16.mxu1 %v2667_v48 }
  0xed   :  { %1886 = vmatprep.subr.bf16.mxu0 %v2667_v48 }
  0xef   :  { %2255 = vmatpush1.bf16.msra.mxu1 %v2665_v49 }
  0xf0   :  { %1887 = vmatpush1.bf16.msra.mxu0 %v2665_v49  ;;  %2240 = vmatprep.subr.bf16.mxu1 %v2670_v50 }
  0xf1   :  { %1888 = vmatprep.subr.bf16.mxu0 %v2670_v50 }
  0xf3   :  { %2256 = vmatpush1.bf16.msra.mxu1 %v2668_v51 }
  0xf4   :  { %1889 = vmatpush1.bf16.msra.mxu0 %v2668_v51  ;;  %2241 = vmatprep.subr.bf16.mxu1 %v2673_v52 }
  0xf5   :  { %1890 = vmatprep.subr.bf16.mxu0 %v2673_v52 }
  0xf7   :  { %2257 = vmatpush1.bf16.msra.mxu1 %v2671_v53 }
  0xf8   :  { %1891 = vmatpush1.bf16.msra.mxu0 %v2671_v53  ;;  %2242 = vmatprep.subr.bf16.mxu1 %v2676_v54 }
  0xf9   :  { %1892 = vmatprep.subr.bf16.mxu0 %v2676_v54 }
  0xfb   :  { %2258 = vmatpush1.bf16.msra.mxu1 %v2674_v55 }
  0xfc   :  { %1893 = vmatpush1.bf16.msra.mxu0 %v2674_v55  ;;  %2243 = vmatprep.subr.bf16.mxu1 %v2679_v56 }
  0xfd   :  { %1894 = vmatprep.subr.bf16.mxu0 %v2679_v56 }
  0xff   :  { %2259 = vmatpush1.bf16.msra.mxu1 %v2677_v57 }
 0x100   :  { %1895 = vmatpush1.bf16.msra.mxu0 %v2677_v57 }
 0x102   :  { %1907 = vmatmul.mubr.bf16.vlgmr.msra.gmra.mrb[8].mxu1 %v2683_v59 }
 0x103   :  { %1897 = vmatmul.mubr.bf16.vlgmr.msra.gmra.mrb[0].mxu0 %v2680_v58 }
 0x195   :  { %v1686_v60 = vpop.f32.mrb[0].mxu1 }
 0x196   :  { %v1688_v61 = vpop.f32.mrb[1].mxu1 }
 0x197   :  { %v1690_v62 = vpop.f32.mrb[2].mxu1 }
 0x198   :  { %v1692_v63 = vpop.f32.mrb[3].mxu1 }
 0x19d   :  { %v1696_v0 = vpop.f32.mrb[4].mxu1 }
 0x19e   :  { %v1855_v1 = vpop.f32.mrb[4].mxu0  ;;  %v1698_v3 = vpop.f32.mrb[5].mxu1 }
 0x19f   :  { %v2264_v2 = vadd.f32 %v1855_v1, %v1696_v0  ;;  %v1857_v4 = vpop.f32.mrb[5].mxu0  ;;  %v1700_v6 = vpop.f32.mrb[6].mxu1 }
 0x1a0   :  { %v2266_v5 = vadd.f32 %v1857_v4, %v1698_v3  ;;  %v1859_v7 = vpop.f32.mrb[6].mxu0  ;;  %v1702_v9 = vpop.f32.mrb[7].mxu1 }
 0x1a1   :  { %v2268_v8 = vadd.f32 %v1859_v7, %v1700_v6  ;;  %v1861_v10 = vpop.f32.mrb[7].mxu0 }
 0x1a2   :  { %v2270_v11 = vadd.f32 %v1861_v10, %v1702_v9 }
 0x1d5   :  { %v1908_v19 = vpop.f32.mrb[8].mxu1 }
 0x1d6   :  { %v1898_v18 = vpop.f32.mrb[0].mxu0  ;;  %v2265_v22 = vadd.f32 %v2264_v2, %v1908_v19  ;;  %v1910_v24 = vpop.f32.mrb[9].mxu1 }
 0x1d7   :  { %v2260_v21 = vadd.f32 %v1898_v18, %v1686_v60  ;;  %v1900_v23 = vpop.f32.mrb[1].mxu0  ;;  %v2267_v26 = vadd.f32 %v2266_v5, %v1910_v24  ;;  %v1912_v28 = vpop.f32.mrb[10].mxu1 }
 0x1d8   :  { %v2261_v25 = vadd.f32 %v1900_v23, %v1688_v61  ;;  %v1902_v27 = vpop.f32.mrb[2].mxu0  ;;  %v1960_v30 = vadd.f32 %v2265_v22, %v1949_v17  ;;  %v2269_v32 = vadd.f32 %v2268_v8, %v1912_v28  ;;  %v1914_v34 = vpop.f32.mrb[11].mxu1 }
 0x1d9   :  { %v1956_v29 = vadd.f32 %v2260_v21, %v1949_v17  ;;  %v2262_v31 = vadd.f32 %v1902_v27, %v1690_v62  ;;  %v1904_v33 = vpop.f32.mrb[3].mxu0  ;;  %v1961_v36 = vadd.f32 %v2267_v26, %v1953_v20  ;;  %v2271_v38 = vadd.f32 %v2270_v11, %v1914_v34 }
 0x1da   :  { %v1957_v35 = vadd.f32 %v2261_v25, %v1953_v20  ;;  %v2263_v37 = vadd.f32 %v1904_v33, %v1692_v63  ;;  %1968 = vst [vmem:[%s3492_s3 + $0x20] sm:$0xff] %v1960_v30  ;;  %v1962_v40 = vadd.f32 %v2269_v32, %v1949_v17 }
 0x1db   :  { %1964 = vst [vmem:[%s3492_s3] sm:$0xff] %v1956_v29  ;;  %v1958_v39 = vadd.f32 %v2262_v31, %v1949_v17  ;;  %1969 = vst [vmem:[%s3492_s3 + $0x28] sm:$0xff] %v1961_v36  ;;  %v1963_v42 = vadd.f32 %v2271_v38, %v1953_v20 }
 0x1dc   :  { %1965 = vst [vmem:[%s3492_s3 + $0x8] sm:$0xff] %v1957_v35  ;;  %v1959_v41 = vadd.f32 %v2263_v37, %v1953_v20  ;;  %1970 = vst [vmem:[%s3492_s3 + $0x30] sm:$0xff] %v1962_v40 }
 0x1dd   :  { %1966 = vst [vmem:[%s3492_s3 + $0x10] sm:$0xff] %v1958_v39  ;;  %1971 = vst [vmem:[%s3492_s3 + $0x38] sm:$0xff] %v1963_v42 }
 0x1de   :  { %1967 = vst [vmem:[%s3492_s3 + $0x18] sm:$0xff] %v1959_v41 }

// kernel: alexnet_forward.35
= control target key start
LH: loop header
LB: loop body
LE: loop exit
PB: predicated region body
PF: predicated region fallthrough
CT: control target
= control target key end

     0   :  { %s2430_s1 = inlined_call_operand.vmem [shape: bf16[1792,128], index: 1, kind: input, shape index: {}]   ;;  %s2431_s0 = inlined_call_operand.vmem [shape: bf16[32,1792], index: 0, kind: input, shape index: {}]   ;;  %s2432_s2 = inlined_call_operand.vmem [shape: f32[1,128], index: 2, kind: input, shape index: {}]   ;;  %s2433_s3 = inlined_call_operand.vmem [shape: f32[32,128], index: 3, kind: output, shape index: {}]  }
   0x1   :  { %v1821_v0 = vld [vmem:[%s2430_s1 + $0x40] sm:$0xff]   ;;  %v1825_v4 = vld [vmem:[%s2430_s1 + $0x48] sm:$0xff]   ;;  %v1829_v8 = vld [vmem:[%s2430_s1 + $0x50] sm:$0xff]  }
   0x2   :  { %v1822_v1 = vld [vmem:[%s2430_s1 + $0xc0] sm:$0xff]   ;;  %1609 = vmatprep.subr.bf16.mxu0 %v1821_v0  ;;  %v1826_v5 = vld [vmem:[%s2430_s1 + $0xc8] sm:$0xff]   ;;  %v1830_v9 = vld [vmem:[%s2430_s1 + $0xd0] sm:$0xff]  }
   0x3   :  { %v1823_v2 = vld [vmem:[%s2430_s1] sm:$0xff]   ;;  %1637 = vmatprep.subr.bf16.mxu1 %v1822_v1  ;;  %v1827_v6 = vld [vmem:[%s2430_s1 + $0x8] sm:$0xff]   ;;  %v1831_v10 = vld [vmem:[%s2430_s1 + $0x10] sm:$0xff]  }
   0x4   :  { %v1824_v3 = vld [vmem:[%s2430_s1 + $0x80] sm:$0xff]   ;;  %1610 = vmatpush3.bf16.msra.mxu0 %v1823_v2  ;;  %v1828_v7 = vld [vmem:[%s2430_s1 + $0x88] sm:$0xff]   ;;  %v1832_v11 = vld [vmem:[%s2430_s1 + $0x90] sm:$0xff]  }
   0x5   :  { %1638 = vmatpush3.bf16.msra.mxu1 %v1824_v3  ;;  %1611 = vmatprep.subr.bf16.mxu0 %v1825_v4  ;;  %v1833_v12 = vld [vmem:[%s2430_s1 + $0x58] sm:$0xff]   ;;  %v1837_v16 = vld [vmem:[%s2430_s1 + $0x60] sm:$0xff]   ;;  %v1841_v20 = vld [vmem:[%s2430_s1 + $0x68] sm:$0xff]  }
   0x6   :  { %1639 = vmatprep.subr.bf16.mxu1 %v1826_v5  ;;  %v1834_v13 = vld [vmem:[%s2430_s1 + $0xd8] sm:$0xff]   ;;  %v1838_v17 = vld [vmem:[%s2430_s1 + $0xe0] sm:$0xff]   ;;  %v1842_v21 = vld [vmem:[%s2430_s1 + $0xe8] sm:$0xff]  }
   0x7   :  { %v1835_v14 = vld [vmem:[%s2430_s1 + $0x18] sm:$0xff]   ;;  %v1839_v18 = vld [vmem:[%s2430_s1 + $0x20] sm:$0xff]   ;;  %v1843_v22 = vld [vmem:[%s2430_s1 + $0x28] sm:$0xff]  }
   0x8   :  { %1612 = vmatpush3.bf16.msra.mxu0 %v1827_v6  ;;  %v1836_v15 = vld [vmem:[%s2430_s1 + $0x98] sm:$0xff]   ;;  %v1840_v19 = vld [vmem:[%s2430_s1 + $0xa0] sm:$0xff]   ;;  %v1844_v23 = vld [vmem:[%s2430_s1 + $0xa8] sm:$0xff]  }
   0x9   :  { %1640 = vmatpush3.bf16.msra.mxu1 %v1828_v7  ;;  %1613 = vmatprep.subr.bf16.mxu0 %v1829_v8  ;;  %v1845_v24 = vld [vmem:[%s2430_s1 + $0x70] sm:$0xff]   ;;  %v1849_v28 = vld [vmem:[%s2430_s1 + $0x78] sm:$0xff]   ;;  %v1856_v34 = vld [vmem:[%s2431_s0 + $0x8] ss:$56 sps:$4 sm:$0xff]  }
   0xa   :  { %1641 = vmatprep.subr.bf16.mxu1 %v1830_v9  ;;  %v1846_v25 = vld [vmem:[%s2430_s1 + $0xf0] sm:$0xff]   ;;  %v1850_v29 = vld [vmem:[%s2430_s1 + $0xf8] sm:$0xff]   ;;  %v1858_v35 = vld [vmem:[%s2431_s0 + $0xc] ss:$56 sps:$4 sm:$0xff]  }
   0xb   :  { %v1847_v26 = vld [vmem:[%s2430_s1 + $0x30] sm:$0xff]   ;;  %v1851_v30 = vld [vmem:[%s2430_s1 + $0x38] sm:$0xff]   ;;  %v1859_v36 = vld [vmem:[%s2430_s1 + $0x140] sm:$0xff]   ;;  %1172 = vmatprep.mubr.bf16.mxu1 %v1858_v35 }
   0xc   :  { %1614 = vmatpush3.bf16.msra.mxu0 %v1831_v10  ;;  %v1848_v27 = vld [vmem:[%s2430_s1 + $0xb0] sm:$0xff]   ;;  %v1852_v31 = vld [vmem:[%s2430_s1 + $0xb8] sm:$0xff]   ;;  %v1860_v37 = vld [vmem:[%s2430_s1 + $0x1c0] sm:$0xff]  }
   0xd   :  { %1642 = vmatpush3.bf16.msra.mxu1 %v1832_v11  ;;  %1615 = vmatprep.subr.bf16.mxu0 %v1833_v12  ;;  %v1853_v32 = vld [vmem:[%s2431_s0] ss:$56 sps:$4 sm:$0xff]   ;;  %v1855_v33 = vld [vmem:[%s2431_s0 + $0x4] ss:$56 sps:$4 sm:$0xff]   ;;  %v1863_v40 = vld [vmem:[%s2430_s1 + $0x148] sm:$0xff]  }
   0xe   :  { %1643 = vmatprep.subr.bf16.mxu1 %v1834_v13  ;;  %1123 = vmatprep.mubr.bf16.mxu0 %v1855_v33  ;;  %v1861_v38 = vld [vmem:[%s2430_s1 + $0x100] sm:$0xff]   ;;  %v1864_v41 = vld [vmem:[%s2430_s1 + $0x1c8] sm:$0xff]   ;;  %v1867_v44 = vld [vmem:[%s2430_s1 + $0x150] sm:$0xff]  }
   0xf   :  { %v1862_v39 = vld [vmem:[%s2430_s1 + $0x180] sm:$0xff]   ;;  %v1865_v42 = vld [vmem:[%s2430_s1 + $0x108] sm:$0xff]   ;;  %v1868_v45 = vld [vmem:[%s2430_s1 + $0x1d0] sm:$0xff]  }
  0x10   :  { %1616 = vmatpush3.bf16.msra.mxu0 %v1835_v14  ;;  %v1866_v43 = vld [vmem:[%s2430_s1 + $0x188] sm:$0xff]   ;;  %v1869_v46 = vld [vmem:[%s2430_s1 + $0x110] sm:$0xff]   ;;  %v1871_v48 = vld [vmem:[%s2430_s1 + $0x158] sm:$0xff]  }
  0x11   :  { %1644 = vmatpush3.bf16.msra.mxu1 %v1836_v15  ;;  %1617 = vmatprep.subr.bf16.mxu0 %v1837_v16  ;;  %v1870_v47 = vld [vmem:[%s2430_s1 + $0x190] sm:$0xff]   ;;  %v1872_v49 = vld [vmem:[%s2430_s1 + $0x1d8] sm:$0xff]   ;;  %v1875_v52 = vld [vmem:[%s2430_s1 + $0x160] sm:$0xff]  }
  0x12   :  { %1645 = vmatprep.subr.bf16.mxu1 %v1838_v17  ;;  %v1873_v50 = vld [vmem:[%s2430_s1 + $0x118] sm:$0xff]   ;;  %v1876_v53 = vld [vmem:[%s2430_s1 + $0x1e0] sm:$0xff]   ;;  %v1879_v56 = vld [vmem:[%s2430_s1 + $0x168] sm:$0xff]  }
  0x13   :  { %v1874_v51 = vld [vmem:[%s2430_s1 + $0x198] sm:$0xff]   ;;  %v1877_v54 = vld [vmem:[%s2430_s1 + $0x120] sm:$0xff]   ;;  %v1880_v57 = vld [vmem:[%s2430_s1 + $0x1e8] sm:$0xff]  }
  0x14   :  { %1618 = vmatpush3.bf16.msra.mxu0 %v1839_v18  ;;  %v1878_v55 = vld [vmem:[%s2430_s1 + $0x1a0] sm:$0xff]   ;;  %v1881_v58 = vld [vmem:[%s2431_s0 + $0x74] ss:$56 sps:$4 sm:$0xff]   ;;  %v1887_v62 = vld [vmem:[%s2431_s0 + $0x70] ss:$56 sps:$4 sm:$0xff]  }
  0x15   :  { %1646 = vmatpush3.bf16.msra.mxu1 %v1840_v19  ;;  %1619 = vmatprep.subr.bf16.mxu0 %v1841_v20  ;;  %v1883_v59 = vld [vmem:[%s2431_s0 + $0x7c] ss:$56 sps:$4 sm:$0xff]   ;;  %v1885_v60 = vld [vmem:[%s2430_s1 + $0x128] sm:$0xff]   ;;  %v1888_v63 = vld [vmem:[%s2431_s0 + $0x78] ss:$56 sps:$4 sm:$0xff]  }
  0x16   :  { %1647 = vmatprep.subr.bf16.mxu1 %v1842_v21  ;;  %v1886_v61 = vld [vmem:[%s2430_s1 + $0x1a8] sm:$0xff]   ;;  %v1889_v0 = vld [vmem:[%s2430_s1 + $0x170] sm:$0xff]   ;;  %v1893_v4 = vld [vmem:[%s2430_s1 + $0x178] sm:$0xff]  }
  0x17   :  { %v1890_v1 = vld [vmem:[%s2430_s1 + $0x1f0] sm:$0xff]   ;;  %v1894_v5 = vld [vmem:[%s2430_s1 + $0x1f8] sm:$0xff]   ;;  %v1903_v12 = vld [vmem:[%s2430_s1 + $0x240] sm:$0xff]  }
  0x18   :  { %1620 = vmatpush3.bf16.msra.mxu0 %v1843_v22  ;;  %v1891_v2 = vld [vmem:[%s2430_s1 + $0x130] sm:$0xff]   ;;  %v1895_v6 = vld [vmem:[%s2430_s1 + $0x138] sm:$0xff]   ;;  %v1904_v13 = vld [vmem:[%s2430_s1 + $0x2c0] sm:$0xff]  }
  0x19   :  { %1648 = vmatpush3.bf16.msra.mxu1 %v1844_v23  ;;  %1621 = vmatprep.subr.bf16.mxu0 %v1845_v24  ;;  %v1892_v3 = vld [vmem:[%s2430_s1 + $0x1b0] sm:$0xff]   ;;  %v1896_v7 = vld [vmem:[%s2430_s1 + $0x1b8] sm:$0xff]   ;;  %v1905_v14 = vld [vmem:[%s2430_s1 + $0x200] sm:$0xff]  }
  0x1a   :  { %1649 = vmatprep.subr.bf16.mxu1 %v1846_v25  ;;  %v1897_v8 = vld [vmem:[%s2431_s0 + $0x10] ss:$56 sps:$4 sm:$0xff]   ;;  %v1899_v9 = vld [vmem:[%s2431_s0 + $0x14] ss:$56 sps:$4 sm:$0xff]   ;;  %v1906_v15 = vld [vmem:[%s2430_s1 + $0x280] sm:$0xff]  }
  0x1b   :  { %v1900_v10 = vld [vmem:[%s2431_s0 + $0x18] ss:$56 sps:$4 sm:$0xff]   ;;  %v1902_v11 = vld [vmem:[%s2431_s0 + $0x1c] ss:$56 sps:$4 sm:$0xff]   ;;  %v1907_v16 = vld [vmem:[%s2430_s1 + $0x248] sm:$0xff]  }
  0x1c   :  { %1622 = vmatpush3.bf16.msra.mxu0 %v1847_v26  ;;  %v1908_v17 = vld [vmem:[%s2430_s1 + $0x2c8] sm:$0xff]   ;;  %v1911_v20 = vld [vmem:[%s2431_s0 + $0x84] ss:$56 sps:$4 sm:$0xff]   ;;  %v1913_v21 = vld [vmem:[%s2431_s0 + $0x80] ss:$56 sps:$4 sm:$0xff]  }
  0x1d   :  { %1650 = vmatpush3.bf16.msra.mxu1 %v1848_v27  ;;  %1623 = vmatprep.subr.bf16.mxu0 %v1849_v28  ;;  %v1909_v18 = vld [vmem:[%s2430_s1 + $0x208] sm:$0xff]   ;;  %v1914_v22 = vld [vmem:[%s2430_s1 + $0x250] sm:$0xff]   ;;  %v1921_v28 = vld [vmem:[%s2430_s1 + $0x258] sm:$0xff]  }
  0x1e   :  { %1651 = vmatprep.subr.bf16.mxu1 %v1850_v29  ;;  %v1910_v19 = vld [vmem:[%s2430_s1 + $0x288] sm:$0xff]   ;;  %v1915_v23 = vld [vmem:[%s2430_s1 + $0x2d0] sm:$0xff]   ;;  %v1922_v29 = vld [vmem:[%s2430_s1 + $0x2d8] sm:$0xff]  }
  0x1f   :  { %v1916_v24 = vld [vmem:[%s2431_s0 + $0x8c] ss:$56 sps:$4 sm:$0xff]   ;;  %v1918_v25 = vld [vmem:[%s2430_s1 + $0x210] sm:$0xff]   ;;  %v1920_v27 = vld [vmem:[%s2431_s0 + $0x88] ss:$56 sps:$4 sm:$0xff]  }
  0x20   :  { %1624 = vmatpush3.bf16.msra.mxu0 %v1851_v30  ;;  %v1919_v26 = vld [vmem:[%s2430_s1 + $0x290] sm:$0xff]   ;;  %v1923_v30 = vld [vmem:[%s2430_s1 + $0x218] sm:$0xff]   ;;  %v1926_v33 = vld [vmem:[%s2430_s1 + $0x2e0] sm:$0xff]  }
  0x21   :  { %1652 = vmatpush3.bf16.msra.mxu1 %v1852_v31  ;;  %1665 = vmatprep.subr.bf16.mxu0 %v1859_v36  ;;  %v1924_v31 = vld [vmem:[%s2430_s1 + $0x298] sm:$0xff]   ;;  %v1928_v35 = vld [vmem:[%s2430_s1 + $0x2a0] sm:$0xff]   ;;  %v1929_v36 = vld [vmem:[%s2430_s1 + $0x268] sm:$0xff]  }
  0x22   :  { %1693 = vmatprep.subr.bf16.mxu1 %v1860_v37  ;;  %v1930_v37 = vld [vmem:[%s2430_s1 + $0x2e8] sm:$0xff]  }
  0x23   :  { %1124 = vmatmul.mubr.bf16.vlgmr.msra.gmra.mrb[0].mxu0 %v1853_v32  ;;  %v1925_v32 = vld [vmem:[%s2430_s1 + $0x260] sm:$0xff]  }
  0x24   :  { %1173 = vmatmul.mubr.bf16.vlgmr.msra.gmra.mrb[0].mxu1 %v1856_v34  ;;  %1666 = vmatpush3.bf16.msra.mxu0 %v1861_v38  ;;  %v1927_v34 = vld [vmem:[%s2430_s1 + $0x220] sm:$0xff]   ;;  %v1931_v38 = vld [vmem:[%s2430_s1 + $0x228] sm:$0xff]  }
  0x25   :  { %1694 = vmatpush3.bf16.msra.mxu1 %v1862_v39  ;;  %1667 = vmatprep.subr.bf16.mxu0 %v1863_v40  ;;  %v1932_v39 = vld [vmem:[%s2430_s1 + $0x2a8] sm:$0xff]   ;;  %v1933_v40 = vld [vmem:[%s2430_s1 + $0x270] sm:$0xff]  }
  0x26   :  { %1695 = vmatprep.subr.bf16.mxu1 %v1864_v41  ;;  %1131 = vmatprep.mubr.bf16.mxu0 %v1881_v58  ;;  %v1934_v41 = vld [vmem:[%s2430_s1 + $0x2f0] sm:$0xff]  }
  0x27   :  { %1180 = vmatprep.mubr.bf16.mxu1 %v1883_v59  ;;  %v1954_v58 = vld [vmem:[%s2430_s1 + $0x350] sm:$0xff]  }
  0x28   :  { %1668 = vmatpush3.bf16.msra.mxu0 %v1865_v42  ;;  %v1935_v42 = vld [vmem:[%s2430_s1 + $0x230] sm:$0xff]  }
  0x29   :  { %1696 = vmatpush3.bf16.msra.mxu1 %v1866_v43  ;;  %1669 = vmatprep.subr.bf16.mxu0 %v1867_v44  ;;  %v1936_v43 = vld [vmem:[%s2430_s1 + $0x2b0] sm:$0xff]   ;;  %v1937_v44 = vld [vmem:[%s2430_s1 + $0x278] sm:$0xff]  }
  0x2a   :  { %1697 = vmatprep.subr.bf16.mxu1 %v1868_v45  ;;  %v1938_v45 = vld [vmem:[%s2430_s1 + $0x2f8] sm:$0xff]  }
  0x2b   :  { %1132 = vmatmul.mubr.bf16.gmra.mrb[4].mxu0 %v1887_v62  ;;  %v1955_v59 = vld [vmem:[%s2431_s0 + $0x9c] ss:$56 sps:$4 sm:$0xff]  }
  0x2c   :  { %1670 = vmatpush3.bf16.msra.mxu0 %v1869_v46  ;;  %1181 = vmatmul.mubr.bf16.gmra.mrb[4].mxu1 %v1888_v63  ;;  %v1939_v46 = vld [vmem:[%s2430_s1 + $0x238] sm:$0xff]  }
  0x2d   :  { %1698 = vmatpush3.bf16.msra.mxu1 %v1870_v47  ;;  %1671 = vmatprep.subr.bf16.mxu0 %v1871_v48  ;;  %v1940_v47 = vld [vmem:[%s2430_s1 + $0x2b8] sm:$0xff]  }
  0x2e   :  { %1699 = vmatprep.subr.bf16.mxu1 %v1872_v49  ;;  %1221 = vmatprep.mubr.bf16.mxu0 %v1899_v9  ;;  %v1941_v48 = vld [vmem:[%s2431_s0 + $0x20] ss:$56 sps:$4 sm:$0xff]   ;;  %v1943_v49 = vld [vmem:[%s2431_s0 + $0x24] ss:$56 sps:$4 sm:$0xff]  }
  0x2f   :  { %1270 = vmatprep.mubr.bf16.mxu1 %v1902_v11  ;;  %v1959_v62 = vld [vmem:[%s2430_s1 + $0x358] sm:$0xff]  }
  0x30   :  { %1672 = vmatpush3.bf16.msra.mxu0 %v1873_v50  ;;  %v1944_v50 = vld [vmem:[%s2431_s0 + $0x28] ss:$56 sps:$4 sm:$0xff]   ;;  %v1960_v63 = vld [vmem:[%s2430_s1 + $0x318] sm:$0xff]  }
  0x31   :  { %1700 = vmatpush3.bf16.msra.mxu1 %v1874_v51  ;;  %1673 = vmatprep.subr.bf16.mxu0 %v1875_v52  ;;  %v1946_v51 = vld [vmem:[%s2431_s0 + $0x2c] ss:$56 sps:$4 sm:$0xff]   ;;  %v1968_v9 = vld [vmem:[%s2430_s1 + $0x338] sm:$0xff]  }
  0x32   :  { %1701 = vmatprep.subr.bf16.mxu1 %v1876_v53  ;;  %v1947_v52 = vld [vmem:[%s2430_s1 + $0x340] sm:$0xff]  }
  0x33   :  { %v1948_v53 = vld [vmem:[%s2430_s1 + $0x300] sm:$0xff]  }
  0x34   :  { %1674 = vmatpush3.bf16.msra.mxu0 %v1877_v54  ;;  %v1949_v54 = vld [vmem:[%s2430_s1 + $0x348] sm:$0xff]   ;;  %v1972_v11 = vld [vmem:[%s2431_s0 + $0xa0] ss:$56 sps:$4 sm:$0xff]  }
  0x35   :  { %1702 = vmatpush3.bf16.msra.mxu1 %v1878_v55  ;;  %1675 = vmatprep.subr.bf16.mxu0 %v1879_v56  ;;  %v1950_v55 = vld [vmem:[%s2430_s1 + $0x308] sm:$0xff]  }
  0x36   :  { %1703 = vmatprep.subr.bf16.mxu1 %v1880_v57  ;;  %v1951_v56 = vld [vmem:[%s2431_s0 + $0x94] ss:$56 sps:$4 sm:$0xff]   ;;  %v1953_v57 = vld [vmem:[%s2431_s0 + $0x90] ss:$56 sps:$4 sm:$0xff]  }
  0x38   :  { %1676 = vmatpush3.bf16.msra.mxu0 %v1885_v60  ;;  %v1957_v60 = vld [vmem:[%s2430_s1 + $0x310] sm:$0xff]  }
  0x39   :  { %1704 = vmatpush3.bf16.msra.mxu1 %v1886_v61  ;;  %1677 = vmatprep.subr.bf16.mxu0 %v1889_v0  ;;  %v1958_v61 = vld [vmem:[%s2431_s0 + $0x98] ss:$56 sps:$4 sm:$0xff]   ;;  %v1961_v0 = vld [vmem:[%s2430_s1 + $0x360] sm:$0xff]  }
  0x3a   :  { %1705 = vmatprep.subr.bf16.mxu1 %v1890_v1  ;;  %v1962_v1 = vld [vmem:[%s2430_s1 + $0x320] sm:$0xff]  }
  0x3c   :  { %1678 = vmatpush3.bf16.msra.mxu0 %v1891_v2  ;;  %v1963_v2 = vld [vmem:[%s2430_s1 + $0x368] sm:$0xff]  }
  0x3d   :  { %1706 = vmatpush3.bf16.msra.mxu1 %v1892_v3  ;;  %1679 = vmatprep.subr.bf16.mxu0 %v1893_v4  ;;  %v1964_v3 = vld [vmem:[%s2430_s1 + $0x328] sm:$0xff]  }
  0x3e   :  { %1707 = vmatprep.subr.bf16.mxu1 %v1894_v5  ;;  %v1971_v4 = vld [vmem:[%s2431_s0 + $0x34] ss:$56 sps:$4 sm:$0xff]  }
  0x3f   :  { %v1965_v5 = vld [vmem:[%s2430_s1 + $0x370] sm:$0xff]  }
  0x40   :  { %1680 = vmatpush3.bf16.msra.mxu0 %v1895_v6  ;;  %v1974_v6 = vld [vmem:[%s2431_s0 + $0xa4] ss:$56 sps:$4 sm:$0xff]  }
  0x41   :  { %1708 = vmatpush3.bf16.msra.mxu1 %v1896_v7  ;;  %1721 = vmatprep.subr.bf16.mxu0 %v1903_v12  ;;  %v1966_v7 = vld [vmem:[%s2430_s1 + $0x330] sm:$0xff]  }
  0x42   :  { %1749 = vmatprep.subr.bf16.mxu1 %v1904_v13 }
  0x43   :  { %1222 = vmatmul.mubr.bf16.vlgmr.msra.gmra.mrb[8].mxu0 %v1897_v8  ;;  %v1967_v8 = vld [vmem:[%s2430_s1 + $0x378] sm:$0xff]  }
  0x44   :  { %1271 = vmatmul.mubr.bf16.vlgmr.msra.gmra.mrb[8].mxu1 %v1900_v10  ;;  %1722 = vmatpush3.bf16.msra.mxu0 %v1905_v14  ;;  %v1969_v10 = vld [vmem:[%s2431_s0 + $0x30] ss:$56 sps:$4 sm:$0xff]  }
  0x45   :  { %1750 = vmatpush3.bf16.msra.mxu1 %v1906_v15  ;;  %1723 = vmatprep.subr.bf16.mxu0 %v1907_v16 }
  0x46   :  { %1751 = vmatprep.subr.bf16.mxu1 %v1908_v17  ;;  %1229 = vmatprep.mubr.bf16.mxu0 %v1911_v20 }
  0x47   :  { %1278 = vmatprep.mubr.bf16.mxu1 %v1916_v24 }
  0x48   :  { %1724 = vmatpush3.bf16.msra.mxu0 %v1909_v18 }
  0x49   :  { %1752 = vmatpush3.bf16.msra.mxu1 %v1910_v19  ;;  %1725 = vmatprep.subr.bf16.mxu0 %v1914_v22 }
  0x4a   :  { %1753 = vmatprep.subr.bf16.mxu1 %v1915_v23 }
  0x4b   :  { %1230 = vmatmul.mubr.bf16.gmra.mrb[12].mxu0 %v1913_v21 }
  0x4c   :  { %1726 = vmatpush3.bf16.msra.mxu0 %v1918_v25  ;;  %1279 = vmatmul.mubr.bf16.gmra.mrb[12].mxu1 %v1920_v27 }
  0x4d   :  { %1754 = vmatpush3.bf16.msra.mxu1 %v1919_v26  ;;  %1727 = vmatprep.subr.bf16.mxu0 %v1921_v28 }
  0x4e   :  { %1755 = vmatprep.subr.bf16.mxu1 %v1922_v29  ;;  %1319 = vmatprep.mubr.bf16.mxu0 %v1943_v49 }
  0x4f   :  { %1368 = vmatprep.mubr.bf16.mxu1 %v1946_v51 }
  0x50   :  { %1728 = vmatpush3.bf16.msra.mxu0 %v1923_v30 }
  0x51   :  { %1756 = vmatpush3.bf16.msra.mxu1 %v1924_v31  ;;  %1729 = vmatprep.subr.bf16.mxu0 %v1925_v32 }
  0x52   :  { %1757 = vmatprep.subr.bf16.mxu1 %v1926_v33 }
  0x54   :  { %1730 = vmatpush3.bf16.msra.mxu0 %v1927_v34 }
  0x55   :  { %1758 = vmatpush3.bf16.msra.mxu1 %v1928_v35  ;;  %1731 = vmatprep.subr.bf16.mxu0 %v1929_v36 }
  0x56   :  { %1759 = vmatprep.subr.bf16.mxu1 %v1930_v37 }
  0x58   :  { %1732 = vmatpush3.bf16.msra.mxu0 %v1931_v38 }
  0x59   :  { %1760 = vmatpush3.bf16.msra.mxu1 %v1932_v39  ;;  %1733 = vmatprep.subr.bf16.mxu0 %v1933_v40 }
  0x5a   :  { %1761 = vmatprep.subr.bf16.mxu1 %v1934_v41 }
  0x5c   :  { %1734 = vmatpush3.bf16.msra.mxu0 %v1935_v42 }
  0x5d   :  { %1762 = vmatpush3.bf16.msra.mxu1 %v1936_v43  ;;  %1735 = vmatprep.subr.bf16.mxu0 %v1937_v44 }
  0x5e   :  { %1763 = vmatprep.subr.bf16.mxu1 %v1938_v45 }
  0x60   :  { %1736 = vmatpush3.bf16.msra.mxu0 %v1939_v46 }
  0x61   :  { %1764 = vmatpush3.bf16.msra.mxu1 %v1940_v47  ;;  %1777 = vmatprep.subr.bf16.mxu0 %v1947_v52 }
  0x62   :  { %1805 = vmatprep.subr.bf16.mxu1 %v1947_v52 }
  0x63   :  { %1320 = vmatmul.mubr.bf16.vlgmr.msra.gmra.mrb[16].mxu0 %v1941_v48 }
  0x64   :  { %1369 = vmatmul.mubr.bf16.vlgmr.msra.gmra.mrb[16].mxu1 %v1944_v50  ;;  %1778 = vmatpush3.bf16.msra.mxu0 %v1948_v53 }
  0x65   :  { %1813 = vmatpush3.bf16.msra.mxu1 %v1948_v53  ;;  %1779 = vmatprep.subr.bf16.mxu0 %v1949_v54 }
  0x66   :  { %1806 = vmatprep.subr.bf16.mxu1 %v1949_v54  ;;  %1327 = vmatprep.mubr.bf16.mxu0 %v1951_v56 }
  0x67   :  { %1376 = vmatprep.mubr.bf16.mxu1 %v1955_v59 }
  0x68   :  { %1780 = vmatpush3.bf16.msra.mxu0 %v1950_v55 }
  0x69   :  { %1814 = vmatpush3.bf16.msra.mxu1 %v1950_v55  ;;  %1781 = vmatprep.subr.bf16.mxu0 %v1954_v58 }
  0x6a   :  { %1807 = vmatprep.subr.bf16.mxu1 %v1954_v58 }
  0x6b   :  { %1328 = vmatmul.mubr.bf16.gmra.mrb[20].mxu0 %v1953_v57 }
  0x6c   :  { %1782 = vmatpush3.bf16.msra.mxu0 %v1957_v60  ;;  %1377 = vmatmul.mubr.bf16.gmra.mrb[20].mxu1 %v1958_v61 }
  0x6d   :  { %1815 = vmatpush3.bf16.msra.mxu1 %v1957_v60  ;;  %1783 = vmatprep.subr.bf16.mxu0 %v1959_v62 }
  0x6e   :  { %1808 = vmatprep.subr.bf16.mxu1 %v1959_v62  ;;  %1417 = vmatprep.mubr.bf16.mxu0 %v1971_v4 }
  0x6f   :  { %1425 = vmatprep.mubr.bf16.mxu1 %v1974_v6 }
  0x70   :  { %1784 = vmatpush3.bf16.msra.mxu0 %v1960_v63 }
  0x71   :  { %1816 = vmatpush3.bf16.msra.mxu1 %v1960_v63  ;;  %1785 = vmatprep.subr.bf16.mxu0 %v1961_v0 }
  0x72   :  { %1809 = vmatprep.subr.bf16.mxu1 %v1961_v0 }
  0x74   :  { %1786 = vmatpush3.bf16.msra.mxu0 %v1962_v1 }
  0x75   :  { %1817 = vmatpush3.bf16.msra.mxu1 %v1962_v1  ;;  %1787 = vmatprep.subr.bf16.mxu0 %v1963_v2 }
  0x76   :  { %1810 = vmatprep.subr.bf16.mxu1 %v1963_v2 }
  0x78   :  { %1788 = vmatpush3.bf16.msra.mxu0 %v1964_v3 }
  0x79   :  { %1818 = vmatpush3.bf16.msra.mxu1 %v1964_v3  ;;  %1789 = vmatprep.subr.bf16.mxu0 %v1965_v5 }
  0x7a   :  { %1811 = vmatprep.subr.bf16.mxu1 %v1965_v5 }
  0x7c   :  { %1790 = vmatpush3.bf16.msra.mxu0 %v1966_v7 }
  0x7d   :  { %1819 = vmatpush3.bf16.msra.mxu1 %v1966_v7  ;;  %1791 = vmatprep.subr.bf16.mxu0 %v1967_v8 }
  0x7e   :  { %1812 = vmatprep.subr.bf16.mxu1 %v1967_v8 }
  0x80   :  { %1792 = vmatpush3.bf16.msra.mxu0 %v1968_v9 }
  0x81   :  { %1820 = vmatpush3.bf16.msra.mxu1 %v1968_v9 }
  0x83   :  { %1418 = vmatmul.mubr.bf16.vlgmr.msra.gmra.mrb[24].mxu0 %v1969_v10 }
  0x84   :  { %1426 = vmatmul.mubr.bf16.vlgmr.msra.gmra.mrb[24].mxu1 %v1972_v11 }
  0xf6   :  { %v1625_v12 = vpop.f32.mrb[0].mxu0 }
  0xf7   :  { %v1653_v13 = vpop.f32.mrb[0].mxu1  ;;  %v1626_v14 = vpop.f32.mrb[1].mxu0 }
  0xf8   :  { %v1627_v15 = vadd.f32 %v1626_v14, %v1625_v12  ;;  %v1654_v16 = vpop.f32.mrb[1].mxu1  ;;  %v1628_v17 = vpop.f32.mrb[2].mxu0 }
  0xf9   :  { %v1655_v18 = vadd.f32 %v1654_v16, %v1653_v13  ;;  %v1656_v19 = vpop.f32.mrb[2].mxu1  ;;  %v1629_v20 = vpop.f32.mrb[3].mxu0 }
  0xfa   :  { %v1630_v21 = vadd.f32 %v1629_v20, %v1628_v17  ;;  %v1657_v22 = vpop.f32.mrb[3].mxu1 }
  0xfb   :  { %v1175_v23 = vadd.f32 %v1655_v18, %v1627_v15  ;;  %v1658_v24 = vadd.f32 %v1657_v22, %v1656_v19 }
  0xfd   :  { %v1178_v25 = vadd.f32 %v1658_v24, %v1630_v21 }
  0xfe   :  { %v1631_v26 = vpop.f32.mrb[4].mxu0 }
  0xff   :  { %v1659_v27 = vpop.f32.mrb[4].mxu1  ;;  %v1632_v28 = vpop.f32.mrb[5].mxu0 }
 0x100   :  { %v1633_v29 = vadd.f32 %v1632_v28, %v1631_v26  ;;  %v1660_v30 = vpop.f32.mrb[5].mxu1  ;;  %v1634_v31 = vpop.f32.mrb[6].mxu0 }
 0x101   :  { %v1661_v32 = vadd.f32 %v1660_v30, %v1659_v27  ;;  %v1662_v33 = vpop.f32.mrb[6].mxu1  ;;  %v1635_v34 = vpop.f32.mrb[7].mxu0 }
 0x102   :  { %v1636_v35 = vadd.f32 %v1635_v34, %v1634_v31  ;;  %v1663_v36 = vpop.f32.mrb[7].mxu1 }
 0x103   :  { %v1183_v37 = vadd.f32 %v1661_v32, %v1633_v29  ;;  %v1664_v38 = vadd.f32 %v1663_v36, %v1662_v33 }
 0x105   :  { %v1186_v39 = vadd.f32 %v1664_v38, %v1636_v35 }
 0x116   :  { %v1681_v40 = vpop.f32.mrb[8].mxu0 }
 0x117   :  { %v1709_v41 = vpop.f32.mrb[8].mxu1  ;;  %v1682_v42 = vpop.f32.mrb[9].mxu0 }
 0x118   :  { %v1683_v43 = vadd.f32 %v1682_v42, %v1681_v40  ;;  %v1710_v44 = vpop.f32.mrb[9].mxu1  ;;  %v1684_v45 = vpop.f32.mrb[10].mxu0 }
 0x119   :  { %v1711_v46 = vadd.f32 %v1710_v44, %v1709_v41  ;;  %v1712_v47 = vpop.f32.mrb[10].mxu1  ;;  %v1685_v48 = vpop.f32.mrb[11].mxu0 }
 0x11a   :  { %v1224_v49 = vadd.f32 %v1683_v43, %v1175_v23  ;;  %v1686_v50 = vadd.f32 %v1685_v48, %v1684_v45  ;;  %v1713_v51 = vpop.f32.mrb[11].mxu1 }
 0x11b   :  { %v1714_v52 = vadd.f32 %v1713_v51, %v1712_v47 }
 0x11c   :  { %v1273_v53 = vadd.f32 %v1711_v46, %v1224_v49  ;;  %v1227_v54 = vadd.f32 %v1686_v50, %v1178_v25  ;;  %v1608_v46 = vld [vmem:[%s2432_s2] ss:$0 sm:$0xff] }
 0x11e   :  { %v1276_v55 = vadd.f32 %v1714_v52, %v1227_v54  ;;  %v1687_v56 = vpop.f32.mrb[12].mxu0 }
 0x11f   :  { %v1688_v57 = vpop.f32.mrb[13].mxu0  ;;  %v1715_v63 = vpop.f32.mrb[12].mxu1 }
 0x120   :  { %v1689_v58 = vadd.f32 %v1688_v57, %v1687_v56  ;;  %v1690_v59 = vpop.f32.mrb[14].mxu0  ;;  %v1716_v1 = vpop.f32.mrb[13].mxu1 }
 0x121   :  { %v1691_v60 = vpop.f32.mrb[15].mxu0  ;;  %v1717_v2 = vadd.f32 %v1716_v1, %v1715_v63  ;;  %v1718_v3 = vpop.f32.mrb[14].mxu1 }
 0x122   :  { %v1232_v61 = vadd.f32 %v1689_v58, %v1183_v37  ;;  %v1692_v62 = vadd.f32 %v1691_v60, %v1690_v59  ;;  %v1719_v4 = vpop.f32.mrb[15].mxu1 }
 0x123   :  { %v1720_v6 = vadd.f32 %v1719_v4, %v1718_v3 }
 0x124   :  { %v1235_v0 = vadd.f32 %v1692_v62, %v1186_v39  ;;  %v1281_v5 = vadd.f32 %v1717_v2, %v1232_v61 }
 0x126   :  { %v1284_v7 = vadd.f32 %v1720_v6, %v1235_v0 }
 0x136   :  { %v1737_v8 = vpop.f32.mrb[16].mxu0 }
 0x137   :  { %v1738_v9 = vpop.f32.mrb[17].mxu0  ;;  %v1765_v10 = vpop.f32.mrb[16].mxu1 }
 0x138   :  { %v1739_v11 = vadd.f32 %v1738_v9, %v1737_v8  ;;  %v1740_v12 = vpop.f32.mrb[18].mxu0  ;;  %v1766_v13 = vpop.f32.mrb[17].mxu1 }
 0x139   :  { %v1741_v14 = vpop.f32.mrb[19].mxu0  ;;  %v1767_v16 = vadd.f32 %v1766_v13, %v1765_v10  ;;  %v1768_v17 = vpop.f32.mrb[18].mxu1 }
 0x13a   :  { %v1322_v15 = vadd.f32 %v1739_v11, %v1273_v53  ;;  %v1742_v18 = vadd.f32 %v1741_v14, %v1740_v12  ;;  %v1769_v19 = vpop.f32.mrb[19].mxu1 }
 0x13b   :  { %v1770_v22 = vadd.f32 %v1769_v19, %v1768_v17 }
 0x13c   :  { %v1371_v20 = vadd.f32 %v1767_v16, %v1322_v15  ;;  %v1325_v21 = vadd.f32 %v1742_v18, %v1276_v55 }
 0x13e   :  { %v1374_v23 = vadd.f32 %v1770_v22, %v1325_v21  ;;  %v1743_v24 = vpop.f32.mrb[20].mxu0 }
 0x13f   :  { %v1744_v25 = vpop.f32.mrb[21].mxu0  ;;  %v1771_v28 = vpop.f32.mrb[20].mxu1 }
 0x140   :  { %v1745_v26 = vadd.f32 %v1744_v25, %v1743_v24  ;;  %v1746_v27 = vpop.f32.mrb[22].mxu0  ;;  %v1772_v32 = vpop.f32.mrb[21].mxu1 }
 0x141   :  { %v1747_v29 = vpop.f32.mrb[23].mxu0  ;;  %v1773_v33 = vadd.f32 %v1772_v32, %v1771_v28  ;;  %v1774_v34 = vpop.f32.mrb[22].mxu1 }
 0x142   :  { %v1330_v30 = vadd.f32 %v1745_v26, %v1281_v5  ;;  %v1748_v31 = vadd.f32 %v1747_v29, %v1746_v27  ;;  %v1775_v36 = vpop.f32.mrb[23].mxu1 }
 0x143   :  { %v1776_v38 = vadd.f32 %v1775_v36, %v1774_v34 }
 0x144   :  { %v1333_v35 = vadd.f32 %v1748_v31, %v1284_v7  ;;  %v1379_v37 = vadd.f32 %v1773_v33, %v1330_v30 }
 0x146   :  { %v1382_v39 = vadd.f32 %v1776_v38, %v1333_v35 }
 0x156   :  { %v1793_v40 = vpop.f32.mrb[24].mxu0 }
 0x157   :  { %v1799_v41 = vpop.f32.mrb[24].mxu1  ;;  %v1794_v42 = vpop.f32.mrb[25].mxu0 }
 0x158   :  { %v1795_v43 = vadd.f32 %v1794_v42, %v1793_v40  ;;  %v1800_v44 = vpop.f32.mrb[25].mxu1  ;;  %v1796_v45 = vpop.f32.mrb[26].mxu0 }
 0x159   :  { %v1801_v47 = vadd.f32 %v1800_v44, %v1799_v41  ;;  %v1802_v48 = vpop.f32.mrb[26].mxu1  ;;  %v1797_v49 = vpop.f32.mrb[27].mxu0 }
 0x15a   :  { %v1420_v50 = vadd.f32 %v1795_v43, %v1371_v20  ;;  %v1798_v51 = vadd.f32 %v1797_v49, %v1796_v45  ;;  %v1803_v52 = vpop.f32.mrb[27].mxu1 }
 0x15b   :  { %v1428_v53 = vadd.f32 %v1801_v47, %v1379_v37  ;;  %v1804_v54 = vadd.f32 %v1803_v52, %v1802_v48 }
 0x15c   :  { %v1456_v55 = vadd.f32 %v1608_v46, %v1420_v50  ;;  %v1423_v56 = vadd.f32 %v1798_v51, %v1374_v23 }
 0x15d   :  { %v1458_v57 = vadd.f32 %v1608_v46, %v1428_v53  ;;  %v1431_v58 = vadd.f32 %v1804_v54, %v1382_v39 }
 0x15e   :  { %1460 = vst [vmem:[%s2433_s3] sm:$0xff] %v1456_v55  ;;  %v1457_v59 = vadd.f32 %v1608_v46, %v1423_v56 }
 0x15f   :  { %1462 = vst [vmem:[%s2433_s3 + $0x10] sm:$0xff] %v1458_v57  ;;  %v1459_v60 = vadd.f32 %v1608_v46, %v1431_v58 }
 0x160   :  { %1461 = vst [vmem:[%s2433_s3 + $0x8] sm:$0xff] %v1457_v59 }
 0x161   :  { %1463 = vst [vmem:[%s2433_s3 + $0x18] sm:$0xff] %v1459_v60 }

// kernel: alexnet_forward.36
= control target key start
LH: loop header
LB: loop body
LE: loop exit
PB: predicated region body
PF: predicated region fallthrough
CT: control target
= control target key end

     0   :  { %v53_v0 = vmov 0.0   ;;  %s96_s1 = inlined_call_operand.vmem [shape: f32[1,128], index: 1, kind: output, shape index: {0}]   ;;  %s97_s2 = inlined_call_operand.vmem [shape: f32[1,128], index: 2, kind: output, shape index: {1}]   ;;  %s98_s0 = inlined_call_operand.vmem [shape: f32[24,128], index: 0, kind: input, shape index: {}]  }
   0x1   :  { %14 = vst [vmem:[%s96_s1] sm:$0x1] %v53_v0  ;;  %15 = vst [vmem:[%s97_s2] sm:$0x1] %v53_v0  ;;  %v16_v1 = vld [vmem:[%s98_s0] sm:$0xff]  ;;  %v17_v2 = vld [vmem:[%s98_s0 + $0x8] sm:$0xff] }
   0x2   :  { %v18_v3 = vld [vmem:[%s98_s0 + $0x10] sm:$0xff]  ;;  %v20_v4 = vadd.f32 %v17_v2, %v16_v1  ;;  %v31_v5 = vmul.f32 %v16_v1, %v16_v1  ;;  %v32_v6 = vmul.f32 %v17_v2, %v17_v2 }
   0x3   :  { %v33_v7 = vmul.f32 %v18_v3, %v18_v3 }
   0x4   :  { %v21_v8 = vadd.f32 %v20_v4, %v18_v3  ;;  %v34_v9 = vadd.f32 %v32_v6, %v31_v5 }
   0x6   :  { %v22_v10 = vrot.slane %v21_v8, 4  ;;  %v35_v11 = vadd.f32 %v34_v9, %v33_v7 }
   0x8   :  { %v23_v12 = vadd.f32 %v22_v10, %v21_v8  ;;  %v36_v13 = vrot.slane %v35_v11, 4  ;;  %v19_v20 = vld [vmem:[%s96_s1] sm:$0x1] }
   0x9   :  { %v30_v23 = vld [vmem:[%s97_s2] sm:$0x1] }
   0xa   :  { %v24_v14 = vrot.slane %v23_v12, 2  ;;  %v37_v15 = vadd.f32 %v36_v13, %v35_v11 }
   0xc   :  { %v25_v16 = vadd.f32 %v24_v14, %v23_v12  ;;  %v38_v17 = vrot.slane %v37_v15, 2 }
   0xe   :  { %v26_v18 = vrot.slane %v25_v16, 1  ;;  %v39_v19 = vadd.f32 %v38_v17, %v37_v15 }
  0x10   :  { %v27_v21 = vadd.f32 %v26_v18, %v25_v16  ;;  %v40_v22 = vrot.slane %v39_v19, 1 }
  0x12   :  { %v28_v24 = vadd.f32 %v27_v21, %v19_v20  ;;  %v41_v25 = vadd.f32 %v40_v22, %v39_v19 }
  0x14   :  { %29 = vst [vmem:[%s96_s1] sm:$0x1] %v28_v24  ;;  %v42_v26 = vadd.f32 %v41_v25, %v30_v23 }
  0x16   :  { %43 = vst [vmem:[%s97_s2] sm:$0x1] %v42_v26 }

// kernel: alexnet_forward.37
= control target key start
LH: loop header
LB: loop body
LE: loop exit
PB: predicated region body
PF: predicated region fallthrough
CT: control target
= control target key end

     0   :  { %s93_s0 = inlined_call_operand.vmem [shape: f32[24,128], index: 0, kind: input, shape index: {}]   ;;  %s94_s1 = inlined_call_operand.vmem [shape: f32[1,128], index: 1, kind: input, shape index: {}]   ;;  %s95_s2 = inlined_call_operand.vmem [shape: f32[1,128], index: 2, kind: input, shape index: {}]   ;;  %s96_s3 = inlined_call_operand.vmem [shape: f32[24,128], index: 3, kind: output, shape index: {}]  }
   0x1   :  { %v14_v0 = vld [vmem:[%s93_s0] sm:$0xff]  ;;  %v15_v4 = vld [vmem:[%s93_s0 + $0x8] sm:$0xff]  ;;  %v16_v5 = vld [vmem:[%s93_s0 + $0x10] sm:$0xff] }
   0x2   :  { %v47_v1 = vld [vmem:[%s94_s1] ss:$0 sm:$0xff] }
   0x3   :  { %v48_v2 = vld [vmem:[%s95_s2] ss:$0 sm:$0xff]  ;;  %v24_v3 = vmul.f32 %v47_v1, %v14_v0  ;;  %v25_v6 = vmul.f32 %v47_v1, %v15_v4  ;;  %v26_v7 = vmul.f32 %v47_v1, %v16_v5 }
   0x5   :  { %v34_v8 = vadd.f32 %v48_v2, %v24_v3  ;;  %v35_v9 = vadd.f32 %v48_v2, %v25_v6  ;;  %v36_v10 = vadd.f32 %v48_v2, %v26_v7 }
   0x7   :  { %v37_v11 = vmax.f32 %v34_v8, 0.0  ;;  %v38_v12 = vmax.f32 %v35_v9, 0.0  ;;  %v39_v13 = vmax.f32 %v36_v10, 0.0 }
   0x9   :  { %40 = vst [vmem:[%s96_s3] sm:$0xff] %v37_v11  ;;  %41 = vst [vmem:[%s96_s3 + $0x8] sm:$0xff] %v38_v12 }
   0xa   :  { %42 = vst [vmem:[%s96_s3 + $0x10] sm:$0xff] %v39_v13 }

// kernel: alexnet_forward.38
= control target key start
LH: loop header
LB: loop body
LE: loop exit
PB: predicated region body
PF: predicated region fallthrough
CT: control target
= control target key end

     0   :  { %s2099_s1 = inlined_call_operand.vmem [shape: bf16[1152,256], index: 1, kind: input, shape index: {}]   ;;  %s2100_s0 = inlined_call_operand.vmem [shape: bf16[16,1152], index: 0, kind: input, shape index: {}]   ;;  %s2101_s2 = inlined_call_operand.vmem [shape: f32[1,256], index: 2, kind: input, shape index: {}]   ;;  %s2102_s3 = inlined_call_operand.vmem [shape: f32[16,256], index: 3, kind: output, shape index: {}]  }
   0x1   :  { %v1375_v0 = vld [vmem:[%s2099_s1 + $0x4] ss:$8 sps:$4 sm:$0xff]   ;;  %v1379_v2 = vld [vmem:[%s2099_s1] ss:$8 sps:$4 sm:$0xff]   ;;  %v1381_v4 = vld [vmem:[%s2099_s1 + $0x14] ss:$8 sps:$4 sm:$0xff]  }
   0x2   :  { %v1377_v1 = vld [vmem:[%s2099_s1 + $0x204] ss:$8 sps:$4 sm:$0xff]   ;;  %947 = vmatprep.subr.bf16.mxu1 %v1375_v0  ;;  %v1380_v3 = vld [vmem:[%s2099_s1 + $0x200] ss:$8 sps:$4 sm:$0xff]   ;;  %v1383_v5 = vld [vmem:[%s2099_s1 + $0x214] ss:$8 sps:$4 sm:$0xff]  }
   0x3   :  { %1033 = vmatprep.subr.bf16.mxu0 %v1377_v1  ;;  %948 = vmatpush1.bf16.msra.mxu1 %v1379_v2  ;;  %v1385_v6 = vld [vmem:[%s2099_s1 + $0x10] ss:$8 sps:$4 sm:$0xff]   ;;  %v1387_v8 = vld [vmem:[%s2099_s1 + $0x24] ss:$8 sps:$4 sm:$0xff]   ;;  %v1391_v10 = vld [vmem:[%s2099_s1 + $0x20] ss:$8 sps:$4 sm:$0xff]  }
   0x4   :  { %1034 = vmatpush1.bf16.msra.mxu0 %v1380_v3  ;;  %949 = vmatprep.subr.bf16.mxu1 %v1381_v4  ;;  %v1386_v7 = vld [vmem:[%s2099_s1 + $0x210] ss:$8 sps:$4 sm:$0xff]   ;;  %v1389_v9 = vld [vmem:[%s2099_s1 + $0x224] ss:$8 sps:$4 sm:$0xff]   ;;  %v1392_v11 = vld [vmem:[%s2099_s1 + $0x220] ss:$8 sps:$4 sm:$0xff]  }
   0x5   :  { %1035 = vmatprep.subr.bf16.mxu0 %v1383_v5  ;;  %v1393_v12 = vld [vmem:[%s2099_s1 + $0x34] ss:$8 sps:$4 sm:$0xff]   ;;  %v1397_v14 = vld [vmem:[%s2099_s1 + $0x30] ss:$8 sps:$4 sm:$0xff]   ;;  %v1399_v16 = vld [vmem:[%s2099_s1 + $0x44] ss:$8 sps:$4 sm:$0xff]  }
   0x6   :  { %v1395_v13 = vld [vmem:[%s2099_s1 + $0x234] ss:$8 sps:$4 sm:$0xff]   ;;  %v1398_v15 = vld [vmem:[%s2099_s1 + $0x230] ss:$8 sps:$4 sm:$0xff]   ;;  %v1401_v17 = vld [vmem:[%s2099_s1 + $0x244] ss:$8 sps:$4 sm:$0xff]  }
   0x7   :  { %950 = vmatpush1.bf16.msra.mxu1 %v1385_v6  ;;  %v1403_v18 = vld [vmem:[%s2099_s1 + $0x40] ss:$8 sps:$4 sm:$0xff]   ;;  %v1405_v20 = vld [vmem:[%s2099_s1 + $0x54] ss:$8 sps:$4 sm:$0xff]   ;;  %v1409_v22 = vld [vmem:[%s2099_s1 + $0x50] ss:$8 sps:$4 sm:$0xff]  }
   0x8   :  { %1036 = vmatpush1.bf16.msra.mxu0 %v1386_v7  ;;  %951 = vmatprep.subr.bf16.mxu1 %v1387_v8  ;;  %v1404_v19 = vld [vmem:[%s2099_s1 + $0x240] ss:$8 sps:$4 sm:$0xff]   ;;  %v1407_v21 = vld [vmem:[%s2099_s1 + $0x254] ss:$8 sps:$4 sm:$0xff]   ;;  %v1410_v23 = vld [vmem:[%s2099_s1 + $0x250] ss:$8 sps:$4 sm:$0xff]  }
   0x9   :  { %1037 = vmatprep.subr.bf16.mxu0 %v1389_v9  ;;  %v1411_v24 = vld [vmem:[%s2099_s1 + $0x64] ss:$8 sps:$4 sm:$0xff]   ;;  %v1415_v26 = vld [vmem:[%s2099_s1 + $0x60] ss:$8 sps:$4 sm:$0xff]   ;;  %v1417_v28 = vld [vmem:[%s2099_s1 + $0x74] ss:$8 sps:$4 sm:$0xff]  }
   0xa   :  { %v1413_v25 = vld [vmem:[%s2099_s1 + $0x264] ss:$8 sps:$4 sm:$0xff]   ;;  %v1416_v27 = vld [vmem:[%s2099_s1 + $0x260] ss:$8 sps:$4 sm:$0xff]   ;;  %v1419_v29 = vld [vmem:[%s2099_s1 + $0x274] ss:$8 sps:$4 sm:$0xff]  }
   0xb   :  { %952 = vmatpush1.bf16.msra.mxu1 %v1391_v10  ;;  %v1421_v30 = vld [vmem:[%s2099_s1 + $0x70] ss:$8 sps:$4 sm:$0xff]   ;;  %v1423_v32 = vld [vmem:[%s2099_s1 + $0x84] ss:$8 sps:$4 sm:$0xff]   ;;  %v1427_v34 = vld [vmem:[%s2099_s1 + $0x80] ss:$8 sps:$4 sm:$0xff]  }
   0xc   :  { %1038 = vmatpush1.bf16.msra.mxu0 %v1392_v11  ;;  %953 = vmatprep.subr.bf16.mxu1 %v1393_v12  ;;  %v1422_v31 = vld [vmem:[%s2099_s1 + $0x270] ss:$8 sps:$4 sm:$0xff]   ;;  %v1425_v33 = vld [vmem:[%s2099_s1 + $0x284] ss:$8 sps:$4 sm:$0xff]   ;;  %v1428_v35 = vld [vmem:[%s2099_s1 + $0x280] ss:$8 sps:$4 sm:$0xff]  }
   0xd   :  { %1039 = vmatprep.subr.bf16.mxu0 %v1395_v13  ;;  %v1429_v36 = vld [vmem:[%s2099_s1 + $0x94] ss:$8 sps:$4 sm:$0xff]   ;;  %v1433_v38 = vld [vmem:[%s2099_s1 + $0x90] ss:$8 sps:$4 sm:$0xff]   ;;  %v1435_v40 = vld [vmem:[%s2099_s1 + $0xa4] ss:$8 sps:$4 sm:$0xff]  }
   0xe   :  { %v1431_v37 = vld [vmem:[%s2099_s1 + $0x294] ss:$8 sps:$4 sm:$0xff]   ;;  %v1434_v39 = vld [vmem:[%s2099_s1 + $0x290] ss:$8 sps:$4 sm:$0xff]   ;;  %v1437_v41 = vld [vmem:[%s2099_s1 + $0x2a4] ss:$8 sps:$4 sm:$0xff]  }
   0xf   :  { %954 = vmatpush1.bf16.msra.mxu1 %v1397_v14  ;;  %v1439_v42 = vld [vmem:[%s2099_s1 + $0xa0] ss:$8 sps:$4 sm:$0xff]   ;;  %v1441_v44 = vld [vmem:[%s2099_s1 + $0xb4] ss:$8 sps:$4 sm:$0xff]   ;;  %v1445_v46 = vld [vmem:[%s2099_s1 + $0xb0] ss:$8 sps:$4 sm:$0xff]  }
  0x10   :  { %1040 = vmatpush1.bf16.msra.mxu0 %v1398_v15  ;;  %955 = vmatprep.subr.bf16.mxu1 %v1399_v16  ;;  %v1440_v43 = vld [vmem:[%s2099_s1 + $0x2a0] ss:$8 sps:$4 sm:$0xff]   ;;  %v1443_v45 = vld [vmem:[%s2099_s1 + $0x2b4] ss:$8 sps:$4 sm:$0xff]   ;;  %v1446_v47 = vld [vmem:[%s2099_s1 + $0x2b0] ss:$8 sps:$4 sm:$0xff]  }
  0x11   :  { %1041 = vmatprep.subr.bf16.mxu0 %v1401_v17  ;;  %v1473_v48 = vld [vmem:[%s2100_s0 + $0x4] ss:$36 sps:$4 sm:$0xff]   ;;  %v1479_v51 = vld [vmem:[%s2100_s0 + $0x14] ss:$36 sps:$4 sm:$0xff]  }
  0x12   :  { %v1447_v49 = vld [vmem:[%s2099_s1 + $0xc4] ss:$8 sps:$4 sm:$0xff]   ;;  %979 = vmatprep.mubr.bf16.mxu1 %v1473_v48  ;;  %v1451_v52 = vld [vmem:[%s2099_s1 + $0xc0] ss:$8 sps:$4 sm:$0xff]   ;;  %v1453_v54 = vld [vmem:[%s2099_s1 + $0xd4] ss:$8 sps:$4 sm:$0xff]   ;;  %1065 = vmatprep.mubr.bf16.mxu0 %v1479_v51 }
  0x13   :  { %956 = vmatpush1.bf16.msra.mxu1 %v1403_v18  ;;  %v1449_v50 = vld [vmem:[%s2099_s1 + $0x2c4] ss:$8 sps:$4 sm:$0xff]   ;;  %v1452_v53 = vld [vmem:[%s2099_s1 + $0x2c0] ss:$8 sps:$4 sm:$0xff]   ;;  %v1455_v55 = vld [vmem:[%s2099_s1 + $0x2d4] ss:$8 sps:$4 sm:$0xff]  }
  0x14   :  { %1042 = vmatpush1.bf16.msra.mxu0 %v1404_v19  ;;  %957 = vmatprep.subr.bf16.mxu1 %v1405_v20  ;;  %v1457_v56 = vld [vmem:[%s2099_s1 + $0xd0] ss:$8 sps:$4 sm:$0xff]   ;;  %v1459_v58 = vld [vmem:[%s2099_s1 + $0xe4] ss:$8 sps:$4 sm:$0xff]   ;;  %v1463_v60 = vld [vmem:[%s2099_s1 + $0xe0] ss:$8 sps:$4 sm:$0xff]  }
  0x15   :  { %1043 = vmatprep.subr.bf16.mxu0 %v1407_v21  ;;  %v1458_v57 = vld [vmem:[%s2099_s1 + $0x2d0] ss:$8 sps:$4 sm:$0xff]   ;;  %v1461_v59 = vld [vmem:[%s2099_s1 + $0x2e4] ss:$8 sps:$4 sm:$0xff]   ;;  %v1464_v61 = vld [vmem:[%s2099_s1 + $0x2e0] ss:$8 sps:$4 sm:$0xff]  }
  0x16   :  { %v1465_v62 = vld [vmem:[%s2099_s1 + $0xf4] ss:$8 sps:$4 sm:$0xff]   ;;  %v1469_v0 = vld [vmem:[%s2099_s1 + $0xf0] ss:$8 sps:$4 sm:$0xff]   ;;  %v1476_v2 = vld [vmem:[%s2099_s1 + $0x104] ss:$8 sps:$4 sm:$0xff]  }
  0x17   :  { %958 = vmatpush1.bf16.msra.mxu1 %v1409_v22  ;;  %v1467_v63 = vld [vmem:[%s2099_s1 + $0x2f4] ss:$8 sps:$4 sm:$0xff]   ;;  %v1470_v1 = vld [vmem:[%s2099_s1 + $0x2f0] ss:$8 sps:$4 sm:$0xff]   ;;  %v1482_v3 = vld [vmem:[%s2099_s1 + $0x304] ss:$8 sps:$4 sm:$0xff]  }
  0x18   :  { %1044 = vmatpush1.bf16.msra.mxu0 %v1410_v23  ;;  %959 = vmatprep.subr.bf16.mxu1 %v1411_v24  ;;  %v1471_v4 = vld [vmem:[%s2100_s0] ss:$36 sps:$4 sm:$0xff]   ;;  %v1477_v6 = vld [vmem:[%s2100_s0 + $0x10] ss:$36 sps:$4 sm:$0xff]  }
  0x19   :  { %1045 = vmatprep.subr.bf16.mxu0 %v1413_v25  ;;  %v1474_v5 = vld [vmem:[%s2099_s1 + $0x100] ss:$8 sps:$4 sm:$0xff]   ;;  %v1485_v8 = vld [vmem:[%s2099_s1 + $0x114] ss:$8 sps:$4 sm:$0xff]   ;;  %v1483_v10 = vld [vmem:[%s2099_s1 + $0x110] ss:$8 sps:$4 sm:$0xff]  }
  0x1a   :  { %v1480_v7 = vld [vmem:[%s2099_s1 + $0x300] ss:$8 sps:$4 sm:$0xff]   ;;  %v1488_v9 = vld [vmem:[%s2099_s1 + $0x314] ss:$8 sps:$4 sm:$0xff]   ;;  %v1486_v11 = vld [vmem:[%s2099_s1 + $0x310] ss:$8 sps:$4 sm:$0xff]  }
  0x1b   :  { %960 = vmatpush1.bf16.msra.mxu1 %v1415_v26  ;;  %v1491_v12 = vld [vmem:[%s2099_s1 + $0x124] ss:$8 sps:$4 sm:$0xff]   ;;  %v1489_v14 = vld [vmem:[%s2099_s1 + $0x120] ss:$8 sps:$4 sm:$0xff]   ;;  %v1497_v16 = vld [vmem:[%s2099_s1 + $0x134] ss:$8 sps:$4 sm:$0xff]  }
  0x1c   :  { %1046 = vmatpush1.bf16.msra.mxu0 %v1416_v27  ;;  %961 = vmatprep.subr.bf16.mxu1 %v1417_v28  ;;  %v1494_v13 = vld [vmem:[%s2099_s1 + $0x324] ss:$8 sps:$4 sm:$0xff]   ;;  %v1492_v15 = vld [vmem:[%s2099_s1 + $0x320] ss:$8 sps:$4 sm:$0xff]   ;;  %v1500_v17 = vld [vmem:[%s2099_s1 + $0x334] ss:$8 sps:$4 sm:$0xff]  }
  0x1d   :  { %1047 = vmatprep.subr.bf16.mxu0 %v1419_v29  ;;  %v1495_v18 = vld [vmem:[%s2099_s1 + $0x130] ss:$8 sps:$4 sm:$0xff]   ;;  %v1503_v20 = vld [vmem:[%s2099_s1 + $0x144] ss:$8 sps:$4 sm:$0xff]   ;;  %v1501_v22 = vld [vmem:[%s2099_s1 + $0x140] ss:$8 sps:$4 sm:$0xff]  }
  0x1e   :  { %v1498_v19 = vld [vmem:[%s2099_s1 + $0x330] ss:$8 sps:$4 sm:$0xff]   ;;  %v1506_v21 = vld [vmem:[%s2099_s1 + $0x344] ss:$8 sps:$4 sm:$0xff]   ;;  %v1504_v23 = vld [vmem:[%s2099_s1 + $0x340] ss:$8 sps:$4 sm:$0xff]  }
  0x1f   :  { %962 = vmatpush1.bf16.msra.mxu1 %v1421_v30  ;;  %v1509_v24 = vld [vmem:[%s2099_s1 + $0x154] ss:$8 sps:$4 sm:$0xff]   ;;  %v1507_v26 = vld [vmem:[%s2099_s1 + $0x150] ss:$8 sps:$4 sm:$0xff]   ;;  %v1515_v28 = vld [vmem:[%s2099_s1 + $0x164] ss:$8 sps:$4 sm:$0xff]  }
  0x20   :  { %1048 = vmatpush1.bf16.msra.mxu0 %v1422_v31  ;;  %963 = vmatprep.subr.bf16.mxu1 %v1423_v32  ;;  %v1512_v25 = vld [vmem:[%s2099_s1 + $0x354] ss:$8 sps:$4 sm:$0xff]   ;;  %v1510_v27 = vld [vmem:[%s2099_s1 + $0x350] ss:$8 sps:$4 sm:$0xff]   ;;  %v1518_v29 = vld [vmem:[%s2099_s1 + $0x364] ss:$8 sps:$4 sm:$0xff]  }
  0x21   :  { %1049 = vmatprep.subr.bf16.mxu0 %v1425_v33  ;;  %v1513_v30 = vld [vmem:[%s2099_s1 + $0x160] ss:$8 sps:$4 sm:$0xff]   ;;  %v1521_v32 = vld [vmem:[%s2099_s1 + $0x174] ss:$8 sps:$4 sm:$0xff]  }
  0x22   :  { %v1516_v31 = vld [vmem:[%s2099_s1 + $0x360] ss:$8 sps:$4 sm:$0xff]   ;;  %v1524_v33 = vld [vmem:[%s2099_s1 + $0x374] ss:$8 sps:$4 sm:$0xff]  }
  0x23   :  { %964 = vmatpush1.bf16.msra.mxu1 %v1427_v34  ;;  %v1575_v34 = vld [vmem:[%s2100_s0 + $0xc] ss:$36 sps:$4 sm:$0xff]   ;;  %v1537_v48 = vld [vmem:[%s2099_s1 + $0x1a0] ss:$8 sps:$4 sm:$0xff]   ;;  %v1548_v51 = vld [vmem:[%s2099_s1 + $0x3b4] ss:$8 sps:$4 sm:$0xff]  }
  0x24   :  { %1050 = vmatpush1.bf16.msra.mxu0 %v1428_v35  ;;  %965 = vmatprep.subr.bf16.mxu1 %v1429_v36  ;;  %v1578_v35 = vld [vmem:[%s2100_s0 + $0x1c] ss:$36 sps:$4 sm:$0xff]   ;;  %v1519_v36 = vld [vmem:[%s2099_s1 + $0x170] ss:$8 sps:$4 sm:$0xff]  }
  0x25   :  { %1051 = vmatprep.subr.bf16.mxu0 %v1431_v37  ;;  %v1522_v37 = vld [vmem:[%s2099_s1 + $0x370] ss:$8 sps:$4 sm:$0xff]  }
  0x27   :  { %966 = vmatpush1.bf16.msra.mxu1 %v1433_v38  ;;  %v1527_v38 = vld [vmem:[%s2099_s1 + $0x184] ss:$8 sps:$4 sm:$0xff]  }
  0x28   :  { %1052 = vmatpush1.bf16.msra.mxu0 %v1434_v39  ;;  %967 = vmatprep.subr.bf16.mxu1 %v1435_v40  ;;  %v1530_v39 = vld [vmem:[%s2099_s1 + $0x384] ss:$8 sps:$4 sm:$0xff]   ;;  %v1525_v40 = vld [vmem:[%s2099_s1 + $0x180] ss:$8 sps:$4 sm:$0xff]  }
  0x29   :  { %1053 = vmatprep.subr.bf16.mxu0 %v1437_v41  ;;  %v1528_v41 = vld [vmem:[%s2099_s1 + $0x380] ss:$8 sps:$4 sm:$0xff]  }
  0x2b   :  { %968 = vmatpush1.bf16.msra.mxu1 %v1439_v42  ;;  %v1533_v42 = vld [vmem:[%s2099_s1 + $0x194] ss:$8 sps:$4 sm:$0xff]  }
  0x2c   :  { %1054 = vmatpush1.bf16.msra.mxu0 %v1440_v43  ;;  %969 = vmatprep.subr.bf16.mxu1 %v1441_v44  ;;  %v1536_v43 = vld [vmem:[%s2099_s1 + $0x394] ss:$8 sps:$4 sm:$0xff]   ;;  %v1531_v44 = vld [vmem:[%s2099_s1 + $0x190] ss:$8 sps:$4 sm:$0xff]  }
  0x2d   :  { %1055 = vmatprep.subr.bf16.mxu0 %v1443_v45  ;;  %v1534_v45 = vld [vmem:[%s2099_s1 + $0x390] ss:$8 sps:$4 sm:$0xff]  }
  0x2f   :  { %970 = vmatpush1.bf16.msra.mxu1 %v1445_v46  ;;  %v1539_v46 = vld [vmem:[%s2099_s1 + $0x1a4] ss:$8 sps:$4 sm:$0xff]  }
  0x30   :  { %1056 = vmatpush1.bf16.msra.mxu0 %v1446_v47  ;;  %971 = vmatprep.subr.bf16.mxu1 %v1447_v49  ;;  %v1542_v47 = vld [vmem:[%s2099_s1 + $0x3a4] ss:$8 sps:$4 sm:$0xff]   ;;  %v1540_v49 = vld [vmem:[%s2099_s1 + $0x3a0] ss:$8 sps:$4 sm:$0xff]  }
  0x31   :  { %1057 = vmatprep.subr.bf16.mxu0 %v1449_v50  ;;  %v1545_v50 = vld [vmem:[%s2099_s1 + $0x1b4] ss:$8 sps:$4 sm:$0xff]  }
  0x33   :  { %972 = vmatpush1.bf16.msra.mxu1 %v1451_v52  ;;  %v1543_v52 = vld [vmem:[%s2099_s1 + $0x1b0] ss:$8 sps:$4 sm:$0xff]  }
  0x34   :  { %1058 = vmatpush1.bf16.msra.mxu0 %v1452_v53  ;;  %973 = vmatprep.subr.bf16.mxu1 %v1453_v54  ;;  %v1546_v53 = vld [vmem:[%s2099_s1 + $0x3b0] ss:$8 sps:$4 sm:$0xff]   ;;  %v1551_v54 = vld [vmem:[%s2099_s1 + $0x1c4] ss:$8 sps:$4 sm:$0xff]  }
  0x35   :  { %1059 = vmatprep.subr.bf16.mxu0 %v1455_v55  ;;  %v1554_v55 = vld [vmem:[%s2099_s1 + $0x3c4] ss:$8 sps:$4 sm:$0xff]  }
  0x37   :  { %974 = vmatpush1.bf16.msra.mxu1 %v1457_v56  ;;  %v1549_v56 = vld [vmem:[%s2099_s1 + $0x1c0] ss:$8 sps:$4 sm:$0xff]  }
  0x38   :  { %1060 = vmatpush1.bf16.msra.mxu0 %v1458_v57  ;;  %975 = vmatprep.subr.bf16.mxu1 %v1459_v58  ;;  %v1552_v57 = vld [vmem:[%s2099_s1 + $0x3c0] ss:$8 sps:$4 sm:$0xff]   ;;  %v1557_v58 = vld [vmem:[%s2099_s1 + $0x1d4] ss:$8 sps:$4 sm:$0xff]  }
  0x39   :  { %1061 = vmatprep.subr.bf16.mxu0 %v1461_v59  ;;  %v1560_v59 = vld [vmem:[%s2099_s1 + $0x3d4] ss:$8 sps:$4 sm:$0xff]  }
  0x3b   :  { %976 = vmatpush1.bf16.msra.mxu1 %v1463_v60  ;;  %v1555_v60 = vld [vmem:[%s2099_s1 + $0x1d0] ss:$8 sps:$4 sm:$0xff]  }
  0x3c   :  { %1062 = vmatpush1.bf16.msra.mxu0 %v1464_v61  ;;  %977 = vmatprep.subr.bf16.mxu1 %v1465_v62  ;;  %v1558_v61 = vld [vmem:[%s2099_s1 + $0x3d0] ss:$8 sps:$4 sm:$0xff]   ;;  %v1563_v62 = vld [vmem:[%s2099_s1 + $0x1e4] ss:$8 sps:$4 sm:$0xff]  }
  0x3d   :  { %1063 = vmatprep.subr.bf16.mxu0 %v1467_v63  ;;  %v1566_v63 = vld [vmem:[%s2099_s1 + $0x3e4] ss:$8 sps:$4 sm:$0xff]  }
  0x3f   :  { %978 = vmatpush1.bf16.msra.mxu1 %v1469_v0  ;;  %v1561_v0 = vld [vmem:[%s2099_s1 + $0x1e0] ss:$8 sps:$4 sm:$0xff]  }
  0x40   :  { %1064 = vmatpush1.bf16.msra.mxu0 %v1470_v1  ;;  %990 = vmatprep.subr.bf16.mxu1 %v1476_v2  ;;  %v1564_v1 = vld [vmem:[%s2099_s1 + $0x3e0] ss:$8 sps:$4 sm:$0xff]   ;;  %v1569_v2 = vld [vmem:[%s2099_s1 + $0x1f4] ss:$8 sps:$4 sm:$0xff]  }
  0x41   :  { %1076 = vmatprep.subr.bf16.mxu0 %v1482_v3  ;;  %v1572_v3 = vld [vmem:[%s2099_s1 + $0x3f4] ss:$8 sps:$4 sm:$0xff]  }
  0x42   :  { %980 = vmatmul.mubr.bf16.vlgmr.msra.gmra.mrb[0].mxu1 %v1471_v4  ;;  %v1567_v4 = vld [vmem:[%s2099_s1 + $0x1f0] ss:$8 sps:$4 sm:$0xff]  }
  0x43   :  { %1066 = vmatmul.mubr.bf16.vlgmr.msra.gmra.mrb[0].mxu0 %v1477_v6  ;;  %991 = vmatpush1.bf16.msra.mxu1 %v1474_v5  ;;  %v1570_v5 = vld [vmem:[%s2099_s1 + $0x3f0] ss:$8 sps:$4 sm:$0xff]   ;;  %v1581_v6 = vld [vmem:[%s2099_s1 + $0x404] ss:$8 sps:$4 sm:$0xff]  }
  0x44   :  { %1077 = vmatpush1.bf16.msra.mxu0 %v1480_v7  ;;  %992 = vmatprep.subr.bf16.mxu1 %v1485_v8  ;;  %v1573_v7 = vld [vmem:[%s2100_s0 + $0x8] ss:$36 sps:$4 sm:$0xff]   ;;  %v1576_v8 = vld [vmem:[%s2100_s0 + $0x18] ss:$36 sps:$4 sm:$0xff]  }
  0x45   :  { %1078 = vmatprep.subr.bf16.mxu0 %v1488_v9  ;;  %1022 = vmatprep.mubr.bf16.mxu1 %v1575_v34  ;;  %v1579_v9 = vld [vmem:[%s2099_s1 + $0x400] ss:$8 sps:$4 sm:$0xff]  }
  0x46   :  { %1108 = vmatprep.mubr.bf16.mxu0 %v1578_v35 }
  0x47   :  { %993 = vmatpush1.bf16.msra.mxu1 %v1483_v10  ;;  %v1584_v10 = vld [vmem:[%s2099_s1 + $0x414] ss:$8 sps:$4 sm:$0xff]  }
  0x48   :  { %1079 = vmatpush1.bf16.msra.mxu0 %v1486_v11  ;;  %994 = vmatprep.subr.bf16.mxu1 %v1491_v12  ;;  %v1582_v11 = vld [vmem:[%s2099_s1 + $0x410] ss:$8 sps:$4 sm:$0xff]   ;;  %v1604_v12 = vmov 0  }
  0x49   :  { %1080 = vmatprep.subr.bf16.mxu0 %v1494_v13  ;;  %v1587_v13 = vld [vmem:[%s2099_s1 + $0x424] ss:$8 sps:$4 sm:$0xff]  }
  0x4b   :  { %995 = vmatpush1.bf16.msra.mxu1 %v1489_v14  ;;  %v1585_v14 = vld [vmem:[%s2099_s1 + $0x420] ss:$8 sps:$4 sm:$0xff]  }
  0x4c   :  { %1081 = vmatpush1.bf16.msra.mxu0 %v1492_v15  ;;  %996 = vmatprep.subr.bf16.mxu1 %v1497_v16  ;;  %v1590_v15 = vld [vmem:[%s2099_s1 + $0x434] ss:$8 sps:$4 sm:$0xff]   ;;  %v1588_v16 = vld [vmem:[%s2099_s1 + $0x430] ss:$8 sps:$4 sm:$0xff]  }
  0x4d   :  { %1082 = vmatprep.subr.bf16.mxu0 %v1500_v17  ;;  %v1593_v17 = vld [vmem:[%s2099_s1 + $0x444] ss:$8 sps:$4 sm:$0xff]  }
  0x4f   :  { %997 = vmatpush1.bf16.msra.mxu1 %v1495_v18  ;;  %v1591_v18 = vld [vmem:[%s2099_s1 + $0x440] ss:$8 sps:$4 sm:$0xff]  }
  0x50   :  { %1083 = vmatpush1.bf16.msra.mxu0 %v1498_v19  ;;  %998 = vmatprep.subr.bf16.mxu1 %v1503_v20  ;;  %v1596_v19 = vld [vmem:[%s2099_s1 + $0x454] ss:$8 sps:$4 sm:$0xff]   ;;  %v1594_v20 = vld [vmem:[%s2099_s1 + $0x450] ss:$8 sps:$4 sm:$0xff]  }
  0x51   :  { %1084 = vmatprep.subr.bf16.mxu0 %v1506_v21  ;;  %v1599_v21 = vld [vmem:[%s2099_s1 + $0x464] ss:$8 sps:$4 sm:$0xff]  }
  0x53   :  { %999 = vmatpush1.bf16.msra.mxu1 %v1501_v22  ;;  %v1597_v22 = vld [vmem:[%s2099_s1 + $0x460] ss:$8 sps:$4 sm:$0xff]  }
  0x54   :  { %1085 = vmatpush1.bf16.msra.mxu0 %v1504_v23  ;;  %1000 = vmatprep.subr.bf16.mxu1 %v1509_v24  ;;  %v1602_v23 = vld [vmem:[%s2099_s1 + $0x474] ss:$8 sps:$4 sm:$0xff]   ;;  %v1600_v24 = vld [vmem:[%s2099_s1 + $0x470] ss:$8 sps:$4 sm:$0xff]  }
  0x55   :  { %1086 = vmatprep.subr.bf16.mxu0 %v1512_v25  ;;  %v1603_v25 = vld [vmem:[%s2100_s0 + $0x20] ss:$36 sps:$4 sm:$0xff]  }
  0x57   :  { %1001 = vmatpush1.bf16.msra.mxu1 %v1507_v26 }
  0x58   :  { %1087 = vmatpush1.bf16.msra.mxu0 %v1510_v27  ;;  %1002 = vmatprep.subr.bf16.mxu1 %v1515_v28 }
  0x59   :  { %1088 = vmatprep.subr.bf16.mxu0 %v1518_v29 }
  0x5b   :  { %1003 = vmatpush1.bf16.msra.mxu1 %v1513_v30  ;;  %v1179_v30 = vlaneseq }
  0x5c   :  { %1089 = vmatpush1.bf16.msra.mxu0 %v1516_v31  ;;  %1004 = vmatprep.subr.bf16.mxu1 %v1521_v32 }
  0x5d   :  { %1090 = vmatprep.subr.bf16.mxu0 %v1524_v33  ;;  %v1180_v31 = vshrl.u32 %v1179_v30, 7  ;;  %v1177_v33 = vld [vmem:[%s2101_s2] sm:$0x3] }
  0x5f   :  { %1005 = vmatpush1.bf16.msra.mxu1 %v1519_v36  ;;  %v1181_v32 = vsub.s32 0, %v1180_v31  ;;  %v1185_v34 = vsub.s32 1, %v1180_v31 }
  0x60   :  { %1091 = vmatpush1.bf16.msra.mxu0 %v1522_v37  ;;  %1006 = vmatprep.subr.bf16.mxu1 %v1527_v38 }
  0x61   :  { %1092 = vmatprep.subr.bf16.mxu0 %v1530_v39  ;;  %v1182_v35 = vrot.slane %v1177_v33, %v1181_v32  ;;  %v1186_v37 = vrot.slane %v1177_v33, %v1185_v34 }
  0x63   :  { %1007 = vmatpush1.bf16.msra.mxu1 %v1525_v40 }
  0x64   :  { %1093 = vmatpush1.bf16.msra.mxu0 %v1528_v41  ;;  %1008 = vmatprep.subr.bf16.mxu1 %v1533_v42 }
  0x65   :  { %1094 = vmatprep.subr.bf16.mxu0 %v1536_v43 }
  0x67   :  { %1009 = vmatpush1.bf16.msra.mxu1 %v1531_v44 }
  0x68   :  { %1095 = vmatpush1.bf16.msra.mxu0 %v1534_v45  ;;  %1010 = vmatprep.subr.bf16.mxu1 %v1539_v46 }
  0x69   :  { %1096 = vmatprep.subr.bf16.mxu0 %v1542_v47 }
  0x6b   :  { %1011 = vmatpush1.bf16.msra.mxu1 %v1537_v48 }
  0x6c   :  { %1097 = vmatpush1.bf16.msra.mxu0 %v1540_v49  ;;  %1012 = vmatprep.subr.bf16.mxu1 %v1545_v50 }
  0x6d   :  { %1098 = vmatprep.subr.bf16.mxu0 %v1548_v51 }
  0x6f   :  { %1013 = vmatpush1.bf16.msra.mxu1 %v1543_v52 }
  0x70   :  { %1099 = vmatpush1.bf16.msra.mxu0 %v1546_v53  ;;  %1014 = vmatprep.subr.bf16.mxu1 %v1551_v54 }
  0x71   :  { %1100 = vmatprep.subr.bf16.mxu0 %v1554_v55 }
  0x73   :  { %1015 = vmatpush1.bf16.msra.mxu1 %v1549_v56 }
  0x74   :  { %1101 = vmatpush1.bf16.msra.mxu0 %v1552_v57  ;;  %1016 = vmatprep.subr.bf16.mxu1 %v1557_v58 }
  0x75   :  { %1102 = vmatprep.subr.bf16.mxu0 %v1560_v59 }
  0x77   :  { %1017 = vmatpush1.bf16.msra.mxu1 %v1555_v60 }
  0x78   :  { %1103 = vmatpush1.bf16.msra.mxu0 %v1558_v61  ;;  %1018 = vmatprep.subr.bf16.mxu1 %v1563_v62 }
  0x79   :  { %1104 = vmatprep.subr.bf16.mxu0 %v1566_v63 }
  0x7b   :  { %1019 = vmatpush1.bf16.msra.mxu1 %v1561_v0 }
  0x7c   :  { %1105 = vmatpush1.bf16.msra.mxu0 %v1564_v1  ;;  %1020 = vmatprep.subr.bf16.mxu1 %v1569_v2 }
  0x7d   :  { %1106 = vmatprep.subr.bf16.mxu0 %v1572_v3 }
  0x7f   :  { %1021 = vmatpush1.bf16.msra.mxu1 %v1567_v4 }
  0x80   :  { %1107 = vmatpush1.bf16.msra.mxu0 %v1570_v5 }
  0x81   :  { %1119 = vmatprep.subr.bf16.mxu0 %v1581_v6 }
  0x82   :  { %1023 = vmatmul.mubr.bf16.vlgmr.msra.gmra.mrb[0].mxu1 %v1573_v7 }
  0x83   :  { %1109 = vmatmul.mubr.bf16.vlgmr.msra.gmra.mrb[0].mxu0 %v1576_v8 }
  0x84   :  { %1120 = vmatpush1.bf16.msra.mxu0 %v1579_v9  ;;  %1151 = vmatprep.mubr.bf16.mxu0 %v1604_v12 }
  0x85   :  { %1121 = vmatprep.subr.bf16.mxu0 %v1584_v10 }
  0x88   :  { %1122 = vmatpush1.bf16.msra.mxu0 %v1582_v11 }
  0x89   :  { %1123 = vmatprep.subr.bf16.mxu0 %v1587_v13 }
  0x8c   :  { %1124 = vmatpush1.bf16.msra.mxu0 %v1585_v14 }
  0x8d   :  { %1125 = vmatprep.subr.bf16.mxu0 %v1590_v15 }
  0x90   :  { %1126 = vmatpush1.bf16.msra.mxu0 %v1588_v16 }
  0x91   :  { %1127 = vmatprep.subr.bf16.mxu0 %v1593_v17 }
  0x94   :  { %1128 = vmatpush1.bf16.msra.mxu0 %v1591_v18 }
  0x95   :  { %1129 = vmatprep.subr.bf16.mxu0 %v1596_v19 }
  0x98   :  { %1130 = vmatpush1.bf16.msra.mxu0 %v1594_v20 }
  0x99   :  { %1131 = vmatprep.subr.bf16.mxu0 %v1599_v21 }
  0x9c   :  { %1132 = vmatpush1.bf16.msra.mxu0 %v1597_v22 }
  0x9d   :  { %1133 = vmatprep.subr.bf16.mxu0 %v1602_v23 }
  0xa0   :  { %1134 = vmatpush1.bf16.msra.mxu0 %v1600_v24 }
  0xa3   :  { %1152 = vmatmul.mubr.bf16.vlgmr.msra.gmra.mrb[0].mxu0 %v1603_v25 }
 0x155   :  { %v1024_v26 = vpop.f32.mrb[0].mxu1 }
 0x156   :  { %v1026_v27 = vpop.f32.mrb[1].mxu1 }
 0x157   :  { %v1028_v28 = vpop.f32.mrb[2].mxu1 }
 0x158   :  { %v1030_v29 = vpop.f32.mrb[3].mxu1 }
 0x176   :  { %v1153_v36 = vpop.f32.mrb[0].mxu0 }
 0x177   :  { %v1358_v38 = vadd.f32 %v1153_v36, %v1024_v26  ;;  %v1155_v39 = vpop.f32.mrb[1].mxu0 }
 0x178   :  { %v1359_v40 = vadd.f32 %v1155_v39, %v1026_v27  ;;  %v1157_v41 = vpop.f32.mrb[2].mxu0 }
 0x179   :  { %v1189_v42 = vadd.f32 %v1358_v38, %v1182_v35  ;;  %v1360_v43 = vadd.f32 %v1157_v41, %v1028_v28  ;;  %v1159_v44 = vpop.f32.mrb[3].mxu0 }
 0x17a   :  { %v1190_v45 = vadd.f32 %v1359_v40, %v1186_v37  ;;  %v1361_v46 = vadd.f32 %v1159_v44, %v1030_v29 }
 0x17b   :  { %v1193_v47 = vmax.f32 %v1189_v42, 0.0  ;;  %v1191_v48 = vadd.f32 %v1360_v43, %v1182_v35 }
 0x17c   :  { %v1194_v49 = vmax.f32 %v1190_v45, 0.0  ;;  %v1192_v50 = vadd.f32 %v1361_v46, %v1186_v37 }
 0x17d   :  { %1197 = vst [vmem:[%s2102_s3] sm:$0xff] %v1193_v47  ;;  %v1195_v51 = vmax.f32 %v1191_v48, 0.0 }
 0x17e   :  { %1198 = vst [vmem:[%s2102_s3 + $0x8] sm:$0xff] %v1194_v49  ;;  %v1196_v52 = vmax.f32 %v1192_v50, 0.0 }
 0x17f   :  { %1199 = vst [vmem:[%s2102_s3 + $0x10] sm:$0xff] %v1195_v51 }
 0x180   :  { %1200 = vst [vmem:[%s2102_s3 + $0x18] sm:$0xff] %v1196_v52 }

// kernel: alexnet_forward.39
= control target key start
LH: loop header
LB: loop body
LE: loop exit
PB: predicated region body
PF: predicated region fallthrough
CT: control target
= control target key end

     0   :  { %v290_v34 = vlaneseq  ;;  %s538_s1 = inlined_call_operand.vmem [shape: bf16[256,256], index: 1, kind: input, shape index: {}]   ;;  %s539_s0 = inlined_call_operand.vmem [shape: bf16[16,256], index: 0, kind: input, shape index: {}]   ;;  %s540_s2 = inlined_call_operand.vmem [shape: f32[1,256], index: 2, kind: input, shape index: {}]   ;;  %s541_s3 = inlined_call_operand.vmem [shape: f32[16,256], index: 3, kind: output, shape index: {}]  }
   0x1   :  { %v350_v0 = vld [vmem:[%s538_s1 + $0x4] ss:$8 sps:$4 sm:$0xff]   ;;  %v352_v1 = vld [vmem:[%s538_s1] ss:$8 sps:$4 sm:$0xff]   ;;  %v353_v2 = vld [vmem:[%s538_s1 + $0x14] ss:$8 sps:$4 sm:$0xff]  }
   0x2   :  { %230 = vmatprep.subr.bf16.mxu0 %v350_v0  ;;  %v355_v3 = vld [vmem:[%s538_s1 + $0x10] ss:$8 sps:$4 sm:$0xff]   ;;  %v356_v4 = vld [vmem:[%s538_s1 + $0x24] ss:$8 sps:$4 sm:$0xff]   ;;  %v358_v5 = vld [vmem:[%s538_s1 + $0x20] ss:$8 sps:$4 sm:$0xff]  }
   0x3   :  { %231 = vmatpush1.bf16.msra.mxu0 %v352_v1  ;;  %v359_v6 = vld [vmem:[%s538_s1 + $0x34] ss:$8 sps:$4 sm:$0xff]   ;;  %v361_v7 = vld [vmem:[%s538_s1 + $0x30] ss:$8 sps:$4 sm:$0xff]   ;;  %v362_v8 = vld [vmem:[%s538_s1 + $0x44] ss:$8 sps:$4 sm:$0xff]  }
   0x4   :  { %232 = vmatprep.subr.bf16.mxu0 %v353_v2  ;;  %v364_v9 = vld [vmem:[%s538_s1 + $0x40] ss:$8 sps:$4 sm:$0xff]   ;;  %v365_v10 = vld [vmem:[%s538_s1 + $0x54] ss:$8 sps:$4 sm:$0xff]   ;;  %v367_v11 = vld [vmem:[%s538_s1 + $0x50] ss:$8 sps:$4 sm:$0xff]  }
   0x5   :  { %v368_v12 = vld [vmem:[%s538_s1 + $0x64] ss:$8 sps:$4 sm:$0xff]   ;;  %v370_v14 = vld [vmem:[%s538_s1 + $0x60] ss:$8 sps:$4 sm:$0xff]   ;;  %v371_v15 = vld [vmem:[%s538_s1 + $0x74] ss:$8 sps:$4 sm:$0xff]  }
   0x6   :  { %v400_v13 = vld [vmem:[%s539_s0 + $0x4] ss:$8 sps:$4 sm:$0xff]   ;;  %v373_v16 = vld [vmem:[%s538_s1 + $0x70] ss:$8 sps:$4 sm:$0xff]   ;;  %v376_v18 = vld [vmem:[%s538_s1 + $0x80] ss:$8 sps:$4 sm:$0xff]  }
   0x7   :  { %233 = vmatpush1.bf16.msra.mxu0 %v355_v3  ;;  %262 = vmatprep.mubr.bf16.mxu0 %v400_v13  ;;  %v374_v17 = vld [vmem:[%s538_s1 + $0x84] ss:$8 sps:$4 sm:$0xff]   ;;  %v377_v19 = vld [vmem:[%s538_s1 + $0x94] ss:$8 sps:$4 sm:$0xff]   ;;  %v379_v20 = vld [vmem:[%s538_s1 + $0x90] ss:$8 sps:$4 sm:$0xff]  }
   0x8   :  { %234 = vmatprep.subr.bf16.mxu0 %v356_v4  ;;  %v380_v21 = vld [vmem:[%s538_s1 + $0xa4] ss:$8 sps:$4 sm:$0xff]   ;;  %v382_v22 = vld [vmem:[%s538_s1 + $0xa0] ss:$8 sps:$4 sm:$0xff]   ;;  %v383_v23 = vld [vmem:[%s538_s1 + $0xb4] ss:$8 sps:$4 sm:$0xff]  }
   0x9   :  { %v385_v24 = vld [vmem:[%s538_s1 + $0xb0] ss:$8 sps:$4 sm:$0xff]   ;;  %v386_v25 = vld [vmem:[%s538_s1 + $0xc4] ss:$8 sps:$4 sm:$0xff]   ;;  %v388_v26 = vld [vmem:[%s538_s1 + $0xc0] ss:$8 sps:$4 sm:$0xff]  }
   0xa   :  { %v389_v27 = vld [vmem:[%s538_s1 + $0xd4] ss:$8 sps:$4 sm:$0xff]   ;;  %v391_v28 = vld [vmem:[%s538_s1 + $0xd0] ss:$8 sps:$4 sm:$0xff]   ;;  %v392_v29 = vld [vmem:[%s538_s1 + $0xe4] ss:$8 sps:$4 sm:$0xff]  }
   0xb   :  { %235 = vmatpush1.bf16.msra.mxu0 %v358_v5  ;;  %v394_v30 = vld [vmem:[%s538_s1 + $0xe0] ss:$8 sps:$4 sm:$0xff]   ;;  %v395_v31 = vld [vmem:[%s538_s1 + $0xf4] ss:$8 sps:$4 sm:$0xff]   ;;  %v397_v32 = vld [vmem:[%s538_s1 + $0xf0] ss:$8 sps:$4 sm:$0xff]  }
   0xc   :  { %236 = vmatprep.subr.bf16.mxu0 %v359_v6  ;;  %v398_v33 = vld [vmem:[%s539_s0] ss:$8 sps:$4 sm:$0xff]   ;;  %v291_v35 = vshrl.u32 %v290_v34, 7 }
   0xd   :  { %v288_v37 = vld [vmem:[%s540_s2] sm:$0x3] }
   0xe   :  { %v292_v36 = vsub.s32 0, %v291_v35  ;;  %v296_v38 = vsub.s32 1, %v291_v35 }
   0xf   :  { %237 = vmatpush1.bf16.msra.mxu0 %v361_v7 }
  0x10   :  { %238 = vmatprep.subr.bf16.mxu0 %v362_v8  ;;  %v293_v39 = vrot.slane %v288_v37, %v292_v36  ;;  %v297_v40 = vrot.slane %v288_v37, %v296_v38 }
  0x13   :  { %239 = vmatpush1.bf16.msra.mxu0 %v364_v9 }
  0x14   :  { %240 = vmatprep.subr.bf16.mxu0 %v365_v10 }
  0x17   :  { %241 = vmatpush1.bf16.msra.mxu0 %v367_v11 }
  0x18   :  { %242 = vmatprep.subr.bf16.mxu0 %v368_v12 }
  0x1b   :  { %243 = vmatpush1.bf16.msra.mxu0 %v370_v14 }
  0x1c   :  { %244 = vmatprep.subr.bf16.mxu0 %v371_v15 }
  0x1f   :  { %245 = vmatpush1.bf16.msra.mxu0 %v373_v16 }
  0x20   :  { %246 = vmatprep.subr.bf16.mxu0 %v374_v17 }
  0x23   :  { %247 = vmatpush1.bf16.msra.mxu0 %v376_v18 }
  0x24   :  { %248 = vmatprep.subr.bf16.mxu0 %v377_v19 }
  0x27   :  { %249 = vmatpush1.bf16.msra.mxu0 %v379_v20 }
  0x28   :  { %250 = vmatprep.subr.bf16.mxu0 %v380_v21 }
  0x2b   :  { %251 = vmatpush1.bf16.msra.mxu0 %v382_v22 }
  0x2c   :  { %252 = vmatprep.subr.bf16.mxu0 %v383_v23 }
  0x2f   :  { %253 = vmatpush1.bf16.msra.mxu0 %v385_v24 }
  0x30   :  { %254 = vmatprep.subr.bf16.mxu0 %v386_v25 }
  0x33   :  { %255 = vmatpush1.bf16.msra.mxu0 %v388_v26 }
  0x34   :  { %256 = vmatprep.subr.bf16.mxu0 %v389_v27 }
  0x37   :  { %257 = vmatpush1.bf16.msra.mxu0 %v391_v28 }
  0x38   :  { %258 = vmatprep.subr.bf16.mxu0 %v392_v29 }
  0x3b   :  { %259 = vmatpush1.bf16.msra.mxu0 %v394_v30 }
  0x3c   :  { %260 = vmatprep.subr.bf16.mxu0 %v395_v31 }
  0x3f   :  { %261 = vmatpush1.bf16.msra.mxu0 %v397_v32 }
  0x42   :  { %263 = vmatmul.mubr.bf16.vlgmr.msra.gmra.mrb[0].mxu0 %v398_v33 }
 0x115   :  { %v264_v41 = vpop.f32.mrb[0].mxu0 }
 0x116   :  { %v300_v42 = vadd.f32 %v293_v39, %v264_v41  ;;  %v266_v43 = vpop.f32.mrb[1].mxu0 }
 0x117   :  { %v301_v44 = vadd.f32 %v297_v40, %v266_v43  ;;  %v268_v45 = vpop.f32.mrb[2].mxu0 }
 0x118   :  { %v304_v46 = vmax.f32 %v300_v42, 0.0  ;;  %v302_v47 = vadd.f32 %v293_v39, %v268_v45  ;;  %v270_v48 = vpop.f32.mrb[3].mxu0 }
 0x119   :  { %v305_v49 = vmax.f32 %v301_v44, 0.0  ;;  %v303_v50 = vadd.f32 %v297_v40, %v270_v48 }
 0x11a   :  { %308 = vst [vmem:[%s541_s3] sm:$0xff] %v304_v46  ;;  %v306_v51 = vmax.f32 %v302_v47, 0.0 }
 0x11b   :  { %309 = vst [vmem:[%s541_s3 + $0x8] sm:$0xff] %v305_v49  ;;  %v307_v52 = vmax.f32 %v303_v50, 0.0 }
 0x11c   :  { %310 = vst [vmem:[%s541_s3 + $0x10] sm:$0xff] %v306_v51 }
 0x11d   :  { %311 = vst [vmem:[%s541_s3 + $0x18] sm:$0xff] %v307_v52 }

// kernel: alexnet_forward.40
= control target key start
LH: loop header
LB: loop body
LE: loop exit
PB: predicated region body
PF: predicated region fallthrough
CT: control target
= control target key end

     0   :  { %s371_s1 = inlined_call_operand.vmem [shape: bf16[256,128], index: 1, kind: input, shape index: {}]   ;;  %s372_s0 = inlined_call_operand.vmem [shape: bf16[16,256], index: 0, kind: input, shape index: {}]   ;;  %s373_s2 = inlined_call_operand.vmem [shape: f32[1,128], index: 2, kind: input, shape index: {}]   ;;  %s374_s3 = inlined_call_operand.vmem [shape: f32[16,128], index: 3, kind: output, shape index: {}]  }
   0x1   :  { %v269_v0 = vld [vmem:[%s371_s1 + $0x40] sm:$0xff]   ;;  %v271_v2 = vld [vmem:[%s371_s1 + $0x48] sm:$0xff]   ;;  %v273_v4 = vld [vmem:[%s371_s1 + $0x50] sm:$0xff]  }
   0x2   :  { %v270_v1 = vld [vmem:[%s371_s1] sm:$0xff]   ;;  %247 = vmatprep.subr.bf16.mxu0 %v269_v0  ;;  %v272_v3 = vld [vmem:[%s371_s1 + $0x8] sm:$0xff]   ;;  %v274_v5 = vld [vmem:[%s371_s1 + $0x10] sm:$0xff]  }
   0x3   :  { %248 = vmatpush3.bf16.msra.mxu0 %v270_v1  ;;  %v275_v6 = vld [vmem:[%s371_s1 + $0x58] sm:$0xff]   ;;  %v277_v8 = vld [vmem:[%s371_s1 + $0x60] sm:$0xff]   ;;  %v279_v10 = vld [vmem:[%s371_s1 + $0x68] sm:$0xff]  }
   0x4   :  { %249 = vmatprep.subr.bf16.mxu0 %v271_v2  ;;  %v276_v7 = vld [vmem:[%s371_s1 + $0x18] sm:$0xff]   ;;  %v278_v9 = vld [vmem:[%s371_s1 + $0x20] sm:$0xff]   ;;  %v280_v12 = vld [vmem:[%s371_s1 + $0x28] sm:$0xff]  }
   0x5   :  { %v287_v11 = vld [vmem:[%s372_s0 + $0x4] ss:$8 sps:$4 sm:$0xff]   ;;  %v281_v13 = vld [vmem:[%s371_s1 + $0x70] sm:$0xff]   ;;  %v283_v15 = vld [vmem:[%s371_s1 + $0x78] sm:$0xff]  }
   0x6   :  { %195 = vmatprep.mubr.bf16.mxu0 %v287_v11  ;;  %v282_v14 = vld [vmem:[%s371_s1 + $0x30] sm:$0xff]   ;;  %v284_v16 = vld [vmem:[%s371_s1 + $0x38] sm:$0xff]   ;;  %v285_v17 = vld [vmem:[%s372_s0] ss:$8 sps:$4 sm:$0xff]  }
   0x7   :  { %250 = vmatpush3.bf16.msra.mxu0 %v272_v3  ;;  %v246_v20 = vld [vmem:[%s373_s2] ss:$0 sm:$0xff] }
   0x8   :  { %251 = vmatprep.subr.bf16.mxu0 %v273_v4 }
   0xb   :  { %252 = vmatpush3.bf16.msra.mxu0 %v274_v5 }
   0xc   :  { %253 = vmatprep.subr.bf16.mxu0 %v275_v6 }
   0xf   :  { %254 = vmatpush3.bf16.msra.mxu0 %v276_v7 }
  0x10   :  { %255 = vmatprep.subr.bf16.mxu0 %v277_v8 }
  0x13   :  { %256 = vmatpush3.bf16.msra.mxu0 %v278_v9 }
  0x14   :  { %257 = vmatprep.subr.bf16.mxu0 %v279_v10 }
  0x17   :  { %258 = vmatpush3.bf16.msra.mxu0 %v280_v12 }
  0x18   :  { %259 = vmatprep.subr.bf16.mxu0 %v281_v13 }
  0x1b   :  { %260 = vmatpush3.bf16.msra.mxu0 %v282_v14 }
  0x1c   :  { %261 = vmatprep.subr.bf16.mxu0 %v283_v15 }
  0x1f   :  { %262 = vmatpush3.bf16.msra.mxu0 %v284_v16 }
  0x22   :  { %196 = vmatmul.mubr.bf16.vlgmr.msra.gmra.mrb[0].mxu0 %v285_v17 }
  0xf5   :  { %v263_v18 = vpop.f32.mrb[0].mxu0 }
  0xf6   :  { %v264_v19 = vpop.f32.mrb[1].mxu0 }
  0xf7   :  { %v265_v21 = vadd.f32 %v264_v19, %v263_v18  ;;  %v266_v22 = vpop.f32.mrb[2].mxu0 }
  0xf8   :  { %v267_v23 = vpop.f32.mrb[3].mxu0 }
  0xf9   :  { %v220_v24 = vadd.f32 %v265_v21, %v246_v20  ;;  %v268_v25 = vadd.f32 %v267_v23, %v266_v22 }
  0xfb   :  { %222 = vst [vmem:[%s374_s3] sm:$0xff] %v220_v24  ;;  %v221_v26 = vadd.f32 %v268_v25, %v246_v20 }
  0xfd   :  { %223 = vst [vmem:[%s374_s3 + $0x8] sm:$0xff] %v221_v26 }

// kernel: alexnet_forward.41
= control target key start
LH: loop header
LB: loop body
LE: loop exit
PB: predicated region body
PF: predicated region fallthrough
CT: control target
= control target key end

     0   :  { %s43_s0 = inlined_call_operand.vmem [shape: f32[8,128], index: 0, kind: input, shape index: {}]   ;;  %s44_s1 = inlined_call_operand.vmem [shape: f32[8,128], index: 1, kind: output, shape index: {}]  }
   0x1   :  { %v8_v0 = vld [vmem:[%s43_s0] sm:$0xff] }
   0x2   :  { %9 = vmax.xlane.f32.xlu0 %v8_v0 }
  0x8f   :  { %v10_v1 = vpop.xlane.xlu0 %9 }
  0x90   :  { %v11_v2 = vsub.f32 %v8_v0, %v10_v1 }
  0x92   :  { %v12_v3 = vmul.f32 1.442695, %v11_v2 }
  0x94   :  { %23 = vpow2.f32 %v12_v3 }
  0x9e   :  { %v24_v4 = vpop.eup %23 }
  0x9f   :  { %14 = vadd.xlane.f32.xlu0 %v24_v4 }
 0x12c   :  { %v15_v5 = vpop.xlane.xlu0 %14 }
 0x12d   :  { %25 = vrcp.f32 %v15_v5 }
 0x137   :  { %v26_v6 = vpop.eup %25 }
 0x138   :  { %v17_v7 = vmul.f32 %v26_v6, %v24_v4 }
 0x13a   :  { %18 = vst [vmem:[%s44_s1] sm:$0xff] %v17_v7 }

</bundles_post_ra>
